<compile_context>
chip_gen: v7x
topology: tpu7x:2x2x1
jax: 0.10.0
libtpu: 0.0.40
codegen_flags: <defaults>
</compile_context>

<pallas_src>
import functools

import jax
import jax.numpy as jnp
from jax.experimental import pallas as pl
from jax.experimental.pallas import tpu as pltpu

LANE = 128
TM_TARGET = 512    # row tile
TN_TARGET = 512    # Cout tile
TK_TARGET = 2048   # reduction tile
EPS = 1e-5


# ---------------------------------------------------------------------------
# Tiling helpers
# ---------------------------------------------------------------------------
def _round_up(x, m):
    return (x + m - 1) // m * m


def _pick_tile(dim, target):
    """dim is a multiple of 128.  Largest multiple of 128 <= target dividing
    dim (or dim itself when dim <= target)."""
    if dim <= target:
        return dim
    best = LANE
    t = 2 * LANE
    while t <= target:
        if dim % t == 0:
            best = t
        t += LANE
    return best


# ---------------------------------------------------------------------------
# Pallas kernels: K-tiled matmul + f32 accumulator + fused epilogue
# ---------------------------------------------------------------------------
def _mm_kernel(p_ref, w_ref, b_ref, o_ref, acc_ref, *, n_k, relu):
    k = pl.program_id(2)

    @pl.when(k == 0)
    def _():
        acc_ref[...] = jnp.zeros_like(acc_ref)

    acc_ref[...] += jnp.dot(p_ref[...], w_ref[...],
                            preferred_element_type=jnp.float32)

    @pl.when(k == n_k - 1)
    def _():
        y = acc_ref[...] + b_ref[...]          # f32 epilogue (BN scale pre-folded)
        if relu:
            y = jnp.maximum(y, 0.0)
        o_ref[...] = y.astype(o_ref.dtype)


def _mm_phase_kernel(p_ref, w_ref, b_ref, m_ref, o_ref, acc_ref, *, n_k, fuse):
    """Per-phase conv-transpose matmul with fused BN bias, relu and pyramid
    merge: out = relu(other (+|*) relu(acc + bias))."""
    k = pl.program_id(3)

    @pl.when(k == 0)
    def _():
        acc_ref[...] = jnp.zeros_like(acc_ref)

    acc_ref[...] += jnp.dot(p_ref[0], w_ref[0],
                            preferred_element_type=jnp.float32)

    @pl.when(k == n_k - 1)
    def _():
        y = jnp.maximum(acc_ref[...] + b_ref[...], 0.0)    # relu(bn(convT(x)))
        oth = m_ref[0].astype(jnp.float32)
        if fuse == "add":
            y = jnp.maximum(oth + y, 0.0)                  # relu(other + .)
        else:
            y = jnp.maximum(oth * y, 0.0)                  # relu(other * .)
        o_ref[0] = y.astype(o_ref.dtype)


def _matmul_bias_act(patches, w2, bias, *, relu, out_dtype=jnp.bfloat16):
    """out = act(patches @ w2 + bias).  patches (M, K), w2 (K, coutp) bf16,
    bias (1, coutp) f32; K and coutp are multiples of 128 (pre-padded)."""
    M, K = patches.shape
    coutp = w2.shape[1]

    mp = _round_up(M, LANE)
    tm = _pick_tile(mp, TM_TARGET)
    tn = _pick_tile(coutp, TN_TARGET)
    tk = _pick_tile(K, TK_TARGET)
    if mp // tm == 1 and coutp // tn == 1 and tm % 256 == 0:
        tm //= 2                                 # keep >=2 blocks for 2-TC chips
    nm, nn, nk = mp // tm, coutp // tn, K // tk

    p = patches.astype(jnp.bfloat16)
    if mp != M:                                  # pad only the ragged tail rows
        p = jnp.pad(p, ((0, mp - M), (0, 0)))

    out_b = jnp.dtype(out_dtype).itemsize
    tile_bytes = (tm * tk + tk * tn) * 2 + tn * 4 + tm * tn * out_b
    vmem_limit = int(min(48 << 20, max(32 << 20,
                                       2 * tile_bytes + tm * tn * 4 + (2 << 20))))

    out = pl.pallas_call(
        functools.partial(_mm_kernel, n_k=nk, relu=relu),
        out_shape=jax.ShapeDtypeStruct((mp, coutp), out_dtype),
        grid=(nm, nn, nk),
        in_specs=[
            pl.BlockSpec((tm, tk), lambda i, j, k: (i, k)),
            pl.BlockSpec((tk, tn), lambda i, j, k: (k, j)),
            pl.BlockSpec((1, tn), lambda i, j, k: (0, j)),
        ],
        out_specs=pl.BlockSpec((tm, tn), lambda i, j, k: (i, j)),
        scratch_shapes=[pltpu.VMEM((tm, tn), jnp.float32)],
        compiler_params=pltpu.CompilerParams(
            dimension_semantics=("parallel", "parallel", "arbitrary"),
            vmem_limit_bytes=vmem_limit),
    )(p, w2, bias)
    return out[:M] if mp != M else out


def _matmul_bias_act_phased(patches, w_ph, bias, other, *, fuse,
                            out_dtype=jnp.bfloat16):
    """All 4 conv-transpose phases in one pallas_call.
    patches (4, M, K), w_ph (4, K, coutp), other (4, M, coutp), bias (1, coutp)."""
    _, M, K = patches.shape
    coutp = w_ph.shape[-1]

    mp = _round_up(M, LANE)
    tm = _pick_tile(mp, TM_TARGET)
    tn = _pick_tile(coutp, TN_TARGET)
    tk = _pick_tile(K, TK_TARGET)
    nm, nn, nk = mp // tm, coutp // tn, K // tk

    p = patches.astype(jnp.bfloat16)
    o = other
    if mp != M:
        p = jnp.pad(p, ((0, 0), (0, mp - M), (0, 0)))
        o = jnp.pad(o, ((0, 0), (0, mp - M), (0, 0)))

    out_b = jnp.dtype(out_dtype).itemsize
    oth_b = jnp.dtype(o.dtype).itemsize
    tile_bytes = (tm * tk + tk * tn) * 2 + tn * 4 + tm * tn * (oth_b + out_b)
    vmem_limit = int(min(48 << 20, max(32 << 20,
                                       2 * tile_bytes + tm * tn * 4 + (2 << 20))))

    out = pl.pallas_call(
        functools.partial(_mm_phase_kernel, n_k=nk, fuse=fuse),
        out_shape=jax.ShapeDtypeStruct((4, mp, coutp), out_dtype),
        grid=(4, nm, nn, nk),
        in_specs=[
            pl.BlockSpec((1, tm, tk), lambda ph, i, j, k: (ph, i, k)),
            pl.BlockSpec((1, tk, tn), lambda ph, i, j, k: (ph, k, j)),
            pl.BlockSpec((1, tn), lambda ph, i, j, k: (0, j)),
            pl.BlockSpec((1, tm, tn), lambda ph, i, j, k: (ph, i, j)),
        ],
        out_specs=pl.BlockSpec((1, tm, tn), lambda ph, i, j, k: (ph, i, j)),
        scratch_shapes=[pltpu.VMEM((tm, tn), jnp.float32)],
        compiler_params=pltpu.CompilerParams(
            dimension_semantics=("parallel", "parallel", "parallel", "arbitrary"),
            vmem_limit_bytes=vmem_limit),
    )(p, w_ph, bias, o)
    return out[:, :M] if mp != M else out


# ---------------------------------------------------------------------------
# Conv helpers (im2col glue in JAX, matmul + fused epilogue in Pallas)
# ---------------------------------------------------------------------------
def _im2col(x, kh, kw, stride, pad):
    """x: NHWC -> patches (N*OH*OW, kh*kw*C), taps ordered (kh, kw, c)."""
    n, h, w, c = x.shape
    xp = jnp.pad(x, ((0, 0), (pad, pad), (pad, pad), (0, 0)))
    oh = (h + 2 * pad - kh) // stride + 1
    ow = (w + 2 * pad - kw) // stride + 1
    cols = []
    for ih in range(kh):
        for iw in range(kw):
            cols.append(
                xp[:, ih:ih + stride * (oh - 1) + 1:stride,
                      iw:iw + stride * (ow - 1) + 1:stride, :])
    p = jnp.stack(cols, axis=3)                   # (N, OH, OW, kh*kw, C)
    return p.reshape(n * oh * ow, kh * kw * c), oh, ow


def conv2d_bn(x, w2, bias, *, kh, kw, stride, pad, relu,
              out_dtype=jnp.bfloat16):
    """x: NHWC (bf16, channel-padded).  w2: GEMM-ready (kh*kw*cinp, coutp)."""
    n, h, w, cinp = x.shape
    coutp = w2.shape[1]
    if kh == 1 and kw == 1 and stride == 1 and pad == 0:
        patches, oh, ow = x.reshape(n * h * w, cinp), h, w
    else:
        patches, oh, ow = _im2col(x, kh, kw, stride, pad)
    out = _matmul_bias_act(patches, w2, bias, relu=relu, out_dtype=out_dtype)
    return out.reshape(n, oh, ow, coutp)


def conv_transpose_fused(x, w_ph, bias, *, fuse, other, out_dtype=jnp.bfloat16):
    """ConvTranspose2d(k=4, s=2, p=1) + BN + ReLU + fused pyramid merge.
    Decomposed into 4 sub-pixel phases (dense 2x2 stride-1 convs, no
    zero-insertion), all run in ONE pallas_call via a phase grid axis.
    x: (n, h, w, cinp);  w_ph: (4, 4*cinp, coutp);  other: (n, 2h, 2w, coutp)."""
    n, h, w, cinp = x.shape
    coutp = w_ph.shape[-1]
    M = n * h * w

    xp = jnp.pad(x, ((0, 0), (1, 1), (1, 1), (0, 0)))
    phase_patches = []
    for a in (0, 1):
        for b in (0, 1):
            taps = [xp[:, 1 - a + dh:1 - a + dh + h, 1 - b + dw:1 - b + dw + w, :]
                    for dh in (0, 1) for dw in (0, 1)]
            phase_patches.append(jnp.stack(taps, axis=3).reshape(M, 4 * cinp))
    patches = jnp.stack(phase_patches, axis=0)            # (4, M, 4*cinp)

    # merge operand -> phase-stacked with ONE reshape+transpose (no strided gathers)
    oth = other.reshape(n, h, 2, w, 2, coutp)
    oth = jnp.transpose(oth, (2, 4, 0, 1, 3, 5)).reshape(4, M, coutp)

    out = _matmul_bias_act_phased(patches, w_ph, bias, oth, fuse=fuse,
                                  out_dtype=out_dtype)
    out = out.reshape(2, 2, n, h, w, coutp)
    out = jnp.transpose(out, (2, 3, 0, 4, 1, 5)).reshape(n, 2 * h, 2 * w, coutp)
    return out


# ---------------------------------------------------------------------------
# Parameters: synthetic raw params + one-time GEMM-ready preparation
# ---------------------------------------------------------------------------
def _bn_fold(gamma, beta, mean, var):
    scale = gamma / jnp.sqrt(var + EPS)
    bias = beta - mean * scale
    return scale, bias


def make_params(key, channels):
    cm = channels // 4
    conv_shapes = {
        "conv_master": (channels, channels, 1, 1),
        "conv7x7_1": (cm, channels, 7, 7),
        "conv5x5_1": (cm, cm, 5, 5),
        "conv3x3_1": (cm, cm, 3, 3),
        "conv7x7_2": (cm, cm, 7, 7),
        "conv5x5_2": (cm, cm, 5, 5),
        "conv3x3_2": (cm, cm, 3, 3),
        # ConvTranspose weights are (Cin, Cout, kh, kw)
        "conv_upsample_3": (cm, cm, 4, 4),
        "conv_upsample_2": (cm, cm, 4, 4),
        "conv_upsample_1": (cm, channels, 4, 4),
    }
    bn_sizes = {
        "bn_master": channels, "bn1_1": cm, "bn2_1": cm, "bn3_1": cm,
        "bn1_2": cm, "bn2_2": cm, "bn3_2": cm,
        "bn_upsample_3": cm, "bn_upsample_2": cm, "bn_upsample_1": channels,
    }
    params = {}
    keys = jax.random.split(key, len(conv_shapes) + len(bn_sizes))
    ki = 0
    for name, shp in conv_shapes.items():
        params[name] = 0.05 * jax.random.normal(keys[ki], shp, jnp.float32)
        ki += 1
    for name, nch in bn_sizes.items():
        kg, kb, km, kv = jax.random.split(keys[ki], 4)
        ki += 1
        gamma = 1.0 + 0.1 * jax.random.normal(kg, (nch,), jnp.float32)
        beta = 0.1 * jax.random.normal(kb, (nch,), jnp.float32)
        mean = 0.1 * jax.random.normal(km, (nch,), jnp.float32)
        var = 1.0 + 0.1 * jnp.abs(jax.random.normal(kv, (nch,), jnp.float32))
        params[name] = _bn_fold(gamma, beta, mean, var)
    return params


def prepare_params(raw, channels):
    """Fold BN scale into weights, transpose to GEMM layout, zero-pad all
    channel dims to multiples of 128, build phase-stacked conv-transpose
    weights, and cast to bf16.  Done ONCE outside jit."""
    cm = channels // 4
    cpad = _round_up(channels, LANE)
    mpad = _round_up(cm, LANE)

    def conv_w(name, bn_name, cin, cinp, cout, coutp):
        w = raw[name]                                     # (cout, cin, kh, kw)
        scale, bias = raw[bn_name]
        kh, kw = w.shape[2], w.shape[3]
        wf = w * scale.reshape(-1, 1, 1, 1)
        wf = jnp.pad(wf, ((0, coutp - cout), (0, cinp - cin), (0, 0), (0, 0)))
        w2 = jnp.transpose(wf, (2, 3, 1, 0)).reshape(kh * kw * cinp, coutp)
        b = jnp.pad(bias, (0, coutp - cout)).reshape(1, coutp)
        return {"w": w2.astype(jnp.bfloat16), "b": b.astype(jnp.float32)}

    def convT_w(name, bn_name, cin, cinp, cout, coutp):
        wt = raw[name]                                    # (cin, cout, 4, 4)
        scale, bias = raw[bn_name]
        wf = wt * scale.reshape(1, -1, 1, 1)
        wf = jnp.pad(wf, ((0, cinp - cin), (0, coutp - cout), (0, 0), (0, 0)))
        phases = []
        for a in (0, 1):
            khs = (3, 1) if a == 0 else (2, 0)
            for b_ in (0, 1):
                kws = (3, 1) if b_ == 0 else (2, 0)
                taps = [wf[:, :, khs[dh], kws[dw]]
                        for dh in (0, 1) for dw in (0, 1)]
                phases.append(jnp.stack(taps, axis=0).reshape(4 * cinp, coutp))
        wp = jnp.stack(phases, axis=0)                    # (4, 4*cinp, coutp)
        b = jnp.pad(bias, (0, coutp - cout)).reshape(1, coutp)
        return {"w": wp.astype(jnp.bfloat16), "b": b.astype(jnp.float32)}

    return {
        "conv_master": conv_w("conv_master", "bn_master", channels, cpad, channels, cpad),
        "conv7x7_1": conv_w("conv7x7_1", "bn1_1", channels, cpad, cm, mpad),
        "conv7x7_2": conv_w("conv7x7_2", "bn1_2", cm, mpad, cm, mpad),
        "conv5x5_1": conv_w("conv5x5_1", "bn2_1", cm, mpad, cm, mpad),
        "conv5x5_2": conv_w("conv5x5_2", "bn2_2", cm, mpad, cm, mpad),
        "conv3x3_1": conv_w("conv3x3_1", "bn3_1", cm, mpad, cm, mpad),
        "conv3x3_2": conv_w("conv3x3_2", "bn3_2", cm, mpad, cm, mpad),
        "conv_upsample_3": convT_w("conv_upsample_3", "bn_upsample_3", cm, mpad, cm, mpad),
        "conv_upsample_2": convT_w("conv_upsample_2", "bn_upsample_2", cm, mpad, cm, mpad),
        "conv_upsample_1": convT_w("conv_upsample_1", "bn_upsample_1", cm, mpad, channels, cpad),
    }


# ---------------------------------------------------------------------------
# FPM forward
# ---------------------------------------------------------------------------
def fpm_forward(p, x_nchw, *, channels):
    cpad = p["conv_master"]["w"].shape[0]          # 1x1 conv: K == padded channels
    x = jnp.transpose(x_nchw, (0, 2, 3, 1))
    x = jnp.pad(x, ((0, 0), (0, 0), (0, 0), (0, cpad - channels))).astype(jnp.bfloat16)

    c = p["conv_master"]
    x_master = conv2d_bn(x, c["w"], c["b"], kh=1, kw=1, stride=1, pad=0, relu=False)

    c = p["conv7x7_1"]
    x1_1 = conv2d_bn(x, c["w"], c["b"], kh=7, kw=7, stride=2, pad=3, relu=True)
    c = p["conv7x7_2"]
    x1_2 = conv2d_bn(x1_1, c["w"], c["b"], kh=7, kw=7, stride=1, pad=3, relu=False)

    c = p["conv5x5_1"]
    x2_1 = conv2d_bn(x1_1, c["w"], c["b"], kh=5, kw=5, stride=2, pad=2, relu=True)
    c = p["conv5x5_2"]
    x2_2 = conv2d_bn(x2_1, c["w"], c["b"], kh=5, kw=5, stride=1, pad=2, relu=False)

    c = p["conv3x3_1"]
    x3_1 = conv2d_bn(x2_1, c["w"], c["b"], kh=3, kw=3, stride=2, pad=1, relu=True)
    c = p["conv3x3_2"]
    x3_2 = conv2d_bn(x3_1, c["w"], c["b"], kh=3, kw=3, stride=1, pad=1, relu=False)

    # x2_merge = relu(x2_2 + relu(bn(convT(x3_2))))   -- merge fused in epilogue
    c = p["conv_upsample_3"]
    x2_merge = conv_transpose_fused(x3_2, c["w"], c["b"], fuse="add", other=x2_2)

    # x1_merge = relu(x1_2 + relu(bn(convT(x2_merge))))
    c = p["conv_upsample_2"]
    x1_merge = conv_transpose_fused(x2_merge, c["w"], c["b"], fuse="add", other=x1_2)

    # out = relu(x_master * relu(bn(convT(x1_merge))))
    c = p["conv_upsample_1"]
    out = conv_transpose_fused(x1_merge, c["w"], c["b"], fuse="mul",
                               other=x_master, out_dtype=jnp.float32)

    out = out[..., :channels]                      # drop channel padding
    return jnp.transpose(out, (0, 3, 1, 2))        # back to NCHW


# ---------------------------------------------------------------------------
if __name__ == "__main__":
    channels = 16          # small stand-in for 1024 (channels_mid = 4)
    batch, hw = 2, 16

    key = jax.random.PRNGKey(0)
    k_par, k_x = jax.random.split(key)
    raw_params = make_params(k_par, channels)
    params = prepare_params(raw_params, channels)          # one-time, outside jit
    x = jax.random.normal(k_x, (batch, channels, hw, hw), jnp.float32)  # NCHW

    fwd = jax.jit(functools.partial(fpm_forward, channels=channels))
    out = jax.block_until_ready(fwd(params, x))
    assert out.shape == (batch, channels, hw, hw), out.shape
    assert out.dtype == jnp.float32
    assert bool(jnp.all(jnp.isfinite(out)))
    print("KERNEL_OK")
</pallas_src>

<mosaic_0001>
module attributes {stable_mosaic.version = 11 : i64} {
  func.func @_mm_kernel(%arg0: i32, %arg1: i32, %arg2: i32, %arg3: memref<128x896xbf16, #tpu.memory_space<vmem>>, %arg4: memref<896x128xbf16, #tpu.memory_space<vmem>>, %arg5: memref<1x128xf32, #tpu.memory_space<vmem>>, %arg6: memref<128x128xbf16, #tpu.memory_space<vmem>>, %arg7: memref<128x128xf32, #tpu.memory_space<vmem>>) attributes {dimension_semantics = [#tpu.dimension_semantics<parallel>, #tpu.dimension_semantics<parallel>, #tpu.dimension_semantics<arbitrary>], iteration_bounds = array<i64: 1, 1, 7>, scalar_prefetch = 0 : i64, scratch_operands = 1 : i64, tpu.core_type = #tpu.core_type<tc>, window_params = [{transform_indices = @transform_0, window_bounds = array<i64: 128, 896>}, {transform_indices = @transform_1, window_bounds = array<i64: 896, 128>}, {transform_indices = @transform_2, window_bounds = array<i64: 1, 128>}, {transform_indices = @transform_3, window_bounds = array<i64: 128, 128>}]} {
    %c0_i32 = arith.constant 0 : i32
    %0 = arith.cmpi eq, %arg2, %c0_i32 : i32
    %1 = arith.extui %0 : i1 to i32
    %c0_i32_0 = arith.constant 0 : i32
    %2 = arith.cmpi ne, %1, %c0_i32_0 : i32
    scf.if %2 {
      %cst_9 = arith.constant 0.000000e+00 : f32
      %12 = vector.broadcast %cst_9 : f32 to vector<128x128xf32>
      %c0_10 = arith.constant 0 : index
      %c0_11 = arith.constant 0 : index
      %13 = vector.load %arg7[%c0_10, %c0_11] : memref<128x128xf32, #tpu.memory_space<vmem>>, vector<128x128xf32>
      tpu.vector_store %arg7[%c0_10, %c0_11], %12 {strides = array<i32>} : memref<128x128xf32, #tpu.memory_space<vmem>>, vector<128x128xf32>,
    } else {
    }
    %c0 = arith.constant 0 : index
    %c0_1 = arith.constant 0 : index
    %3 = vector.load %arg7[%c0, %c0_1] : memref<128x128xf32, #tpu.memory_space<vmem>>, vector<128x128xf32>
    %c0_2 = arith.constant 0 : index
    %c0_3 = arith.constant 0 : index
    %4 = vector.load %arg3[%c0_2, %c0_3] : memref<128x896xbf16, #tpu.memory_space<vmem>>, vector<128x896xbf16>
    %c0_4 = arith.constant 0 : index
    %c0_5 = arith.constant 0 : index
    %5 = vector.load %arg4[%c0_4, %c0_5] : memref<896x128xbf16, #tpu.memory_space<vmem>>, vector<896x128xbf16>
    %cst = arith.constant dense<0.000000e+00> : vector<128x128xf32>
    %6 = tpu.matmul %4, %5, %cst {dimension_numbers = #tpu.dot_dimension_numbers<[1], [0], [0], [1], [0, 0, 1, 1], [], []>} : vector<128x896xbf16>, vector<896x128xbf16>, vector<128x128xf32> -> vector<128x128xf32>
    %7 = arith.addf %3, %6 : vector<128x128xf32>
    %c0_6 = arith.constant 0 : index
    %c0_7 = arith.constant 0 : index
    %8 = vector.load %arg7[%c0_6, %c0_7] : memref<128x128xf32, #tpu.memory_space<vmem>>, vector<128x128xf32>
    tpu.vector_store %arg7[%c0_6, %c0_7], %7 {strides = array<i32>} : memref<128x128xf32, #tpu.memory_space<vmem>>, vector<128x128xf32>,
    %c6_i32 = arith.constant 6 : i32
    %9 = arith.cmpi eq, %arg2, %c6_i32 : i32
    %10 = arith.extui %9 : i1 to i32
    %c0_i32_8 = arith.constant 0 : i32
    %11 = arith.cmpi ne, %10, %c0_i32_8 : i32
    scf.if %11 {
      %c0_9 = arith.constant 0 : index
      %c0_10 = arith.constant 0 : index
      %12 = vector.load %arg7[%c0_9, %c0_10] : memref<128x128xf32, #tpu.memory_space<vmem>>, vector<128x128xf32>
      %c0_11 = arith.constant 0 : index
      %c0_12 = arith.constant 0 : index
      %13 = vector.load %arg5[%c0_11, %c0_12] : memref<1x128xf32, #tpu.memory_space<vmem>>, vector<1x128xf32>
      %14 = vector.broadcast %13 : vector<1x128xf32> to vector<128x128xf32>
      %15 = arith.addf %12, %14 : vector<128x128xf32>
      %cst_13 = arith.constant 0.000000e+00 : f32
      %16 = vector.broadcast %cst_13 : f32 to vector<128x128xf32>
      %17 = arith.maximumf %15, %16 : vector<128x128xf32>
      %18 = arith.truncf %17 : vector<128x128xf32> to vector<128x128xbf16>
      %c0_14 = arith.constant 0 : index
      %c0_15 = arith.constant 0 : index
      %19 = vector.load %arg6[%c0_14, %c0_15] : memref<128x128xbf16, #tpu.memory_space<vmem>>, vector<128x128xbf16>
      tpu.vector_store %arg6[%c0_14, %c0_15], %18 {strides = array<i32>} : memref<128x128xbf16, #tpu.memory_space<vmem>>, vector<128x128xbf16>,
    } else {
    }
    return
  }
  func.func @transform_0(%arg0: i32, %arg1: i32, %arg2: i32) -> (i32, i32) {
    %c0_i32 = arith.constant 0 : i32
    return %arg0, %arg2 : i32, i32
  }
  func.func @transform_1(%arg0: i32, %arg1: i32, %arg2: i32) -> (i32, i32) {
    %c0_i32 = arith.constant 0 : i32
    return %arg2, %arg1 : i32, i32
  }
  func.func @transform_2(%arg0: i32, %arg1: i32, %arg2: i32) -> (i32, i32) {
    %c0_i32 = arith.constant 0 : i32
    %c0_i32_0 = arith.constant 0 : i32
    return %c0_i32, %arg1 : i32, i32
  }
  func.func @transform_3(%arg0: i32, %arg1: i32, %arg2: i32) -> (i32, i32) {
    %c0_i32 = arith.constant 0 : i32
    return %arg0, %arg1 : i32, i32
  }
}

module attributes {stable_mosaic.version = 11 : i64} {
  func.func @_mm_kernel(%arg0: i32, %arg1: i32, %arg2: i32, %arg3: memref<128x896xbf16, #tpu.memory_space<vmem>>, %arg4: memref<896x128xbf16, #tpu.memory_space<vmem>>, %arg5: memref<1x128xf32, #tpu.memory_space<vmem>>, %arg6: memref<128x128xbf16, #tpu.memory_space<vmem>>, %arg7: memref<128x128xf32, #tpu.memory_space<vmem>>) attributes {dimension_semantics = [#tpu.dimension_semantics<parallel>, #tpu.dimension_semantics<parallel>, #tpu.dimension_semantics<arbitrary>], iteration_bounds = array<i64: 1, 1, 7>, scalar_prefetch = 0 : i64, scratch_operands = 1 : i64, tpu.core_type = #tpu.core_type<tc>, window_params = [{transform_indices = @transform_0, window_bounds = array<i64: 128, 896>}, {transform_indices = @transform_1, window_bounds = array<i64: 896, 128>}, {transform_indices = @transform_2, window_bounds = array<i64: 1, 128>}, {transform_indices = @transform_3, window_bounds = array<i64: 128, 128>}]} {
    %c0_i32 = arith.constant 0 : i32
    %0 = arith.cmpi eq, %arg2, %c0_i32 : i32
    %1 = arith.extui %0 : i1 to i32
    %c0_i32_0 = arith.constant 0 : i32
    %2 = arith.cmpi ne, %1, %c0_i32_0 : i32
    scf.if %2 {
      %cst_9 = arith.constant 0.000000e+00 : f32
      %12 = vector.broadcast %cst_9 : f32 to vector<128x128xf32>
      %c0_10 = arith.constant 0 : index
      %c0_11 = arith.constant 0 : index
      %13 = vector.load %arg7[%c0_10, %c0_11] : memref<128x128xf32, #tpu.memory_space<vmem>>, vector<128x128xf32>
      tpu.vector_store %arg7[%c0_10, %c0_11], %12 {strides = array<i32>} : memref<128x128xf32, #tpu.memory_space<vmem>>, vector<128x128xf32>,
    } else {
    }
    %c0 = arith.constant 0 : index
    %c0_1 = arith.constant 0 : index
    %3 = vector.load %arg7[%c0, %c0_1] : memref<128x128xf32, #tpu.memory_space<vmem>>, vector<128x128xf32>
    %c0_2 = arith.constant 0 : index
    %c0_3 = arith.constant 0 : index
    %4 = vector.load %arg3[%c0_2, %c0_3] : memref<128x896xbf16, #tpu.memory_space<vmem>>, vector<128x896xbf16>
    %c0_4 = arith.constant 0 : index
    %c0_5 = arith.constant 0 : index
    %5 = vector.load %arg4[%c0_4, %c0_5] : memref<896x128xbf16, #tpu.memory_space<vmem>>, vector<896x128xbf16>
    %cst = arith.constant dense<0.000000e+00> : vector<128x128xf32>
    %6 = tpu.matmul %4, %5, %cst {dimension_numbers = #tpu.dot_dimension_numbers<[1], [0], [0], [1], [0, 0, 1, 1], [], []>} : vector<128x896xbf16>, vector<896x128xbf16>, vector<128x128xf32> -> vector<128x128xf32>
    %7 = arith.addf %3, %6 : vector<128x128xf32>
    %c0_6 = arith.constant 0 : index
    %c0_7 = arith.constant 0 : index
    %8 = vector.load %arg7[%c0_6, %c0_7] : memref<128x128xf32, #tpu.memory_space<vmem>>, vector<128x128xf32>
    tpu.vector_store %arg7[%c0_6, %c0_7], %7 {strides = array<i32>} : memref<128x128xf32, #tpu.memory_space<vmem>>, vector<128x128xf32>,
    %c6_i32 = arith.constant 6 : i32
    %9 = arith.cmpi eq, %arg2, %c6_i32 : i32
    %10 = arith.extui %9 : i1 to i32
    %c0_i32_8 = arith.constant 0 : i32
    %11 = arith.cmpi ne, %10, %c0_i32_8 : i32
    scf.if %11 {
      %c0_9 = arith.constant 0 : index
      %c0_10 = arith.constant 0 : index
      %12 = vector.load %arg7[%c0_9, %c0_10] : memref<128x128xf32, #tpu.memory_space<vmem>>, vector<128x128xf32>
      %c0_11 = arith.constant 0 : index
      %c0_12 = arith.constant 0 : index
      %13 = vector.load %arg5[%c0_11, %c0_12] : memref<1x128xf32, #tpu.memory_space<vmem>>, vector<1x128xf32>
      %14 = vector.broadcast %13 : vector<1x128xf32> to vector<128x128xf32>
      %15 = arith.addf %12, %14 : vector<128x128xf32>
      %16 = arith.truncf %15 : vector<128x128xf32> to vector<128x128xbf16>
      %c0_13 = arith.constant 0 : index
      %c0_14 = arith.constant 0 : index
      %17 = vector.load %arg6[%c0_13, %c0_14] : memref<128x128xbf16, #tpu.memory_space<vmem>>, vector<128x128xbf16>
      tpu.vector_store %arg6[%c0_13, %c0_14], %16 {strides = array<i32>} : memref<128x128xbf16, #tpu.memory_space<vmem>>, vector<128x128xbf16>,
    } else {
    }
    return
  }
  func.func @transform_0(%arg0: i32, %arg1: i32, %arg2: i32) -> (i32, i32) {
    %c0_i32 = arith.constant 0 : i32
    return %arg0, %arg2 : i32, i32
  }
  func.func @transform_1(%arg0: i32, %arg1: i32, %arg2: i32) -> (i32, i32) {
    %c0_i32 = arith.constant 0 : i32
    return %arg2, %arg1 : i32, i32
  }
  func.func @transform_2(%arg0: i32, %arg1: i32, %arg2: i32) -> (i32, i32) {
    %c0_i32 = arith.constant 0 : i32
    %c0_i32_0 = arith.constant 0 : i32
    return %c0_i32, %arg1 : i32, i32
  }
  func.func @transform_3(%arg0: i32, %arg1: i32, %arg2: i32) -> (i32, i32) {
    %c0_i32 = arith.constant 0 : i32
    return %arg0, %arg1 : i32, i32
  }
}

module attributes {stable_mosaic.version = 11 : i64} {
  func.func @_mm_kernel(%arg0: i32, %arg1: i32, %arg2: i32, %arg3: memref<128x640xbf16, #tpu.memory_space<vmem>>, %arg4: memref<640x128xbf16, #tpu.memory_space<vmem>>, %arg5: memref<1x128xf32, #tpu.memory_space<vmem>>, %arg6: memref<128x128xbf16, #tpu.memory_space<vmem>>, %arg7: memref<128x128xf32, #tpu.memory_space<vmem>>) attributes {dimension_semantics = [#tpu.dimension_semantics<parallel>, #tpu.dimension_semantics<parallel>, #tpu.dimension_semantics<arbitrary>], iteration_bounds = array<i64: 1, 1, 5>, scalar_prefetch = 0 : i64, scratch_operands = 1 : i64, tpu.core_type = #tpu.core_type<tc>, window_params = [{transform_indices = @transform_0, window_bounds = array<i64: 128, 640>}, {transform_indices = @transform_1, window_bounds = array<i64: 640, 128>}, {transform_indices = @transform_2, window_bounds = array<i64: 1, 128>}, {transform_indices = @transform_3, window_bounds = array<i64: 128, 128>}]} {
    %c0_i32 = arith.constant 0 : i32
    %0 = arith.cmpi eq, %arg2, %c0_i32 : i32
    %1 = arith.extui %0 : i1 to i32
    %c0_i32_0 = arith.constant 0 : i32
    %2 = arith.cmpi ne, %1, %c0_i32_0 : i32
    scf.if %2 {
      %cst_9 = arith.constant 0.000000e+00 : f32
      %12 = vector.broadcast %cst_9 : f32 to vector<128x128xf32>
      %c0_10 = arith.constant 0 : index
      %c0_11 = arith.constant 0 : index
      %13 = vector.load %arg7[%c0_10, %c0_11] : memref<128x128xf32, #tpu.memory_space<vmem>>, vector<128x128xf32>
      tpu.vector_store %arg7[%c0_10, %c0_11], %12 {strides = array<i32>} : memref<128x128xf32, #tpu.memory_space<vmem>>, vector<128x128xf32>,
    } else {
    }
    %c0 = arith.constant 0 : index
    %c0_1 = arith.constant 0 : index
    %3 = vector.load %arg7[%c0, %c0_1] : memref<128x128xf32, #tpu.memory_space<vmem>>, vector<128x128xf32>
    %c0_2 = arith.constant 0 : index
    %c0_3 = arith.constant 0 : index
    %4 = vector.load %arg3[%c0_2, %c0_3] : memref<128x640xbf16, #tpu.memory_space<vmem>>, vector<128x640xbf16>
    %c0_4 = arith.constant 0 : index
    %c0_5 = arith.constant 0 : index
    %5 = vector.load %arg4[%c0_4, %c0_5] : memref<640x128xbf16, #tpu.memory_space<vmem>>, vector<640x128xbf16>
    %cst = arith.constant dense<0.000000e+00> : vector<128x128xf32>
    %6 = tpu.matmul %4, %5, %cst {dimension_numbers = #tpu.dot_dimension_numbers<[1], [0], [0], [1], [0, 0, 1, 1], [], []>} : vector<128x640xbf16>, vector<640x128xbf16>, vector<128x128xf32> -> vector<128x128xf32>
    %7 = arith.addf %3, %6 : vector<128x128xf32>
    %c0_6 = arith.constant 0 : index
    %c0_7 = arith.constant 0 : index
    %8 = vector.load %arg7[%c0_6, %c0_7] : memref<128x128xf32, #tpu.memory_space<vmem>>, vector<128x128xf32>
    tpu.vector_store %arg7[%c0_6, %c0_7], %7 {strides = array<i32>} : memref<128x128xf32, #tpu.memory_space<vmem>>, vector<128x128xf32>,
    %c4_i32 = arith.constant 4 : i32
    %9 = arith.cmpi eq, %arg2, %c4_i32 : i32
    %10 = arith.extui %9 : i1 to i32
    %c0_i32_8 = arith.constant 0 : i32
    %11 = arith.cmpi ne, %10, %c0_i32_8 : i32
    scf.if %11 {
      %c0_9 = arith.constant 0 : index
      %c0_10 = arith.constant 0 : index
      %12 = vector.load %arg7[%c0_9, %c0_10] : memref<128x128xf32, #tpu.memory_space<vmem>>, vector<128x128xf32>
      %c0_11 = arith.constant 0 : index
      %c0_12 = arith.constant 0 : index
      %13 = vector.load %arg5[%c0_11, %c0_12] : memref<1x128xf32, #tpu.memory_space<vmem>>, vector<1x128xf32>
      %14 = vector.broadcast %13 : vector<1x128xf32> to vector<128x128xf32>
      %15 = arith.addf %12, %14 : vector<128x128xf32>
      %cst_13 = arith.constant 0.000000e+00 : f32
      %16 = vector.broadcast %cst_13 : f32 to vector<128x128xf32>
      %17 = arith.maximumf %15, %16 : vector<128x128xf32>
      %18 = arith.truncf %17 : vector<128x128xf32> to vector<128x128xbf16>
      %c0_14 = arith.constant 0 : index
      %c0_15 = arith.constant 0 : index
      %19 = vector.load %arg6[%c0_14, %c0_15] : memref<128x128xbf16, #tpu.memory_space<vmem>>, vector<128x128xbf16>
      tpu.vector_store %arg6[%c0_14, %c0_15], %18 {strides = array<i32>} : memref<128x128xbf16, #tpu.memory_space<vmem>>, vector<128x128xbf16>,
    } else {
    }
    return
  }
  func.func @transform_0(%arg0: i32, %arg1: i32, %arg2: i32) -> (i32, i32) {
    %c0_i32 = arith.constant 0 : i32
    return %arg0, %arg2 : i32, i32
  }
  func.func @transform_1(%arg0: i32, %arg1: i32, %arg2: i32) -> (i32, i32) {
    %c0_i32 = arith.constant 0 : i32
    return %arg2, %arg1 : i32, i32
  }
  func.func @transform_2(%arg0: i32, %arg1: i32, %arg2: i32) -> (i32, i32) {
    %c0_i32 = arith.constant 0 : i32
    %c0_i32_0 = arith.constant 0 : i32
    return %c0_i32, %arg1 : i32, i32
  }
  func.func @transform_3(%arg0: i32, %arg1: i32, %arg2: i32) -> (i32, i32) {
    %c0_i32 = arith.constant 0 : i32
    return %arg0, %arg1 : i32, i32
  }
}

module attributes {stable_mosaic.version = 11 : i64} {
  func.func @_mm_kernel(%arg0: i32, %arg1: i32, %arg2: i32, %arg3: memref<128x640xbf16, #tpu.memory_space<vmem>>, %arg4: memref<640x128xbf16, #tpu.memory_space<vmem>>, %arg5: memref<1x128xf32, #tpu.memory_space<vmem>>, %arg6: memref<128x128xbf16, #tpu.memory_space<vmem>>, %arg7: memref<128x128xf32, #tpu.memory_space<vmem>>) attributes {dimension_semantics = [#tpu.dimension_semantics<parallel>, #tpu.dimension_semantics<parallel>, #tpu.dimension_semantics<arbitrary>], iteration_bounds = array<i64: 1, 1, 5>, scalar_prefetch = 0 : i64, scratch_operands = 1 : i64, tpu.core_type = #tpu.core_type<tc>, window_params = [{transform_indices = @transform_0, window_bounds = array<i64: 128, 640>}, {transform_indices = @transform_1, window_bounds = array<i64: 640, 128>}, {transform_indices = @transform_2, window_bounds = array<i64: 1, 128>}, {transform_indices = @transform_3, window_bounds = array<i64: 128, 128>}]} {
    %c0_i32 = arith.constant 0 : i32
    %0 = arith.cmpi eq, %arg2, %c0_i32 : i32
    %1 = arith.extui %0 : i1 to i32
    %c0_i32_0 = arith.constant 0 : i32
    %2 = arith.cmpi ne, %1, %c0_i32_0 : i32
    scf.if %2 {
      %cst_9 = arith.constant 0.000000e+00 : f32
      %12 = vector.broadcast %cst_9 : f32 to vector<128x128xf32>
      %c0_10 = arith.constant 0 : index
      %c0_11 = arith.constant 0 : index
      %13 = vector.load %arg7[%c0_10, %c0_11] : memref<128x128xf32, #tpu.memory_space<vmem>>, vector<128x128xf32>
      tpu.vector_store %arg7[%c0_10, %c0_11], %12 {strides = array<i32>} : memref<128x128xf32, #tpu.memory_space<vmem>>, vector<128x128xf32>,
    } else {
    }
    %c0 = arith.constant 0 : index
    %c0_1 = arith.constant 0 : index
    %3 = vector.load %arg7[%c0, %c0_1] : memref<128x128xf32, #tpu.memory_space<vmem>>, vector<128x128xf32>
    %c0_2 = arith.constant 0 : index
    %c0_3 = arith.constant 0 : index
    %4 = vector.load %arg3[%c0_2, %c0_3] : memref<128x640xbf16, #tpu.memory_space<vmem>>, vector<128x640xbf16>
    %c0_4 = arith.constant 0 : index
    %c0_5 = arith.constant 0 : index
    %5 = vector.load %arg4[%c0_4, %c0_5] : memref<640x128xbf16, #tpu.memory_space<vmem>>, vector<640x128xbf16>
    %cst = arith.constant dense<0.000000e+00> : vector<128x128xf32>
    %6 = tpu.matmul %4, %5, %cst {dimension_numbers = #tpu.dot_dimension_numbers<[1], [0], [0], [1], [0, 0, 1, 1], [], []>} : vector<128x640xbf16>, vector<640x128xbf16>, vector<128x128xf32> -> vector<128x128xf32>
    %7 = arith.addf %3, %6 : vector<128x128xf32>
    %c0_6 = arith.constant 0 : index
    %c0_7 = arith.constant 0 : index
    %8 = vector.load %arg7[%c0_6, %c0_7] : memref<128x128xf32, #tpu.memory_space<vmem>>, vector<128x128xf32>
    tpu.vector_store %arg7[%c0_6, %c0_7], %7 {strides = array<i32>} : memref<128x128xf32, #tpu.memory_space<vmem>>, vector<128x128xf32>,
    %c4_i32 = arith.constant 4 : i32
    %9 = arith.cmpi eq, %arg2, %c4_i32 : i32
    %10 = arith.extui %9 : i1 to i32
    %c0_i32_8 = arith.constant 0 : i32
    %11 = arith.cmpi ne, %10, %c0_i32_8 : i32
    scf.if %11 {
      %c0_9 = arith.constant 0 : index
      %c0_10 = arith.constant 0 : index
      %12 = vector.load %arg7[%c0_9, %c0_10] : memref<128x128xf32, #tpu.memory_space<vmem>>, vector<128x128xf32>
      %c0_11 = arith.constant 0 : index
      %c0_12 = arith.constant 0 : index
      %13 = vector.load %arg5[%c0_11, %c0_12] : memref<1x128xf32, #tpu.memory_space<vmem>>, vector<1x128xf32>
      %14 = vector.broadcast %13 : vector<1x128xf32> to vector<128x128xf32>
      %15 = arith.addf %12, %14 : vector<128x128xf32>
      %16 = arith.truncf %15 : vector<128x128xf32> to vector<128x128xbf16>
      %c0_13 = arith.constant 0 : index
      %c0_14 = arith.constant 0 : index
      %17 = vector.load %arg6[%c0_13, %c0_14] : memref<128x128xbf16, #tpu.memory_space<vmem>>, vector<128x128xbf16>
      tpu.vector_store %arg6[%c0_13, %c0_14], %16 {strides = array<i32>} : memref<128x128xbf16, #tpu.memory_space<vmem>>, vector<128x128xbf16>,
    } else {
    }
    return
  }
  func.func @transform_0(%arg0: i32, %arg1: i32, %arg2: i32) -> (i32, i32) {
    %c0_i32 = arith.constant 0 : i32
    return %arg0, %arg2 : i32, i32
  }
  func.func @transform_1(%arg0: i32, %arg1: i32, %arg2: i32) -> (i32, i32) {
    %c0_i32 = arith.constant 0 : i32
    return %arg2, %arg1 : i32, i32
  }
  func.func @transform_2(%arg0: i32, %arg1: i32, %arg2: i32) -> (i32, i32) {
    %c0_i32 = arith.constant 0 : i32
    %c0_i32_0 = arith.constant 0 : i32
    return %c0_i32, %arg1 : i32, i32
  }
  func.func @transform_3(%arg0: i32, %arg1: i32, %arg2: i32) -> (i32, i32) {
    %c0_i32 = arith.constant 0 : i32
    return %arg0, %arg1 : i32, i32
  }
}

module attributes {stable_mosaic.version = 11 : i64} {
  func.func @_mm_kernel(%arg0: i32, %arg1: i32, %arg2: i32, %arg3: memref<128x1152xbf16, #tpu.memory_space<vmem>>, %arg4: memref<1152x128xbf16, #tpu.memory_space<vmem>>, %arg5: memref<1x128xf32, #tpu.memory_space<vmem>>, %arg6: memref<128x128xbf16, #tpu.memory_space<vmem>>, %arg7: memref<128x128xf32, #tpu.memory_space<vmem>>) attributes {dimension_semantics = [#tpu.dimension_semantics<parallel>, #tpu.dimension_semantics<parallel>, #tpu.dimension_semantics<arbitrary>], iteration_bounds = array<i64: 1, 1, 1>, scalar_prefetch = 0 : i64, scratch_operands = 1 : i64, tpu.core_type = #tpu.core_type<tc>, window_params = [{transform_indices = @transform_0, window_bounds = array<i64: 128, 1152>}, {transform_indices = @transform_1, window_bounds = array<i64: 1152, 128>}, {transform_indices = @transform_2, window_bounds = array<i64: 1, 128>}, {transform_indices = @transform_3, window_bounds = array<i64: 128, 128>}]} {
    %c0_i32 = arith.constant 0 : i32
    %0 = arith.cmpi eq, %arg2, %c0_i32 : i32
    %1 = arith.extui %0 : i1 to i32
    %c0_i32_0 = arith.constant 0 : i32
    %2 = arith.cmpi ne, %1, %c0_i32_0 : i32
    scf.if %2 {
      %cst_10 = arith.constant 0.000000e+00 : f32
      %12 = vector.broadcast %cst_10 : f32 to vector<128x128xf32>
      %c0_11 = arith.constant 0 : index
      %c0_12 = arith.constant 0 : index
      %13 = vector.load %arg7[%c0_11, %c0_12] : memref<128x128xf32, #tpu.memory_space<vmem>>, vector<128x128xf32>
      tpu.vector_store %arg7[%c0_11, %c0_12], %12 {strides = array<i32>} : memref<128x128xf32, #tpu.memory_space<vmem>>, vector<128x128xf32>,
    } else {
    }
    %c0 = arith.constant 0 : index
    %c0_1 = arith.constant 0 : index
    %3 = vector.load %arg7[%c0, %c0_1] : memref<128x128xf32, #tpu.memory_space<vmem>>, vector<128x128xf32>
    %c0_2 = arith.constant 0 : index
    %c0_3 = arith.constant 0 : index
    %4 = vector.load %arg3[%c0_2, %c0_3] : memref<128x1152xbf16, #tpu.memory_space<vmem>>, vector<128x1152xbf16>
    %c0_4 = arith.constant 0 : index
    %c0_5 = arith.constant 0 : index
    %5 = vector.load %arg4[%c0_4, %c0_5] : memref<1152x128xbf16, #tpu.memory_space<vmem>>, vector<1152x128xbf16>
    %cst = arith.constant dense<0.000000e+00> : vector<128x128xf32>
    %6 = tpu.matmul %4, %5, %cst {dimension_numbers = #tpu.dot_dimension_numbers<[1], [0], [0], [1], [0, 0, 1, 1], [], []>} : vector<128x1152xbf16>, vector<1152x128xbf16>, vector<128x128xf32> -> vector<128x128xf32>
    %7 = arith.addf %3, %6 : vector<128x128xf32>
    %c0_6 = arith.constant 0 : index
    %c0_7 = arith.constant 0 : index
    %8 = vector.load %arg7[%c0_6, %c0_7] : memref<128x128xf32, #tpu.memory_space<vmem>>, vector<128x128xf32>
    tpu.vector_store %arg7[%c0_6, %c0_7], %7 {strides = array<i32>} : memref<128x128xf32, #tpu.memory_space<vmem>>, vector<128x128xf32>,
    %c0_i32_8 = arith.constant 0 : i32
    %9 = arith.cmpi eq, %arg2, %c0_i32_8 : i32
    %10 = arith.extui %9 : i1 to i32
    %c0_i32_9 = arith.constant 0 : i32
    %11 = arith.cmpi ne, %10, %c0_i32_9 : i32
    scf.if %11 {
      %c0_10 = arith.constant 0 : index
      %c0_11 = arith.constant 0 : index
      %12 = vector.load %arg7[%c0_10, %c0_11] : memref<128x128xf32, #tpu.memory_space<vmem>>, vector<128x128xf32>
      %c0_12 = arith.constant 0 : index
      %c0_13 = arith.constant 0 : index
      %13 = vector.load %arg5[%c0_12, %c0_13] : memref<1x128xf32, #tpu.memory_space<vmem>>, vector<1x128xf32>
      %14 = vector.broadcast %13 : vector<1x128xf32> to vector<128x128xf32>
      %15 = arith.addf %12, %14 : vector<128x128xf32>
      %cst_14 = arith.constant 0.000000e+00 : f32
      %16 = vector.broadcast %cst_14 : f32 to vector<128x128xf32>
      %17 = arith.maximumf %15, %16 : vector<128x128xf32>
      %18 = arith.truncf %17 : vector<128x128xf32> to vector<128x128xbf16>
      %c0_15 = arith.constant 0 : index
      %c0_16 = arith.constant 0 : index
      %19 = vector.load %arg6[%c0_15, %c0_16] : memref<128x128xbf16, #tpu.memory_space<vmem>>, vector<128x128xbf16>
      tpu.vector_store %arg6[%c0_15, %c0_16], %18 {strides = array<i32>} : memref<128x128xbf16, #tpu.memory_space<vmem>>, vector<128x128xbf16>,
    } else {
    }
    return
  }
  func.func @transform_0(%arg0: i32, %arg1: i32, %arg2: i32) -> (i32, i32) {
    %c0_i32 = arith.constant 0 : i32
    return %arg0, %arg2 : i32, i32
  }
  func.func @transform_1(%arg0: i32, %arg1: i32, %arg2: i32) -> (i32, i32) {
    %c0_i32 = arith.constant 0 : i32
    return %arg2, %arg1 : i32, i32
  }
  func.func @transform_2(%arg0: i32, %arg1: i32, %arg2: i32) -> (i32, i32) {
    %c0_i32 = arith.constant 0 : i32
    %c0_i32_0 = arith.constant 0 : i32
    return %c0_i32, %arg1 : i32, i32
  }
  func.func @transform_3(%arg0: i32, %arg1: i32, %arg2: i32) -> (i32, i32) {
    %c0_i32 = arith.constant 0 : i32
    return %arg0, %arg1 : i32, i32
  }
}

module attributes {stable_mosaic.version = 11 : i64} {
  func.func @_mm_kernel(%arg0: i32, %arg1: i32, %arg2: i32, %arg3: memref<128x1152xbf16, #tpu.memory_space<vmem>>, %arg4: memref<1152x128xbf16, #tpu.memory_space<vmem>>, %arg5: memref<1x128xf32, #tpu.memory_space<vmem>>, %arg6: memref<128x128xbf16, #tpu.memory_space<vmem>>, %arg7: memref<128x128xf32, #tpu.memory_space<vmem>>) attributes {dimension_semantics = [#tpu.dimension_semantics<parallel>, #tpu.dimension_semantics<parallel>, #tpu.dimension_semantics<arbitrary>], iteration_bounds = array<i64: 1, 1, 1>, scalar_prefetch = 0 : i64, scratch_operands = 1 : i64, tpu.core_type = #tpu.core_type<tc>, window_params = [{transform_indices = @transform_0, window_bounds = array<i64: 128, 1152>}, {transform_indices = @transform_1, window_bounds = array<i64: 1152, 128>}, {transform_indices = @transform_2, window_bounds = array<i64: 1, 128>}, {transform_indices = @transform_3, window_bounds = array<i64: 128, 128>}]} {
    %c0_i32 = arith.constant 0 : i32
    %0 = arith.cmpi eq, %arg2, %c0_i32 : i32
    %1 = arith.extui %0 : i1 to i32
    %c0_i32_0 = arith.constant 0 : i32
    %2 = arith.cmpi ne, %1, %c0_i32_0 : i32
    scf.if %2 {
      %cst_10 = arith.constant 0.000000e+00 : f32
      %12 = vector.broadcast %cst_10 : f32 to vector<128x128xf32>
      %c0_11 = arith.constant 0 : index
      %c0_12 = arith.constant 0 : index
      %13 = vector.load %arg7[%c0_11, %c0_12] : memref<128x128xf32, #tpu.memory_space<vmem>>, vector<128x128xf32>
      tpu.vector_store %arg7[%c0_11, %c0_12], %12 {strides = array<i32>} : memref<128x128xf32, #tpu.memory_space<vmem>>, vector<128x128xf32>,
    } else {
    }
    %c0 = arith.constant 0 : index
    %c0_1 = arith.constant 0 : index
    %3 = vector.load %arg7[%c0, %c0_1] : memref<128x128xf32, #tpu.memory_space<vmem>>, vector<128x128xf32>
    %c0_2 = arith.constant 0 : index
    %c0_3 = arith.constant 0 : index
    %4 = vector.load %arg3[%c0_2, %c0_3] : memref<128x1152xbf16, #tpu.memory_space<vmem>>, vector<128x1152xbf16>
    %c0_4 = arith.constant 0 : index
    %c0_5 = arith.constant 0 : index
    %5 = vector.load %arg4[%c0_4, %c0_5] : memref<1152x128xbf16, #tpu.memory_space<vmem>>, vector<1152x128xbf16>
    %cst = arith.constant dense<0.000000e+00> : vector<128x128xf32>
    %6 = tpu.matmul %4, %5, %cst {dimension_numbers = #tpu.dot_dimension_numbers<[1], [0], [0], [1], [0, 0, 1, 1], [], []>} : vector<128x1152xbf16>, vector<1152x128xbf16>, vector<128x128xf32> -> vector<128x128xf32>
    %7 = arith.addf %3, %6 : vector<128x128xf32>
    %c0_6 = arith.constant 0 : index
    %c0_7 = arith.constant 0 : index
    %8 = vector.load %arg7[%c0_6, %c0_7] : memref<128x128xf32, #tpu.memory_space<vmem>>, vector<128x128xf32>
    tpu.vector_store %arg7[%c0_6, %c0_7], %7 {strides = array<i32>} : memref<128x128xf32, #tpu.memory_space<vmem>>, vector<128x128xf32>,
    %c0_i32_8 = arith.constant 0 : i32
    %9 = arith.cmpi eq, %arg2, %c0_i32_8 : i32
    %10 = arith.extui %9 : i1 to i32
    %c0_i32_9 = arith.constant 0 : i32
    %11 = arith.cmpi ne, %10, %c0_i32_9 : i32
    scf.if %11 {
      %c0_10 = arith.constant 0 : index
      %c0_11 = arith.constant 0 : index
      %12 = vector.load %arg7[%c0_10, %c0_11] : memref<128x128xf32, #tpu.memory_space<vmem>>, vector<128x128xf32>
      %c0_12 = arith.constant 0 : index
      %c0_13 = arith.constant 0 : index
      %13 = vector.load %arg5[%c0_12, %c0_13] : memref<1x128xf32, #tpu.memory_space<vmem>>, vector<1x128xf32>
      %14 = vector.broadcast %13 : vector<1x128xf32> to vector<128x128xf32>
      %15 = arith.addf %12, %14 : vector<128x128xf32>
      %16 = arith.truncf %15 : vector<128x128xf32> to vector<128x128xbf16>
      %c0_14 = arith.constant 0 : index
      %c0_15 = arith.constant 0 : index
      %17 = vector.load %arg6[%c0_14, %c0_15] : memref<128x128xbf16, #tpu.memory_space<vmem>>, vector<128x128xbf16>
      tpu.vector_store %arg6[%c0_14, %c0_15], %16 {strides = array<i32>} : memref<128x128xbf16, #tpu.memory_space<vmem>>, vector<128x128xbf16>,
    } else {
    }
    return
  }
  func.func @transform_0(%arg0: i32, %arg1: i32, %arg2: i32) -> (i32, i32) {
    %c0_i32 = arith.constant 0 : i32
    return %arg0, %arg2 : i32, i32
  }
  func.func @transform_1(%arg0: i32, %arg1: i32, %arg2: i32) -> (i32, i32) {
    %c0_i32 = arith.constant 0 : i32
    return %arg2, %arg1 : i32, i32
  }
  func.func @transform_2(%arg0: i32, %arg1: i32, %arg2: i32) -> (i32, i32) {
    %c0_i32 = arith.constant 0 : i32
    %c0_i32_0 = arith.constant 0 : i32
    return %c0_i32, %arg1 : i32, i32
  }
  func.func @transform_3(%arg0: i32, %arg1: i32, %arg2: i32) -> (i32, i32) {
    %c0_i32 = arith.constant 0 : i32
    return %arg0, %arg1 : i32, i32
  }
}

module attributes {stable_mosaic.version = 11 : i64} {
  func.func @_mm_phase_kernel(%arg0: i32, %arg1: i32, %arg2: i32, %arg3: i32, %arg4: memref<1x128x512xbf16, #tpu.memory_space<vmem>>, %arg5: memref<1x512x128xbf16, #tpu.memory_space<vmem>>, %arg6: memref<1x128xf32, #tpu.memory_space<vmem>>, %arg7: memref<1x128x128xbf16, #tpu.memory_space<vmem>>, %arg8: memref<1x128x128xbf16, #tpu.memory_space<vmem>>, %arg9: memref<128x128xf32, #tpu.memory_space<vmem>>) attributes {dimension_semantics = [#tpu.dimension_semantics<parallel>, #tpu.dimension_semantics<parallel>, #tpu.dimension_semantics<parallel>, #tpu.dimension_semantics<arbitrary>], iteration_bounds = array<i64: 4, 1, 1, 1>, scalar_prefetch = 0 : i64, scratch_operands = 1 : i64, tpu.core_type = #tpu.core_type<tc>, window_params = [{transform_indices = @transform_0, window_bounds = array<i64: 1, 128, 512>}, {transform_indices = @transform_1, window_bounds = array<i64: 1, 512, 128>}, {transform_indices = @transform_2, window_bounds = array<i64: 1, 128>}, {transform_indices = @transform_3, window_bounds = array<i64: 1, 128, 128>}, {transform_indices = @transform_4, window_bounds = array<i64: 1, 128, 128>}]} {
    %c0_i32 = arith.constant 0 : i32
    %0 = arith.cmpi eq, %arg3, %c0_i32 : i32
    %1 = arith.extui %0 : i1 to i32
    %c0_i32_0 = arith.constant 0 : i32
    %2 = arith.cmpi ne, %1, %c0_i32_0 : i32
    scf.if %2 {
      %cst_12 = arith.constant 0.000000e+00 : f32
      %14 = vector.broadcast %cst_12 : f32 to vector<128x128xf32>
      %c0_13 = arith.constant 0 : index
      %c0_14 = arith.constant 0 : index
      %15 = vector.load %arg9[%c0_13, %c0_14] : memref<128x128xf32, #tpu.memory_space<vmem>>, vector<128x128xf32>
      tpu.vector_store %arg9[%c0_13, %c0_14], %14 {strides = array<i32>} : memref<128x128xf32, #tpu.memory_space<vmem>>, vector<128x128xf32>,
    } else {
    }
    %c0 = arith.constant 0 : index
    %c0_1 = arith.constant 0 : index
    %3 = vector.load %arg9[%c0, %c0_1] : memref<128x128xf32, #tpu.memory_space<vmem>>, vector<128x128xf32>
    %c0_2 = arith.constant 0 : index
    %c0_3 = arith.constant 0 : index
    %c0_4 = arith.constant 0 : index
    %4 = vector.load %arg4[%c0_2, %c0_3, %c0_4] : memref<1x128x512xbf16, #tpu.memory_space<vmem>>, vector<1x128x512xbf16>
    %5 = vector.shape_cast %4 : vector<1x128x512xbf16> to vector<128x512xbf16>
    %c0_5 = arith.constant 0 : index
    %c0_6 = arith.constant 0 : index
    %c0_7 = arith.constant 0 : index
    %6 = vector.load %arg5[%c0_5, %c0_6, %c0_7] : memref<1x512x128xbf16, #tpu.memory_space<vmem>>, vector<1x512x128xbf16>
    %7 = vector.shape_cast %6 : vector<1x512x128xbf16> to vector<512x128xbf16>
    %cst = arith.constant dense<0.000000e+00> : vector<128x128xf32>
    %8 = tpu.matmul %5, %7, %cst {dimension_numbers = #tpu.dot_dimension_numbers<[1], [0], [0], [1], [0, 0, 1, 1], [], []>} : vector<128x512xbf16>, vector<512x128xbf16>, vector<128x128xf32> -> vector<128x128xf32>
    %9 = arith.addf %3, %8 : vector<128x128xf32>
    %c0_8 = arith.constant 0 : index
    %c0_9 = arith.constant 0 : index
    %10 = vector.load %arg9[%c0_8, %c0_9] : memref<128x128xf32, #tpu.memory_space<vmem>>, vector<128x128xf32>
    tpu.vector_store %arg9[%c0_8, %c0_9], %9 {strides = array<i32>} : memref<128x128xf32, #tpu.memory_space<vmem>>, vector<128x128xf32>,
    %c0_i32_10 = arith.constant 0 : i32
    %11 = arith.cmpi eq, %arg3, %c0_i32_10 : i32
    %12 = arith.extui %11 : i1 to i32
    %c0_i32_11 = arith.constant 0 : i32
    %13 = arith.cmpi ne, %12, %c0_i32_11 : i32
    scf.if %13 {
      %c0_12 = arith.constant 0 : index
      %c0_13 = arith.constant 0 : index
      %14 = vector.load %arg9[%c0_12, %c0_13] : memref<128x128xf32, #tpu.memory_space<vmem>>, vector<128x128xf32>
      %c0_14 = arith.constant 0 : index
      %c0_15 = arith.constant 0 : index
      %15 = vector.load %arg6[%c0_14, %c0_15] : memref<1x128xf32, #tpu.memory_space<vmem>>, vector<1x128xf32>
      %16 = vector.broadcast %15 : vector<1x128xf32> to vector<128x128xf32>
      %17 = arith.addf %14, %16 : vector<128x128xf32>
      %cst_16 = arith.constant 0.000000e+00 : f32
      %18 = vector.broadcast %cst_16 : f32 to vector<128x128xf32>
      %19 = arith.maximumf %17, %18 : vector<128x128xf32>
      %c0_17 = arith.constant 0 : index
      %c0_18 = arith.constant 0 : index
      %c0_19 = arith.constant 0 : index
      %20 = vector.load %arg7[%c0_17, %c0_18, %c0_19] : memref<1x128x128xbf16, #tpu.memory_space<vmem>>, vector<1x128x128xbf16>
      %21 = vector.shape_cast %20 : vector<1x128x128xbf16> to vector<128x128xbf16>
      %22 = arith.extf %21 : vector<128x128xbf16> to vector<128x128xf32>
      %23 = arith.addf %22, %19 : vector<128x128xf32>
      %cst_20 = arith.constant 0.000000e+00 : f32
      %24 = vector.broadcast %cst_20 : f32 to vector<128x128xf32>
      %25 = arith.maximumf %23, %24 : vector<128x128xf32>
      %26 = arith.truncf %25 : vector<128x128xf32> to vector<128x128xbf16>
      %c0_21 = arith.constant 0 : index
      %c0_22 = arith.constant 0 : index
      %c0_23 = arith.constant 0 : index
      %27 = vector.load %arg8[%c0_21, %c0_22, %c0_23] : memref<1x128x128xbf16, #tpu.memory_space<vmem>>, vector<1x128x128xbf16>
      %28 = vector.shape_cast %27 : vector<1x128x128xbf16> to vector<128x128xbf16>
      %29 = vector.shape_cast %26 : vector<128x128xbf16> to vector<1x128x128xbf16>
      tpu.vector_store %arg8[%c0_21, %c0_22, %c0_23], %29 {strides = array<i32>} : memref<1x128x128xbf16, #tpu.memory_space<vmem>>, vector<1x128x128xbf16>,
    } else {
    }
    return
  }
  func.func @transform_0(%arg0: i32, %arg1: i32, %arg2: i32, %arg3: i32) -> (i32, i32, i32) {
    %c0_i32 = arith.constant 0 : i32
    return %arg0, %arg1, %arg3 : i32, i32, i32
  }
  func.func @transform_1(%arg0: i32, %arg1: i32, %arg2: i32, %arg3: i32) -> (i32, i32, i32) {
    %c0_i32 = arith.constant 0 : i32
    return %arg0, %arg3, %arg2 : i32, i32, i32
  }
  func.func @transform_2(%arg0: i32, %arg1: i32, %arg2: i32, %arg3: i32) -> (i32, i32) {
    %c0_i32 = arith.constant 0 : i32
    %c0_i32_0 = arith.constant 0 : i32
    return %c0_i32, %arg2 : i32, i32
  }
  func.func @transform_3(%arg0: i32, %arg1: i32, %arg2: i32, %arg3: i32) -> (i32, i32, i32) {
    %c0_i32 = arith.constant 0 : i32
    return %arg0, %arg1, %arg2 : i32, i32, i32
  }
  func.func @transform_4(%arg0: i32, %arg1: i32, %arg2: i32, %arg3: i32) -> (i32, i32, i32) {
    %c0_i32 = arith.constant 0 : i32
    return %arg0, %arg1, %arg2 : i32, i32, i32
  }
}

module attributes {stable_mosaic.version = 11 : i64} {
  func.func @_mm_kernel(%arg0: i32, %arg1: i32, %arg2: i32, %arg3: memref<256x128xbf16, #tpu.memory_space<vmem>>, %arg4: memref<128x128xbf16, #tpu.memory_space<vmem>>, %arg5: memref<1x128xf32, #tpu.memory_space<vmem>>, %arg6: memref<256x128xbf16, #tpu.memory_space<vmem>>, %arg7: memref<256x128xf32, #tpu.memory_space<vmem>>) attributes {dimension_semantics = [#tpu.dimension_semantics<parallel>, #tpu.dimension_semantics<parallel>, #tpu.dimension_semantics<arbitrary>], iteration_bounds = array<i64: 2, 1, 1>, scalar_prefetch = 0 : i64, scratch_operands = 1 : i64, tpu.core_type = #tpu.core_type<tc>, window_params = [{transform_indices = @transform_0, window_bounds = array<i64: 256, 128>}, {transform_indices = @transform_1, window_bounds = array<i64: 128, 128>}, {transform_indices = @transform_2, window_bounds = array<i64: 1, 128>}, {transform_indices = @transform_3, window_bounds = array<i64: 256, 128>}]} {
    %c0_i32 = arith.constant 0 : i32
    %0 = arith.cmpi eq, %arg2, %c0_i32 : i32
    %1 = arith.extui %0 : i1 to i32
    %c0_i32_0 = arith.constant 0 : i32
    %2 = arith.cmpi ne, %1, %c0_i32_0 : i32
    scf.if %2 {
      %cst_10 = arith.constant 0.000000e+00 : f32
      %12 = vector.broadcast %cst_10 : f32 to vector<256x128xf32>
      %c0_11 = arith.constant 0 : index
      %c0_12 = arith.constant 0 : index
      %13 = vector.load %arg7[%c0_11, %c0_12] : memref<256x128xf32, #tpu.memory_space<vmem>>, vector<256x128xf32>
      tpu.vector_store %arg7[%c0_11, %c0_12], %12 {strides = array<i32>} : memref<256x128xf32, #tpu.memory_space<vmem>>, vector<256x128xf32>,
    } else {
    }
    %c0 = arith.constant 0 : index
    %c0_1 = arith.constant 0 : index
    %3 = vector.load %arg7[%c0, %c0_1] : memref<256x128xf32, #tpu.memory_space<vmem>>, vector<256x128xf32>
    %c0_2 = arith.constant 0 : index
    %c0_3 = arith.constant 0 : index
    %4 = vector.load %arg3[%c0_2, %c0_3] : memref<256x128xbf16, #tpu.memory_space<vmem>>, vector<256x128xbf16>
    %c0_4 = arith.constant 0 : index
    %c0_5 = arith.constant 0 : index
    %5 = vector.load %arg4[%c0_4, %c0_5] : memref<128x128xbf16, #tpu.memory_space<vmem>>, vector<128x128xbf16>
    %cst = arith.constant dense<0.000000e+00> : vector<256x128xf32>
    %6 = tpu.matmul %4, %5, %cst {dimension_numbers = #tpu.dot_dimension_numbers<[1], [0], [0], [1], [0, 0, 1, 1], [], []>} : vector<256x128xbf16>, vector<128x128xbf16>, vector<256x128xf32> -> vector<256x128xf32>
    %7 = arith.addf %3, %6 : vector<256x128xf32>
    %c0_6 = arith.constant 0 : index
    %c0_7 = arith.constant 0 : index
    %8 = vector.load %arg7[%c0_6, %c0_7] : memref<256x128xf32, #tpu.memory_space<vmem>>, vector<256x128xf32>
    tpu.vector_store %arg7[%c0_6, %c0_7], %7 {strides = array<i32>} : memref<256x128xf32, #tpu.memory_space<vmem>>, vector<256x128xf32>,
    %c0_i32_8 = arith.constant 0 : i32
    %9 = arith.cmpi eq, %arg2, %c0_i32_8 : i32
    %10 = arith.extui %9 : i1 to i32
    %c0_i32_9 = arith.constant 0 : i32
    %11 = arith.cmpi ne, %10, %c0_i32_9 : i32
    scf.if %11 {
      %c0_10 = arith.constant 0 : index
      %c0_11 = arith.constant 0 : index
      %12 = vector.load %arg7[%c0_10, %c0_11] : memref<256x128xf32, #tpu.memory_space<vmem>>, vector<256x128xf32>
      %c0_12 = arith.constant 0 : index
      %c0_13 = arith.constant 0 : index
      %13 = vector.load %arg5[%c0_12, %c0_13] : memref<1x128xf32, #tpu.memory_space<vmem>>, vector<1x128xf32>
      %14 = vector.broadcast %13 : vector<1x128xf32> to vector<256x128xf32>
      %15 = arith.addf %12, %14 : vector<256x128xf32>
      %16 = arith.truncf %15 : vector<256x128xf32> to vector<256x128xbf16>
      %c0_14 = arith.constant 0 : index
      %c0_15 = arith.constant 0 : index
      %17 = vector.load %arg6[%c0_14, %c0_15] : memref<256x128xbf16, #tpu.memory_space<vmem>>, vector<256x128xbf16>
      tpu.vector_store %arg6[%c0_14, %c0_15], %16 {strides = array<i32>} : memref<256x128xbf16, #tpu.memory_space<vmem>>, vector<256x128xbf16>,
    } else {
    }
    return
  }
  func.func @transform_0(%arg0: i32, %arg1: i32, %arg2: i32) -> (i32, i32) {
    %c0_i32 = arith.constant 0 : i32
    return %arg0, %arg2 : i32, i32
  }
  func.func @transform_1(%arg0: i32, %arg1: i32, %arg2: i32) -> (i32, i32) {
    %c0_i32 = arith.constant 0 : i32
    return %arg2, %arg1 : i32, i32
  }
  func.func @transform_2(%arg0: i32, %arg1: i32, %arg2: i32) -> (i32, i32) {
    %c0_i32 = arith.constant 0 : i32
    %c0_i32_0 = arith.constant 0 : i32
    return %c0_i32, %arg1 : i32, i32
  }
  func.func @transform_3(%arg0: i32, %arg1: i32, %arg2: i32) -> (i32, i32) {
    %c0_i32 = arith.constant 0 : i32
    return %arg0, %arg1 : i32, i32
  }
}

module attributes {stable_mosaic.version = 11 : i64} {
  func.func @_mm_phase_kernel(%arg0: i32, %arg1: i32, %arg2: i32, %arg3: i32, %arg4: memref<1x128x512xbf16, #tpu.memory_space<vmem>>, %arg5: memref<1x512x128xbf16, #tpu.memory_space<vmem>>, %arg6: memref<1x128xf32, #tpu.memory_space<vmem>>, %arg7: memref<1x128x128xbf16, #tpu.memory_space<vmem>>, %arg8: memref<1x128x128xf32, #tpu.memory_space<vmem>>, %arg9: memref<128x128xf32, #tpu.memory_space<vmem>>) attributes {dimension_semantics = [#tpu.dimension_semantics<parallel>, #tpu.dimension_semantics<parallel>, #tpu.dimension_semantics<parallel>, #tpu.dimension_semantics<arbitrary>], iteration_bounds = array<i64: 4, 1, 1, 1>, scalar_prefetch = 0 : i64, scratch_operands = 1 : i64, tpu.core_type = #tpu.core_type<tc>, window_params = [{transform_indices = @transform_0, window_bounds = array<i64: 1, 128, 512>}, {transform_indices = @transform_1, window_bounds = array<i64: 1, 512, 128>}, {transform_indices = @transform_2, window_bounds = array<i64: 1, 128>}, {transform_indices = @transform_3, window_bounds = array<i64: 1, 128, 128>}, {transform_indices = @transform_4, window_bounds = array<i64: 1, 128, 128>}]} {
    %c0_i32 = arith.constant 0 : i32
    %0 = arith.cmpi eq, %arg3, %c0_i32 : i32
    %1 = arith.extui %0 : i1 to i32
    %c0_i32_0 = arith.constant 0 : i32
    %2 = arith.cmpi ne, %1, %c0_i32_0 : i32
    scf.if %2 {
      %cst_12 = arith.constant 0.000000e+00 : f32
      %14 = vector.broadcast %cst_12 : f32 to vector<128x128xf32>
      %c0_13 = arith.constant 0 : index
      %c0_14 = arith.constant 0 : index
      %15 = vector.load %arg9[%c0_13, %c0_14] : memref<128x128xf32, #tpu.memory_space<vmem>>, vector<128x128xf32>
      tpu.vector_store %arg9[%c0_13, %c0_14], %14 {strides = array<i32>} : memref<128x128xf32, #tpu.memory_space<vmem>>, vector<128x128xf32>,
    } else {
    }
    %c0 = arith.constant 0 : index
    %c0_1 = arith.constant 0 : index
    %3 = vector.load %arg9[%c0, %c0_1] : memref<128x128xf32, #tpu.memory_space<vmem>>, vector<128x128xf32>
    %c0_2 = arith.constant 0 : index
    %c0_3 = arith.constant 0 : index
    %c0_4 = arith.constant 0 : index
    %4 = vector.load %arg4[%c0_2, %c0_3, %c0_4] : memref<1x128x512xbf16, #tpu.memory_space<vmem>>, vector<1x128x512xbf16>
    %5 = vector.shape_cast %4 : vector<1x128x512xbf16> to vector<128x512xbf16>
    %c0_5 = arith.constant 0 : index
    %c0_6 = arith.constant 0 : index
    %c0_7 = arith.constant 0 : index
    %6 = vector.load %arg5[%c0_5, %c0_6, %c0_7] : memref<1x512x128xbf16, #tpu.memory_space<vmem>>, vector<1x512x128xbf16>
    %7 = vector.shape_cast %6 : vector<1x512x128xbf16> to vector<512x128xbf16>
    %cst = arith.constant dense<0.000000e+00> : vector<128x128xf32>
    %8 = tpu.matmul %5, %7, %cst {dimension_numbers = #tpu.dot_dimension_numbers<[1], [0], [0], [1], [0, 0, 1, 1], [], []>} : vector<128x512xbf16>, vector<512x128xbf16>, vector<128x128xf32> -> vector<128x128xf32>
    %9 = arith.addf %3, %8 : vector<128x128xf32>
    %c0_8 = arith.constant 0 : index
    %c0_9 = arith.constant 0 : index
    %10 = vector.load %arg9[%c0_8, %c0_9] : memref<128x128xf32, #tpu.memory_space<vmem>>, vector<128x128xf32>
    tpu.vector_store %arg9[%c0_8, %c0_9], %9 {strides = array<i32>} : memref<128x128xf32, #tpu.memory_space<vmem>>, vector<128x128xf32>,
    %c0_i32_10 = arith.constant 0 : i32
    %11 = arith.cmpi eq, %arg3, %c0_i32_10 : i32
    %12 = arith.extui %11 : i1 to i32
    %c0_i32_11 = arith.constant 0 : i32
    %13 = arith.cmpi ne, %12, %c0_i32_11 : i32
    scf.if %13 {
      %c0_12 = arith.constant 0 : index
      %c0_13 = arith.constant 0 : index
      %14 = vector.load %arg9[%c0_12, %c0_13] : memref<128x128xf32, #tpu.memory_space<vmem>>, vector<128x128xf32>
      %c0_14 = arith.constant 0 : index
      %c0_15 = arith.constant 0 : index
      %15 = vector.load %arg6[%c0_14, %c0_15] : memref<1x128xf32, #tpu.memory_space<vmem>>, vector<1x128xf32>
      %16 = vector.broadcast %15 : vector<1x128xf32> to vector<128x128xf32>
      %17 = arith.addf %14, %16 : vector<128x128xf32>
      %cst_16 = arith.constant 0.000000e+00 : f32
      %18 = vector.broadcast %cst_16 : f32 to vector<128x128xf32>
      %19 = arith.maximumf %17, %18 : vector<128x128xf32>
      %c0_17 = arith.constant 0 : index
      %c0_18 = arith.constant 0 : index
      %c0_19 = arith.constant 0 : index
      %20 = vector.load %arg7[%c0_17, %c0_18, %c0_19] : memref<1x128x128xbf16, #tpu.memory_space<vmem>>, vector<1x128x128xbf16>
      %21 = vector.shape_cast %20 : vector<1x128x128xbf16> to vector<128x128xbf16>
      %22 = arith.extf %21 : vector<128x128xbf16> to vector<128x128xf32>
      %23 = arith.mulf %22, %19 : vector<128x128xf32>
      %cst_20 = arith.constant 0.000000e+00 : f32
      %24 = vector.broadcast %cst_20 : f32 to vector<128x128xf32>
      %25 = arith.maximumf %23, %24 : vector<128x128xf32>
      %c0_21 = arith.constant 0 : index
      %c0_22 = arith.constant 0 : index
      %c0_23 = arith.constant 0 : index
      %26 = vector.load %arg8[%c0_21, %c0_22, %c0_23] : memref<1x128x128xf32, #tpu.memory_space<vmem>>, vector<1x128x128xf32>
      %27 = vector.shape_cast %26 : vector<1x128x128xf32> to vector<128x128xf32>
      %28 = vector.shape_cast %25 : vector<128x128xf32> to vector<1x128x128xf32>
      tpu.vector_store %arg8[%c0_21, %c0_22, %c0_23], %28 {strides = array<i32>} : memref<1x128x128xf32, #tpu.memory_space<vmem>>, vector<1x128x128xf32>,
    } else {
    }
    return
  }
  func.func @transform_0(%arg0: i32, %arg1: i32, %arg2: i32, %arg3: i32) -> (i32, i32, i32) {
    %c0_i32 = arith.constant 0 : i32
    return %arg0, %arg1, %arg3 : i32, i32, i32
  }
  func.func @transform_1(%arg0: i32, %arg1: i32, %arg2: i32, %arg3: i32) -> (i32, i32, i32) {
    %c0_i32 = arith.constant 0 : i32
    return %arg0, %arg3, %arg2 : i32, i32, i32
  }
  func.func @transform_2(%arg0: i32, %arg1: i32, %arg2: i32, %arg3: i32) -> (i32, i32) {
    %c0_i32 = arith.constant 0 : i32
    %c0_i32_0 = arith.constant 0 : i32
    return %c0_i32, %arg2 : i32, i32
  }
  func.func @transform_3(%arg0: i32, %arg1: i32, %arg2: i32, %arg3: i32) -> (i32, i32, i32) {
    %c0_i32 = arith.constant 0 : i32
    return %arg0, %arg1, %arg2 : i32, i32, i32
  }
  func.func @transform_4(%arg0: i32, %arg1: i32, %arg2: i32, %arg3: i32) -> (i32, i32, i32) {
    %c0_i32 = arith.constant 0 : i32
    return %arg0, %arg1, %arg2 : i32, i32, i32
  }
}

</mosaic_0001>

<bundles_post_ra>
// kernel: fpm_forward.11
= control target key start
LH: loop header
LB: loop body
LE: loop exit
PB: predicated region body
PF: predicated region fallthrough
CT: control target
= control target key end

     0   :  { %s2637_s12 = smov 0   ;;  %s2639_s13 = smov 0   ;;  %s3036_s0 = inlined_call_operand.vmem [shape: bf16[128,6272], index: 0, kind: input, shape index: {}]   ;;  %s3037_s1 = inlined_call_operand.vmem [shape: bf16[6272,128], index: 1, kind: input, shape index: {}]   ;;  %s3038_s2 = inlined_call_operand.vmem [shape: f32[1,128], index: 2, kind: input, shape index: {}]   ;;  %s3039_s3 = inlined_call_operand.vmem [shape: bf16[128,128], index: 3, kind: output, shape index: {}]  }
   0x1   :  { %s2641_s14 = smov 0   ;;  %s2643_s15 = smov 0  }
   0x2   :  { %s2645_s16 = smov 0  }
   0x3 LB: > { %s25_s17 = sadd.s32 1, %s2610_s15  ;;  %p48_p1 = scmp.ne.s32.totalorder %s2602_s13, %s2598_s12  ;;  %s2614_s16 = sphi %s2645_s16, %s13_s16   ;;  %s2610_s15 = sphi %s2643_s15, %s3043_s15   ;;  %s2606_s14 = sphi %s2641_s14, %s3042_s14   ;;  %s2602_s13 = sphi %s2639_s13, %s3041_s13   ;;  %s2598_s12 = sphi %s2637_s12, %s3040_s12  }
   0x4   : > { %p26_p0 = scmp.ge.s32.totalorder %s25_s17, 7  ;;  %p49_p2 = scmp.eq.s32.totalorder %s2614_s16, 0 }
   0x5   : > { %s41_s19 = sadd.s32 1, %s2602_s13  ;;  %p1922_p5 = scmp.ge.s32.totalorder %s2614_s16, 7 }
   0x6   : > { %s3045_s17 = smov (%p26_p0, %s25_s17), 0  ;;  %p50_p3 = por %p49_p2, %p48_p1 }
   0x7   : > { %s37_s18 = ssub.s32 %s2610_s15, %s3045_s17  ;;  %162 = sbr.rel (%p1922_p5) target bundleno = 53 (0x35), region = 20 }
   0x8   : > { %p39_p4 = scmp.eq.s32.totalorder %s37_s18, 0 }
   0xa   : > { %s2672_s20 = scalar_select %p39_p4, %s2602_s13, %s41_s19  }
   0xe   : > { %165 = sbr.rel (!%p50_p3) target bundleno = 53 (0x35), region = 24  ;;  %s167_s21 = sand.u32 (%p50_p3), 1, %s2602_s13  }
   0xf   : > { %s2093_s22 = smul.u32 (%p50_p3), 28, %s2610_s15 }
  0x10   : > { %s2397_s23 = smul.u32 (%p50_p3), 448, %s167_s21 }
  0x11   : > { %s2680_s26 = scalar_lea.vmem (%p50_p3), %s3036_s0, %s2093_s22 }
  0x12   : > { %v190_v0 = vld [vmem:[%s2680_s26] sm:$0xff] (%p50_p3)  ;;  %v192_v1 = vld [vmem:[%s2680_s26 + $0x8] sm:$0xff] (%p50_p3)  ;;  %v194_v2 = vld [vmem:[%s2680_s26 + $0x10] sm:$0xff] (%p50_p3)  ;;  %s2685_s27 = scalar_lea.vmem (%p50_p3), [#allocation3], %s2397_s23 }
  0x13   : > { %191 = vst [vmem:[%s2685_s27] sm:$0xff] (%p50_p3), %v190_v0  ;;  %193 = vst [vmem:[%s2685_s27 + $0x8] sm:$0xff] (%p50_p3), %v192_v1  ;;  %v196_v3 = vld [vmem:[%s2680_s26 + $0xc4] sm:$0xff] (%p50_p3)  ;;  %v198_v4 = vld [vmem:[%s2680_s26 + $0xcc] sm:$0xff] (%p50_p3) }
  0x14   : > { %195 = vst [vmem:[%s2685_s27 + $0x10] sm:$0xff] (%p50_p3), %v194_v2  ;;  %v200_v5 = vld [vmem:[%s2680_s26 + $0xd4] sm:$0xff] (%p50_p3)  ;;  %197 = vst [vmem:[%s2685_s27 + $0x1c] sm:$0xff] (%p50_p3), %v196_v3  ;;  %v202_v6 = vld [vmem:[%s2680_s26 + $0x188] sm:$0xff] (%p50_p3) }
  0x15   : > { %199 = vst [vmem:[%s2685_s27 + $0x24] sm:$0xff] %v198_v4  ;;  %201 = vst [vmem:[%s2685_s27 + $0x2c] sm:$0xff] %v200_v5  ;;  %v204_v7 = vld [vmem:[%s2680_s26 + $0x190] sm:$0xff]  ;;  %v206_v8 = vld [vmem:[%s2680_s26 + $0x198] sm:$0xff] }
  0x16   : > { %203 = vst [vmem:[%s2685_s27 + $0x38] sm:$0xff] %v202_v6  ;;  %205 = vst [vmem:[%s2685_s27 + $0x40] sm:$0xff] %v204_v7  ;;  %v208_v9 = vld [vmem:[%s2680_s26 + $0x24c] sm:$0xff]  ;;  %v210_v10 = vld [vmem:[%s2680_s26 + $0x254] sm:$0xff] }
  0x17   : > { %207 = vst [vmem:[%s2685_s27 + $0x48] sm:$0xff] %v206_v8  ;;  %v212_v11 = vld [vmem:[%s2680_s26 + $0x25c] sm:$0xff]  ;;  %209 = vst [vmem:[%s2685_s27 + $0x54] sm:$0xff] %v208_v9  ;;  %v214_v12 = vld [vmem:[%s2680_s26 + $0x310] sm:$0xff] }
  0x18   : > { %211 = vst [vmem:[%s2685_s27 + $0x5c] sm:$0xff] %v210_v10  ;;  %213 = vst [vmem:[%s2685_s27 + $0x64] sm:$0xff] %v212_v11  ;;  %v216_v13 = vld [vmem:[%s2680_s26 + $0x318] sm:$0xff]  ;;  %v218_v14 = vld [vmem:[%s2680_s26 + $0x320] sm:$0xff] }
  0x19   : > { %215 = vst [vmem:[%s2685_s27 + $0x70] sm:$0xff] %v214_v12  ;;  %217 = vst [vmem:[%s2685_s27 + $0x78] sm:$0xff] %v216_v13  ;;  %v220_v15 = vld [vmem:[%s2680_s26 + $0x3d4] sm:$0xff]  ;;  %v222_v16 = vld [vmem:[%s2680_s26 + $0x3dc] sm:$0xff] }
  0x1a   : > { %219 = vst [vmem:[%s2685_s27 + $0x80] sm:$0xff] %v218_v14  ;;  %v224_v17 = vld [vmem:[%s2680_s26 + $0x3e4] sm:$0xff]  ;;  %221 = vst [vmem:[%s2685_s27 + $0x8c] sm:$0xff] %v220_v15  ;;  %v226_v18 = vld [vmem:[%s2680_s26 + $0x498] sm:$0xff] }
  0x1b   : > { %223 = vst [vmem:[%s2685_s27 + $0x94] sm:$0xff] %v222_v16  ;;  %225 = vst [vmem:[%s2685_s27 + $0x9c] sm:$0xff] %v224_v17  ;;  %v228_v19 = vld [vmem:[%s2680_s26 + $0x4a0] sm:$0xff]  ;;  %v230_v20 = vld [vmem:[%s2680_s26 + $0x4a8] sm:$0xff] }
  0x1c   : > { %227 = vst [vmem:[%s2685_s27 + $0xa8] sm:$0xff] %v226_v18  ;;  %229 = vst [vmem:[%s2685_s27 + $0xb0] sm:$0xff] %v228_v19  ;;  %v232_v21 = vld [vmem:[%s2680_s26 + $0x55c] sm:$0xff]  ;;  %v234_v22 = vld [vmem:[%s2680_s26 + $0x564] sm:$0xff] }
  0x1d   : > { %231 = vst [vmem:[%s2685_s27 + $0xb8] sm:$0xff] %v230_v20  ;;  %v236_v23 = vld [vmem:[%s2680_s26 + $0x56c] sm:$0xff]  ;;  %233 = vst [vmem:[%s2685_s27 + $0xc4] sm:$0xff] %v232_v21  ;;  %v238_v24 = vld [vmem:[%s2680_s26 + $0x620] sm:$0xff] }
  0x1e   : > { %235 = vst [vmem:[%s2685_s27 + $0xcc] sm:$0xff] %v234_v22  ;;  %237 = vst [vmem:[%s2685_s27 + $0xd4] sm:$0xff] %v236_v23  ;;  %v240_v25 = vld [vmem:[%s2680_s26 + $0x628] sm:$0xff]  ;;  %v242_v26 = vld [vmem:[%s2680_s26 + $0x630] sm:$0xff] }
  0x1f   : > { %239 = vst [vmem:[%s2685_s27 + $0xe0] sm:$0xff] %v238_v24  ;;  %241 = vst [vmem:[%s2685_s27 + $0xe8] sm:$0xff] %v240_v25  ;;  %v244_v27 = vld [vmem:[%s2680_s26 + $0x6e4] sm:$0xff]  ;;  %v246_v28 = vld [vmem:[%s2680_s26 + $0x6ec] sm:$0xff] }
  0x20   : > { %243 = vst [vmem:[%s2685_s27 + $0xf0] sm:$0xff] %v242_v26  ;;  %v248_v29 = vld [vmem:[%s2680_s26 + $0x6f4] sm:$0xff]  ;;  %245 = vst [vmem:[%s2685_s27 + $0xfc] sm:$0xff] %v244_v27  ;;  %v250_v30 = vld [vmem:[%s2680_s26 + $0x7a8] sm:$0xff] }
  0x21   : > { %247 = vst [vmem:[%s2685_s27 + $0x104] sm:$0xff] %v246_v28  ;;  %249 = vst [vmem:[%s2685_s27 + $0x10c] sm:$0xff] %v248_v29  ;;  %v252_v31 = vld [vmem:[%s2680_s26 + $0x7b0] sm:$0xff]  ;;  %v254_v32 = vld [vmem:[%s2680_s26 + $0x7b8] sm:$0xff] }
  0x22   : > { %251 = vst [vmem:[%s2685_s27 + $0x118] sm:$0xff] %v250_v30  ;;  %253 = vst [vmem:[%s2685_s27 + $0x120] sm:$0xff] %v252_v31  ;;  %v256_v33 = vld [vmem:[%s2680_s26 + $0x86c] sm:$0xff]  ;;  %v258_v34 = vld [vmem:[%s2680_s26 + $0x874] sm:$0xff] }
  0x23   : > { %255 = vst [vmem:[%s2685_s27 + $0x128] sm:$0xff] %v254_v32  ;;  %v260_v35 = vld [vmem:[%s2680_s26 + $0x87c] sm:$0xff]  ;;  %257 = vst [vmem:[%s2685_s27 + $0x134] sm:$0xff] %v256_v33  ;;  %v262_v36 = vld [vmem:[%s2680_s26 + $0x930] sm:$0xff] }
  0x24   : > { %259 = vst [vmem:[%s2685_s27 + $0x13c] sm:$0xff] %v258_v34  ;;  %261 = vst [vmem:[%s2685_s27 + $0x144] sm:$0xff] %v260_v35  ;;  %v264_v37 = vld [vmem:[%s2680_s26 + $0x938] sm:$0xff]  ;;  %v266_v38 = vld [vmem:[%s2680_s26 + $0x940] sm:$0xff] }
  0x25   : > { %263 = vst [vmem:[%s2685_s27 + $0x150] sm:$0xff] %v262_v36  ;;  %265 = vst [vmem:[%s2685_s27 + $0x158] sm:$0xff] %v264_v37  ;;  %v268_v39 = vld [vmem:[%s2680_s26 + $0x9f4] sm:$0xff]  ;;  %v270_v40 = vld [vmem:[%s2680_s26 + $0x9fc] sm:$0xff] }
  0x26   : > { %267 = vst [vmem:[%s2685_s27 + $0x160] sm:$0xff] %v266_v38  ;;  %v272_v41 = vld [vmem:[%s2680_s26 + $0xa04] sm:$0xff]  ;;  %269 = vst [vmem:[%s2685_s27 + $0x16c] sm:$0xff] %v268_v39  ;;  %v274_v42 = vld [vmem:[%s2680_s26 + $0xab8] sm:$0xff] }
  0x27   : > { %271 = vst [vmem:[%s2685_s27 + $0x174] sm:$0xff] %v270_v40  ;;  %273 = vst [vmem:[%s2685_s27 + $0x17c] sm:$0xff] %v272_v41  ;;  %v276_v43 = vld [vmem:[%s2680_s26 + $0xac0] sm:$0xff]  ;;  %v278_v44 = vld [vmem:[%s2680_s26 + $0xac8] sm:$0xff] }
  0x28   : > { %275 = vst [vmem:[%s2685_s27 + $0x188] sm:$0xff] %v274_v42  ;;  %277 = vst [vmem:[%s2685_s27 + $0x190] sm:$0xff] %v276_v43  ;;  %v280_v45 = vld [vmem:[%s2680_s26 + $0xb7c] sm:$0xff]  ;;  %v282_v46 = vld [vmem:[%s2680_s26 + $0xb84] sm:$0xff] }
  0x29   : > { %279 = vst [vmem:[%s2685_s27 + $0x198] sm:$0xff] %v278_v44  ;;  %v284_v47 = vld [vmem:[%s2680_s26 + $0xb8c] sm:$0xff]  ;;  %281 = vst [vmem:[%s2685_s27 + $0x1a4] sm:$0xff] %v280_v45  ;;  %v1924_v48 = vld [vmem:[%s2680_s26 + $0x18] sm:$0xf] }
  0x2a   : > { %283 = vst [vmem:[%s2685_s27 + $0x1ac] sm:$0xff] %v282_v46  ;;  %285 = vst [vmem:[%s2685_s27 + $0x1b4] sm:$0xff] %v284_v47  ;;  %v1926_v49 = vld [vmem:[%s2680_s26 + $0xdc] sm:$0xf]  ;;  %v1928_v50 = vld [vmem:[%s2680_s26 + $0x1a0] sm:$0xf] }
  0x2b   : > { %1925 = vst [vmem:[%s2685_s27 + $0x18] sm:$0xf] %v1924_v48  ;;  %1927 = vst [vmem:[%s2685_s27 + $0x34] sm:$0xf] %v1926_v49  ;;  %v1930_v51 = vld [vmem:[%s2680_s26 + $0x264] sm:$0xf] }
  0x2c   : > { %1929 = vst [vmem:[%s2685_s27 + $0x50] sm:$0xf] %v1928_v50  ;;  %v1932_v52 = vld [vmem:[%s2680_s26 + $0x328] sm:$0xf]  ;;  %v1934_v53 = vld [vmem:[%s2680_s26 + $0x3ec] sm:$0xf] }
  0x2d   : > { %1931 = vst [vmem:[%s2685_s27 + $0x6c] sm:$0xf] %v1930_v51  ;;  %1933 = vst [vmem:[%s2685_s27 + $0x88] sm:$0xf] %v1932_v52  ;;  %v1936_v54 = vld [vmem:[%s2680_s26 + $0x4b0] sm:$0xf] }
  0x2e   : > { %1935 = vst [vmem:[%s2685_s27 + $0xa4] sm:$0xf] %v1934_v53  ;;  %v1938_v55 = vld [vmem:[%s2680_s26 + $0x574] sm:$0xf]  ;;  %v1940_v56 = vld [vmem:[%s2680_s26 + $0x638] sm:$0xf] }
  0x2f   : > { %1937 = vst [vmem:[%s2685_s27 + $0xc0] sm:$0xf] %v1936_v54  ;;  %1939 = vst [vmem:[%s2685_s27 + $0xdc] sm:$0xf] %v1938_v55  ;;  %v1942_v57 = vld [vmem:[%s2680_s26 + $0x6fc] sm:$0xf] }
  0x30   : > { %1941 = vst [vmem:[%s2685_s27 + $0xf8] sm:$0xf] %v1940_v56  ;;  %v1944_v58 = vld [vmem:[%s2680_s26 + $0x7c0] sm:$0xf]  ;;  %v1946_v59 = vld [vmem:[%s2680_s26 + $0x884] sm:$0xf] }
  0x31   : > { %1943 = vst [vmem:[%s2685_s27 + $0x114] sm:$0xf] %v1942_v57  ;;  %1945 = vst [vmem:[%s2685_s27 + $0x130] sm:$0xf] %v1944_v58  ;;  %v1948_v60 = vld [vmem:[%s2680_s26 + $0x948] sm:$0xf] }
  0x32   : > { %1947 = vst [vmem:[%s2685_s27 + $0x14c] sm:$0xf] %v1946_v59  ;;  %v1950_v61 = vld [vmem:[%s2680_s26 + $0xa0c] sm:$0xf]  ;;  %v1952_v62 = vld [vmem:[%s2680_s26 + $0xad0] sm:$0xf] }
  0x33   : > { %1949 = vst [vmem:[%s2685_s27 + $0x168] sm:$0xf] %v1948_v60  ;;  %1951 = vst [vmem:[%s2685_s27 + $0x184] sm:$0xf] %v1950_v61  ;;  %v1954_v63 = vld [vmem:[%s2680_s26 + $0xb94] sm:$0xf] }
  0x34   : > { %1953 = vst [vmem:[%s2685_s27 + $0x1a0] sm:$0xf] %v1952_v62  ;;  %1955 = vst [vmem:[%s2685_s27 + $0x1bc] sm:$0xf] %v1954_v63 }
  0x35 PF: > { %p1956_p6 = scmp.ge.s32.totalorder %s2614_s16, 1  ;;  %p341_p7 = scmp.lt.s32.totalorder %s2614_s16, 8 }
  0x37   : > { %p342_p8 = pnand %p1956_p6, %p341_p7 }
  0x38   : > { %s348_s28 = sand.u32 (!%p342_p8), 1, %s2598_s12   ;;  %s387_s29 = smul.u32 (!%p342_p8), 112, %s2606_s14 }
  0x39   : > { %345 = sbr.rel (%p342_p8) target bundleno = 466 (0x1d2), region = 54  ;;  %p1958_p10 = scmp.ne.s32.totalorder (!%p342_p8), %s2606_s14, 0 }
  0x3a   : > { %s2398_s30 = smul.u32 (!%p342_p8), 448, %s348_s28  ;;  %p388_p9 = scmp.lt.s32.totalorder (!%p342_p8), %s387_s29, 783 }
  0x3c   : > { %s2821_s8 = scalar_lea.vmem (!%p342_p8), [#allocation3], %s2398_s30 }
  0x40   : > { %s3047_s29 = smov (!%p388_p9, %s387_s29), 783  ;;  %412 = sbr.rel (%p1958_p10) target bundleno = 74 (0x4a), region = 62 }
  0x41   : > { %s1957_s4 = sshll.u32 %s3047_s29, 2  ;;  %v2616_v0 = vmov (!%p1958_p10), 0.0  }
  0x42   : > { %s2819_s7 = scalar_lea.vmem %s3037_s1, %s1957_s4  ;;  %413 = vst [vmem:[#allocation2] sm:$0xff] (!%p1958_p10), %v2616_v0  ;;  %414 = vst [vmem:[#allocation2 + $0x8] sm:$0xff] (!%p1958_p10), %v2616_v0 }
  0x43   : > { %415 = vst [vmem:[#allocation2 + $0x10] sm:$0xff] (!%p1958_p10), %v2616_v0  ;;  %416 = vst [vmem:[#allocation2 + $0x18] sm:$0xff] (!%p1958_p10), %v2616_v0 }
  0x44   : > { %417 = vst [vmem:[#allocation2 + $0x20] sm:$0xff] (!%p1958_p10), %v2616_v0  ;;  %418 = vst [vmem:[#allocation2 + $0x28] sm:$0xff] (!%p1958_p10), %v2616_v0 }
  0x45   : > { %419 = vst [vmem:[#allocation2 + $0x30] sm:$0xff] (!%p1958_p10), %v2616_v0  ;;  %420 = vst [vmem:[#allocation2 + $0x38] sm:$0xff] (!%p1958_p10), %v2616_v0 }
  0x46   : > { %421 = vst [vmem:[#allocation2 + $0x40] sm:$0xff] (!%p1958_p10), %v2616_v0  ;;  %422 = vst [vmem:[#allocation2 + $0x48] sm:$0xff] (!%p1958_p10), %v2616_v0 }
  0x47   : > { %423 = vst [vmem:[#allocation2 + $0x50] sm:$0xff] %v2616_v0  ;;  %424 = vst [vmem:[#allocation2 + $0x58] sm:$0xff] %v2616_v0 }
  0x48   : > { %425 = vst [vmem:[#allocation2 + $0x60] sm:$0xff] %v2616_v0  ;;  %426 = vst [vmem:[#allocation2 + $0x68] sm:$0xff] %v2616_v0 }
  0x49   : > { %427 = vst [vmem:[#allocation2 + $0x70] sm:$0xff] %v2616_v0  ;;  %428 = vst [vmem:[#allocation2 + $0x78] sm:$0xff] %v2616_v0 }
  0x4a PF: > { %v2440_v1 = vld [vmem:[%s2819_s7 + $0x40] sm:$0xff]   ;;  %v2444_v5 = vld [vmem:[%s2819_s7 + $0x48] sm:$0xff]   ;;  %v2448_v9 = vld [vmem:[%s2819_s7 + $0x50] sm:$0xff]   ;;  %p2071_p11 = scmp.ne.s32.totalorder %s2606_s14, 6 }
  0x4b   : > { %v2441_v2 = vld [vmem:[%s2819_s7 + $0xc0] sm:$0xff]   ;;  %2157 = vmatprep.subr.bf16.mxu0 %v2440_v1  ;;  %v2445_v6 = vld [vmem:[%s2819_s7 + $0xc8] sm:$0xff]   ;;  %v2449_v10 = vld [vmem:[%s2819_s7 + $0xd0] sm:$0xff]  }
  0x4c   : > { %v2442_v3 = vld [vmem:[%s2819_s7] sm:$0xff]   ;;  %2221 = vmatprep.subr.bf16.mxu1 %v2441_v2  ;;  %v2446_v7 = vld [vmem:[%s2819_s7 + $0x8] sm:$0xff]   ;;  %v2450_v11 = vld [vmem:[%s2819_s7 + $0x10] sm:$0xff]  }
  0x4d   : > { %v2443_v4 = vld [vmem:[%s2819_s7 + $0x80] sm:$0xff]   ;;  %2158 = vmatpush3.bf16.msra.mxu0 %v2442_v3  ;;  %v2447_v8 = vld [vmem:[%s2819_s7 + $0x88] sm:$0xff]   ;;  %v2451_v12 = vld [vmem:[%s2819_s7 + $0x90] sm:$0xff]  }
  0x4e   : > { %2222 = vmatpush3.bf16.msra.mxu1 %v2443_v4  ;;  %2159 = vmatprep.subr.bf16.mxu0 %v2444_v5  ;;  %v2452_v13 = vld [vmem:[%s2819_s7 + $0x58] sm:$0xff]   ;;  %v2456_v17 = vld [vmem:[%s2819_s7 + $0x60] sm:$0xff]   ;;  %v2460_v21 = vld [vmem:[%s2819_s7 + $0x68] sm:$0xff]  }
  0x4f   : > { %2223 = vmatprep.subr.bf16.mxu1 %v2445_v6  ;;  %v2453_v14 = vld [vmem:[%s2819_s7 + $0xd8] sm:$0xff]   ;;  %v2457_v18 = vld [vmem:[%s2819_s7 + $0xe0] sm:$0xff]   ;;  %v2461_v22 = vld [vmem:[%s2819_s7 + $0xe8] sm:$0xff]  }
  0x50   : > { %v2454_v15 = vld [vmem:[%s2819_s7 + $0x18] sm:$0xff]   ;;  %v2458_v19 = vld [vmem:[%s2819_s7 + $0x20] sm:$0xff]   ;;  %v2462_v23 = vld [vmem:[%s2819_s7 + $0x28] sm:$0xff]  }
  0x51   : > { %2160 = vmatpush3.bf16.msra.mxu0 %v2446_v7  ;;  %v2455_v16 = vld [vmem:[%s2819_s7 + $0x98] sm:$0xff]   ;;  %v2459_v20 = vld [vmem:[%s2819_s7 + $0xa0] sm:$0xff]   ;;  %v2463_v24 = vld [vmem:[%s2819_s7 + $0xa8] sm:$0xff]  }
  0x52   : > { %2224 = vmatpush3.bf16.msra.mxu1 %v2447_v8  ;;  %2161 = vmatprep.subr.bf16.mxu0 %v2448_v9  ;;  %v2464_v25 = vld [vmem:[%s2819_s7 + $0x70] sm:$0xff]   ;;  %v2468_v29 = vld [vmem:[%s2819_s7 + $0x78] sm:$0xff]   ;;  %v2474_v34 = vld [vmem:[%s2821_s8 + $0x4] ss:$28 sps:$4 sm:$0xff]  }
  0x53   : > { %2225 = vmatprep.subr.bf16.mxu1 %v2449_v10  ;;  %v2465_v26 = vld [vmem:[%s2819_s7 + $0xf0] sm:$0xff]   ;;  %v2469_v30 = vld [vmem:[%s2819_s7 + $0xf8] sm:$0xff]   ;;  %v2475_v35 = vld [vmem:[%s2821_s8 + $0x8] ss:$28 sps:$4 sm:$0xff]   ;;  %1277 = vmatprep.mubr.bf16.mxu0 %v2474_v34 }
  0x54   : > { %v2466_v27 = vld [vmem:[%s2819_s7 + $0x30] sm:$0xff]   ;;  %v2470_v31 = vld [vmem:[%s2819_s7 + $0x38] sm:$0xff]   ;;  %v2477_v36 = vld [vmem:[%s2821_s8 + $0xc] ss:$28 sps:$4 sm:$0xff]  }
  0x55   : > { %2162 = vmatpush3.bf16.msra.mxu0 %v2450_v11  ;;  %v2467_v28 = vld [vmem:[%s2819_s7 + $0xb0] sm:$0xff]   ;;  %v2471_v32 = vld [vmem:[%s2819_s7 + $0xb8] sm:$0xff]   ;;  %v2478_v37 = vld [vmem:[%s2819_s7 + $0x140] sm:$0xff]   ;;  %1374 = vmatprep.mubr.bf16.mxu1 %v2477_v36 }
  0x56   : > { %2226 = vmatpush3.bf16.msra.mxu1 %v2451_v12  ;;  %2163 = vmatprep.subr.bf16.mxu0 %v2452_v13  ;;  %v2472_v33 = vld [vmem:[%s2821_s8] ss:$28 sps:$4 sm:$0xff]   ;;  %v2484_v41 = vld [vmem:[%s2821_s8 + $0x38] ss:$28 sps:$4 sm:$0xff]   ;;  %v2486_v43 = vld [vmem:[%s2819_s7 + $0x148] sm:$0xff]  }
  0x57   : > { %2227 = vmatprep.subr.bf16.mxu1 %v2453_v14  ;;  %v2479_v38 = vld [vmem:[%s2819_s7 + $0x100] sm:$0xff]   ;;  %v2480_v39 = vld [vmem:[%s2821_s8 + $0x3c] ss:$28 sps:$4 sm:$0xff]   ;;  %v2487_v44 = vld [vmem:[%s2819_s7 + $0x108] sm:$0xff]  }
  0x58   : > { %v2482_v40 = vld [vmem:[%s2821_s8 + $0x44] ss:$28 sps:$4 sm:$0xff]   ;;  %v2488_v45 = vld [vmem:[%s2821_s8 + $0x74] ss:$28 sps:$4 sm:$0xff]   ;;  %v2490_v46 = vld [vmem:[%s2821_s8 + $0x7c] ss:$28 sps:$4 sm:$0xff]  }
  0x59   : > { %2164 = vmatpush3.bf16.msra.mxu0 %v2454_v15  ;;  %v2485_v42 = vld [vmem:[%s2821_s8 + $0x40] ss:$28 sps:$4 sm:$0xff]   ;;  %v2494_v47 = vld [vmem:[%s2819_s7 + $0x150] sm:$0xff]   ;;  %v2496_v51 = vld [vmem:[%s2821_s8 + $0xac] ss:$28 sps:$4 sm:$0xff]  }
  0x5a   : > { %2228 = vmatpush3.bf16.msra.mxu1 %v2455_v16  ;;  %2165 = vmatprep.subr.bf16.mxu0 %v2456_v17  ;;  %v2495_v48 = vld [vmem:[%s2819_s7 + $0x110] sm:$0xff]   ;;  %v2502_v53 = vld [vmem:[%s2819_s7 + $0x158] sm:$0xff]   ;;  %v2500_v55 = vld [vmem:[%s2821_s8 + $0xa8] ss:$28 sps:$4 sm:$0xff]  }
  0x5b   : > { %2229 = vmatprep.subr.bf16.mxu1 %v2457_v18  ;;  %v2492_v49 = vld [vmem:[%s2821_s8 + $0x70] ss:$28 sps:$4 sm:$0xff]   ;;  %v2493_v50 = vld [vmem:[%s2821_s8 + $0x78] ss:$28 sps:$4 sm:$0xff]   ;;  %v2510_v56 = vld [vmem:[%s2819_s7 + $0x160] sm:$0xff]  }
  0x5c   : > { %v2498_v52 = vld [vmem:[%s2821_s8 + $0xb4] ss:$28 sps:$4 sm:$0xff]   ;;  %v2503_v54 = vld [vmem:[%s2819_s7 + $0x118] sm:$0xff]   ;;  %v2511_v58 = vld [vmem:[%s2819_s7 + $0x120] sm:$0xff]  }
  0x5d   : > { %2166 = vmatpush3.bf16.msra.mxu0 %v2458_v19  ;;  %v2501_v57 = vld [vmem:[%s2821_s8 + $0xb0] ss:$28 sps:$4 sm:$0xff]   ;;  %v2512_v59 = vld [vmem:[%s2819_s7 + $0x180] sm:$0xff]   ;;  %v2513_v4 = vld [vmem:[%s2821_s8 + $0x11c] ss:$28 sps:$4 sm:$0xff]  }
  0x5e   : > { %2230 = vmatpush3.bf16.msra.mxu1 %v2459_v20  ;;  %2167 = vmatprep.subr.bf16.mxu0 %v2460_v21  ;;  %v2504_v60 = vld [vmem:[%s2821_s8 + $0xe4] ss:$28 sps:$4 sm:$0xff]   ;;  %v2506_v61 = vld [vmem:[%s2821_s8 + $0xec] ss:$28 sps:$4 sm:$0xff]   ;;  %v2522_v1 = vld [vmem:[%s2819_s7 + $0x190] sm:$0xff]  }
  0x5f   : > { %2231 = vmatprep.subr.bf16.mxu1 %v2461_v22  ;;  %v2519_v62 = vld [vmem:[%s2819_s7 + $0x168] sm:$0xff]   ;;  %v2508_v2 = vld [vmem:[%s2821_s8 + $0xe0] ss:$28 sps:$4 sm:$0xff]   ;;  %v2529_v6 = vld [vmem:[%s2819_s7 + $0x170] sm:$0xff]  }
  0x60   : > { %v2520_v63 = vld [vmem:[%s2819_s7 + $0x188] sm:$0xff]   ;;  %v2515_v5 = vld [vmem:[%s2821_s8 + $0x124] ss:$28 sps:$4 sm:$0xff]   ;;  %v2530_v7 = vld [vmem:[%s2819_s7 + $0x198] sm:$0xff]  }
  0x61   : > { %2168 = vmatpush3.bf16.msra.mxu0 %v2462_v23  ;;  %v2521_v0 = vld [vmem:[%s2819_s7 + $0x128] sm:$0xff]   ;;  %v2531_v8 = vld [vmem:[%s2819_s7 + $0x130] sm:$0xff]   ;;  %v2532_v9 = vld [vmem:[%s2819_s7 + $0x1a0] sm:$0xff]  }
  0x62   : > { %2232 = vmatpush3.bf16.msra.mxu1 %v2463_v24  ;;  %2169 = vmatprep.subr.bf16.mxu0 %v2464_v25  ;;  %v2509_v3 = vld [vmem:[%s2821_s8 + $0xe8] ss:$28 sps:$4 sm:$0xff]   ;;  %v2517_v10 = vld [vmem:[%s2821_s8 + $0x118] ss:$28 sps:$4 sm:$0xff]   ;;  %v2518_v11 = vld [vmem:[%s2821_s8 + $0x120] ss:$28 sps:$4 sm:$0xff]  }
  0x63   : > { %2233 = vmatprep.subr.bf16.mxu1 %v2465_v26  ;;  %v2523_v12 = vld [vmem:[%s2821_s8 + $0x154] ss:$28 sps:$4 sm:$0xff]   ;;  %v2525_v13 = vld [vmem:[%s2821_s8 + $0x15c] ss:$28 sps:$4 sm:$0xff]   ;;  %v2540_v15 = vld [vmem:[%s2819_s7 + $0x1a8] sm:$0xff]  }
  0x64   : > { %v2539_v14 = vld [vmem:[%s2819_s7 + $0x178] sm:$0xff]   ;;  %v2542_v17 = vld [vmem:[%s2819_s7 + $0x1b0] sm:$0xff]   ;;  %v2533_v20 = vld [vmem:[%s2821_s8 + $0x18c] ss:$28 sps:$4 sm:$0xff]  }
  0x65   : > { %2170 = vmatpush3.bf16.msra.mxu0 %v2466_v27  ;;  %v2541_v16 = vld [vmem:[%s2819_s7 + $0x138] sm:$0xff]   ;;  %v2527_v18 = vld [vmem:[%s2821_s8 + $0x150] ss:$28 sps:$4 sm:$0xff]   ;;  %v2537_v23 = vld [vmem:[%s2821_s8 + $0x188] ss:$28 sps:$4 sm:$0xff]  }
  0x66   : > { %2234 = vmatpush3.bf16.msra.mxu1 %v2467_v28  ;;  %2171 = vmatprep.subr.bf16.mxu0 %v2468_v29  ;;  %v2528_v19 = vld [vmem:[%s2821_s8 + $0x158] ss:$28 sps:$4 sm:$0xff]   ;;  %v2538_v24 = vld [vmem:[%s2821_s8 + $0x190] ss:$28 sps:$4 sm:$0xff]  }
  0x67   : > { %2235 = vmatprep.subr.bf16.mxu1 %v2469_v30  ;;  %v2535_v21 = vld [vmem:[%s2821_s8 + $0x194] ss:$28 sps:$4 sm:$0xff]   ;;  %v2546_v22 = vld [vmem:[%s2819_s7 + $0x1b8] sm:$0xff]   ;;  %v2549_v29 = vld [vmem:[%s2821_s8 + $0x4c] ss:$28 sps:$4 sm:$0xff]  }
  0x68   : > { %v2545_v25 = vld [vmem:[%s2821_s8 + $0x14] ss:$28 sps:$4 sm:$0xff]   ;;  %v2555_v30 = vld [vmem:[%s2821_s8 + $0x88] ss:$28 sps:$4 sm:$0xff]   ;;  %v2557_v36 = vld [vmem:[%s2821_s8 + $0xbc] ss:$28 sps:$4 sm:$0xff]  }
  0x69   : > { %2172 = vmatpush3.bf16.msra.mxu0 %v2470_v31  ;;  %v2547_v26 = vld [vmem:[%s2821_s8 + $0x18] ss:$28 sps:$4 sm:$0xff]   ;;  %v2543_v27 = vld [vmem:[%s2821_s8 + $0x10] ss:$28 sps:$4 sm:$0xff]   ;;  %v2551_v31 = vld [vmem:[%s2821_s8 + $0x48] ss:$28 sps:$4 sm:$0xff]  }
  0x6a   : > { %2236 = vmatpush3.bf16.msra.mxu1 %v2471_v32  ;;  %2285 = vmatprep.subr.bf16.mxu0 %v2478_v37  ;;  %v2548_v28 = vld [vmem:[%s2821_s8 + $0x50] ss:$28 sps:$4 sm:$0xff]   ;;  %v2552_v32 = vld [vmem:[%s2821_s8 + $0x84] ss:$28 sps:$4 sm:$0xff]   ;;  %v2563_v34 = vld [vmem:[%s2821_s8 + $0xf8] ss:$28 sps:$4 sm:$0xff]  }
  0x6b   : > { %2365 = vmatprep.subr.bf16.mxu1 %v2512_v59  ;;  %v2564_v37 = vld [vmem:[%s2821_s8 + $0x130] ss:$28 sps:$4 sm:$0xff]  }
  0x6c   : > { %1278 = vmatmul.mubr.bf16.vlgmr.msra.gmra.mrb[0].mxu0 %v2472_v33  ;;  %v2556_v33 = vld [vmem:[%s2821_s8 + $0xc0] ss:$28 sps:$4 sm:$0xff]  }
  0x6d   : > { %1375 = vmatmul.mubr.bf16.vlgmr.msra.gmra.mrb[0].mxu1 %v2475_v35  ;;  %2286 = vmatpush3.bf16.msra.mxu0 %v2479_v38  ;;  %v2554_v35 = vld [vmem:[%s2821_s8 + $0x80] ss:$28 sps:$4 sm:$0xff]   ;;  %v2571_v38 = vld [vmem:[%s2821_s8 + $0x168] ss:$28 sps:$4 sm:$0xff]  }
  0x6e   : > { %1285 = vmatprep.mubr.bf16.mxu0 %v2480_v39  ;;  %1382 = vmatprep.mubr.bf16.mxu1 %v2482_v40  ;;  %v2559_v39 = vld [vmem:[%s2821_s8 + $0xb8] ss:$28 sps:$4 sm:$0xff]  }
  0x6f   : > { %2287 = vmatprep.subr.bf16.mxu0 %v2486_v43  ;;  %2366 = vmatpush3.bf16.msra.mxu1 %v2512_v59  ;;  %v2560_v40 = vld [vmem:[%s2821_s8 + $0xf4] ss:$28 sps:$4 sm:$0xff]   ;;  %v2565_v43 = vld [vmem:[%s2821_s8 + $0x12c] ss:$28 sps:$4 sm:$0xff]  }
  0x70   : > { %2367 = vmatprep.subr.bf16.mxu1 %v2520_v63 }
  0x71   : > { %2288 = vmatpush3.bf16.msra.mxu0 %v2487_v44  ;;  %v2567_v44 = vld [vmem:[%s2821_s8 + $0x128] ss:$28 sps:$4 sm:$0xff]  }
  0x72   : > { %2289 = vmatprep.subr.bf16.mxu0 %v2494_v47  ;;  %v2573_v47 = vld [vmem:[%s2821_s8 + $0x19c] ss:$28 sps:$4 sm:$0xff]  }
  0x73   : > { %2368 = vmatpush3.bf16.msra.mxu1 %v2520_v63 }
  0x74   : > { %1286 = vmatmul.mubr.bf16.gmra.mrb[4].mxu0 %v2484_v41  ;;  %2369 = vmatprep.subr.bf16.mxu1 %v2522_v1  ;;  %v2572_v41 = vld [vmem:[%s2821_s8 + $0x1a0] ss:$28 sps:$4 sm:$0xff]  }
  0x75   : > { %1383 = vmatmul.mubr.bf16.gmra.mrb[4].mxu1 %v2485_v42  ;;  %1293 = vmatprep.mubr.bf16.mxu0 %v2488_v45  ;;  %v2562_v42 = vld [vmem:[%s2821_s8 + $0xf0] ss:$28 sps:$4 sm:$0xff]   ;;  %v2568_v45 = vld [vmem:[%s2821_s8 + $0x164] ss:$28 sps:$4 sm:$0xff]  }
  0x76   : > { %1390 = vmatprep.mubr.bf16.mxu1 %v2490_v46  ;;  %2290 = vmatpush3.bf16.msra.mxu0 %v2495_v48  ;;  %v2570_v46 = vld [vmem:[%s2821_s8 + $0x160] ss:$28 sps:$4 sm:$0xff]   ;;  %v2575_v48 = vld [vmem:[%s2821_s8 + $0x198] ss:$28 sps:$4 sm:$0xff]  }
  0x77   : > { %2291 = vmatprep.subr.bf16.mxu0 %v2502_v53  ;;  %2370 = vmatpush3.bf16.msra.mxu1 %v2522_v1 }
  0x78   : > { %2371 = vmatprep.subr.bf16.mxu1 %v2530_v7 }
  0x7a   : > { %2292 = vmatpush3.bf16.msra.mxu0 %v2503_v54 }
  0x7b   : > { %2293 = vmatprep.subr.bf16.mxu0 %v2510_v56  ;;  %2372 = vmatpush3.bf16.msra.mxu1 %v2530_v7 }
  0x7c   : > { %1294 = vmatmul.mubr.bf16.gmra.mrb[8].mxu0 %v2492_v49  ;;  %2373 = vmatprep.subr.bf16.mxu1 %v2532_v9 }
  0x7d   : > { %1391 = vmatmul.mubr.bf16.gmra.mrb[8].mxu1 %v2493_v50  ;;  %1301 = vmatprep.mubr.bf16.mxu0 %v2496_v51 }
  0x7e   : > { %1398 = vmatprep.mubr.bf16.mxu1 %v2498_v52  ;;  %2294 = vmatpush3.bf16.msra.mxu0 %v2511_v58 }
  0x7f   : > { %2295 = vmatprep.subr.bf16.mxu0 %v2519_v62  ;;  %2374 = vmatpush3.bf16.msra.mxu1 %v2532_v9 }
  0x80   : > { %2375 = vmatprep.subr.bf16.mxu1 %v2540_v15 }
  0x82   : > { %2296 = vmatpush3.bf16.msra.mxu0 %v2521_v0 }
  0x83   : > { %2297 = vmatprep.subr.bf16.mxu0 %v2529_v6  ;;  %2376 = vmatpush3.bf16.msra.mxu1 %v2540_v15 }
  0x84   : > { %1302 = vmatmul.mubr.bf16.gmra.mrb[12].mxu0 %v2500_v55  ;;  %2377 = vmatprep.subr.bf16.mxu1 %v2542_v17 }
  0x85   : > { %1399 = vmatmul.mubr.bf16.gmra.mrb[12].mxu1 %v2501_v57  ;;  %1309 = vmatprep.mubr.bf16.mxu0 %v2504_v60 }
  0x86   : > { %1406 = vmatprep.mubr.bf16.mxu1 %v2506_v61  ;;  %2298 = vmatpush3.bf16.msra.mxu0 %v2531_v8 }
  0x87   : > { %2299 = vmatprep.subr.bf16.mxu0 %v2539_v14  ;;  %2378 = vmatpush3.bf16.msra.mxu1 %v2542_v17 }
  0x88   : > { %2379 = vmatprep.subr.bf16.mxu1 %v2546_v22 }
  0x8a   : > { %2300 = vmatpush3.bf16.msra.mxu0 %v2541_v16 }
  0x8b   : > { %2380 = vmatpush3.bf16.msra.mxu1 %v2546_v22 }
  0x8c   : > { %1310 = vmatmul.mubr.bf16.gmra.mrb[16].mxu0 %v2508_v2 }
  0x8d   : > { %1407 = vmatmul.mubr.bf16.gmra.mrb[16].mxu1 %v2509_v3  ;;  %1317 = vmatprep.mubr.bf16.mxu0 %v2513_v4 }
  0x8e   : > { %1414 = vmatprep.mubr.bf16.mxu1 %v2515_v5 }
  0x94   : > { %1318 = vmatmul.mubr.bf16.gmra.mrb[20].mxu0 %v2517_v10 }
  0x95   : > { %1415 = vmatmul.mubr.bf16.gmra.mrb[20].mxu1 %v2518_v11  ;;  %1325 = vmatprep.mubr.bf16.mxu0 %v2523_v12 }
  0x96   : > { %1422 = vmatprep.mubr.bf16.mxu1 %v2525_v13 }
  0x9c   : > { %1326 = vmatmul.mubr.bf16.gmra.mrb[24].mxu0 %v2527_v18 }
  0x9d   : > { %1423 = vmatmul.mubr.bf16.gmra.mrb[24].mxu1 %v2528_v19  ;;  %1333 = vmatprep.mubr.bf16.mxu0 %v2533_v20 }
  0x9e   : > { %1430 = vmatprep.mubr.bf16.mxu1 %v2535_v21 }
  0xa4   : > { %1334 = vmatmul.mubr.bf16.gmra.mrb[28].mxu0 %v2537_v23 }
  0xa5   : > { %1431 = vmatmul.mubr.bf16.gmra.mrb[28].mxu1 %v2538_v24  ;;  %1471 = vmatprep.mubr.bf16.mxu0 %v2545_v25 }
  0xa6   : > { %2381 = vmatprep.mubr.bf16.mxu1 %v2547_v26 }
  0xac   : > { %1472 = vmatmul.mubr.bf16.vlgmr.msra.gmra.mrb[32].mxu0 %v2543_v27 }
  0xad   : > { %2382 = vmatmul.mubr.bf16.vlgmr.msra.gmra.mrb[32].mxu1 %v2548_v28  ;;  %1479 = vmatprep.mubr.bf16.mxu0 %v2549_v29 }
  0xae   : > { %2385 = vmatprep.mubr.bf16.mxu1 %v2555_v30 }
  0xb4   : > { %1480 = vmatmul.mubr.bf16.gmra.mrb[36].mxu0 %v2551_v31 }
  0xb5   : > { %1487 = vmatprep.mubr.bf16.mxu0 %v2552_v32  ;;  %2386 = vmatmul.mubr.bf16.gmra.mrb[36].mxu1 %v2556_v33 }
  0xb6   : > { %2389 = vmatprep.mubr.bf16.mxu1 %v2563_v34 }
  0xbc   : > { %1488 = vmatmul.mubr.bf16.gmra.mrb[40].mxu0 %v2554_v35 }
  0xbd   : > { %1495 = vmatprep.mubr.bf16.mxu0 %v2557_v36  ;;  %2390 = vmatmul.mubr.bf16.gmra.mrb[40].mxu1 %v2564_v37 }
  0xbe   : > { %2393 = vmatprep.mubr.bf16.mxu1 %v2571_v38 }
  0xc4   : > { %1496 = vmatmul.mubr.bf16.gmra.mrb[44].mxu0 %v2559_v39 }
  0xc5   : > { %1503 = vmatprep.mubr.bf16.mxu0 %v2560_v40  ;;  %2394 = vmatmul.mubr.bf16.gmra.mrb[44].mxu1 %v2572_v41 }
  0xcc   : > { %1504 = vmatmul.mubr.bf16.gmra.mrb[48].mxu0 %v2562_v42 }
  0xcd   : > { %1511 = vmatprep.mubr.bf16.mxu0 %v2565_v43 }
  0xd4   : > { %1512 = vmatmul.mubr.bf16.gmra.mrb[52].mxu0 %v2567_v44 }
  0xd5   : > { %1519 = vmatprep.mubr.bf16.mxu0 %v2568_v45 }
  0xdc   : > { %1520 = vmatmul.mubr.bf16.gmra.mrb[56].mxu0 %v2570_v46 }
  0xdd   : > { %1527 = vmatprep.mubr.bf16.mxu0 %v2573_v47 }
  0xe4   : > { %1528 = vmatmul.mubr.bf16.gmra.mrb[60].mxu0 %v2575_v48 }
 0x13f   : > { %v2173_v49 = vpop.f32.mrb[0].mxu0 }
 0x140   : > { %v2237_v50 = vpop.f32.mrb[0].mxu1  ;;  %v2174_v51 = vpop.f32.mrb[1].mxu0 }
 0x141   : > { %v2175_v52 = vadd.f32 %v2174_v51, %v2173_v49  ;;  %v2238_v53 = vpop.f32.mrb[1].mxu1  ;;  %v2176_v54 = vpop.f32.mrb[2].mxu0 }
 0x142   : > { %v2239_v55 = vadd.f32 %v2238_v53, %v2237_v50  ;;  %v2240_v56 = vpop.f32.mrb[2].mxu1  ;;  %v2177_v57 = vpop.f32.mrb[3].mxu0 }
 0x143   : > { %v2178_v58 = vadd.f32 %v2177_v57, %v2176_v54  ;;  %v2241_v59 = vpop.f32.mrb[3].mxu1 }
 0x144   : > { %v2936_v60 = vadd.f32 %v2239_v55, %v2175_v52  ;;  %v2242_v61 = vadd.f32 %v2241_v59, %v2240_v56 }
 0x146   : > { %v2938_v62 = vadd.f32 %v2242_v61, %v2178_v58 }
 0x147   : > { %v2179_v63 = vpop.f32.mrb[4].mxu0 }
 0x148   : > { %v2243_v0 = vpop.f32.mrb[4].mxu1  ;;  %v2180_v1 = vpop.f32.mrb[5].mxu0 }
 0x149   : > { %v2181_v2 = vadd.f32 %v2180_v1, %v2179_v63  ;;  %v2244_v3 = vpop.f32.mrb[5].mxu1  ;;  %v2182_v4 = vpop.f32.mrb[6].mxu0 }
 0x14a   : > { %v2245_v5 = vadd.f32 %v2244_v3, %v2243_v0  ;;  %v2246_v6 = vpop.f32.mrb[6].mxu1  ;;  %v2183_v7 = vpop.f32.mrb[7].mxu0 }
 0x14b   : > { %v2184_v8 = vadd.f32 %v2183_v7, %v2182_v4  ;;  %v2247_v9 = vpop.f32.mrb[7].mxu1 }
 0x14c   : > { %v2940_v10 = vadd.f32 %v2245_v5, %v2181_v2  ;;  %v2248_v11 = vadd.f32 %v2247_v9, %v2246_v6 }
 0x14e   : > { %v2942_v12 = vadd.f32 %v2248_v11, %v2184_v8 }
 0x14f   : > { %v2185_v13 = vpop.f32.mrb[8].mxu0 }
 0x150   : > { %v2249_v14 = vpop.f32.mrb[8].mxu1  ;;  %v2186_v15 = vpop.f32.mrb[9].mxu0 }
 0x151   : > { %v2187_v16 = vadd.f32 %v2186_v15, %v2185_v13  ;;  %v2250_v17 = vpop.f32.mrb[9].mxu1  ;;  %v2188_v18 = vpop.f32.mrb[10].mxu0 }
 0x152   : > { %v2251_v19 = vadd.f32 %v2250_v17, %v2249_v14  ;;  %v2252_v20 = vpop.f32.mrb[10].mxu1  ;;  %v2189_v21 = vpop.f32.mrb[11].mxu0 }
 0x153   : > { %v2190_v22 = vadd.f32 %v2189_v21, %v2188_v18  ;;  %v2253_v23 = vpop.f32.mrb[11].mxu1 }
 0x154   : > { %v2944_v24 = vadd.f32 %v2251_v19, %v2187_v16  ;;  %v2254_v25 = vadd.f32 %v2253_v23, %v2252_v20 }
 0x156   : > { %v2946_v26 = vadd.f32 %v2254_v25, %v2190_v22 }
 0x157   : > { %v2191_v27 = vpop.f32.mrb[12].mxu0 }
 0x158   : > { %v2255_v28 = vpop.f32.mrb[12].mxu1  ;;  %v2192_v29 = vpop.f32.mrb[13].mxu0 }
 0x159   : > { %v2193_v30 = vadd.f32 %v2192_v29, %v2191_v27  ;;  %v2256_v31 = vpop.f32.mrb[13].mxu1  ;;  %v2194_v32 = vpop.f32.mrb[14].mxu0 }
 0x15a   : > { %v2257_v33 = vadd.f32 %v2256_v31, %v2255_v28  ;;  %v2258_v34 = vpop.f32.mrb[14].mxu1  ;;  %v2195_v35 = vpop.f32.mrb[15].mxu0 }
 0x15b   : > { %v2196_v36 = vadd.f32 %v2195_v35, %v2194_v32  ;;  %v2259_v37 = vpop.f32.mrb[15].mxu1 }
 0x15c   : > { %v2948_v38 = vadd.f32 %v2257_v33, %v2193_v30  ;;  %v2260_v39 = vadd.f32 %v2259_v37, %v2258_v34 }
 0x15e   : > { %v2950_v40 = vadd.f32 %v2260_v39, %v2196_v36 }
 0x15f   : > { %v2197_v41 = vpop.f32.mrb[16].mxu0 }
 0x160   : > { %v2261_v42 = vpop.f32.mrb[16].mxu1  ;;  %v2198_v43 = vpop.f32.mrb[17].mxu0 }
 0x161   : > { %v2199_v44 = vadd.f32 %v2198_v43, %v2197_v41  ;;  %v2262_v45 = vpop.f32.mrb[17].mxu1  ;;  %v2200_v46 = vpop.f32.mrb[18].mxu0 }
 0x162   : > { %v2263_v47 = vadd.f32 %v2262_v45, %v2261_v42  ;;  %v2264_v48 = vpop.f32.mrb[18].mxu1  ;;  %v2201_v49 = vpop.f32.mrb[19].mxu0 }
 0x163   : > { %v2202_v50 = vadd.f32 %v2201_v49, %v2200_v46  ;;  %v2265_v51 = vpop.f32.mrb[19].mxu1 }
 0x164   : > { %v2952_v52 = vadd.f32 %v2263_v47, %v2199_v44  ;;  %v2266_v53 = vadd.f32 %v2265_v51, %v2264_v48 }
 0x166   : > { %v2954_v54 = vadd.f32 %v2266_v53, %v2202_v50  ;;  %v429_v53 = vld [vmem:[#allocation2] sm:$0xff] }
 0x167   : > { %v2203_v55 = vpop.f32.mrb[20].mxu0 }
 0x168   : > { %v2267_v56 = vpop.f32.mrb[20].mxu1  ;;  %v2204_v57 = vpop.f32.mrb[21].mxu0 }
 0x169   : > { %v2205_v58 = vadd.f32 %v2204_v57, %v2203_v55  ;;  %v2268_v59 = vpop.f32.mrb[21].mxu1  ;;  %v2206_v61 = vpop.f32.mrb[22].mxu0  ;;  %v430_v57 = vld [vmem:[#allocation2 + $0x8] sm:$0xff] }
 0x16a   : > { %v2269_v63 = vadd.f32 %v2268_v59, %v2267_v56  ;;  %v2270_v0 = vpop.f32.mrb[22].mxu1  ;;  %v2207_v1 = vpop.f32.mrb[23].mxu0 }
 0x16b   : > { %v2208_v2 = vadd.f32 %v2207_v1, %v2206_v61  ;;  %v2271_v3 = vpop.f32.mrb[23].mxu1 }
 0x16c   : > { %v2956_v4 = vadd.f32 %v2269_v63, %v2205_v58  ;;  %v2272_v5 = vadd.f32 %v2271_v3, %v2270_v0 }
 0x16e   : > { %v2958_v6 = vadd.f32 %v2272_v5, %v2208_v2 }
 0x16f   : > { %v2209_v7 = vpop.f32.mrb[24].mxu0 }
 0x170   : > { %v2273_v8 = vpop.f32.mrb[24].mxu1  ;;  %v2210_v9 = vpop.f32.mrb[25].mxu0 }
 0x171   : > { %v2211_v11 = vadd.f32 %v2210_v9, %v2209_v7  ;;  %v2274_v13 = vpop.f32.mrb[25].mxu1  ;;  %v2212_v14 = vpop.f32.mrb[26].mxu0 }
 0x172   : > { %v2275_v15 = vadd.f32 %v2274_v13, %v2273_v8  ;;  %v2276_v16 = vpop.f32.mrb[26].mxu1  ;;  %v2213_v17 = vpop.f32.mrb[27].mxu0  ;;  %v431_v13 = vld [vmem:[#allocation2 + $0x10] sm:$0xff] }
 0x173   : > { %v2214_v18 = vadd.f32 %v2213_v17, %v2212_v14  ;;  %v2277_v19 = vpop.f32.mrb[27].mxu1 }
 0x174   : > { %v2960_v20 = vadd.f32 %v2275_v15, %v2211_v11  ;;  %v2278_v21 = vadd.f32 %v2277_v19, %v2276_v16  ;;  %v432_v15 = vld [vmem:[#allocation2 + $0x18] sm:$0xff] }
 0x176   : > { %v2962_v22 = vadd.f32 %v2278_v21, %v2214_v18 }
 0x177   : > { %v2215_v23 = vpop.f32.mrb[28].mxu0 }
 0x178   : > { %v2279_v25 = vpop.f32.mrb[28].mxu1  ;;  %v2216_v27 = vpop.f32.mrb[29].mxu0 }
 0x179   : > { %v2217_v28 = vadd.f32 %v2216_v27, %v2215_v23  ;;  %v2280_v29 = vpop.f32.mrb[29].mxu1  ;;  %v2218_v30 = vpop.f32.mrb[30].mxu0 }
 0x17a   : > { %v2281_v31 = vadd.f32 %v2280_v29, %v2279_v25  ;;  %v2282_v32 = vpop.f32.mrb[30].mxu1  ;;  %v2219_v33 = vpop.f32.mrb[31].mxu0 }
 0x17b   : > { %v2220_v34 = vadd.f32 %v2219_v33, %v2218_v30  ;;  %v2283_v35 = vpop.f32.mrb[31].mxu1 }
 0x17c   : > { %v2964_v36 = vadd.f32 %v2281_v31, %v2217_v28  ;;  %v2284_v37 = vadd.f32 %v2283_v35, %v2282_v32  ;;  %v434_v35 = vld [vmem:[#allocation2 + $0x28] sm:$0xff] }
 0x17e   : > { %v2966_v39 = vadd.f32 %v2284_v37, %v2220_v34 }
 0x17f   : > { %v2301_v41 = vpop.f32.mrb[32].mxu0 }
 0x180   : > { %v2302_v42 = vpop.f32.mrb[33].mxu0  ;;  %v2383_v43 = vpop.f32.mrb[32].mxu1 }
 0x181   : > { %v2303_v44 = vadd.f32 %v2302_v42, %v2301_v41  ;;  %v2304_v45 = vpop.f32.mrb[34].mxu0  ;;  %v1570_v46 = vpop.f32.mrb[33].mxu1 }
 0x182   : > { %v2305_v47 = vpop.f32.mrb[35].mxu0  ;;  %v2384_v48 = vpop.f32.mrb[34].mxu1 }
 0x183   : > { %v2306_v49 = vadd.f32 %v2305_v47, %v2304_v45  ;;  %v1474_v50 = vadd.f32 %v2303_v44, %v2936_v60  ;;  %v1573_v51 = vpop.f32.mrb[35].mxu1 }
 0x185   : > { %v1571_v55 = vadd.f32 %v1570_v46, %v1474_v50  ;;  %v1477_v56 = vadd.f32 %v2306_v49, %v2938_v62 }
 0x187   : > { %v1633_v58 = vadd.f32 %v1571_v55, %v429_v53  ;;  %v1574_v59 = vadd.f32 %v1573_v51, %v1477_v56  ;;  %v2307_v61 = vpop.f32.mrb[36].mxu0  ;;  %v435_v53 = vld [vmem:[#allocation2 + $0x30] sm:$0xff] }
 0x188   : > { %v2308_v63 = vpop.f32.mrb[37].mxu0  ;;  %v2387_v0 = vpop.f32.mrb[36].mxu1 }
 0x189   : > { %1649 = vst [vmem:[#allocation2] sm:$0xff] %v1633_v58  ;;  %v1634_v1 = vadd.f32 %v1574_v59, %v430_v57  ;;  %v2309_v2 = vadd.f32 %v2308_v63, %v2307_v61  ;;  %v2310_v3 = vpop.f32.mrb[38].mxu0  ;;  %v1586_v5 = vpop.f32.mrb[37].mxu1  ;;  %v436_v57 = vld [vmem:[#allocation2 + $0x38] sm:$0xff] }
 0x18a   : > { %v2311_v7 = vpop.f32.mrb[39].mxu0  ;;  %v2388_v8 = vpop.f32.mrb[38].mxu1 }
 0x18b   : > { %1650 = vst [vmem:[#allocation2 + $0x8] sm:$0xff] %v1634_v1  ;;  %v1482_v60 = vadd.f32 %v2309_v2, %v2940_v10  ;;  %v2312_v9 = vadd.f32 %v2311_v7, %v2310_v3  ;;  %v1589_v11 = vpop.f32.mrb[39].mxu1 }
 0x18d   : > { %v1579_v62 = vadd.f32 %v2383_v43, %v1482_v60  ;;  %v1485_v14 = vadd.f32 %v2312_v9, %v2942_v12  ;;  %v433_v12 = vld [vmem:[#allocation2 + $0x20] sm:$0xff] }
 0x18e   : > { %v437_v60 = vld [vmem:[#allocation2 + $0x40] sm:$0xff] }
 0x18f   : > { %v1635_v16 = vadd.f32 %v1579_v62, %v431_v13  ;;  %v1582_v17 = vadd.f32 %v2384_v48, %v1485_v14  ;;  %v2313_v18 = vpop.f32.mrb[40].mxu0 }
 0x190   : > { %v2314_v19 = vpop.f32.mrb[41].mxu0  ;;  %v2972_v21 = vpop.f32.mrb[40].mxu1 }
 0x191   : > { %1651 = vst [vmem:[#allocation2 + $0x10] sm:$0xff] %v1635_v16  ;;  %v1636_v23 = vadd.f32 %v1582_v17, %v432_v15  ;;  %v2315_v25 = vadd.f32 %v2314_v19, %v2313_v18  ;;  %v2316_v27 = vpop.f32.mrb[42].mxu0  ;;  %v1602_v28 = vpop.f32.mrb[41].mxu1 }
 0x192   : > { %v2317_v29 = vpop.f32.mrb[43].mxu0  ;;  %v2392_v10 = vpop.f32.mrb[42].mxu1 }
 0x193   : > { %1652 = vst [vmem:[#allocation2 + $0x18] sm:$0xff] %v1636_v23  ;;  %v2318_v30 = vadd.f32 %v2317_v29, %v2316_v27  ;;  %v1490_v31 = vadd.f32 %v2315_v25, %v2944_v24  ;;  %v1605_v32 = vpop.f32.mrb[43].mxu1  ;;  %v439_v23 = vld [vmem:[#allocation2 + $0x50] sm:$0xff] }
 0x195   : > { %v1587_v33 = vadd.f32 %v1586_v5, %v1490_v31  ;;  %v1493_v34 = vadd.f32 %v2318_v30, %v2946_v26 }
 0x197   : > { %v1637_v37 = vadd.f32 %v1587_v33, %v433_v12  ;;  %v1590_v41 = vadd.f32 %v1589_v11, %v1493_v34  ;;  %v2319_v42 = vpop.f32.mrb[44].mxu0  ;;  %v438_v11 = vld [vmem:[#allocation2 + $0x48] sm:$0xff] }
 0x198   : > { %v2320_v43 = vpop.f32.mrb[45].mxu0  ;;  %v2976_v44 = vpop.f32.mrb[44].mxu1 }
 0x199   : > { %1653 = vst [vmem:[#allocation2 + $0x20] sm:$0xff] %v1637_v37  ;;  %v1638_v45 = vadd.f32 %v1590_v41, %v434_v35  ;;  %v2321_v46 = vadd.f32 %v2320_v43, %v2319_v42  ;;  %v2322_v47 = vpop.f32.mrb[46].mxu0  ;;  %v1618_v48 = vpop.f32.mrb[45].mxu1  ;;  %v441_v35 = vld [vmem:[#allocation2 + $0x60] sm:$0xff]  ;;  %v442_v41 = vld [vmem:[#allocation2 + $0x68] sm:$0xff] }
 0x19a   : > { %v2323_v49 = vpop.f32.mrb[47].mxu0  ;;  %v2978_v50 = vpop.f32.mrb[46].mxu1 }
 0x19b   : > { %1654 = vst [vmem:[#allocation2 + $0x28] sm:$0xff] %v1638_v45  ;;  %v1498_v24 = vadd.f32 %v2321_v46, %v2948_v38  ;;  %v2324_v51 = vadd.f32 %v2323_v49, %v2322_v47  ;;  %v1621_v26 = vpop.f32.mrb[47].mxu1 }
 0x19d   : > { %v1595_v55 = vadd.f32 %v2387_v0, %v1498_v24  ;;  %v1501_v56 = vadd.f32 %v2324_v51, %v2950_v40 }
 0x19f   : > { %v1639_v58 = vadd.f32 %v1595_v55, %v435_v53  ;;  %v1598_v59 = vadd.f32 %v2388_v8, %v1501_v56  ;;  %v2325_v61 = vpop.f32.mrb[48].mxu0  ;;  %v443_v53 = vld [vmem:[#allocation2 + $0x70] sm:$0xff] }
 0x1a0   : > { %v2326_v63 = vpop.f32.mrb[49].mxu0 }
 0x1a1   : > { %1655 = vst [vmem:[#allocation2 + $0x30] sm:$0xff] %v1639_v58  ;;  %v1640_v1 = vadd.f32 %v1598_v59, %v436_v57  ;;  %v2327_v2 = vadd.f32 %v2326_v63, %v2325_v61  ;;  %v2328_v3 = vpop.f32.mrb[50].mxu0  ;;  %v1669_v57 = vld [vmem:[#allocation2] sm:$0xff] (!%p2071_p11)  ;;  %v1670_v58 = vld [vmem:[#allocation2 + $0x8] sm:$0xff] (!%p2071_p11)  ;;  %v1671_v61 = vld [vmem:[#allocation2 + $0x10] sm:$0xff] (!%p2071_p11) }
 0x1a2   : > { %v2329_v5 = vpop.f32.mrb[51].mxu0  ;;  %v1673_v63 = vld [vmem:[#allocation2 + $0x20] sm:$0xff] (!%p2071_p11) }
 0x1a3   : > { %1656 = vst [vmem:[#allocation2 + $0x38] sm:$0xff] %v1640_v1  ;;  %v2330_v7 = vadd.f32 %v2329_v5, %v2328_v3  ;;  %v1506_v38 = vadd.f32 %v2327_v2, %v2952_v52 }
 0x1a5   : > { %v1603_v9 = vadd.f32 %v1602_v28, %v1506_v38  ;;  %v1509_v0 = vadd.f32 %v2330_v7, %v2954_v54  ;;  %v440_v54 = vld [vmem:[#allocation2 + $0x58] sm:$0xff] }
 0x1a7   : > { %v1641_v40 = vadd.f32 %v1603_v9, %v437_v60  ;;  %v1606_v13 = vadd.f32 %v1605_v32, %v1509_v0  ;;  %v2331_v62 = vpop.f32.mrb[52].mxu0 }
 0x1a8   : > { %v2332_v8 = vpop.f32.mrb[53].mxu0  ;;  %v1675_v5 = vld [vmem:[#allocation2 + $0x30] sm:$0xff] (!%p2071_p11) }
 0x1a9   : > { %1657 = vst [vmem:[#allocation2 + $0x40] sm:$0xff] %v1641_v40  ;;  %v1642_v14 = vadd.f32 %v1606_v13, %v438_v11  ;;  %v2333_v15 = vadd.f32 %v2332_v8, %v2331_v62  ;;  %v2334_v16 = vpop.f32.mrb[54].mxu0 }
 0x1aa   : > { %v2335_v17 = vpop.f32.mrb[55].mxu0  ;;  %v1676_v7 = vld [vmem:[#allocation2 + $0x38] sm:$0xff] (!%p2071_p11) }
 0x1ab   : > { %1658 = vst [vmem:[#allocation2 + $0x48] sm:$0xff] %v1642_v14  ;;  %v1514_v18 = vadd.f32 %v2333_v15, %v2956_v4  ;;  %v2336_v19 = vadd.f32 %v2335_v17, %v2334_v16 }
 0x1ad   : > { %v1611_v52 = vadd.f32 %v2972_v21, %v1514_v18  ;;  %v1517_v25 = vadd.f32 %v2336_v19, %v2958_v6 }
 0x1af   : > { %v1643_v27 = vadd.f32 %v1611_v52, %v439_v23  ;;  %v1614_v28 = vadd.f32 %v2392_v10, %v1517_v25  ;;  %v2337_v29 = vpop.f32.mrb[56].mxu0 }
 0x1b0   : > { %v2338_v30 = vpop.f32.mrb[57].mxu0  ;;  %v1677_v11 = vld [vmem:[#allocation2 + $0x40] sm:$0xff] (!%p2071_p11) }
 0x1b1   : > { %1659 = vst [vmem:[#allocation2 + $0x50] sm:$0xff] %v1643_v27  ;;  %v1644_v31 = vadd.f32 %v1614_v28, %v440_v54  ;;  %v2339_v32 = vadd.f32 %v2338_v30, %v2337_v29  ;;  %v2340_v12 = vpop.f32.mrb[58].mxu0 }
 0x1b2   : > { %v2341_v33 = vpop.f32.mrb[59].mxu0  ;;  %v1678_v40 = vld [vmem:[#allocation2 + $0x48] sm:$0xff] (!%p2071_p11) }
 0x1b3   : > { %1660 = vst [vmem:[#allocation2 + $0x58] sm:$0xff] %v1644_v31  ;;  %v2342_v34 = vadd.f32 %v2341_v33, %v2340_v12  ;;  %v1522_v4 = vadd.f32 %v2339_v32, %v2960_v20 }
 0x1b5   : > { %v1619_v37 = vadd.f32 %v1618_v48, %v1522_v4  ;;  %v1525_v21 = vadd.f32 %v2342_v34, %v2962_v22  ;;  %v444_v22 = vld [vmem:[#allocation2 + $0x78] sm:$0xff] }
 0x1b7   : > { %v1645_v6 = vadd.f32 %v1619_v37, %v441_v35  ;;  %v1622_v42 = vadd.f32 %v1621_v26, %v1525_v21  ;;  %v2343_v43 = vpop.f32.mrb[60].mxu0 }
 0x1b8   : > { %v2344_v10 = vpop.f32.mrb[61].mxu0  ;;  %v1679_v13 = vld [vmem:[#allocation2 + $0x50] sm:$0xff] (!%p2071_p11) }
 0x1b9   : > { %1661 = vst [vmem:[#allocation2 + $0x60] sm:$0xff] %v1645_v6  ;;  %v1646_v45 = vadd.f32 %v1622_v42, %v442_v41  ;;  %v2345_v46 = vadd.f32 %v2344_v10, %v2343_v43  ;;  %v2346_v47 = vpop.f32.mrb[62].mxu0 }
 0x1ba   : > { %v2347_v49 = vpop.f32.mrb[63].mxu0  ;;  %v1680_v16 = vld [vmem:[#allocation2 + $0x58] sm:$0xff] (!%p2071_p11) }
 0x1bb   : > { %1662 = vst [vmem:[#allocation2 + $0x68] sm:$0xff] %v1646_v45  ;;  %v1530_v24 = vadd.f32 %v2345_v46, %v2964_v36  ;;  %v2348_v51 = vadd.f32 %v2347_v49, %v2346_v47  ;;  %v2072_v36 = vld [vmem:[%s3038_s2] ss:$0 sm:$0xff] (!%p2071_p11) }
 0x1bc   : > { %v1692_v59 = vadd.f32 (!%p2071_p11), %v2072_v36, %v1669_v57  ;;  %v1694_v1 = vadd.f32 (!%p2071_p11), %v2072_v36, %v1671_v61  ;;  %v1696_v3 = vadd.f32 (!%p2071_p11), %v2072_v36, %v1673_v63  ;;  %v1698_v0 = vadd.f32 (!%p2071_p11), %v2072_v36, %v1675_v5 }
 0x1bd   : > { %v1627_v20 = vadd.f32 %v2976_v44, %v1530_v24  ;;  %v1533_v48 = vadd.f32 %v2348_v51, %v2966_v39  ;;  %1668 = sbr.rel (%p2071_p11) target bundleno = 466 (0x1d2), region = 66  ;;  %v1693_v44 = vadd.f32 (!%p2071_p11), %v2072_v36, %v1670_v58  ;;  %v1672_v39 = vld [vmem:[#allocation2 + $0x18] sm:$0xff] (!%p2071_p11)  ;;  %v1699_v15 = vadd.f32 (!%p2071_p11), %v2072_v36, %v1676_v7 }
 0x1be   : > { %v1695_v2 = vadd.f32 (!%p2071_p11), %v2072_v36, %v1672_v39  ;;  %v1708_v38 = vmax.f32 (!%p2071_p11), %v1692_v59, 0.0  ;;  %v1710_v62 = vmax.f32 (!%p2071_p11), %v1694_v1, 0.0  ;;  %v1712_v14 = vmax.f32 (!%p2071_p11), %v1696_v3, 0.0 }
 0x1bf   : > { %v1647_v55 = vadd.f32 %v1627_v20, %v443_v53  ;;  %v1630_v26 = vadd.f32 %v2978_v50, %v1533_v48  ;;  %v1674_v50 = vld [vmem:[#allocation2 + $0x28] sm:$0xff] (!%p2071_p11)  ;;  %v1709_v60 = vmax.f32 (!%p2071_p11), %v1693_v44, 0.0  ;;  %v1714_v23 = vmax.f32 (!%p2071_p11), %v1698_v0, 0.0 }
 0x1c0   : > { %v1697_v9 = vadd.f32 (!%p2071_p11), %v2072_v36, %v1674_v50  ;;  %v1711_v8 = vmax.f32 (!%p2071_p11), %v1695_v2, 0.0  ;;  %v1681_v17 = vld [vmem:[#allocation2 + $0x60] sm:$0xff] (!%p2071_p11)  ;;  %v1700_v52 = vadd.f32 (!%p2071_p11), %v2072_v36, %v1677_v11  ;;  %v1715_v27 = vmax.f32 (!%p2071_p11), %v1699_v15, 0.0 }
 0x1c1   : > { %1663 = vst [vmem:[#allocation2 + $0x70] sm:$0xff] %v1647_v55  ;;  %v1648_v56 = vadd.f32 %v1630_v26, %v444_v22  ;;  %v2113_v18 = vpack.c.bf16 (!%p2071_p11), %v1709_v60, %v1708_v38  ;;  %v1701_v28 = vadd.f32 (!%p2071_p11), %v2072_v36, %v1678_v40  ;;  %v1702_v29 = vadd.f32 (!%p2071_p11), %v2072_v36, %v1679_v13 }
 0x1c2   : > { %v1713_v19 = vmax.f32 (!%p2071_p11), %v1697_v9, 0.0  ;;  %v1682_v25 = vld [vmem:[#allocation2 + $0x68] sm:$0xff] (!%p2071_p11)  ;;  %v2118_v54 = vpack.c.bf16 (!%p2071_p11), %v1711_v8, %v1710_v62  ;;  %v1716_v12 = vmax.f32 (!%p2071_p11), %v1700_v52, 0.0  ;;  %v1703_v33 = vadd.f32 (!%p2071_p11), %v2072_v36, %v1680_v16 }
 0x1c3   : > { %1664 = vst [vmem:[#allocation2 + $0x78] sm:$0xff] %v1648_v56  ;;  %2114 = vst [vmem:[%s3039_s3] sm:$0xff] (!%p2071_p11), %v2113_v18   ;;  %v1704_v34 = vadd.f32 (!%p2071_p11), %v2072_v36, %v1681_v17  ;;  %v2128_v4 = vpack.c.bf16 (!%p2071_p11), %v1715_v27, %v1714_v23  ;;  %v1717_v35 = vmax.f32 (!%p2071_p11), %v1701_v28, 0.0  ;;  %v1718_v37 = vmax.f32 (!%p2071_p11), %v1702_v29, 0.0 }
 0x1c4   : > { %v2123_v32 = vpack.c.bf16 %v1713_v19, %v1712_v14  ;;  %2150 = vst [vmem:[%s3039_s3 + $0x8] sm:$0xff] %v2118_v54   ;;  %v1705_v21 = vadd.f32 %v2072_v36, %v1682_v25  ;;  %v1719_v41 = vmax.f32 %v1703_v33, 0.0 }
 0x1c5   : > { %v1720_v6 = vmax.f32 %v1704_v34, 0.0  ;;  %2152 = vst [vmem:[%s3039_s3 + $0x18] sm:$0xff] %v2128_v4   ;;  %v2133_v10 = vpack.c.bf16 %v1717_v35, %v1716_v12 }
 0x1c6   : > { %2151 = vst [vmem:[%s3039_s3 + $0x10] sm:$0xff] %v2123_v32   ;;  %v1721_v45 = vmax.f32 %v1705_v21, 0.0  ;;  %v2138_v46 = vpack.c.bf16 %v1719_v41, %v1718_v37 }
 0x1c7   : > { %2153 = vst [vmem:[%s3039_s3 + $0x20] sm:$0xff] %v2133_v10  }
 0x1c8   : > { %v1683_v30 = vld [vmem:[#allocation2 + $0x70] sm:$0xff]  ;;  %v2143_v24 = vpack.c.bf16 %v1721_v45, %v1720_v6  ;;  %2154 = vst [vmem:[%s3039_s3 + $0x28] sm:$0xff] %v2138_v46  }
 0x1c9   : > { %v1706_v42 = vadd.f32 %v2072_v36, %v1683_v30 }
 0x1ca   : > { %v1684_v31 = vld [vmem:[#allocation2 + $0x78] sm:$0xff]  ;;  %2155 = vst [vmem:[%s3039_s3 + $0x30] sm:$0xff] %v2143_v24  }
 0x1cb   : > { %v1707_v43 = vadd.f32 %v2072_v36, %v1684_v31  ;;  %v1722_v47 = vmax.f32 %v1706_v42, 0.0 }
 0x1cd   : > { %v1723_v49 = vmax.f32 %v1707_v43, 0.0 }
 0x1cf   : > { %v2148_v51 = vpack.c.bf16 %v1723_v49, %v1722_v47 }
 0x1d1   : > { %2156 = vst [vmem:[%s3039_s3 + $0x38] sm:$0xff] %v2148_v51  }
 0x1d2 PF: > { %s13_s16 = sadd.s32 1, %s2614_s16   ;;  %s3040_s12 = smov %s2602_s13 }
 0x1d3   : > { %p10_p12 = scmp.ge.s32.totalorder %s13_s16, 9   ;;  %s3041_s13 = smov %s2672_s20 }
 0x1d4   : > { %s3042_s14 = smov %s2610_s15  ;;  %s3043_s15 = smov %s3045_s17 }
 0x1d5   :  { %12 = sbr.rel (!%p10_p12) target bundleno = 3 (0x3), region = 113 }

// kernel: fpm_forward.12
= control target key start
LH: loop header
LB: loop body
LE: loop exit
PB: predicated region body
PF: predicated region fallthrough
CT: control target
= control target key end

     0   :  { %s2621_s12 = smov 0   ;;  %s2623_s13 = smov 0   ;;  %s3020_s0 = inlined_call_operand.vmem [shape: bf16[128,6272], index: 0, kind: input, shape index: {}]   ;;  %s3021_s1 = inlined_call_operand.vmem [shape: bf16[6272,128], index: 1, kind: input, shape index: {}]   ;;  %s3022_s2 = inlined_call_operand.vmem [shape: f32[1,128], index: 2, kind: input, shape index: {}]   ;;  %s3023_s3 = inlined_call_operand.vmem [shape: bf16[128,128], index: 3, kind: output, shape index: {}]  }
   0x1   :  { %s2625_s14 = smov 0   ;;  %s2627_s15 = smov 0  }
   0x2   :  { %s2629_s16 = smov 0  }
   0x3 LB: > { %s25_s17 = sadd.s32 1, %s2594_s15  ;;  %p48_p1 = scmp.ne.s32.totalorder %s2586_s13, %s2582_s12  ;;  %s2598_s16 = sphi %s2629_s16, %s13_s16   ;;  %s2594_s15 = sphi %s2627_s15, %s3027_s15   ;;  %s2590_s14 = sphi %s2625_s14, %s3026_s14   ;;  %s2586_s13 = sphi %s2623_s13, %s3025_s13   ;;  %s2582_s12 = sphi %s2621_s12, %s3024_s12  }
   0x4   : > { %p26_p0 = scmp.ge.s32.totalorder %s25_s17, 7  ;;  %p49_p2 = scmp.eq.s32.totalorder %s2598_s16, 0 }
   0x5   : > { %s41_s19 = sadd.s32 1, %s2586_s13  ;;  %p1906_p5 = scmp.ge.s32.totalorder %s2598_s16, 7 }
   0x6   : > { %s3029_s17 = smov (%p26_p0, %s25_s17), 0  ;;  %p50_p3 = por %p49_p2, %p48_p1 }
   0x7   : > { %s37_s18 = ssub.s32 %s2594_s15, %s3029_s17  ;;  %162 = sbr.rel (%p1906_p5) target bundleno = 53 (0x35), region = 20 }
   0x8   : > { %p39_p4 = scmp.eq.s32.totalorder %s37_s18, 0 }
   0xa   : > { %s2656_s20 = scalar_select %p39_p4, %s2586_s13, %s41_s19  }
   0xe   : > { %165 = sbr.rel (!%p50_p3) target bundleno = 53 (0x35), region = 24  ;;  %s167_s21 = sand.u32 (%p50_p3), 1, %s2586_s13  }
   0xf   : > { %s2077_s22 = smul.u32 (%p50_p3), 28, %s2594_s15 }
  0x10   : > { %s2381_s23 = smul.u32 (%p50_p3), 448, %s167_s21 }
  0x11   : > { %s2664_s26 = scalar_lea.vmem (%p50_p3), %s3020_s0, %s2077_s22 }
  0x12   : > { %v190_v0 = vld [vmem:[%s2664_s26] sm:$0xff] (%p50_p3)  ;;  %v192_v1 = vld [vmem:[%s2664_s26 + $0x8] sm:$0xff] (%p50_p3)  ;;  %v194_v2 = vld [vmem:[%s2664_s26 + $0x10] sm:$0xff] (%p50_p3)  ;;  %s2669_s27 = scalar_lea.vmem (%p50_p3), [#allocation3], %s2381_s23 }
  0x13   : > { %191 = vst [vmem:[%s2669_s27] sm:$0xff] (%p50_p3), %v190_v0  ;;  %193 = vst [vmem:[%s2669_s27 + $0x8] sm:$0xff] (%p50_p3), %v192_v1  ;;  %v196_v3 = vld [vmem:[%s2664_s26 + $0xc4] sm:$0xff] (%p50_p3)  ;;  %v198_v4 = vld [vmem:[%s2664_s26 + $0xcc] sm:$0xff] (%p50_p3) }
  0x14   : > { %195 = vst [vmem:[%s2669_s27 + $0x10] sm:$0xff] (%p50_p3), %v194_v2  ;;  %v200_v5 = vld [vmem:[%s2664_s26 + $0xd4] sm:$0xff] (%p50_p3)  ;;  %197 = vst [vmem:[%s2669_s27 + $0x1c] sm:$0xff] (%p50_p3), %v196_v3  ;;  %v202_v6 = vld [vmem:[%s2664_s26 + $0x188] sm:$0xff] (%p50_p3) }
  0x15   : > { %199 = vst [vmem:[%s2669_s27 + $0x24] sm:$0xff] %v198_v4  ;;  %201 = vst [vmem:[%s2669_s27 + $0x2c] sm:$0xff] %v200_v5  ;;  %v204_v7 = vld [vmem:[%s2664_s26 + $0x190] sm:$0xff]  ;;  %v206_v8 = vld [vmem:[%s2664_s26 + $0x198] sm:$0xff] }
  0x16   : > { %203 = vst [vmem:[%s2669_s27 + $0x38] sm:$0xff] %v202_v6  ;;  %205 = vst [vmem:[%s2669_s27 + $0x40] sm:$0xff] %v204_v7  ;;  %v208_v9 = vld [vmem:[%s2664_s26 + $0x24c] sm:$0xff]  ;;  %v210_v10 = vld [vmem:[%s2664_s26 + $0x254] sm:$0xff] }
  0x17   : > { %207 = vst [vmem:[%s2669_s27 + $0x48] sm:$0xff] %v206_v8  ;;  %v212_v11 = vld [vmem:[%s2664_s26 + $0x25c] sm:$0xff]  ;;  %209 = vst [vmem:[%s2669_s27 + $0x54] sm:$0xff] %v208_v9  ;;  %v214_v12 = vld [vmem:[%s2664_s26 + $0x310] sm:$0xff] }
  0x18   : > { %211 = vst [vmem:[%s2669_s27 + $0x5c] sm:$0xff] %v210_v10  ;;  %213 = vst [vmem:[%s2669_s27 + $0x64] sm:$0xff] %v212_v11  ;;  %v216_v13 = vld [vmem:[%s2664_s26 + $0x318] sm:$0xff]  ;;  %v218_v14 = vld [vmem:[%s2664_s26 + $0x320] sm:$0xff] }
  0x19   : > { %215 = vst [vmem:[%s2669_s27 + $0x70] sm:$0xff] %v214_v12  ;;  %217 = vst [vmem:[%s2669_s27 + $0x78] sm:$0xff] %v216_v13  ;;  %v220_v15 = vld [vmem:[%s2664_s26 + $0x3d4] sm:$0xff]  ;;  %v222_v16 = vld [vmem:[%s2664_s26 + $0x3dc] sm:$0xff] }
  0x1a   : > { %219 = vst [vmem:[%s2669_s27 + $0x80] sm:$0xff] %v218_v14  ;;  %v224_v17 = vld [vmem:[%s2664_s26 + $0x3e4] sm:$0xff]  ;;  %221 = vst [vmem:[%s2669_s27 + $0x8c] sm:$0xff] %v220_v15  ;;  %v226_v18 = vld [vmem:[%s2664_s26 + $0x498] sm:$0xff] }
  0x1b   : > { %223 = vst [vmem:[%s2669_s27 + $0x94] sm:$0xff] %v222_v16  ;;  %225 = vst [vmem:[%s2669_s27 + $0x9c] sm:$0xff] %v224_v17  ;;  %v228_v19 = vld [vmem:[%s2664_s26 + $0x4a0] sm:$0xff]  ;;  %v230_v20 = vld [vmem:[%s2664_s26 + $0x4a8] sm:$0xff] }
  0x1c   : > { %227 = vst [vmem:[%s2669_s27 + $0xa8] sm:$0xff] %v226_v18  ;;  %229 = vst [vmem:[%s2669_s27 + $0xb0] sm:$0xff] %v228_v19  ;;  %v232_v21 = vld [vmem:[%s2664_s26 + $0x55c] sm:$0xff]  ;;  %v234_v22 = vld [vmem:[%s2664_s26 + $0x564] sm:$0xff] }
  0x1d   : > { %231 = vst [vmem:[%s2669_s27 + $0xb8] sm:$0xff] %v230_v20  ;;  %v236_v23 = vld [vmem:[%s2664_s26 + $0x56c] sm:$0xff]  ;;  %233 = vst [vmem:[%s2669_s27 + $0xc4] sm:$0xff] %v232_v21  ;;  %v238_v24 = vld [vmem:[%s2664_s26 + $0x620] sm:$0xff] }
  0x1e   : > { %235 = vst [vmem:[%s2669_s27 + $0xcc] sm:$0xff] %v234_v22  ;;  %237 = vst [vmem:[%s2669_s27 + $0xd4] sm:$0xff] %v236_v23  ;;  %v240_v25 = vld [vmem:[%s2664_s26 + $0x628] sm:$0xff]  ;;  %v242_v26 = vld [vmem:[%s2664_s26 + $0x630] sm:$0xff] }
  0x1f   : > { %239 = vst [vmem:[%s2669_s27 + $0xe0] sm:$0xff] %v238_v24  ;;  %241 = vst [vmem:[%s2669_s27 + $0xe8] sm:$0xff] %v240_v25  ;;  %v244_v27 = vld [vmem:[%s2664_s26 + $0x6e4] sm:$0xff]  ;;  %v246_v28 = vld [vmem:[%s2664_s26 + $0x6ec] sm:$0xff] }
  0x20   : > { %243 = vst [vmem:[%s2669_s27 + $0xf0] sm:$0xff] %v242_v26  ;;  %v248_v29 = vld [vmem:[%s2664_s26 + $0x6f4] sm:$0xff]  ;;  %245 = vst [vmem:[%s2669_s27 + $0xfc] sm:$0xff] %v244_v27  ;;  %v250_v30 = vld [vmem:[%s2664_s26 + $0x7a8] sm:$0xff] }
  0x21   : > { %247 = vst [vmem:[%s2669_s27 + $0x104] sm:$0xff] %v246_v28  ;;  %249 = vst [vmem:[%s2669_s27 + $0x10c] sm:$0xff] %v248_v29  ;;  %v252_v31 = vld [vmem:[%s2664_s26 + $0x7b0] sm:$0xff]  ;;  %v254_v32 = vld [vmem:[%s2664_s26 + $0x7b8] sm:$0xff] }
  0x22   : > { %251 = vst [vmem:[%s2669_s27 + $0x118] sm:$0xff] %v250_v30  ;;  %253 = vst [vmem:[%s2669_s27 + $0x120] sm:$0xff] %v252_v31  ;;  %v256_v33 = vld [vmem:[%s2664_s26 + $0x86c] sm:$0xff]  ;;  %v258_v34 = vld [vmem:[%s2664_s26 + $0x874] sm:$0xff] }
  0x23   : > { %255 = vst [vmem:[%s2669_s27 + $0x128] sm:$0xff] %v254_v32  ;;  %v260_v35 = vld [vmem:[%s2664_s26 + $0x87c] sm:$0xff]  ;;  %257 = vst [vmem:[%s2669_s27 + $0x134] sm:$0xff] %v256_v33  ;;  %v262_v36 = vld [vmem:[%s2664_s26 + $0x930] sm:$0xff] }
  0x24   : > { %259 = vst [vmem:[%s2669_s27 + $0x13c] sm:$0xff] %v258_v34  ;;  %261 = vst [vmem:[%s2669_s27 + $0x144] sm:$0xff] %v260_v35  ;;  %v264_v37 = vld [vmem:[%s2664_s26 + $0x938] sm:$0xff]  ;;  %v266_v38 = vld [vmem:[%s2664_s26 + $0x940] sm:$0xff] }
  0x25   : > { %263 = vst [vmem:[%s2669_s27 + $0x150] sm:$0xff] %v262_v36  ;;  %265 = vst [vmem:[%s2669_s27 + $0x158] sm:$0xff] %v264_v37  ;;  %v268_v39 = vld [vmem:[%s2664_s26 + $0x9f4] sm:$0xff]  ;;  %v270_v40 = vld [vmem:[%s2664_s26 + $0x9fc] sm:$0xff] }
  0x26   : > { %267 = vst [vmem:[%s2669_s27 + $0x160] sm:$0xff] %v266_v38  ;;  %v272_v41 = vld [vmem:[%s2664_s26 + $0xa04] sm:$0xff]  ;;  %269 = vst [vmem:[%s2669_s27 + $0x16c] sm:$0xff] %v268_v39  ;;  %v274_v42 = vld [vmem:[%s2664_s26 + $0xab8] sm:$0xff] }
  0x27   : > { %271 = vst [vmem:[%s2669_s27 + $0x174] sm:$0xff] %v270_v40  ;;  %273 = vst [vmem:[%s2669_s27 + $0x17c] sm:$0xff] %v272_v41  ;;  %v276_v43 = vld [vmem:[%s2664_s26 + $0xac0] sm:$0xff]  ;;  %v278_v44 = vld [vmem:[%s2664_s26 + $0xac8] sm:$0xff] }
  0x28   : > { %275 = vst [vmem:[%s2669_s27 + $0x188] sm:$0xff] %v274_v42  ;;  %277 = vst [vmem:[%s2669_s27 + $0x190] sm:$0xff] %v276_v43  ;;  %v280_v45 = vld [vmem:[%s2664_s26 + $0xb7c] sm:$0xff]  ;;  %v282_v46 = vld [vmem:[%s2664_s26 + $0xb84] sm:$0xff] }
  0x29   : > { %279 = vst [vmem:[%s2669_s27 + $0x198] sm:$0xff] %v278_v44  ;;  %v284_v47 = vld [vmem:[%s2664_s26 + $0xb8c] sm:$0xff]  ;;  %281 = vst [vmem:[%s2669_s27 + $0x1a4] sm:$0xff] %v280_v45  ;;  %v1908_v48 = vld [vmem:[%s2664_s26 + $0x18] sm:$0xf] }
  0x2a   : > { %283 = vst [vmem:[%s2669_s27 + $0x1ac] sm:$0xff] %v282_v46  ;;  %285 = vst [vmem:[%s2669_s27 + $0x1b4] sm:$0xff] %v284_v47  ;;  %v1910_v49 = vld [vmem:[%s2664_s26 + $0xdc] sm:$0xf]  ;;  %v1912_v50 = vld [vmem:[%s2664_s26 + $0x1a0] sm:$0xf] }
  0x2b   : > { %1909 = vst [vmem:[%s2669_s27 + $0x18] sm:$0xf] %v1908_v48  ;;  %1911 = vst [vmem:[%s2669_s27 + $0x34] sm:$0xf] %v1910_v49  ;;  %v1914_v51 = vld [vmem:[%s2664_s26 + $0x264] sm:$0xf] }
  0x2c   : > { %1913 = vst [vmem:[%s2669_s27 + $0x50] sm:$0xf] %v1912_v50  ;;  %v1916_v52 = vld [vmem:[%s2664_s26 + $0x328] sm:$0xf]  ;;  %v1918_v53 = vld [vmem:[%s2664_s26 + $0x3ec] sm:$0xf] }
  0x2d   : > { %1915 = vst [vmem:[%s2669_s27 + $0x6c] sm:$0xf] %v1914_v51  ;;  %1917 = vst [vmem:[%s2669_s27 + $0x88] sm:$0xf] %v1916_v52  ;;  %v1920_v54 = vld [vmem:[%s2664_s26 + $0x4b0] sm:$0xf] }
  0x2e   : > { %1919 = vst [vmem:[%s2669_s27 + $0xa4] sm:$0xf] %v1918_v53  ;;  %v1922_v55 = vld [vmem:[%s2664_s26 + $0x574] sm:$0xf]  ;;  %v1924_v56 = vld [vmem:[%s2664_s26 + $0x638] sm:$0xf] }
  0x2f   : > { %1921 = vst [vmem:[%s2669_s27 + $0xc0] sm:$0xf] %v1920_v54  ;;  %1923 = vst [vmem:[%s2669_s27 + $0xdc] sm:$0xf] %v1922_v55  ;;  %v1926_v57 = vld [vmem:[%s2664_s26 + $0x6fc] sm:$0xf] }
  0x30   : > { %1925 = vst [vmem:[%s2669_s27 + $0xf8] sm:$0xf] %v1924_v56  ;;  %v1928_v58 = vld [vmem:[%s2664_s26 + $0x7c0] sm:$0xf]  ;;  %v1930_v59 = vld [vmem:[%s2664_s26 + $0x884] sm:$0xf] }
  0x31   : > { %1927 = vst [vmem:[%s2669_s27 + $0x114] sm:$0xf] %v1926_v57  ;;  %1929 = vst [vmem:[%s2669_s27 + $0x130] sm:$0xf] %v1928_v58  ;;  %v1932_v60 = vld [vmem:[%s2664_s26 + $0x948] sm:$0xf] }
  0x32   : > { %1931 = vst [vmem:[%s2669_s27 + $0x14c] sm:$0xf] %v1930_v59  ;;  %v1934_v61 = vld [vmem:[%s2664_s26 + $0xa0c] sm:$0xf]  ;;  %v1936_v62 = vld [vmem:[%s2664_s26 + $0xad0] sm:$0xf] }
  0x33   : > { %1933 = vst [vmem:[%s2669_s27 + $0x168] sm:$0xf] %v1932_v60  ;;  %1935 = vst [vmem:[%s2669_s27 + $0x184] sm:$0xf] %v1934_v61  ;;  %v1938_v63 = vld [vmem:[%s2664_s26 + $0xb94] sm:$0xf] }
  0x34   : > { %1937 = vst [vmem:[%s2669_s27 + $0x1a0] sm:$0xf] %v1936_v62  ;;  %1939 = vst [vmem:[%s2669_s27 + $0x1bc] sm:$0xf] %v1938_v63 }
  0x35 PF: > { %p1940_p6 = scmp.ge.s32.totalorder %s2598_s16, 1  ;;  %p341_p7 = scmp.lt.s32.totalorder %s2598_s16, 8 }
  0x37   : > { %p342_p8 = pnand %p1940_p6, %p341_p7 }
  0x38   : > { %s348_s28 = sand.u32 (!%p342_p8), 1, %s2582_s12   ;;  %s387_s29 = smul.u32 (!%p342_p8), 112, %s2590_s14 }
  0x39   : > { %345 = sbr.rel (%p342_p8) target bundleno = 464 (0x1d0), region = 54  ;;  %p1942_p10 = scmp.ne.s32.totalorder (!%p342_p8), %s2590_s14, 0 }
  0x3a   : > { %s2382_s30 = smul.u32 (!%p342_p8), 448, %s348_s28  ;;  %p388_p9 = scmp.lt.s32.totalorder (!%p342_p8), %s387_s29, 783 }
  0x3c   : > { %s2805_s8 = scalar_lea.vmem (!%p342_p8), [#allocation3], %s2382_s30 }
  0x40   : > { %s3031_s29 = smov (!%p388_p9, %s387_s29), 783  ;;  %412 = sbr.rel (%p1942_p10) target bundleno = 74 (0x4a), region = 62 }
  0x41   : > { %s1941_s4 = sshll.u32 %s3031_s29, 2  ;;  %v2600_v0 = vmov (!%p1942_p10), 0.0  }
  0x42   : > { %s2803_s7 = scalar_lea.vmem %s3021_s1, %s1941_s4  ;;  %413 = vst [vmem:[#allocation2] sm:$0xff] (!%p1942_p10), %v2600_v0  ;;  %414 = vst [vmem:[#allocation2 + $0x8] sm:$0xff] (!%p1942_p10), %v2600_v0 }
  0x43   : > { %415 = vst [vmem:[#allocation2 + $0x10] sm:$0xff] (!%p1942_p10), %v2600_v0  ;;  %416 = vst [vmem:[#allocation2 + $0x18] sm:$0xff] (!%p1942_p10), %v2600_v0 }
  0x44   : > { %417 = vst [vmem:[#allocation2 + $0x20] sm:$0xff] (!%p1942_p10), %v2600_v0  ;;  %418 = vst [vmem:[#allocation2 + $0x28] sm:$0xff] (!%p1942_p10), %v2600_v0 }
  0x45   : > { %419 = vst [vmem:[#allocation2 + $0x30] sm:$0xff] (!%p1942_p10), %v2600_v0  ;;  %420 = vst [vmem:[#allocation2 + $0x38] sm:$0xff] (!%p1942_p10), %v2600_v0 }
  0x46   : > { %421 = vst [vmem:[#allocation2 + $0x40] sm:$0xff] (!%p1942_p10), %v2600_v0  ;;  %422 = vst [vmem:[#allocation2 + $0x48] sm:$0xff] (!%p1942_p10), %v2600_v0 }
  0x47   : > { %423 = vst [vmem:[#allocation2 + $0x50] sm:$0xff] %v2600_v0  ;;  %424 = vst [vmem:[#allocation2 + $0x58] sm:$0xff] %v2600_v0 }
  0x48   : > { %425 = vst [vmem:[#allocation2 + $0x60] sm:$0xff] %v2600_v0  ;;  %426 = vst [vmem:[#allocation2 + $0x68] sm:$0xff] %v2600_v0 }
  0x49   : > { %427 = vst [vmem:[#allocation2 + $0x70] sm:$0xff] %v2600_v0  ;;  %428 = vst [vmem:[#allocation2 + $0x78] sm:$0xff] %v2600_v0 }
  0x4a PF: > { %v2424_v1 = vld [vmem:[%s2803_s7 + $0x40] sm:$0xff]   ;;  %v2428_v5 = vld [vmem:[%s2803_s7 + $0x48] sm:$0xff]   ;;  %v2432_v9 = vld [vmem:[%s2803_s7 + $0x50] sm:$0xff]   ;;  %p2055_p11 = scmp.ne.s32.totalorder %s2590_s14, 6 }
  0x4b   : > { %v2425_v2 = vld [vmem:[%s2803_s7 + $0xc0] sm:$0xff]   ;;  %2141 = vmatprep.subr.bf16.mxu0 %v2424_v1  ;;  %v2429_v6 = vld [vmem:[%s2803_s7 + $0xc8] sm:$0xff]   ;;  %v2433_v10 = vld [vmem:[%s2803_s7 + $0xd0] sm:$0xff]  }
  0x4c   : > { %v2426_v3 = vld [vmem:[%s2803_s7] sm:$0xff]   ;;  %2205 = vmatprep.subr.bf16.mxu1 %v2425_v2  ;;  %v2430_v7 = vld [vmem:[%s2803_s7 + $0x8] sm:$0xff]   ;;  %v2434_v11 = vld [vmem:[%s2803_s7 + $0x10] sm:$0xff]  }
  0x4d   : > { %v2427_v4 = vld [vmem:[%s2803_s7 + $0x80] sm:$0xff]   ;;  %2142 = vmatpush3.bf16.msra.mxu0 %v2426_v3  ;;  %v2431_v8 = vld [vmem:[%s2803_s7 + $0x88] sm:$0xff]   ;;  %v2435_v12 = vld [vmem:[%s2803_s7 + $0x90] sm:$0xff]  }
  0x4e   : > { %2206 = vmatpush3.bf16.msra.mxu1 %v2427_v4  ;;  %2143 = vmatprep.subr.bf16.mxu0 %v2428_v5  ;;  %v2436_v13 = vld [vmem:[%s2803_s7 + $0x58] sm:$0xff]   ;;  %v2440_v17 = vld [vmem:[%s2803_s7 + $0x60] sm:$0xff]   ;;  %v2444_v21 = vld [vmem:[%s2803_s7 + $0x68] sm:$0xff]  }
  0x4f   : > { %2207 = vmatprep.subr.bf16.mxu1 %v2429_v6  ;;  %v2437_v14 = vld [vmem:[%s2803_s7 + $0xd8] sm:$0xff]   ;;  %v2441_v18 = vld [vmem:[%s2803_s7 + $0xe0] sm:$0xff]   ;;  %v2445_v22 = vld [vmem:[%s2803_s7 + $0xe8] sm:$0xff]  }
  0x50   : > { %v2438_v15 = vld [vmem:[%s2803_s7 + $0x18] sm:$0xff]   ;;  %v2442_v19 = vld [vmem:[%s2803_s7 + $0x20] sm:$0xff]   ;;  %v2446_v23 = vld [vmem:[%s2803_s7 + $0x28] sm:$0xff]  }
  0x51   : > { %2144 = vmatpush3.bf16.msra.mxu0 %v2430_v7  ;;  %v2439_v16 = vld [vmem:[%s2803_s7 + $0x98] sm:$0xff]   ;;  %v2443_v20 = vld [vmem:[%s2803_s7 + $0xa0] sm:$0xff]   ;;  %v2447_v24 = vld [vmem:[%s2803_s7 + $0xa8] sm:$0xff]  }
  0x52   : > { %2208 = vmatpush3.bf16.msra.mxu1 %v2431_v8  ;;  %2145 = vmatprep.subr.bf16.mxu0 %v2432_v9  ;;  %v2448_v25 = vld [vmem:[%s2803_s7 + $0x70] sm:$0xff]   ;;  %v2452_v29 = vld [vmem:[%s2803_s7 + $0x78] sm:$0xff]   ;;  %v2458_v34 = vld [vmem:[%s2805_s8 + $0x4] ss:$28 sps:$4 sm:$0xff]  }
  0x53   : > { %2209 = vmatprep.subr.bf16.mxu1 %v2433_v10  ;;  %v2449_v26 = vld [vmem:[%s2803_s7 + $0xf0] sm:$0xff]   ;;  %v2453_v30 = vld [vmem:[%s2803_s7 + $0xf8] sm:$0xff]   ;;  %v2459_v35 = vld [vmem:[%s2805_s8 + $0x8] ss:$28 sps:$4 sm:$0xff]   ;;  %1277 = vmatprep.mubr.bf16.mxu0 %v2458_v34 }
  0x54   : > { %v2450_v27 = vld [vmem:[%s2803_s7 + $0x30] sm:$0xff]   ;;  %v2454_v31 = vld [vmem:[%s2803_s7 + $0x38] sm:$0xff]   ;;  %v2461_v36 = vld [vmem:[%s2805_s8 + $0xc] ss:$28 sps:$4 sm:$0xff]  }
  0x55   : > { %2146 = vmatpush3.bf16.msra.mxu0 %v2434_v11  ;;  %v2451_v28 = vld [vmem:[%s2803_s7 + $0xb0] sm:$0xff]   ;;  %v2455_v32 = vld [vmem:[%s2803_s7 + $0xb8] sm:$0xff]   ;;  %v2462_v37 = vld [vmem:[%s2803_s7 + $0x140] sm:$0xff]   ;;  %1374 = vmatprep.mubr.bf16.mxu1 %v2461_v36 }
  0x56   : > { %2210 = vmatpush3.bf16.msra.mxu1 %v2435_v12  ;;  %2147 = vmatprep.subr.bf16.mxu0 %v2436_v13  ;;  %v2456_v33 = vld [vmem:[%s2805_s8] ss:$28 sps:$4 sm:$0xff]   ;;  %v2468_v41 = vld [vmem:[%s2805_s8 + $0x38] ss:$28 sps:$4 sm:$0xff]   ;;  %v2470_v43 = vld [vmem:[%s2803_s7 + $0x148] sm:$0xff]  }
  0x57   : > { %2211 = vmatprep.subr.bf16.mxu1 %v2437_v14  ;;  %v2463_v38 = vld [vmem:[%s2803_s7 + $0x100] sm:$0xff]   ;;  %v2464_v39 = vld [vmem:[%s2805_s8 + $0x3c] ss:$28 sps:$4 sm:$0xff]   ;;  %v2471_v44 = vld [vmem:[%s2803_s7 + $0x108] sm:$0xff]  }
  0x58   : > { %v2466_v40 = vld [vmem:[%s2805_s8 + $0x44] ss:$28 sps:$4 sm:$0xff]   ;;  %v2472_v45 = vld [vmem:[%s2805_s8 + $0x74] ss:$28 sps:$4 sm:$0xff]   ;;  %v2474_v46 = vld [vmem:[%s2805_s8 + $0x7c] ss:$28 sps:$4 sm:$0xff]  }
  0x59   : > { %2148 = vmatpush3.bf16.msra.mxu0 %v2438_v15  ;;  %v2469_v42 = vld [vmem:[%s2805_s8 + $0x40] ss:$28 sps:$4 sm:$0xff]   ;;  %v2478_v47 = vld [vmem:[%s2803_s7 + $0x150] sm:$0xff]   ;;  %v2480_v51 = vld [vmem:[%s2805_s8 + $0xac] ss:$28 sps:$4 sm:$0xff]  }
  0x5a   : > { %2212 = vmatpush3.bf16.msra.mxu1 %v2439_v16  ;;  %2149 = vmatprep.subr.bf16.mxu0 %v2440_v17  ;;  %v2479_v48 = vld [vmem:[%s2803_s7 + $0x110] sm:$0xff]   ;;  %v2486_v53 = vld [vmem:[%s2803_s7 + $0x158] sm:$0xff]   ;;  %v2484_v55 = vld [vmem:[%s2805_s8 + $0xa8] ss:$28 sps:$4 sm:$0xff]  }
  0x5b   : > { %2213 = vmatprep.subr.bf16.mxu1 %v2441_v18  ;;  %v2476_v49 = vld [vmem:[%s2805_s8 + $0x70] ss:$28 sps:$4 sm:$0xff]   ;;  %v2477_v50 = vld [vmem:[%s2805_s8 + $0x78] ss:$28 sps:$4 sm:$0xff]   ;;  %v2494_v56 = vld [vmem:[%s2803_s7 + $0x160] sm:$0xff]  }
  0x5c   : > { %v2482_v52 = vld [vmem:[%s2805_s8 + $0xb4] ss:$28 sps:$4 sm:$0xff]   ;;  %v2487_v54 = vld [vmem:[%s2803_s7 + $0x118] sm:$0xff]   ;;  %v2495_v58 = vld [vmem:[%s2803_s7 + $0x120] sm:$0xff]  }
  0x5d   : > { %2150 = vmatpush3.bf16.msra.mxu0 %v2442_v19  ;;  %v2485_v57 = vld [vmem:[%s2805_s8 + $0xb0] ss:$28 sps:$4 sm:$0xff]   ;;  %v2496_v59 = vld [vmem:[%s2803_s7 + $0x180] sm:$0xff]   ;;  %v2497_v4 = vld [vmem:[%s2805_s8 + $0x11c] ss:$28 sps:$4 sm:$0xff]  }
  0x5e   : > { %2214 = vmatpush3.bf16.msra.mxu1 %v2443_v20  ;;  %2151 = vmatprep.subr.bf16.mxu0 %v2444_v21  ;;  %v2488_v60 = vld [vmem:[%s2805_s8 + $0xe4] ss:$28 sps:$4 sm:$0xff]   ;;  %v2490_v61 = vld [vmem:[%s2805_s8 + $0xec] ss:$28 sps:$4 sm:$0xff]   ;;  %v2506_v1 = vld [vmem:[%s2803_s7 + $0x190] sm:$0xff]  }
  0x5f   : > { %2215 = vmatprep.subr.bf16.mxu1 %v2445_v22  ;;  %v2503_v62 = vld [vmem:[%s2803_s7 + $0x168] sm:$0xff]   ;;  %v2492_v2 = vld [vmem:[%s2805_s8 + $0xe0] ss:$28 sps:$4 sm:$0xff]   ;;  %v2513_v6 = vld [vmem:[%s2803_s7 + $0x170] sm:$0xff]  }
  0x60   : > { %v2504_v63 = vld [vmem:[%s2803_s7 + $0x188] sm:$0xff]   ;;  %v2499_v5 = vld [vmem:[%s2805_s8 + $0x124] ss:$28 sps:$4 sm:$0xff]   ;;  %v2514_v7 = vld [vmem:[%s2803_s7 + $0x198] sm:$0xff]  }
  0x61   : > { %2152 = vmatpush3.bf16.msra.mxu0 %v2446_v23  ;;  %v2505_v0 = vld [vmem:[%s2803_s7 + $0x128] sm:$0xff]   ;;  %v2515_v8 = vld [vmem:[%s2803_s7 + $0x130] sm:$0xff]   ;;  %v2516_v9 = vld [vmem:[%s2803_s7 + $0x1a0] sm:$0xff]  }
  0x62   : > { %2216 = vmatpush3.bf16.msra.mxu1 %v2447_v24  ;;  %2153 = vmatprep.subr.bf16.mxu0 %v2448_v25  ;;  %v2493_v3 = vld [vmem:[%s2805_s8 + $0xe8] ss:$28 sps:$4 sm:$0xff]   ;;  %v2501_v10 = vld [vmem:[%s2805_s8 + $0x118] ss:$28 sps:$4 sm:$0xff]   ;;  %v2502_v11 = vld [vmem:[%s2805_s8 + $0x120] ss:$28 sps:$4 sm:$0xff]  }
  0x63   : > { %2217 = vmatprep.subr.bf16.mxu1 %v2449_v26  ;;  %v2507_v12 = vld [vmem:[%s2805_s8 + $0x154] ss:$28 sps:$4 sm:$0xff]   ;;  %v2509_v13 = vld [vmem:[%s2805_s8 + $0x15c] ss:$28 sps:$4 sm:$0xff]   ;;  %v2524_v15 = vld [vmem:[%s2803_s7 + $0x1a8] sm:$0xff]  }
  0x64   : > { %v2523_v14 = vld [vmem:[%s2803_s7 + $0x178] sm:$0xff]   ;;  %v2526_v17 = vld [vmem:[%s2803_s7 + $0x1b0] sm:$0xff]   ;;  %v2517_v20 = vld [vmem:[%s2805_s8 + $0x18c] ss:$28 sps:$4 sm:$0xff]  }
  0x65   : > { %2154 = vmatpush3.bf16.msra.mxu0 %v2450_v27  ;;  %v2525_v16 = vld [vmem:[%s2803_s7 + $0x138] sm:$0xff]   ;;  %v2511_v18 = vld [vmem:[%s2805_s8 + $0x150] ss:$28 sps:$4 sm:$0xff]   ;;  %v2521_v23 = vld [vmem:[%s2805_s8 + $0x188] ss:$28 sps:$4 sm:$0xff]  }
  0x66   : > { %2218 = vmatpush3.bf16.msra.mxu1 %v2451_v28  ;;  %2155 = vmatprep.subr.bf16.mxu0 %v2452_v29  ;;  %v2512_v19 = vld [vmem:[%s2805_s8 + $0x158] ss:$28 sps:$4 sm:$0xff]   ;;  %v2522_v24 = vld [vmem:[%s2805_s8 + $0x190] ss:$28 sps:$4 sm:$0xff]  }
  0x67   : > { %2219 = vmatprep.subr.bf16.mxu1 %v2453_v30  ;;  %v2519_v21 = vld [vmem:[%s2805_s8 + $0x194] ss:$28 sps:$4 sm:$0xff]   ;;  %v2530_v22 = vld [vmem:[%s2803_s7 + $0x1b8] sm:$0xff]   ;;  %v2533_v29 = vld [vmem:[%s2805_s8 + $0x4c] ss:$28 sps:$4 sm:$0xff]  }
  0x68   : > { %v2529_v25 = vld [vmem:[%s2805_s8 + $0x14] ss:$28 sps:$4 sm:$0xff]   ;;  %v2539_v30 = vld [vmem:[%s2805_s8 + $0x88] ss:$28 sps:$4 sm:$0xff]   ;;  %v2541_v36 = vld [vmem:[%s2805_s8 + $0xbc] ss:$28 sps:$4 sm:$0xff]  }
  0x69   : > { %2156 = vmatpush3.bf16.msra.mxu0 %v2454_v31  ;;  %v2531_v26 = vld [vmem:[%s2805_s8 + $0x18] ss:$28 sps:$4 sm:$0xff]   ;;  %v2527_v27 = vld [vmem:[%s2805_s8 + $0x10] ss:$28 sps:$4 sm:$0xff]   ;;  %v2535_v31 = vld [vmem:[%s2805_s8 + $0x48] ss:$28 sps:$4 sm:$0xff]  }
  0x6a   : > { %2220 = vmatpush3.bf16.msra.mxu1 %v2455_v32  ;;  %2269 = vmatprep.subr.bf16.mxu0 %v2462_v37  ;;  %v2532_v28 = vld [vmem:[%s2805_s8 + $0x50] ss:$28 sps:$4 sm:$0xff]   ;;  %v2536_v32 = vld [vmem:[%s2805_s8 + $0x84] ss:$28 sps:$4 sm:$0xff]   ;;  %v2547_v34 = vld [vmem:[%s2805_s8 + $0xf8] ss:$28 sps:$4 sm:$0xff]  }
  0x6b   : > { %2349 = vmatprep.subr.bf16.mxu1 %v2496_v59  ;;  %v2548_v37 = vld [vmem:[%s2805_s8 + $0x130] ss:$28 sps:$4 sm:$0xff]  }
  0x6c   : > { %1278 = vmatmul.mubr.bf16.vlgmr.msra.gmra.mrb[0].mxu0 %v2456_v33  ;;  %v2540_v33 = vld [vmem:[%s2805_s8 + $0xc0] ss:$28 sps:$4 sm:$0xff]  }
  0x6d   : > { %1375 = vmatmul.mubr.bf16.vlgmr.msra.gmra.mrb[0].mxu1 %v2459_v35  ;;  %2270 = vmatpush3.bf16.msra.mxu0 %v2463_v38  ;;  %v2538_v35 = vld [vmem:[%s2805_s8 + $0x80] ss:$28 sps:$4 sm:$0xff]   ;;  %v2555_v38 = vld [vmem:[%s2805_s8 + $0x168] ss:$28 sps:$4 sm:$0xff]  }
  0x6e   : > { %1285 = vmatprep.mubr.bf16.mxu0 %v2464_v39  ;;  %1382 = vmatprep.mubr.bf16.mxu1 %v2466_v40  ;;  %v2543_v39 = vld [vmem:[%s2805_s8 + $0xb8] ss:$28 sps:$4 sm:$0xff]  }
  0x6f   : > { %2271 = vmatprep.subr.bf16.mxu0 %v2470_v43  ;;  %2350 = vmatpush3.bf16.msra.mxu1 %v2496_v59  ;;  %v2544_v40 = vld [vmem:[%s2805_s8 + $0xf4] ss:$28 sps:$4 sm:$0xff]   ;;  %v2549_v43 = vld [vmem:[%s2805_s8 + $0x12c] ss:$28 sps:$4 sm:$0xff]  }
  0x70   : > { %2351 = vmatprep.subr.bf16.mxu1 %v2504_v63 }
  0x71   : > { %2272 = vmatpush3.bf16.msra.mxu0 %v2471_v44  ;;  %v2551_v44 = vld [vmem:[%s2805_s8 + $0x128] ss:$28 sps:$4 sm:$0xff]  }
  0x72   : > { %2273 = vmatprep.subr.bf16.mxu0 %v2478_v47  ;;  %v2557_v47 = vld [vmem:[%s2805_s8 + $0x19c] ss:$28 sps:$4 sm:$0xff]  }
  0x73   : > { %2352 = vmatpush3.bf16.msra.mxu1 %v2504_v63 }
  0x74   : > { %1286 = vmatmul.mubr.bf16.gmra.mrb[4].mxu0 %v2468_v41  ;;  %2353 = vmatprep.subr.bf16.mxu1 %v2506_v1  ;;  %v2556_v41 = vld [vmem:[%s2805_s8 + $0x1a0] ss:$28 sps:$4 sm:$0xff]  }
  0x75   : > { %1383 = vmatmul.mubr.bf16.gmra.mrb[4].mxu1 %v2469_v42  ;;  %1293 = vmatprep.mubr.bf16.mxu0 %v2472_v45  ;;  %v2546_v42 = vld [vmem:[%s2805_s8 + $0xf0] ss:$28 sps:$4 sm:$0xff]   ;;  %v2552_v45 = vld [vmem:[%s2805_s8 + $0x164] ss:$28 sps:$4 sm:$0xff]  }
  0x76   : > { %1390 = vmatprep.mubr.bf16.mxu1 %v2474_v46  ;;  %2274 = vmatpush3.bf16.msra.mxu0 %v2479_v48  ;;  %v2554_v46 = vld [vmem:[%s2805_s8 + $0x160] ss:$28 sps:$4 sm:$0xff]   ;;  %v2559_v48 = vld [vmem:[%s2805_s8 + $0x198] ss:$28 sps:$4 sm:$0xff]  }
  0x77   : > { %2275 = vmatprep.subr.bf16.mxu0 %v2486_v53  ;;  %2354 = vmatpush3.bf16.msra.mxu1 %v2506_v1 }
  0x78   : > { %2355 = vmatprep.subr.bf16.mxu1 %v2514_v7 }
  0x7a   : > { %2276 = vmatpush3.bf16.msra.mxu0 %v2487_v54 }
  0x7b   : > { %2277 = vmatprep.subr.bf16.mxu0 %v2494_v56  ;;  %2356 = vmatpush3.bf16.msra.mxu1 %v2514_v7 }
  0x7c   : > { %1294 = vmatmul.mubr.bf16.gmra.mrb[8].mxu0 %v2476_v49  ;;  %2357 = vmatprep.subr.bf16.mxu1 %v2516_v9 }
  0x7d   : > { %1391 = vmatmul.mubr.bf16.gmra.mrb[8].mxu1 %v2477_v50  ;;  %1301 = vmatprep.mubr.bf16.mxu0 %v2480_v51 }
  0x7e   : > { %1398 = vmatprep.mubr.bf16.mxu1 %v2482_v52  ;;  %2278 = vmatpush3.bf16.msra.mxu0 %v2495_v58 }
  0x7f   : > { %2279 = vmatprep.subr.bf16.mxu0 %v2503_v62  ;;  %2358 = vmatpush3.bf16.msra.mxu1 %v2516_v9 }
  0x80   : > { %2359 = vmatprep.subr.bf16.mxu1 %v2524_v15 }
  0x82   : > { %2280 = vmatpush3.bf16.msra.mxu0 %v2505_v0 }
  0x83   : > { %2281 = vmatprep.subr.bf16.mxu0 %v2513_v6  ;;  %2360 = vmatpush3.bf16.msra.mxu1 %v2524_v15 }
  0x84   : > { %1302 = vmatmul.mubr.bf16.gmra.mrb[12].mxu0 %v2484_v55  ;;  %2361 = vmatprep.subr.bf16.mxu1 %v2526_v17 }
  0x85   : > { %1399 = vmatmul.mubr.bf16.gmra.mrb[12].mxu1 %v2485_v57  ;;  %1309 = vmatprep.mubr.bf16.mxu0 %v2488_v60 }
  0x86   : > { %1406 = vmatprep.mubr.bf16.mxu1 %v2490_v61  ;;  %2282 = vmatpush3.bf16.msra.mxu0 %v2515_v8 }
  0x87   : > { %2283 = vmatprep.subr.bf16.mxu0 %v2523_v14  ;;  %2362 = vmatpush3.bf16.msra.mxu1 %v2526_v17 }
  0x88   : > { %2363 = vmatprep.subr.bf16.mxu1 %v2530_v22 }
  0x8a   : > { %2284 = vmatpush3.bf16.msra.mxu0 %v2525_v16 }
  0x8b   : > { %2364 = vmatpush3.bf16.msra.mxu1 %v2530_v22 }
  0x8c   : > { %1310 = vmatmul.mubr.bf16.gmra.mrb[16].mxu0 %v2492_v2 }
  0x8d   : > { %1407 = vmatmul.mubr.bf16.gmra.mrb[16].mxu1 %v2493_v3  ;;  %1317 = vmatprep.mubr.bf16.mxu0 %v2497_v4 }
  0x8e   : > { %1414 = vmatprep.mubr.bf16.mxu1 %v2499_v5 }
  0x94   : > { %1318 = vmatmul.mubr.bf16.gmra.mrb[20].mxu0 %v2501_v10 }
  0x95   : > { %1415 = vmatmul.mubr.bf16.gmra.mrb[20].mxu1 %v2502_v11  ;;  %1325 = vmatprep.mubr.bf16.mxu0 %v2507_v12 }
  0x96   : > { %1422 = vmatprep.mubr.bf16.mxu1 %v2509_v13 }
  0x9c   : > { %1326 = vmatmul.mubr.bf16.gmra.mrb[24].mxu0 %v2511_v18 }
  0x9d   : > { %1423 = vmatmul.mubr.bf16.gmra.mrb[24].mxu1 %v2512_v19  ;;  %1333 = vmatprep.mubr.bf16.mxu0 %v2517_v20 }
  0x9e   : > { %1430 = vmatprep.mubr.bf16.mxu1 %v2519_v21 }
  0xa4   : > { %1334 = vmatmul.mubr.bf16.gmra.mrb[28].mxu0 %v2521_v23 }
  0xa5   : > { %1431 = vmatmul.mubr.bf16.gmra.mrb[28].mxu1 %v2522_v24  ;;  %1471 = vmatprep.mubr.bf16.mxu0 %v2529_v25 }
  0xa6   : > { %2365 = vmatprep.mubr.bf16.mxu1 %v2531_v26 }
  0xac   : > { %1472 = vmatmul.mubr.bf16.vlgmr.msra.gmra.mrb[32].mxu0 %v2527_v27 }
  0xad   : > { %2366 = vmatmul.mubr.bf16.vlgmr.msra.gmra.mrb[32].mxu1 %v2532_v28  ;;  %1479 = vmatprep.mubr.bf16.mxu0 %v2533_v29 }
  0xae   : > { %2369 = vmatprep.mubr.bf16.mxu1 %v2539_v30 }
  0xb4   : > { %1480 = vmatmul.mubr.bf16.gmra.mrb[36].mxu0 %v2535_v31 }
  0xb5   : > { %1487 = vmatprep.mubr.bf16.mxu0 %v2536_v32  ;;  %2370 = vmatmul.mubr.bf16.gmra.mrb[36].mxu1 %v2540_v33 }
  0xb6   : > { %2373 = vmatprep.mubr.bf16.mxu1 %v2547_v34 }
  0xbc   : > { %1488 = vmatmul.mubr.bf16.gmra.mrb[40].mxu0 %v2538_v35 }
  0xbd   : > { %1495 = vmatprep.mubr.bf16.mxu0 %v2541_v36  ;;  %2374 = vmatmul.mubr.bf16.gmra.mrb[40].mxu1 %v2548_v37 }
  0xbe   : > { %2377 = vmatprep.mubr.bf16.mxu1 %v2555_v38 }
  0xc4   : > { %1496 = vmatmul.mubr.bf16.gmra.mrb[44].mxu0 %v2543_v39 }
  0xc5   : > { %1503 = vmatprep.mubr.bf16.mxu0 %v2544_v40  ;;  %2378 = vmatmul.mubr.bf16.gmra.mrb[44].mxu1 %v2556_v41 }
  0xcc   : > { %1504 = vmatmul.mubr.bf16.gmra.mrb[48].mxu0 %v2546_v42 }
  0xcd   : > { %1511 = vmatprep.mubr.bf16.mxu0 %v2549_v43 }
  0xd4   : > { %1512 = vmatmul.mubr.bf16.gmra.mrb[52].mxu0 %v2551_v44 }
  0xd5   : > { %1519 = vmatprep.mubr.bf16.mxu0 %v2552_v45 }
  0xdc   : > { %1520 = vmatmul.mubr.bf16.gmra.mrb[56].mxu0 %v2554_v46 }
  0xdd   : > { %1527 = vmatprep.mubr.bf16.mxu0 %v2557_v47 }
  0xe4   : > { %1528 = vmatmul.mubr.bf16.gmra.mrb[60].mxu0 %v2559_v48 }
 0x13f   : > { %v2157_v49 = vpop.f32.mrb[0].mxu0 }
 0x140   : > { %v2221_v50 = vpop.f32.mrb[0].mxu1  ;;  %v2158_v51 = vpop.f32.mrb[1].mxu0 }
 0x141   : > { %v2159_v52 = vadd.f32 %v2158_v51, %v2157_v49  ;;  %v2222_v53 = vpop.f32.mrb[1].mxu1  ;;  %v2160_v54 = vpop.f32.mrb[2].mxu0 }
 0x142   : > { %v2223_v55 = vadd.f32 %v2222_v53, %v2221_v50  ;;  %v2224_v56 = vpop.f32.mrb[2].mxu1  ;;  %v2161_v57 = vpop.f32.mrb[3].mxu0 }
 0x143   : > { %v2162_v58 = vadd.f32 %v2161_v57, %v2160_v54  ;;  %v2225_v59 = vpop.f32.mrb[3].mxu1 }
 0x144   : > { %v2920_v60 = vadd.f32 %v2223_v55, %v2159_v52  ;;  %v2226_v61 = vadd.f32 %v2225_v59, %v2224_v56 }
 0x146   : > { %v2922_v62 = vadd.f32 %v2226_v61, %v2162_v58 }
 0x147   : > { %v2163_v63 = vpop.f32.mrb[4].mxu0 }
 0x148   : > { %v2227_v0 = vpop.f32.mrb[4].mxu1  ;;  %v2164_v1 = vpop.f32.mrb[5].mxu0 }
 0x149   : > { %v2165_v2 = vadd.f32 %v2164_v1, %v2163_v63  ;;  %v2228_v3 = vpop.f32.mrb[5].mxu1  ;;  %v2166_v4 = vpop.f32.mrb[6].mxu0 }
 0x14a   : > { %v2229_v5 = vadd.f32 %v2228_v3, %v2227_v0  ;;  %v2230_v6 = vpop.f32.mrb[6].mxu1  ;;  %v2167_v7 = vpop.f32.mrb[7].mxu0 }
 0x14b   : > { %v2168_v8 = vadd.f32 %v2167_v7, %v2166_v4  ;;  %v2231_v9 = vpop.f32.mrb[7].mxu1 }
 0x14c   : > { %v2924_v10 = vadd.f32 %v2229_v5, %v2165_v2  ;;  %v2232_v11 = vadd.f32 %v2231_v9, %v2230_v6 }
 0x14e   : > { %v2926_v12 = vadd.f32 %v2232_v11, %v2168_v8 }
 0x14f   : > { %v2169_v13 = vpop.f32.mrb[8].mxu0 }
 0x150   : > { %v2233_v14 = vpop.f32.mrb[8].mxu1  ;;  %v2170_v15 = vpop.f32.mrb[9].mxu0 }
 0x151   : > { %v2171_v16 = vadd.f32 %v2170_v15, %v2169_v13  ;;  %v2234_v17 = vpop.f32.mrb[9].mxu1  ;;  %v2172_v18 = vpop.f32.mrb[10].mxu0 }
 0x152   : > { %v2235_v19 = vadd.f32 %v2234_v17, %v2233_v14  ;;  %v2236_v20 = vpop.f32.mrb[10].mxu1  ;;  %v2173_v21 = vpop.f32.mrb[11].mxu0 }
 0x153   : > { %v2174_v22 = vadd.f32 %v2173_v21, %v2172_v18  ;;  %v2237_v23 = vpop.f32.mrb[11].mxu1 }
 0x154   : > { %v2928_v24 = vadd.f32 %v2235_v19, %v2171_v16  ;;  %v2238_v25 = vadd.f32 %v2237_v23, %v2236_v20 }
 0x156   : > { %v2930_v26 = vadd.f32 %v2238_v25, %v2174_v22 }
 0x157   : > { %v2175_v27 = vpop.f32.mrb[12].mxu0 }
 0x158   : > { %v2239_v28 = vpop.f32.mrb[12].mxu1  ;;  %v2176_v29 = vpop.f32.mrb[13].mxu0 }
 0x159   : > { %v2177_v30 = vadd.f32 %v2176_v29, %v2175_v27  ;;  %v2240_v31 = vpop.f32.mrb[13].mxu1  ;;  %v2178_v32 = vpop.f32.mrb[14].mxu0 }
 0x15a   : > { %v2241_v33 = vadd.f32 %v2240_v31, %v2239_v28  ;;  %v2242_v34 = vpop.f32.mrb[14].mxu1  ;;  %v2179_v35 = vpop.f32.mrb[15].mxu0 }
 0x15b   : > { %v2180_v36 = vadd.f32 %v2179_v35, %v2178_v32  ;;  %v2243_v37 = vpop.f32.mrb[15].mxu1 }
 0x15c   : > { %v2932_v38 = vadd.f32 %v2241_v33, %v2177_v30  ;;  %v2244_v39 = vadd.f32 %v2243_v37, %v2242_v34 }
 0x15e   : > { %v2934_v40 = vadd.f32 %v2244_v39, %v2180_v36 }
 0x15f   : > { %v2181_v41 = vpop.f32.mrb[16].mxu0 }
 0x160   : > { %v2245_v42 = vpop.f32.mrb[16].mxu1  ;;  %v2182_v43 = vpop.f32.mrb[17].mxu0 }
 0x161   : > { %v2183_v44 = vadd.f32 %v2182_v43, %v2181_v41  ;;  %v2246_v45 = vpop.f32.mrb[17].mxu1  ;;  %v2184_v46 = vpop.f32.mrb[18].mxu0 }
 0x162   : > { %v2247_v47 = vadd.f32 %v2246_v45, %v2245_v42  ;;  %v2248_v48 = vpop.f32.mrb[18].mxu1  ;;  %v2185_v49 = vpop.f32.mrb[19].mxu0 }
 0x163   : > { %v2186_v50 = vadd.f32 %v2185_v49, %v2184_v46  ;;  %v2249_v51 = vpop.f32.mrb[19].mxu1 }
 0x164   : > { %v2936_v52 = vadd.f32 %v2247_v47, %v2183_v44  ;;  %v2250_v53 = vadd.f32 %v2249_v51, %v2248_v48 }
 0x166   : > { %v2938_v54 = vadd.f32 %v2250_v53, %v2186_v50  ;;  %v429_v53 = vld [vmem:[#allocation2] sm:$0xff] }
 0x167   : > { %v2187_v55 = vpop.f32.mrb[20].mxu0 }
 0x168   : > { %v2251_v56 = vpop.f32.mrb[20].mxu1  ;;  %v2188_v57 = vpop.f32.mrb[21].mxu0 }
 0x169   : > { %v2189_v58 = vadd.f32 %v2188_v57, %v2187_v55  ;;  %v2252_v59 = vpop.f32.mrb[21].mxu1  ;;  %v2190_v61 = vpop.f32.mrb[22].mxu0  ;;  %v430_v57 = vld [vmem:[#allocation2 + $0x8] sm:$0xff] }
 0x16a   : > { %v2253_v63 = vadd.f32 %v2252_v59, %v2251_v56  ;;  %v2254_v0 = vpop.f32.mrb[22].mxu1  ;;  %v2191_v1 = vpop.f32.mrb[23].mxu0 }
 0x16b   : > { %v2192_v2 = vadd.f32 %v2191_v1, %v2190_v61  ;;  %v2255_v3 = vpop.f32.mrb[23].mxu1 }
 0x16c   : > { %v2940_v4 = vadd.f32 %v2253_v63, %v2189_v58  ;;  %v2256_v5 = vadd.f32 %v2255_v3, %v2254_v0 }
 0x16e   : > { %v2942_v6 = vadd.f32 %v2256_v5, %v2192_v2 }
 0x16f   : > { %v2193_v7 = vpop.f32.mrb[24].mxu0 }
 0x170   : > { %v2257_v8 = vpop.f32.mrb[24].mxu1  ;;  %v2194_v9 = vpop.f32.mrb[25].mxu0 }
 0x171   : > { %v2195_v11 = vadd.f32 %v2194_v9, %v2193_v7  ;;  %v2258_v13 = vpop.f32.mrb[25].mxu1  ;;  %v2196_v14 = vpop.f32.mrb[26].mxu0 }
 0x172   : > { %v2259_v15 = vadd.f32 %v2258_v13, %v2257_v8  ;;  %v2260_v16 = vpop.f32.mrb[26].mxu1  ;;  %v2197_v17 = vpop.f32.mrb[27].mxu0  ;;  %v431_v13 = vld [vmem:[#allocation2 + $0x10] sm:$0xff] }
 0x173   : > { %v2198_v18 = vadd.f32 %v2197_v17, %v2196_v14  ;;  %v2261_v19 = vpop.f32.mrb[27].mxu1 }
 0x174   : > { %v2944_v20 = vadd.f32 %v2259_v15, %v2195_v11  ;;  %v2262_v21 = vadd.f32 %v2261_v19, %v2260_v16  ;;  %v432_v15 = vld [vmem:[#allocation2 + $0x18] sm:$0xff] }
 0x176   : > { %v2946_v22 = vadd.f32 %v2262_v21, %v2198_v18 }
 0x177   : > { %v2199_v23 = vpop.f32.mrb[28].mxu0 }
 0x178   : > { %v2263_v25 = vpop.f32.mrb[28].mxu1  ;;  %v2200_v27 = vpop.f32.mrb[29].mxu0 }
 0x179   : > { %v2201_v28 = vadd.f32 %v2200_v27, %v2199_v23  ;;  %v2264_v29 = vpop.f32.mrb[29].mxu1  ;;  %v2202_v30 = vpop.f32.mrb[30].mxu0 }
 0x17a   : > { %v2265_v31 = vadd.f32 %v2264_v29, %v2263_v25  ;;  %v2266_v32 = vpop.f32.mrb[30].mxu1  ;;  %v2203_v33 = vpop.f32.mrb[31].mxu0 }
 0x17b   : > { %v2204_v34 = vadd.f32 %v2203_v33, %v2202_v30  ;;  %v2267_v35 = vpop.f32.mrb[31].mxu1 }
 0x17c   : > { %v2948_v36 = vadd.f32 %v2265_v31, %v2201_v28  ;;  %v2268_v37 = vadd.f32 %v2267_v35, %v2266_v32  ;;  %v434_v35 = vld [vmem:[#allocation2 + $0x28] sm:$0xff] }
 0x17e   : > { %v2950_v39 = vadd.f32 %v2268_v37, %v2204_v34 }
 0x17f   : > { %v2285_v41 = vpop.f32.mrb[32].mxu0 }
 0x180   : > { %v2286_v42 = vpop.f32.mrb[33].mxu0  ;;  %v2367_v43 = vpop.f32.mrb[32].mxu1 }
 0x181   : > { %v2287_v44 = vadd.f32 %v2286_v42, %v2285_v41  ;;  %v2288_v45 = vpop.f32.mrb[34].mxu0  ;;  %v1570_v46 = vpop.f32.mrb[33].mxu1 }
 0x182   : > { %v2289_v47 = vpop.f32.mrb[35].mxu0  ;;  %v2368_v48 = vpop.f32.mrb[34].mxu1 }
 0x183   : > { %v2290_v49 = vadd.f32 %v2289_v47, %v2288_v45  ;;  %v1474_v50 = vadd.f32 %v2287_v44, %v2920_v60  ;;  %v1573_v51 = vpop.f32.mrb[35].mxu1 }
 0x185   : > { %v1571_v55 = vadd.f32 %v1570_v46, %v1474_v50  ;;  %v1477_v56 = vadd.f32 %v2290_v49, %v2922_v62 }
 0x187   : > { %v1633_v58 = vadd.f32 %v1571_v55, %v429_v53  ;;  %v1574_v59 = vadd.f32 %v1573_v51, %v1477_v56  ;;  %v2291_v61 = vpop.f32.mrb[36].mxu0  ;;  %v435_v53 = vld [vmem:[#allocation2 + $0x30] sm:$0xff] }
 0x188   : > { %v2292_v63 = vpop.f32.mrb[37].mxu0  ;;  %v2371_v0 = vpop.f32.mrb[36].mxu1 }
 0x189   : > { %1649 = vst [vmem:[#allocation2] sm:$0xff] %v1633_v58  ;;  %v1634_v1 = vadd.f32 %v1574_v59, %v430_v57  ;;  %v2293_v2 = vadd.f32 %v2292_v63, %v2291_v61  ;;  %v2294_v3 = vpop.f32.mrb[38].mxu0  ;;  %v1586_v5 = vpop.f32.mrb[37].mxu1  ;;  %v436_v57 = vld [vmem:[#allocation2 + $0x38] sm:$0xff] }
 0x18a   : > { %v2295_v7 = vpop.f32.mrb[39].mxu0  ;;  %v2372_v8 = vpop.f32.mrb[38].mxu1 }
 0x18b   : > { %1650 = vst [vmem:[#allocation2 + $0x8] sm:$0xff] %v1634_v1  ;;  %v1482_v60 = vadd.f32 %v2293_v2, %v2924_v10  ;;  %v2296_v9 = vadd.f32 %v2295_v7, %v2294_v3  ;;  %v1589_v11 = vpop.f32.mrb[39].mxu1 }
 0x18d   : > { %v1579_v62 = vadd.f32 %v2367_v43, %v1482_v60  ;;  %v1485_v14 = vadd.f32 %v2296_v9, %v2926_v12  ;;  %v433_v12 = vld [vmem:[#allocation2 + $0x20] sm:$0xff] }
 0x18e   : > { %v437_v60 = vld [vmem:[#allocation2 + $0x40] sm:$0xff] }
 0x18f   : > { %v1635_v16 = vadd.f32 %v1579_v62, %v431_v13  ;;  %v1582_v17 = vadd.f32 %v2368_v48, %v1485_v14  ;;  %v2297_v18 = vpop.f32.mrb[40].mxu0 }
 0x190   : > { %v2298_v19 = vpop.f32.mrb[41].mxu0  ;;  %v2956_v21 = vpop.f32.mrb[40].mxu1 }
 0x191   : > { %1651 = vst [vmem:[#allocation2 + $0x10] sm:$0xff] %v1635_v16  ;;  %v1636_v23 = vadd.f32 %v1582_v17, %v432_v15  ;;  %v2299_v25 = vadd.f32 %v2298_v19, %v2297_v18  ;;  %v2300_v27 = vpop.f32.mrb[42].mxu0  ;;  %v1602_v28 = vpop.f32.mrb[41].mxu1 }
 0x192   : > { %v2301_v29 = vpop.f32.mrb[43].mxu0  ;;  %v2376_v10 = vpop.f32.mrb[42].mxu1 }
 0x193   : > { %1652 = vst [vmem:[#allocation2 + $0x18] sm:$0xff] %v1636_v23  ;;  %v2302_v30 = vadd.f32 %v2301_v29, %v2300_v27  ;;  %v1490_v31 = vadd.f32 %v2299_v25, %v2928_v24  ;;  %v1605_v32 = vpop.f32.mrb[43].mxu1  ;;  %v439_v23 = vld [vmem:[#allocation2 + $0x50] sm:$0xff] }
 0x195   : > { %v1587_v33 = vadd.f32 %v1586_v5, %v1490_v31  ;;  %v1493_v34 = vadd.f32 %v2302_v30, %v2930_v26 }
 0x197   : > { %v1637_v37 = vadd.f32 %v1587_v33, %v433_v12  ;;  %v1590_v41 = vadd.f32 %v1589_v11, %v1493_v34  ;;  %v2303_v42 = vpop.f32.mrb[44].mxu0  ;;  %v438_v11 = vld [vmem:[#allocation2 + $0x48] sm:$0xff] }
 0x198   : > { %v2304_v43 = vpop.f32.mrb[45].mxu0  ;;  %v2960_v44 = vpop.f32.mrb[44].mxu1 }
 0x199   : > { %1653 = vst [vmem:[#allocation2 + $0x20] sm:$0xff] %v1637_v37  ;;  %v1638_v45 = vadd.f32 %v1590_v41, %v434_v35  ;;  %v2305_v46 = vadd.f32 %v2304_v43, %v2303_v42  ;;  %v2306_v47 = vpop.f32.mrb[46].mxu0  ;;  %v1618_v48 = vpop.f32.mrb[45].mxu1  ;;  %v441_v35 = vld [vmem:[#allocation2 + $0x60] sm:$0xff]  ;;  %v442_v41 = vld [vmem:[#allocation2 + $0x68] sm:$0xff] }
 0x19a   : > { %v2307_v49 = vpop.f32.mrb[47].mxu0  ;;  %v2962_v50 = vpop.f32.mrb[46].mxu1 }
 0x19b   : > { %1654 = vst [vmem:[#allocation2 + $0x28] sm:$0xff] %v1638_v45  ;;  %v1498_v24 = vadd.f32 %v2305_v46, %v2932_v38  ;;  %v2308_v51 = vadd.f32 %v2307_v49, %v2306_v47  ;;  %v1621_v26 = vpop.f32.mrb[47].mxu1 }
 0x19d   : > { %v1595_v55 = vadd.f32 %v2371_v0, %v1498_v24  ;;  %v1501_v56 = vadd.f32 %v2308_v51, %v2934_v40 }
 0x19f   : > { %v1639_v58 = vadd.f32 %v1595_v55, %v435_v53  ;;  %v1598_v59 = vadd.f32 %v2372_v8, %v1501_v56  ;;  %v2309_v61 = vpop.f32.mrb[48].mxu0  ;;  %v443_v53 = vld [vmem:[#allocation2 + $0x70] sm:$0xff] }
 0x1a0   : > { %v2310_v63 = vpop.f32.mrb[49].mxu0 }
 0x1a1   : > { %1655 = vst [vmem:[#allocation2 + $0x30] sm:$0xff] %v1639_v58  ;;  %v1640_v1 = vadd.f32 %v1598_v59, %v436_v57  ;;  %v2311_v2 = vadd.f32 %v2310_v63, %v2309_v61  ;;  %v2312_v3 = vpop.f32.mrb[50].mxu0  ;;  %v1669_v57 = vld [vmem:[#allocation2] sm:$0xff] (!%p2055_p11)  ;;  %v1670_v58 = vld [vmem:[#allocation2 + $0x8] sm:$0xff] (!%p2055_p11)  ;;  %v1671_v61 = vld [vmem:[#allocation2 + $0x10] sm:$0xff] (!%p2055_p11) }
 0x1a2   : > { %v2313_v5 = vpop.f32.mrb[51].mxu0  ;;  %v1673_v63 = vld [vmem:[#allocation2 + $0x20] sm:$0xff] (!%p2055_p11) }
 0x1a3   : > { %1656 = vst [vmem:[#allocation2 + $0x38] sm:$0xff] %v1640_v1  ;;  %v2314_v7 = vadd.f32 %v2313_v5, %v2312_v3  ;;  %v1506_v38 = vadd.f32 %v2311_v2, %v2936_v52 }
 0x1a5   : > { %v1603_v9 = vadd.f32 %v1602_v28, %v1506_v38  ;;  %v1509_v0 = vadd.f32 %v2314_v7, %v2938_v54  ;;  %v440_v54 = vld [vmem:[#allocation2 + $0x58] sm:$0xff] }
 0x1a7   : > { %v1641_v40 = vadd.f32 %v1603_v9, %v437_v60  ;;  %v1606_v13 = vadd.f32 %v1605_v32, %v1509_v0  ;;  %v2315_v62 = vpop.f32.mrb[52].mxu0 }
 0x1a8   : > { %v2316_v8 = vpop.f32.mrb[53].mxu0  ;;  %v1675_v5 = vld [vmem:[#allocation2 + $0x30] sm:$0xff] (!%p2055_p11) }
 0x1a9   : > { %1657 = vst [vmem:[#allocation2 + $0x40] sm:$0xff] %v1641_v40  ;;  %v1642_v14 = vadd.f32 %v1606_v13, %v438_v11  ;;  %v2317_v15 = vadd.f32 %v2316_v8, %v2315_v62  ;;  %v2318_v16 = vpop.f32.mrb[54].mxu0 }
 0x1aa   : > { %v2319_v17 = vpop.f32.mrb[55].mxu0  ;;  %v1676_v7 = vld [vmem:[#allocation2 + $0x38] sm:$0xff] (!%p2055_p11) }
 0x1ab   : > { %1658 = vst [vmem:[#allocation2 + $0x48] sm:$0xff] %v1642_v14  ;;  %v1514_v18 = vadd.f32 %v2317_v15, %v2940_v4  ;;  %v2320_v19 = vadd.f32 %v2319_v17, %v2318_v16 }
 0x1ad   : > { %v1611_v52 = vadd.f32 %v2956_v21, %v1514_v18  ;;  %v1517_v25 = vadd.f32 %v2320_v19, %v2942_v6 }
 0x1af   : > { %v1643_v27 = vadd.f32 %v1611_v52, %v439_v23  ;;  %v1614_v28 = vadd.f32 %v2376_v10, %v1517_v25  ;;  %v2321_v29 = vpop.f32.mrb[56].mxu0 }
 0x1b0   : > { %v2322_v30 = vpop.f32.mrb[57].mxu0  ;;  %v1677_v11 = vld [vmem:[#allocation2 + $0x40] sm:$0xff] (!%p2055_p11) }
 0x1b1   : > { %1659 = vst [vmem:[#allocation2 + $0x50] sm:$0xff] %v1643_v27  ;;  %v1644_v31 = vadd.f32 %v1614_v28, %v440_v54  ;;  %v2323_v32 = vadd.f32 %v2322_v30, %v2321_v29  ;;  %v2324_v12 = vpop.f32.mrb[58].mxu0 }
 0x1b2   : > { %v2325_v33 = vpop.f32.mrb[59].mxu0  ;;  %v1678_v40 = vld [vmem:[#allocation2 + $0x48] sm:$0xff] (!%p2055_p11) }
 0x1b3   : > { %1660 = vst [vmem:[#allocation2 + $0x58] sm:$0xff] %v1644_v31  ;;  %v2326_v34 = vadd.f32 %v2325_v33, %v2324_v12  ;;  %v1522_v4 = vadd.f32 %v2323_v32, %v2944_v20 }
 0x1b5   : > { %v1619_v37 = vadd.f32 %v1618_v48, %v1522_v4  ;;  %v1525_v21 = vadd.f32 %v2326_v34, %v2946_v22  ;;  %v444_v22 = vld [vmem:[#allocation2 + $0x78] sm:$0xff] }
 0x1b7   : > { %v1645_v6 = vadd.f32 %v1619_v37, %v441_v35  ;;  %v1622_v42 = vadd.f32 %v1621_v26, %v1525_v21  ;;  %v2327_v43 = vpop.f32.mrb[60].mxu0 }
 0x1b8   : > { %v2328_v10 = vpop.f32.mrb[61].mxu0  ;;  %v1679_v13 = vld [vmem:[#allocation2 + $0x50] sm:$0xff] (!%p2055_p11) }
 0x1b9   : > { %1661 = vst [vmem:[#allocation2 + $0x60] sm:$0xff] %v1645_v6  ;;  %v1646_v45 = vadd.f32 %v1622_v42, %v442_v41  ;;  %v2329_v46 = vadd.f32 %v2328_v10, %v2327_v43  ;;  %v2330_v47 = vpop.f32.mrb[62].mxu0 }
 0x1ba   : > { %v2331_v49 = vpop.f32.mrb[63].mxu0  ;;  %v1680_v15 = vld [vmem:[#allocation2 + $0x58] sm:$0xff] (!%p2055_p11) }
 0x1bb   : > { %1662 = vst [vmem:[#allocation2 + $0x68] sm:$0xff] %v1646_v45  ;;  %v1530_v24 = vadd.f32 %v2329_v46, %v2948_v36  ;;  %v2332_v51 = vadd.f32 %v2331_v49, %v2330_v47  ;;  %v2056_v36 = vld [vmem:[%s3022_s2] ss:$0 sm:$0xff] (!%p2055_p11) }
 0x1bc   : > { %v1692_v59 = vadd.f32 (!%p2055_p11), %v2056_v36, %v1669_v57  ;;  %v1694_v1 = vadd.f32 (!%p2055_p11), %v2056_v36, %v1671_v61  ;;  %v1696_v3 = vadd.f32 (!%p2055_p11), %v2056_v36, %v1673_v63  ;;  %v1698_v9 = vadd.f32 (!%p2055_p11), %v2056_v36, %v1675_v5 }
 0x1bd   : > { %v1627_v20 = vadd.f32 %v2960_v44, %v1530_v24  ;;  %v1533_v48 = vadd.f32 %v2332_v51, %v2950_v39  ;;  %1668 = sbr.rel (%p2055_p11) target bundleno = 464 (0x1d0), region = 66  ;;  %v1693_v44 = vadd.f32 (!%p2055_p11), %v2056_v36, %v1670_v58  ;;  %v1672_v39 = vld [vmem:[#allocation2 + $0x18] sm:$0xff] (!%p2055_p11)  ;;  %v1699_v0 = vadd.f32 (!%p2055_p11), %v2056_v36, %v1676_v7 }
 0x1be   : > { %v1695_v2 = vadd.f32 (!%p2055_p11), %v2056_v36, %v1672_v39  ;;  %v1700_v8 = vadd.f32 (!%p2055_p11), %v2056_v36, %v1677_v11  ;;  %v1701_v14 = vadd.f32 (!%p2055_p11), %v2056_v36, %v1678_v40  ;;  %v1702_v16 = vadd.f32 (!%p2055_p11), %v2056_v36, %v1679_v13 }
 0x1bf   : > { %v1647_v55 = vadd.f32 %v1627_v20, %v443_v53  ;;  %v1630_v26 = vadd.f32 %v2962_v50, %v1533_v48  ;;  %v1674_v50 = vld [vmem:[#allocation2 + $0x28] sm:$0xff] (!%p2055_p11)  ;;  %v2097_v38 = vpack.c.bf16 (!%p2055_p11), %v1693_v44, %v1692_v59  ;;  %v2112_v23 = vpack.c.bf16 (!%p2055_p11), %v1699_v0, %v1698_v9 }
 0x1c0   : > { %v1697_v60 = vadd.f32 (!%p2055_p11), %v2056_v36, %v1674_v50  ;;  %v2102_v62 = vpack.c.bf16 (!%p2055_p11), %v1695_v2, %v1694_v1  ;;  %v1681_v17 = vld [vmem:[#allocation2 + $0x60] sm:$0xff] (!%p2055_p11)  ;;  %v1703_v52 = vadd.f32 (!%p2055_p11), %v2056_v36, %v1680_v15  ;;  %v2117_v28 = vpack.c.bf16 (!%p2055_p11), %v1701_v14, %v1700_v8 }
 0x1c1   : > { %1663 = vst [vmem:[#allocation2 + $0x70] sm:$0xff] %v1647_v55  ;;  %v1648_v56 = vadd.f32 %v1630_v26, %v444_v22  ;;  %2098 = vst [vmem:[%s3023_s3] sm:$0xff] (!%p2055_p11), %v2097_v38   ;;  %v1704_v25 = vadd.f32 (!%p2055_p11), %v2056_v36, %v1681_v17 }
 0x1c2   : > { %v1682_v18 = vld [vmem:[#allocation2 + $0x68] sm:$0xff] (!%p2055_p11)  ;;  %v2107_v19 = vpack.c.bf16 (!%p2055_p11), %v1697_v60, %v1696_v3  ;;  %2134 = vst [vmem:[%s3023_s3 + $0x8] sm:$0xff] (!%p2055_p11), %v2102_v62   ;;  %2136 = vst [vmem:[%s3023_s3 + $0x18] sm:$0xff] (!%p2055_p11), %v2112_v23   ;;  %v2122_v32 = vpack.c.bf16 (!%p2055_p11), %v1703_v52, %v1702_v16 }
 0x1c3   : > { %1664 = vst [vmem:[#allocation2 + $0x78] sm:$0xff] %v1648_v56  ;;  %v1705_v29 = vadd.f32 (!%p2055_p11), %v2056_v36, %v1682_v18  ;;  %2137 = vst [vmem:[%s3023_s3 + $0x20] sm:$0xff] (!%p2055_p11), %v2117_v28  }
 0x1c4   : > { %2135 = vst [vmem:[%s3023_s3 + $0x10] sm:$0xff] %v2107_v19   ;;  %2138 = vst [vmem:[%s3023_s3 + $0x28] sm:$0xff] %v2122_v32  }
 0x1c5   : > { %v2127_v12 = vpack.c.bf16 %v1705_v29, %v1704_v25 }
 0x1c7   : > { %2139 = vst [vmem:[%s3023_s3 + $0x30] sm:$0xff] %v2127_v12  }
 0x1c8   : > { %v1683_v54 = vld [vmem:[#allocation2 + $0x70] sm:$0xff] }
 0x1c9   : > { %v1706_v30 = vadd.f32 %v2056_v36, %v1683_v54 }
 0x1ca   : > { %v1684_v27 = vld [vmem:[#allocation2 + $0x78] sm:$0xff] }
 0x1cb   : > { %v1707_v31 = vadd.f32 %v2056_v36, %v1684_v27 }
 0x1cd   : > { %v2132_v33 = vpack.c.bf16 %v1707_v31, %v1706_v30 }
 0x1cf   : > { %2140 = vst [vmem:[%s3023_s3 + $0x38] sm:$0xff] %v2132_v33  }
 0x1d0 PF: > { %s13_s16 = sadd.s32 1, %s2598_s16   ;;  %s3024_s12 = smov %s2586_s13 }
 0x1d1   : > { %p10_p12 = scmp.ge.s32.totalorder %s13_s16, 9   ;;  %s3025_s13 = smov %s2656_s20 }
 0x1d2   : > { %s3026_s14 = smov %s2594_s15  ;;  %s3027_s15 = smov %s3029_s17 }
 0x1d3   :  { %12 = sbr.rel (!%p10_p12) target bundleno = 3 (0x3), region = 113 }

// kernel: fpm_forward.13
= control target key start
LH: loop header
LB: loop body
LE: loop exit
PB: predicated region body
PF: predicated region fallthrough
CT: control target
= control target key end

     0   :  { %s2164_s12 = smov 0   ;;  %s2166_s13 = smov 0   ;;  %s2478_s0 = inlined_call_operand.vmem [shape: bf16[128,3200], index: 0, kind: input, shape index: {}]   ;;  %s2479_s1 = inlined_call_operand.vmem [shape: bf16[3200,128], index: 1, kind: input, shape index: {}]   ;;  %s2480_s2 = inlined_call_operand.vmem [shape: f32[1,128], index: 2, kind: input, shape index: {}]   ;;  %s2481_s3 = inlined_call_operand.vmem [shape: bf16[128,128], index: 3, kind: output, shape index: {}]  }
   0x1   :  { %s2168_s14 = smov 0   ;;  %s2170_s15 = smov 0  }
   0x2   :  { %s2172_s16 = smov 0  }
   0x3 LB: > { %s25_s17 = sadd.s32 1, %s2137_s15  ;;  %p48_p1 = scmp.ne.s32.totalorder %s2129_s13, %s2125_s12  ;;  %s2141_s16 = sphi %s2172_s16, %s13_s16   ;;  %s2137_s15 = sphi %s2170_s15, %s2485_s15   ;;  %s2133_s14 = sphi %s2168_s14, %s2484_s14   ;;  %s2129_s13 = sphi %s2166_s13, %s2483_s13   ;;  %s2125_s12 = sphi %s2164_s12, %s2482_s12  }
   0x4   : > { %p26_p0 = scmp.ge.s32.totalorder %s25_s17, 5  ;;  %p49_p2 = scmp.eq.s32.totalorder %s2141_s16, 0 }
   0x5   : > { %s41_s19 = sadd.s32 1, %s2129_s13  ;;  %p1569_p5 = scmp.ge.s32.totalorder %s2141_s16, 5 }
   0x6   : > { %s2487_s17 = smov (%p26_p0, %s25_s17), 0  ;;  %p50_p3 = por %p49_p2, %p48_p1 }
   0x7   : > { %s37_s18 = ssub.s32 %s2137_s15, %s2487_s17  ;;  %162 = sbr.rel (%p1569_p5) target bundleno = 45 (0x2d), region = 20 }
   0x8   : > { %p39_p4 = scmp.eq.s32.totalorder %s37_s18, 0 }
   0xa   : > { %s2199_s20 = scalar_select %p39_p4, %s2129_s13, %s41_s19  }
   0xe   : > { %165 = sbr.rel (!%p50_p3) target bundleno = 45 (0x2d), region = 24  ;;  %s167_s21 = sand.u32 (%p50_p3), 1, %s2129_s13  }
   0xf   : > { %s1708_s22 = smul.u32 (%p50_p3), 20, %s2137_s15 }
  0x10   : > { %s1964_s23 = smul.u32 (%p50_p3), 320, %s167_s21 }
  0x11   : > { %s2207_s26 = scalar_lea.vmem (%p50_p3), %s2478_s0, %s1708_s22 }
  0x12   : > { %v190_v0 = vld [vmem:[%s2207_s26] sm:$0xff] (%p50_p3)  ;;  %v192_v1 = vld [vmem:[%s2207_s26 + $0x8] sm:$0xff] (%p50_p3)  ;;  %s2212_s27 = scalar_lea.vmem (%p50_p3), [#allocation3], %s1964_s23  ;;  %v200_v5 = vld [vmem:[%s2207_s26 + $0xd0] sm:$0xff] (%p50_p3) }
  0x13   : > { %v194_v2 = vld [vmem:[%s2207_s26 + $0x64] sm:$0xff] (%p50_p3)  ;;  %191 = vst [vmem:[%s2212_s27] sm:$0xff] (%p50_p3), %v190_v0  ;;  %193 = vst [vmem:[%s2212_s27 + $0x8] sm:$0xff] (%p50_p3), %v192_v1  ;;  %v196_v3 = vld [vmem:[%s2207_s26 + $0x6c] sm:$0xff] (%p50_p3) }
  0x14   : > { %195 = vst [vmem:[%s2212_s27 + $0x14] sm:$0xff] (%p50_p3), %v194_v2  ;;  %v198_v4 = vld [vmem:[%s2207_s26 + $0xc8] sm:$0xff] (%p50_p3)  ;;  %197 = vst [vmem:[%s2212_s27 + $0x1c] sm:$0xff] (%p50_p3), %v196_v3  ;;  %v204_v7 = vld [vmem:[%s2207_s26 + $0x134] sm:$0xff] (%p50_p3) }
  0x15   : > { %199 = vst [vmem:[%s2212_s27 + $0x28] sm:$0xff] %v198_v4  ;;  %201 = vst [vmem:[%s2212_s27 + $0x30] sm:$0xff] %v200_v5  ;;  %v202_v6 = vld [vmem:[%s2207_s26 + $0x12c] sm:$0xff]  ;;  %v208_v9 = vld [vmem:[%s2207_s26 + $0x198] sm:$0xff] }
  0x16   : > { %v206_v8 = vld [vmem:[%s2207_s26 + $0x190] sm:$0xff]  ;;  %203 = vst [vmem:[%s2212_s27 + $0x3c] sm:$0xff] %v202_v6  ;;  %205 = vst [vmem:[%s2212_s27 + $0x44] sm:$0xff] %v204_v7  ;;  %v212_v11 = vld [vmem:[%s2207_s26 + $0x1fc] sm:$0xff] }
  0x17   : > { %207 = vst [vmem:[%s2212_s27 + $0x50] sm:$0xff] %v206_v8  ;;  %v210_v10 = vld [vmem:[%s2207_s26 + $0x1f4] sm:$0xff]  ;;  %209 = vst [vmem:[%s2212_s27 + $0x58] sm:$0xff] %v208_v9  ;;  %v216_v13 = vld [vmem:[%s2207_s26 + $0x260] sm:$0xff] }
  0x18   : > { %211 = vst [vmem:[%s2212_s27 + $0x64] sm:$0xff] %v210_v10  ;;  %213 = vst [vmem:[%s2212_s27 + $0x6c] sm:$0xff] %v212_v11  ;;  %v214_v12 = vld [vmem:[%s2207_s26 + $0x258] sm:$0xff]  ;;  %v220_v15 = vld [vmem:[%s2207_s26 + $0x2c4] sm:$0xff] }
  0x19   : > { %v218_v14 = vld [vmem:[%s2207_s26 + $0x2bc] sm:$0xff]  ;;  %215 = vst [vmem:[%s2212_s27 + $0x78] sm:$0xff] %v214_v12  ;;  %217 = vst [vmem:[%s2212_s27 + $0x80] sm:$0xff] %v216_v13  ;;  %v224_v17 = vld [vmem:[%s2207_s26 + $0x328] sm:$0xff] }
  0x1a   : > { %219 = vst [vmem:[%s2212_s27 + $0x8c] sm:$0xff] %v218_v14  ;;  %v222_v16 = vld [vmem:[%s2207_s26 + $0x320] sm:$0xff]  ;;  %221 = vst [vmem:[%s2212_s27 + $0x94] sm:$0xff] %v220_v15  ;;  %v228_v19 = vld [vmem:[%s2207_s26 + $0x38c] sm:$0xff] }
  0x1b   : > { %223 = vst [vmem:[%s2212_s27 + $0xa0] sm:$0xff] %v222_v16  ;;  %225 = vst [vmem:[%s2212_s27 + $0xa8] sm:$0xff] %v224_v17  ;;  %v226_v18 = vld [vmem:[%s2207_s26 + $0x384] sm:$0xff]  ;;  %v232_v21 = vld [vmem:[%s2207_s26 + $0x3f0] sm:$0xff] }
  0x1c   : > { %v230_v20 = vld [vmem:[%s2207_s26 + $0x3e8] sm:$0xff]  ;;  %227 = vst [vmem:[%s2212_s27 + $0xb4] sm:$0xff] %v226_v18  ;;  %229 = vst [vmem:[%s2212_s27 + $0xbc] sm:$0xff] %v228_v19  ;;  %v236_v23 = vld [vmem:[%s2207_s26 + $0x454] sm:$0xff] }
  0x1d   : > { %231 = vst [vmem:[%s2212_s27 + $0xc8] sm:$0xff] %v230_v20  ;;  %v234_v22 = vld [vmem:[%s2207_s26 + $0x44c] sm:$0xff]  ;;  %233 = vst [vmem:[%s2212_s27 + $0xd0] sm:$0xff] %v232_v21  ;;  %v240_v25 = vld [vmem:[%s2207_s26 + $0x4b8] sm:$0xff] }
  0x1e   : > { %235 = vst [vmem:[%s2212_s27 + $0xdc] sm:$0xff] %v234_v22  ;;  %237 = vst [vmem:[%s2212_s27 + $0xe4] sm:$0xff] %v236_v23  ;;  %v238_v24 = vld [vmem:[%s2207_s26 + $0x4b0] sm:$0xff]  ;;  %v244_v27 = vld [vmem:[%s2207_s26 + $0x51c] sm:$0xff] }
  0x1f   : > { %v242_v26 = vld [vmem:[%s2207_s26 + $0x514] sm:$0xff]  ;;  %239 = vst [vmem:[%s2212_s27 + $0xf0] sm:$0xff] %v238_v24  ;;  %241 = vst [vmem:[%s2212_s27 + $0xf8] sm:$0xff] %v240_v25  ;;  %v248_v29 = vld [vmem:[%s2207_s26 + $0x580] sm:$0xff] }
  0x20   : > { %243 = vst [vmem:[%s2212_s27 + $0x104] sm:$0xff] %v242_v26  ;;  %v246_v28 = vld [vmem:[%s2207_s26 + $0x578] sm:$0xff]  ;;  %245 = vst [vmem:[%s2212_s27 + $0x10c] sm:$0xff] %v244_v27  ;;  %v252_v31 = vld [vmem:[%s2207_s26 + $0x5e4] sm:$0xff] }
  0x21   : > { %247 = vst [vmem:[%s2212_s27 + $0x118] sm:$0xff] %v246_v28  ;;  %249 = vst [vmem:[%s2212_s27 + $0x120] sm:$0xff] %v248_v29  ;;  %v250_v30 = vld [vmem:[%s2207_s26 + $0x5dc] sm:$0xff]  ;;  %v1571_v32 = vld [vmem:[%s2207_s26 + $0x10] sm:$0xf] }
  0x22   : > { %251 = vst [vmem:[%s2212_s27 + $0x12c] sm:$0xff] %v250_v30  ;;  %253 = vst [vmem:[%s2212_s27 + $0x134] sm:$0xff] %v252_v31  ;;  %v1573_v33 = vld [vmem:[%s2207_s26 + $0x74] sm:$0xf]  ;;  %v1575_v34 = vld [vmem:[%s2207_s26 + $0xd8] sm:$0xf] }
  0x23   : > { %1572 = vst [vmem:[%s2212_s27 + $0x10] sm:$0xf] %v1571_v32  ;;  %v1577_v35 = vld [vmem:[%s2207_s26 + $0x13c] sm:$0xf]  ;;  %1574 = vst [vmem:[%s2212_s27 + $0x24] sm:$0xf] %v1573_v33 }
  0x24   : > { %1576 = vst [vmem:[%s2212_s27 + $0x38] sm:$0xf] %v1575_v34  ;;  %1578 = vst [vmem:[%s2212_s27 + $0x4c] sm:$0xf] %v1577_v35  ;;  %v1579_v36 = vld [vmem:[%s2207_s26 + $0x1a0] sm:$0xf] }
  0x25   : > { %v1581_v37 = vld [vmem:[%s2207_s26 + $0x204] sm:$0xf]  ;;  %v1583_v38 = vld [vmem:[%s2207_s26 + $0x268] sm:$0xf]  ;;  %1580 = vst [vmem:[%s2212_s27 + $0x60] sm:$0xf] %v1579_v36 }
  0x26   : > { %1582 = vst [vmem:[%s2212_s27 + $0x74] sm:$0xf] %v1581_v37  ;;  %1584 = vst [vmem:[%s2212_s27 + $0x88] sm:$0xf] %v1583_v38  ;;  %v1585_v39 = vld [vmem:[%s2207_s26 + $0x2cc] sm:$0xf] }
  0x27   : > { %v1587_v40 = vld [vmem:[%s2207_s26 + $0x330] sm:$0xf]  ;;  %v1589_v41 = vld [vmem:[%s2207_s26 + $0x394] sm:$0xf]  ;;  %1586 = vst [vmem:[%s2212_s27 + $0x9c] sm:$0xf] %v1585_v39 }
  0x28   : > { %1588 = vst [vmem:[%s2212_s27 + $0xb0] sm:$0xf] %v1587_v40  ;;  %1590 = vst [vmem:[%s2212_s27 + $0xc4] sm:$0xf] %v1589_v41  ;;  %v1591_v42 = vld [vmem:[%s2207_s26 + $0x3f8] sm:$0xf] }
  0x29   : > { %v1593_v43 = vld [vmem:[%s2207_s26 + $0x45c] sm:$0xf]  ;;  %v1595_v44 = vld [vmem:[%s2207_s26 + $0x4c0] sm:$0xf]  ;;  %1592 = vst [vmem:[%s2212_s27 + $0xd8] sm:$0xf] %v1591_v42 }
  0x2a   : > { %1594 = vst [vmem:[%s2212_s27 + $0xec] sm:$0xf] %v1593_v43  ;;  %1596 = vst [vmem:[%s2212_s27 + $0x100] sm:$0xf] %v1595_v44  ;;  %v1597_v45 = vld [vmem:[%s2207_s26 + $0x524] sm:$0xf] }
  0x2b   : > { %v1599_v46 = vld [vmem:[%s2207_s26 + $0x588] sm:$0xf]  ;;  %v1601_v47 = vld [vmem:[%s2207_s26 + $0x5ec] sm:$0xf]  ;;  %1598 = vst [vmem:[%s2212_s27 + $0x114] sm:$0xf] %v1597_v45 }
  0x2c   : > { %1600 = vst [vmem:[%s2212_s27 + $0x128] sm:$0xf] %v1599_v46  ;;  %1602 = vst [vmem:[%s2212_s27 + $0x13c] sm:$0xf] %v1601_v47 }
  0x2d PF: > { %p1603_p6 = scmp.ge.s32.totalorder %s2141_s16, 1  ;;  %p309_p7 = scmp.lt.s32.totalorder %s2141_s16, 6 }
  0x2f   : > { %p310_p8 = pnand %p1603_p6, %p309_p7 }
  0x30   : > { %s316_s28 = sand.u32 (!%p310_p8), 1, %s2125_s12   ;;  %s355_s29 = smul.u32 (!%p310_p8), 80, %s2133_s14 }
  0x31   : > { %313 = sbr.rel (%p310_p8) target bundleno = 407 (0x197), region = 54  ;;  %p1605_p10 = scmp.ne.s32.totalorder (!%p310_p8), %s2133_s14, 0 }
  0x32   : > { %s1965_s30 = smul.u32 (!%p310_p8), 320, %s316_s28  ;;  %p356_p9 = scmp.lt.s32.totalorder (!%p310_p8), %s355_s29, 399 }
  0x34   : > { %s2316_s8 = scalar_lea.vmem (!%p310_p8), [#allocation3], %s1965_s30 }
  0x38   : > { %s2489_s29 = smov (!%p356_p9, %s355_s29), 399  ;;  %380 = sbr.rel (%p1605_p10) target bundleno = 66 (0x42), region = 62 }
  0x39   : > { %s1604_s4 = sshll.u32 %s2489_s29, 2  ;;  %v2143_v48 = vmov (!%p1605_p10), 0.0  }
  0x3a   : > { %s2314_s7 = scalar_lea.vmem %s2479_s1, %s1604_s4  ;;  %381 = vst [vmem:[#allocation2] sm:$0xff] (!%p1605_p10), %v2143_v48  ;;  %382 = vst [vmem:[#allocation2 + $0x8] sm:$0xff] (!%p1605_p10), %v2143_v48 }
  0x3b   : > { %383 = vst [vmem:[#allocation2 + $0x10] sm:$0xff] (!%p1605_p10), %v2143_v48  ;;  %384 = vst [vmem:[#allocation2 + $0x18] sm:$0xff] (!%p1605_p10), %v2143_v48 }
  0x3c   : > { %385 = vst [vmem:[#allocation2 + $0x20] sm:$0xff] (!%p1605_p10), %v2143_v48  ;;  %386 = vst [vmem:[#allocation2 + $0x28] sm:$0xff] (!%p1605_p10), %v2143_v48 }
  0x3d   : > { %387 = vst [vmem:[#allocation2 + $0x30] sm:$0xff] (!%p1605_p10), %v2143_v48  ;;  %388 = vst [vmem:[#allocation2 + $0x38] sm:$0xff] (!%p1605_p10), %v2143_v48 }
  0x3e   : > { %389 = vst [vmem:[#allocation2 + $0x40] sm:$0xff] (!%p1605_p10), %v2143_v48  ;;  %390 = vst [vmem:[#allocation2 + $0x48] sm:$0xff] (!%p1605_p10), %v2143_v48 }
  0x3f   : > { %391 = vst [vmem:[#allocation2 + $0x50] sm:$0xff] %v2143_v48  ;;  %392 = vst [vmem:[#allocation2 + $0x58] sm:$0xff] %v2143_v48 }
  0x40   : > { %393 = vst [vmem:[#allocation2 + $0x60] sm:$0xff] %v2143_v48  ;;  %394 = vst [vmem:[#allocation2 + $0x68] sm:$0xff] %v2143_v48 }
  0x41   : > { %395 = vst [vmem:[#allocation2 + $0x70] sm:$0xff] %v2143_v48  ;;  %396 = vst [vmem:[#allocation2 + $0x78] sm:$0xff] %v2143_v48 }
  0x42 PF: > { %v2007_v49 = vld [vmem:[%s2314_s7 + $0x40] sm:$0xff]   ;;  %v2011_v53 = vld [vmem:[%s2314_s7 + $0x48] sm:$0xff]   ;;  %v2015_v57 = vld [vmem:[%s2314_s7 + $0x50] sm:$0xff]   ;;  %p1686_p11 = scmp.ne.s32.totalorder %s2133_s14, 4 }
  0x43   : > { %v2008_v50 = vld [vmem:[%s2314_s7 + $0xc0] sm:$0xff]   ;;  %1772 = vmatprep.subr.bf16.mxu0 %v2007_v49  ;;  %v2012_v54 = vld [vmem:[%s2314_s7 + $0xc8] sm:$0xff]   ;;  %v2016_v58 = vld [vmem:[%s2314_s7 + $0xd0] sm:$0xff]  }
  0x44   : > { %v2009_v51 = vld [vmem:[%s2314_s7] sm:$0xff]   ;;  %1836 = vmatprep.subr.bf16.mxu1 %v2008_v50  ;;  %v2013_v55 = vld [vmem:[%s2314_s7 + $0x8] sm:$0xff]   ;;  %v2017_v59 = vld [vmem:[%s2314_s7 + $0x10] sm:$0xff]  }
  0x45   : > { %v2010_v52 = vld [vmem:[%s2314_s7 + $0x80] sm:$0xff]   ;;  %1773 = vmatpush3.bf16.msra.mxu0 %v2009_v51  ;;  %v2014_v56 = vld [vmem:[%s2314_s7 + $0x88] sm:$0xff]   ;;  %v2018_v60 = vld [vmem:[%s2314_s7 + $0x90] sm:$0xff]  }
  0x46   : > { %1837 = vmatpush3.bf16.msra.mxu1 %v2010_v52  ;;  %1774 = vmatprep.subr.bf16.mxu0 %v2011_v53  ;;  %v2019_v61 = vld [vmem:[%s2314_s7 + $0x58] sm:$0xff]   ;;  %v2023_v1 = vld [vmem:[%s2314_s7 + $0x60] sm:$0xff]   ;;  %v2027_v5 = vld [vmem:[%s2314_s7 + $0x68] sm:$0xff]  }
  0x47   : > { %1838 = vmatprep.subr.bf16.mxu1 %v2012_v54  ;;  %v2020_v62 = vld [vmem:[%s2314_s7 + $0xd8] sm:$0xff]   ;;  %v2024_v2 = vld [vmem:[%s2314_s7 + $0xe0] sm:$0xff]   ;;  %v2028_v6 = vld [vmem:[%s2314_s7 + $0xe8] sm:$0xff]  }
  0x48   : > { %v2021_v63 = vld [vmem:[%s2314_s7 + $0x18] sm:$0xff]   ;;  %v2025_v3 = vld [vmem:[%s2314_s7 + $0x20] sm:$0xff]   ;;  %v2029_v7 = vld [vmem:[%s2314_s7 + $0x28] sm:$0xff]  }
  0x49   : > { %1775 = vmatpush3.bf16.msra.mxu0 %v2013_v55  ;;  %v2022_v0 = vld [vmem:[%s2314_s7 + $0x98] sm:$0xff]   ;;  %v2026_v4 = vld [vmem:[%s2314_s7 + $0xa0] sm:$0xff]   ;;  %v2030_v8 = vld [vmem:[%s2314_s7 + $0xa8] sm:$0xff]  }
  0x4a   : > { %1839 = vmatpush3.bf16.msra.mxu1 %v2014_v56  ;;  %1776 = vmatprep.subr.bf16.mxu0 %v2015_v57  ;;  %v2031_v9 = vld [vmem:[%s2314_s7 + $0x70] sm:$0xff]   ;;  %v2035_v13 = vld [vmem:[%s2314_s7 + $0x78] sm:$0xff]   ;;  %v2044_v20 = vld [vmem:[%s2316_s8 + $0xc] ss:$20 sps:$4 sm:$0xff]  }
  0x4b   : > { %1840 = vmatprep.subr.bf16.mxu1 %v2016_v58  ;;  %v2032_v10 = vld [vmem:[%s2314_s7 + $0xf0] sm:$0xff]   ;;  %v2036_v14 = vld [vmem:[%s2314_s7 + $0xf8] sm:$0xff]   ;;  %v2045_v21 = vld [vmem:[%s2314_s7 + $0x100] sm:$0xff]   ;;  %1118 = vmatprep.mubr.bf16.mxu1 %v2044_v20 }
  0x4c   : > { %v2033_v11 = vld [vmem:[%s2314_s7 + $0x30] sm:$0xff]   ;;  %v2037_v15 = vld [vmem:[%s2314_s7 + $0x38] sm:$0xff]   ;;  %v2046_v22 = vld [vmem:[%s2316_s8 + $0x2c] ss:$20 sps:$4 sm:$0xff]  }
  0x4d   : > { %1777 = vmatpush3.bf16.msra.mxu0 %v2017_v59  ;;  %v2034_v12 = vld [vmem:[%s2314_s7 + $0xb0] sm:$0xff]   ;;  %v2038_v16 = vld [vmem:[%s2314_s7 + $0xb8] sm:$0xff]   ;;  %v2052_v24 = vld [vmem:[%s2314_s7 + $0x108] sm:$0xff]  }
  0x4e   : > { %1841 = vmatpush3.bf16.msra.mxu1 %v2018_v60  ;;  %1778 = vmatprep.subr.bf16.mxu0 %v2019_v61  ;;  %v2039_v17 = vld [vmem:[%s2316_s8] ss:$20 sps:$4 sm:$0xff]   ;;  %v2041_v18 = vld [vmem:[%s2316_s8 + $0x4] ss:$20 sps:$4 sm:$0xff]   ;;  %v2042_v19 = vld [vmem:[%s2316_s8 + $0x8] ss:$20 sps:$4 sm:$0xff]  }
  0x4f   : > { %1842 = vmatprep.subr.bf16.mxu1 %v2020_v62  ;;  %1021 = vmatprep.mubr.bf16.mxu0 %v2041_v18  ;;  %v2048_v23 = vld [vmem:[%s2316_s8 + $0x34] ss:$20 sps:$4 sm:$0xff]   ;;  %v2051_v26 = vld [vmem:[%s2316_s8 + $0x30] ss:$20 sps:$4 sm:$0xff]   ;;  %v2066_v30 = vld [vmem:[%s2314_s7 + $0x118] sm:$0xff]  }
  0x50   : > { %v2050_v25 = vld [vmem:[%s2316_s8 + $0x28] ss:$20 sps:$4 sm:$0xff]   ;;  %v2059_v29 = vld [vmem:[%s2314_s7 + $0x110] sm:$0xff]   ;;  %v2058_v32 = vld [vmem:[%s2316_s8 + $0x58] ss:$20 sps:$4 sm:$0xff]  }
  0x51   : > { %1779 = vmatpush3.bf16.msra.mxu0 %v2021_v63  ;;  %v2053_v27 = vld [vmem:[%s2316_s8 + $0x54] ss:$20 sps:$4 sm:$0xff]   ;;  %v2055_v28 = vld [vmem:[%s2316_s8 + $0x5c] ss:$20 sps:$4 sm:$0xff]   ;;  %v2062_v34 = vld [vmem:[%s2316_s8 + $0x84] ss:$20 sps:$4 sm:$0xff]  }
  0x52   : > { %1843 = vmatpush3.bf16.msra.mxu1 %v2022_v0  ;;  %1780 = vmatprep.subr.bf16.mxu0 %v2023_v1  ;;  %v2057_v31 = vld [vmem:[%s2316_s8 + $0x50] ss:$20 sps:$4 sm:$0xff]   ;;  %v2080_v36 = vld [vmem:[%s2314_s7 + $0x128] sm:$0xff]   ;;  %v2065_v38 = vld [vmem:[%s2316_s8 + $0x80] ss:$20 sps:$4 sm:$0xff]  }
  0x53   : > { %1844 = vmatprep.subr.bf16.mxu1 %v2024_v2  ;;  %v2060_v33 = vld [vmem:[%s2316_s8 + $0x7c] ss:$20 sps:$4 sm:$0xff]   ;;  %v2073_v35 = vld [vmem:[%s2314_s7 + $0x120] sm:$0xff]   ;;  %v2064_v37 = vld [vmem:[%s2316_s8 + $0x78] ss:$20 sps:$4 sm:$0xff]  }
  0x54   : > { %v2067_v39 = vld [vmem:[%s2316_s8 + $0xa4] ss:$20 sps:$4 sm:$0xff]   ;;  %v2087_v40 = vld [vmem:[%s2314_s7 + $0x130] sm:$0xff]   ;;  %v2069_v41 = vld [vmem:[%s2316_s8 + $0xac] ss:$20 sps:$4 sm:$0xff]  }
  0x55   : > { %1781 = vmatpush3.bf16.msra.mxu0 %v2025_v3  ;;  %v2094_v42 = vld [vmem:[%s2314_s7 + $0x138] sm:$0xff]   ;;  %v2071_v43 = vld [vmem:[%s2316_s8 + $0xa0] ss:$20 sps:$4 sm:$0xff]   ;;  %v2079_v48 = vld [vmem:[%s2316_s8 + $0xd0] ss:$20 sps:$4 sm:$0xff]  }
  0x56   : > { %1845 = vmatpush3.bf16.msra.mxu1 %v2026_v4  ;;  %1782 = vmatprep.subr.bf16.mxu0 %v2027_v5  ;;  %v2072_v44 = vld [vmem:[%s2316_s8 + $0xa8] ss:$20 sps:$4 sm:$0xff]   ;;  %v2074_v45 = vld [vmem:[%s2316_s8 + $0xcc] ss:$20 sps:$4 sm:$0xff]   ;;  %v2085_v51 = vld [vmem:[%s2316_s8 + $0xf0] ss:$20 sps:$4 sm:$0xff]  }
  0x57   : > { %1846 = vmatprep.subr.bf16.mxu1 %v2028_v6  ;;  %v2076_v46 = vld [vmem:[%s2316_s8 + $0xd4] ss:$20 sps:$4 sm:$0xff]   ;;  %v2083_v50 = vld [vmem:[%s2316_s8 + $0xfc] ss:$20 sps:$4 sm:$0xff]   ;;  %v2086_v52 = vld [vmem:[%s2316_s8 + $0xf8] ss:$20 sps:$4 sm:$0xff]  }
  0x58   : > { %v2078_v47 = vld [vmem:[%s2316_s8 + $0xc8] ss:$20 sps:$4 sm:$0xff]   ;;  %v2090_v54 = vld [vmem:[%s2316_s8 + $0x124] ss:$20 sps:$4 sm:$0xff]   ;;  %v2093_v56 = vld [vmem:[%s2316_s8 + $0x120] ss:$20 sps:$4 sm:$0xff]  }
  0x59   : > { %1783 = vmatpush3.bf16.msra.mxu0 %v2029_v7  ;;  %v2081_v49 = vld [vmem:[%s2316_s8 + $0xf4] ss:$20 sps:$4 sm:$0xff]   ;;  %v2088_v53 = vld [vmem:[%s2316_s8 + $0x11c] ss:$20 sps:$4 sm:$0xff]   ;;  %v2092_v55 = vld [vmem:[%s2316_s8 + $0x118] ss:$20 sps:$4 sm:$0xff]  }
  0x5a   : > { %1847 = vmatpush3.bf16.msra.mxu1 %v2030_v8  ;;  %1784 = vmatprep.subr.bf16.mxu0 %v2031_v9  ;;  %v2095_v57 = vld [vmem:[%s2316_s8 + $0x10] ss:$20 sps:$4 sm:$0xff]   ;;  %v2097_v59 = vld [vmem:[%s2316_s8 + $0x38] ss:$20 sps:$4 sm:$0xff]   ;;  %v2099_v61 = vld [vmem:[%s2316_s8 + $0x60] ss:$20 sps:$4 sm:$0xff]  }
  0x5b   : > { %1848 = vmatprep.subr.bf16.mxu1 %v2032_v10  ;;  %v2096_v58 = vld [vmem:[%s2316_s8 + $0xb0] ss:$20 sps:$4 sm:$0xff]   ;;  %v2098_v60 = vld [vmem:[%s2316_s8 + $0xd8] ss:$20 sps:$4 sm:$0xff]   ;;  %v2100_v62 = vld [vmem:[%s2316_s8 + $0x100] ss:$20 sps:$4 sm:$0xff]  }
  0x5c   : > { %v2101_v63 = vld [vmem:[%s2316_s8 + $0x88] ss:$20 sps:$4 sm:$0xff]  }
  0x5d   : > { %1785 = vmatpush3.bf16.msra.mxu0 %v2033_v11  ;;  %v2102_v0 = vld [vmem:[%s2316_s8 + $0x128] ss:$20 sps:$4 sm:$0xff]  }
  0x5e   : > { %1849 = vmatpush3.bf16.msra.mxu1 %v2034_v12  ;;  %1786 = vmatprep.subr.bf16.mxu0 %v2035_v13 }
  0x5f   : > { %1850 = vmatprep.subr.bf16.mxu1 %v2036_v14 }
  0x61   : > { %1787 = vmatpush3.bf16.msra.mxu0 %v2037_v15 }
  0x62   : > { %1851 = vmatpush3.bf16.msra.mxu1 %v2038_v16  ;;  %1916 = vmatprep.subr.bf16.mxu0 %v2045_v21 }
  0x63   : > { %1948 = vmatprep.subr.bf16.mxu1 %v2045_v21 }
  0x64   : > { %1022 = vmatmul.mubr.bf16.vlgmr.msra.gmra.mrb[0].mxu0 %v2039_v17 }
  0x65   : > { %1119 = vmatmul.mubr.bf16.vlgmr.msra.gmra.mrb[0].mxu1 %v2042_v19  ;;  %1917 = vmatpush3.bf16.msra.mxu0 %v2045_v21 }
  0x66   : > { %1956 = vmatpush3.bf16.msra.mxu1 %v2045_v21  ;;  %1029 = vmatprep.mubr.bf16.mxu0 %v2046_v22 }
  0x67   : > { %1126 = vmatprep.mubr.bf16.mxu1 %v2048_v23  ;;  %1918 = vmatprep.subr.bf16.mxu0 %v2052_v24 }
  0x68   : > { %1949 = vmatprep.subr.bf16.mxu1 %v2052_v24 }
  0x69   : > { %1919 = vmatpush3.bf16.msra.mxu0 %v2052_v24 }
  0x6a   : > { %1957 = vmatpush3.bf16.msra.mxu1 %v2052_v24  ;;  %1920 = vmatprep.subr.bf16.mxu0 %v2059_v29 }
  0x6b   : > { %1950 = vmatprep.subr.bf16.mxu1 %v2059_v29 }
  0x6c   : > { %1030 = vmatmul.mubr.bf16.gmra.mrb[4].mxu0 %v2050_v25 }
  0x6d   : > { %1127 = vmatmul.mubr.bf16.gmra.mrb[4].mxu1 %v2051_v26  ;;  %1037 = vmatprep.mubr.bf16.mxu0 %v2053_v27 }
  0x6e   : > { %1134 = vmatprep.mubr.bf16.mxu1 %v2055_v28  ;;  %1921 = vmatpush3.bf16.msra.mxu0 %v2059_v29 }
  0x6f   : > { %1958 = vmatpush3.bf16.msra.mxu1 %v2059_v29  ;;  %1922 = vmatprep.subr.bf16.mxu0 %v2066_v30 }
  0x70   : > { %1951 = vmatprep.subr.bf16.mxu1 %v2066_v30 }
  0x72   : > { %1923 = vmatpush3.bf16.msra.mxu0 %v2066_v30 }
  0x73   : > { %1959 = vmatpush3.bf16.msra.mxu1 %v2066_v30  ;;  %1924 = vmatprep.subr.bf16.mxu0 %v2073_v35 }
  0x74   : > { %1038 = vmatmul.mubr.bf16.gmra.mrb[8].mxu0 %v2057_v31  ;;  %1952 = vmatprep.subr.bf16.mxu1 %v2073_v35 }
  0x75   : > { %1135 = vmatmul.mubr.bf16.gmra.mrb[8].mxu1 %v2058_v32  ;;  %1045 = vmatprep.mubr.bf16.mxu0 %v2060_v33 }
  0x76   : > { %1142 = vmatprep.mubr.bf16.mxu1 %v2062_v34  ;;  %1925 = vmatpush3.bf16.msra.mxu0 %v2073_v35 }
  0x77   : > { %1960 = vmatpush3.bf16.msra.mxu1 %v2073_v35  ;;  %1926 = vmatprep.subr.bf16.mxu0 %v2080_v36 }
  0x78   : > { %1953 = vmatprep.subr.bf16.mxu1 %v2080_v36 }
  0x7a   : > { %1927 = vmatpush3.bf16.msra.mxu0 %v2080_v36 }
  0x7b   : > { %1961 = vmatpush3.bf16.msra.mxu1 %v2080_v36  ;;  %1928 = vmatprep.subr.bf16.mxu0 %v2087_v40 }
  0x7c   : > { %1046 = vmatmul.mubr.bf16.gmra.mrb[12].mxu0 %v2064_v37  ;;  %1954 = vmatprep.subr.bf16.mxu1 %v2087_v40 }
  0x7d   : > { %1143 = vmatmul.mubr.bf16.gmra.mrb[12].mxu1 %v2065_v38  ;;  %1053 = vmatprep.mubr.bf16.mxu0 %v2067_v39 }
  0x7e   : > { %1150 = vmatprep.mubr.bf16.mxu1 %v2069_v41  ;;  %1929 = vmatpush3.bf16.msra.mxu0 %v2087_v40 }
  0x7f   : > { %1962 = vmatpush3.bf16.msra.mxu1 %v2087_v40  ;;  %1930 = vmatprep.subr.bf16.mxu0 %v2094_v42 }
  0x80   : > { %1955 = vmatprep.subr.bf16.mxu1 %v2094_v42 }
  0x82   : > { %1931 = vmatpush3.bf16.msra.mxu0 %v2094_v42 }
  0x83   : > { %1963 = vmatpush3.bf16.msra.mxu1 %v2094_v42 }
  0x84   : > { %1054 = vmatmul.mubr.bf16.gmra.mrb[16].mxu0 %v2071_v43 }
  0x85   : > { %1151 = vmatmul.mubr.bf16.gmra.mrb[16].mxu1 %v2072_v44  ;;  %1061 = vmatprep.mubr.bf16.mxu0 %v2074_v45 }
  0x86   : > { %1158 = vmatprep.mubr.bf16.mxu1 %v2076_v46 }
  0x8c   : > { %1062 = vmatmul.mubr.bf16.gmra.mrb[20].mxu0 %v2078_v47 }
  0x8d   : > { %1159 = vmatmul.mubr.bf16.gmra.mrb[20].mxu1 %v2079_v48  ;;  %1069 = vmatprep.mubr.bf16.mxu0 %v2081_v49 }
  0x8e   : > { %1166 = vmatprep.mubr.bf16.mxu1 %v2083_v50 }
  0x94   : > { %1070 = vmatmul.mubr.bf16.gmra.mrb[24].mxu0 %v2085_v51 }
  0x95   : > { %1167 = vmatmul.mubr.bf16.gmra.mrb[24].mxu1 %v2086_v52  ;;  %1077 = vmatprep.mubr.bf16.mxu0 %v2088_v53 }
  0x96   : > { %1174 = vmatprep.mubr.bf16.mxu1 %v2090_v54 }
  0x9c   : > { %1078 = vmatmul.mubr.bf16.gmra.mrb[28].mxu0 %v2092_v55 }
  0x9d   : > { %1175 = vmatmul.mubr.bf16.gmra.mrb[28].mxu1 %v2093_v56  ;;  %1932 = vmatprep.mubr.bf16.mxu0 %v2095_v57 }
  0x9e   : > { %1940 = vmatprep.mubr.bf16.mxu1 %v2096_v58 }
  0xa4   : > { %1933 = vmatmul.mubr.bf16.vlgmr.msra.gmra.mrb[32].mxu0 %v2097_v59 }
  0xa5   : > { %1941 = vmatmul.mubr.bf16.vlgmr.msra.gmra.mrb[32].mxu1 %v2098_v60  ;;  %1936 = vmatprep.mubr.bf16.mxu0 %v2099_v61 }
  0xa6   : > { %1944 = vmatprep.mubr.bf16.mxu1 %v2100_v62 }
  0xac   : > { %1937 = vmatmul.mubr.bf16.gmra.mrb[36].mxu0 %v2101_v63 }
  0xad   : > { %1945 = vmatmul.mubr.bf16.gmra.mrb[36].mxu1 %v2102_v0 }
 0x137   : > { %v1788_v1 = vpop.f32.mrb[0].mxu0 }
 0x138   : > { %v1852_v2 = vpop.f32.mrb[0].mxu1  ;;  %v1789_v3 = vpop.f32.mrb[1].mxu0 }
 0x139   : > { %v1790_v4 = vadd.f32 %v1789_v3, %v1788_v1  ;;  %v1853_v5 = vpop.f32.mrb[1].mxu1  ;;  %v1791_v6 = vpop.f32.mrb[2].mxu0 }
 0x13a   : > { %v1854_v7 = vadd.f32 %v1853_v5, %v1852_v2  ;;  %v1855_v8 = vpop.f32.mrb[2].mxu1  ;;  %v1792_v9 = vpop.f32.mrb[3].mxu0 }
 0x13b   : > { %v1793_v10 = vadd.f32 %v1792_v9, %v1791_v6  ;;  %v1856_v11 = vpop.f32.mrb[3].mxu1 }
 0x13c   : > { %v1857_v12 = vadd.f32 %v1856_v11, %v1855_v8  ;;  %v2399_v13 = vadd.f32 %v1854_v7, %v1790_v4 }
 0x13e   : > { %v2401_v14 = vadd.f32 %v1857_v12, %v1793_v10 }
 0x13f   : > { %v1794_v15 = vpop.f32.mrb[4].mxu0 }
 0x140   : > { %v1858_v16 = vpop.f32.mrb[4].mxu1  ;;  %v1795_v17 = vpop.f32.mrb[5].mxu0 }
 0x141   : > { %v1796_v18 = vadd.f32 %v1795_v17, %v1794_v15  ;;  %v1859_v19 = vpop.f32.mrb[5].mxu1  ;;  %v1797_v20 = vpop.f32.mrb[6].mxu0 }
 0x142   : > { %v1860_v21 = vadd.f32 %v1859_v19, %v1858_v16  ;;  %v1861_v22 = vpop.f32.mrb[6].mxu1  ;;  %v1798_v23 = vpop.f32.mrb[7].mxu0 }
 0x143   : > { %v1799_v24 = vadd.f32 %v1798_v23, %v1797_v20  ;;  %v1862_v25 = vpop.f32.mrb[7].mxu1 }
 0x144   : > { %v1863_v26 = vadd.f32 %v1862_v25, %v1861_v22  ;;  %v2403_v27 = vadd.f32 %v1860_v21, %v1796_v18 }
 0x146   : > { %v2405_v28 = vadd.f32 %v1863_v26, %v1799_v24 }
 0x147   : > { %v1800_v29 = vpop.f32.mrb[8].mxu0 }
 0x148   : > { %v1864_v30 = vpop.f32.mrb[8].mxu1  ;;  %v1801_v31 = vpop.f32.mrb[9].mxu0 }
 0x149   : > { %v1802_v32 = vadd.f32 %v1801_v31, %v1800_v29  ;;  %v1865_v33 = vpop.f32.mrb[9].mxu1  ;;  %v1803_v34 = vpop.f32.mrb[10].mxu0 }
 0x14a   : > { %v1866_v35 = vadd.f32 %v1865_v33, %v1864_v30  ;;  %v1867_v36 = vpop.f32.mrb[10].mxu1  ;;  %v1804_v37 = vpop.f32.mrb[11].mxu0 }
 0x14b   : > { %v1805_v38 = vadd.f32 %v1804_v37, %v1803_v34  ;;  %v1868_v39 = vpop.f32.mrb[11].mxu1 }
 0x14c   : > { %v1869_v40 = vadd.f32 %v1868_v39, %v1867_v36  ;;  %v2407_v41 = vadd.f32 %v1866_v35, %v1802_v32 }
 0x14e   : > { %v2409_v42 = vadd.f32 %v1869_v40, %v1805_v38 }
 0x14f   : > { %v1806_v43 = vpop.f32.mrb[12].mxu0 }
 0x150   : > { %v1870_v44 = vpop.f32.mrb[12].mxu1  ;;  %v1807_v45 = vpop.f32.mrb[13].mxu0 }
 0x151   : > { %v1808_v46 = vadd.f32 %v1807_v45, %v1806_v43  ;;  %v1871_v47 = vpop.f32.mrb[13].mxu1  ;;  %v1809_v48 = vpop.f32.mrb[14].mxu0 }
 0x152   : > { %v1872_v49 = vadd.f32 %v1871_v47, %v1870_v44  ;;  %v1873_v50 = vpop.f32.mrb[14].mxu1  ;;  %v1810_v51 = vpop.f32.mrb[15].mxu0 }
 0x153   : > { %v1811_v52 = vadd.f32 %v1810_v51, %v1809_v48  ;;  %v1874_v53 = vpop.f32.mrb[15].mxu1 }
 0x154   : > { %v1875_v54 = vadd.f32 %v1874_v53, %v1873_v50  ;;  %v2411_v55 = vadd.f32 %v1872_v49, %v1808_v46 }
 0x156   : > { %v2413_v56 = vadd.f32 %v1875_v54, %v1811_v52 }
 0x157   : > { %v1812_v57 = vpop.f32.mrb[16].mxu0 }
 0x158   : > { %v1876_v58 = vpop.f32.mrb[16].mxu1  ;;  %v1813_v59 = vpop.f32.mrb[17].mxu0 }
 0x159   : > { %v1814_v60 = vadd.f32 %v1813_v59, %v1812_v57  ;;  %v1877_v61 = vpop.f32.mrb[17].mxu1  ;;  %v1815_v62 = vpop.f32.mrb[18].mxu0  ;;  %v399_v57 = vld [vmem:[#allocation2 + $0x10] sm:$0xff] }
 0x15a   : > { %v1878_v63 = vadd.f32 %v1877_v61, %v1876_v58  ;;  %v1879_v0 = vpop.f32.mrb[18].mxu1  ;;  %v1816_v1 = vpop.f32.mrb[19].mxu0 }
 0x15b   : > { %v1817_v2 = vadd.f32 %v1816_v1, %v1815_v62  ;;  %v1880_v3 = vpop.f32.mrb[19].mxu1  ;;  %v397_v62 = vld [vmem:[#allocation2] sm:$0xff] }
 0x15c   : > { %v1881_v4 = vadd.f32 %v1880_v3, %v1879_v0  ;;  %v1153_v5 = vadd.f32 %v1878_v63, %v1814_v60  ;;  %v407_v60 = vld [vmem:[#allocation2 + $0x50] sm:$0xff] }
 0x15e   : > { %v2415_v6 = vadd.f32 %v1881_v4, %v1817_v2  ;;  %v405_v2 = vld [vmem:[#allocation2 + $0x40] sm:$0xff]  ;;  %v400_v4 = vld [vmem:[#allocation2 + $0x18] sm:$0xff] }
 0x15f   : > { %v1818_v7 = vpop.f32.mrb[20].mxu0 }
 0x160   : > { %v1882_v8 = vpop.f32.mrb[20].mxu1  ;;  %v1819_v9 = vpop.f32.mrb[21].mxu0 }
 0x161   : > { %v1820_v10 = vadd.f32 %v1819_v9, %v1818_v7  ;;  %v1883_v11 = vpop.f32.mrb[21].mxu1  ;;  %v1821_v12 = vpop.f32.mrb[22].mxu0 }
 0x162   : > { %v1884_v15 = vadd.f32 %v1883_v11, %v1882_v8  ;;  %v1885_v16 = vpop.f32.mrb[22].mxu1  ;;  %v1822_v17 = vpop.f32.mrb[23].mxu0  ;;  %v408_v11 = vld [vmem:[#allocation2 + $0x58] sm:$0xff] }
 0x163   : > { %v1823_v18 = vadd.f32 %v1822_v17, %v1821_v12  ;;  %v1886_v19 = vpop.f32.mrb[23].mxu1 }
 0x164   : > { %v1887_v20 = vadd.f32 %v1886_v19, %v1885_v16  ;;  %v1161_v21 = vadd.f32 %v1884_v15, %v1820_v10  ;;  %v398_v15 = vld [vmem:[#allocation2 + $0x8] sm:$0xff] }
 0x166   : > { %v1164_v22 = vadd.f32 %v1887_v20, %v1823_v18  ;;  %v406_v20 = vld [vmem:[#allocation2 + $0x48] sm:$0xff] }
 0x167   : > { %v1824_v23 = vpop.f32.mrb[24].mxu0 }
 0x168   : > { %v1888_v24 = vpop.f32.mrb[24].mxu1  ;;  %v1825_v25 = vpop.f32.mrb[25].mxu0 }
 0x169   : > { %v1826_v26 = vadd.f32 %v1825_v25, %v1824_v23  ;;  %v1889_v29 = vpop.f32.mrb[25].mxu1  ;;  %v1827_v30 = vpop.f32.mrb[26].mxu0 }
 0x16a   : > { %v1890_v31 = vadd.f32 %v1889_v29, %v1888_v24  ;;  %v1891_v32 = vpop.f32.mrb[26].mxu1  ;;  %v1828_v33 = vpop.f32.mrb[27].mxu0  ;;  %v411_v29 = vld [vmem:[#allocation2 + $0x70] sm:$0xff] }
 0x16b   : > { %v1829_v34 = vadd.f32 %v1828_v33, %v1827_v30  ;;  %v1892_v35 = vpop.f32.mrb[27].mxu1 }
 0x16c   : > { %v1893_v36 = vadd.f32 %v1892_v35, %v1891_v32  ;;  %v2417_v37 = vadd.f32 %v1890_v31, %v1826_v26  ;;  %v403_v26 = vld [vmem:[#allocation2 + $0x30] sm:$0xff]  ;;  %v401_v31 = vld [vmem:[#allocation2 + $0x20] sm:$0xff] }
 0x16e   : > { %v2419_v38 = vadd.f32 %v1893_v36, %v1829_v34  ;;  %v409_v34 = vld [vmem:[#allocation2 + $0x60] sm:$0xff]  ;;  %v404_v36 = vld [vmem:[#allocation2 + $0x38] sm:$0xff] }
 0x16f   : > { %v1830_v39 = vpop.f32.mrb[28].mxu0 }
 0x170   : > { %v1894_v40 = vpop.f32.mrb[28].mxu1  ;;  %v1831_v43 = vpop.f32.mrb[29].mxu0 }
 0x171   : > { %v1832_v44 = vadd.f32 %v1831_v43, %v1830_v39  ;;  %v1895_v45 = vpop.f32.mrb[29].mxu1  ;;  %v1833_v46 = vpop.f32.mrb[30].mxu0 }
 0x172   : > { %v1896_v47 = vadd.f32 %v1895_v45, %v1894_v40  ;;  %v1897_v48 = vpop.f32.mrb[30].mxu1  ;;  %v1834_v49 = vpop.f32.mrb[31].mxu0  ;;  %v412_v45 = vld [vmem:[#allocation2 + $0x78] sm:$0xff] }
 0x173   : > { %v1835_v50 = vadd.f32 %v1834_v49, %v1833_v46  ;;  %v1898_v51 = vpop.f32.mrb[31].mxu1 }
 0x174   : > { %v1899_v52 = vadd.f32 %v1898_v51, %v1897_v48  ;;  %v1177_v53 = vadd.f32 %v1896_v47, %v1832_v44  ;;  %v402_v47 = vld [vmem:[#allocation2 + $0x28] sm:$0xff] }
 0x176   : > { %v2421_v54 = vadd.f32 %v1899_v52, %v1835_v50 }
 0x177   : > { %v1934_v58 = vpop.f32.mrb[32].mxu0 }
 0x178   : > { %v1226_v59 = vadd.f32 %v1934_v58, %v2403_v27  ;;  %v1942_v61 = vpop.f32.mrb[32].mxu1  ;;  %v1217_v63 = vpop.f32.mrb[33].mxu0 }
 0x179   : > { %v1258_v0 = vadd.f32 %v1942_v61, %v1161_v21  ;;  %v1218_v1 = vadd.f32 %v1217_v63, %v2399_v13  ;;  %v1249_v3 = vpop.f32.mrb[33].mxu1  ;;  %v1935_v7 = vpop.f32.mrb[34].mxu0 }
 0x17a   : > { %v1282_v8 = vadd.f32 %v1226_v59, %v399_v57  ;;  %v1250_v9 = vadd.f32 %v1249_v3, %v1153_v5  ;;  %v1229_v10 = vadd.f32 %v1935_v7, %v2405_v28  ;;  %v1943_v12 = vpop.f32.mrb[34].mxu1  ;;  %v1220_v16 = vpop.f32.mrb[35].mxu0 }
 0x17b   : > { %v1290_v27 = vadd.f32 %v1258_v0, %v407_v60  ;;  %v1280_v17 = vadd.f32 %v1218_v1, %v397_v62  ;;  %v1261_v18 = vadd.f32 %v1943_v12, %v1164_v22  ;;  %v1221_v19 = vadd.f32 %v1220_v16, %v2401_v14  ;;  %v1252_v21 = vpop.f32.mrb[35].mxu1  ;;  %v1687_v60 = vld [vmem:[%s2480_s2] ss:$0 sm:$0xff] (!%p1686_p11) }
 0x17c   : > { %1298 = vst [vmem:[#allocation2 + $0x10] sm:$0xff] %v1282_v8  ;;  %v1288_v13 = vadd.f32 %v1250_v9, %v405_v2  ;;  %v1283_v23 = vadd.f32 %v1229_v10, %v400_v4  ;;  %v1253_v24 = vadd.f32 %v1252_v21, %v2415_v6 }
 0x17d   : > { %1306 = vst [vmem:[#allocation2 + $0x50] sm:$0xff] %v1290_v27  ;;  %1296 = vst [vmem:[#allocation2] sm:$0xff] %v1280_v17  ;;  %v1291_v5 = vadd.f32 %v1261_v18, %v408_v11  ;;  %v1281_v28 = vadd.f32 %v1221_v19, %v398_v15 }
 0x17e   : > { %1304 = vst [vmem:[#allocation2 + $0x40] sm:$0xff] %v1288_v13  ;;  %1299 = vst [vmem:[#allocation2 + $0x18] sm:$0xff] %v1283_v23  ;;  %v1289_v25 = vadd.f32 %v1253_v24, %v406_v20 }
 0x17f   : > { %1307 = vst [vmem:[#allocation2 + $0x58] sm:$0xff] %v1291_v5  ;;  %1297 = vst [vmem:[#allocation2 + $0x8] sm:$0xff] %v1281_v28  ;;  %v1938_v22 = vpop.f32.mrb[36].mxu0 }
 0x180   : > { %1305 = vst [vmem:[#allocation2 + $0x48] sm:$0xff] %v1289_v25  ;;  %v1242_v14 = vadd.f32 %v1938_v22, %v2411_v55  ;;  %v1946_v30 = vpop.f32.mrb[36].mxu1  ;;  %v1233_v32 = vpop.f32.mrb[37].mxu0 }
 0x181   : > { %v1274_v33 = vadd.f32 %v1946_v30, %v1177_v53  ;;  %v1234_v6 = vadd.f32 %v1233_v32, %v2407_v41  ;;  %v1265_v35 = vpop.f32.mrb[37].mxu1  ;;  %v1939_v39 = vpop.f32.mrb[38].mxu0  ;;  %v410_v41 = vld [vmem:[#allocation2 + $0x68] sm:$0xff] }
 0x182   : > { %v1286_v40 = vadd.f32 %v1242_v14, %v403_v26  ;;  %v1266_v43 = vadd.f32 %v1265_v35, %v2417_v37  ;;  %v1245_v44 = vadd.f32 %v1939_v39, %v2413_v56  ;;  %v1947_v46 = vpop.f32.mrb[38].mxu1  ;;  %v1236_v55 = vpop.f32.mrb[39].mxu0  ;;  %1315 = sbr.rel (%p1686_p11) target bundleno = 407 (0x197), region = 66 }
 0x183   : > { %v1294_v48 = vadd.f32 %v1274_v33, %v411_v29  ;;  %v1284_v49 = vadd.f32 %v1234_v6, %v401_v31  ;;  %v1277_v50 = vadd.f32 %v1947_v46, %v2421_v54  ;;  %v1237_v51 = vadd.f32 %v1236_v55, %v2409_v42  ;;  %v1268_v52 = vpop.f32.mrb[39].mxu1  ;;  %v1318_v62 = vld [vmem:[#allocation2 + $0x10] sm:$0xff] (!%p1686_p11) }
 0x184   : > { %1302 = vst [vmem:[#allocation2 + $0x30] sm:$0xff] %v1286_v40  ;;  %v1292_v53 = vadd.f32 %v1266_v43, %v409_v34  ;;  %v1287_v57 = vadd.f32 %v1245_v44, %v404_v36  ;;  %v1269_v58 = vadd.f32 %v1268_v52, %v2419_v38  ;;  %v1316_v42 = vld [vmem:[#allocation2] sm:$0xff] (!%p1686_p11)  ;;  %v1341_v1 = vadd.f32 (!%p1686_p11), %v1687_v60, %v1318_v62  ;;  %v1326_v27 = vld [vmem:[#allocation2 + $0x50] sm:$0xff] (!%p1686_p11) }
 0x185   : > { %1310 = vst [vmem:[#allocation2 + $0x70] sm:$0xff] %v1294_v48  ;;  %1300 = vst [vmem:[#allocation2 + $0x20] sm:$0xff] %v1284_v49  ;;  %v1295_v56 = vadd.f32 %v1277_v50, %v412_v45  ;;  %v1285_v37 = vadd.f32 %v1237_v51, %v402_v47  ;;  %v1339_v38 = vadd.f32 (!%p1686_p11), %v1687_v60, %v1316_v42  ;;  %v1319_v63 = vld [vmem:[#allocation2 + $0x18] sm:$0xff] (!%p1686_p11)  ;;  %v1324_v15 = vld [vmem:[#allocation2 + $0x40] sm:$0xff] (!%p1686_p11) }
 0x186   : > { %1308 = vst [vmem:[#allocation2 + $0x60] sm:$0xff] %v1292_v53  ;;  %1303 = vst [vmem:[#allocation2 + $0x38] sm:$0xff] %v1287_v57  ;;  %v1293_v59 = vadd.f32 %v1269_v58, %v410_v41  ;;  %v1317_v54 = vld [vmem:[#allocation2 + $0x8] sm:$0xff] (!%p1686_p11)  ;;  %v1342_v2 = vadd.f32 (!%p1686_p11), %v1687_v60, %v1319_v63  ;;  %v1357_v17 = vmax.f32 (!%p1686_p11), %v1341_v1, 0.0  ;;  %v1327_v21 = vld [vmem:[#allocation2 + $0x58] sm:$0xff] (!%p1686_p11)  ;;  %v1347_v28 = vadd.f32 (!%p1686_p11), %v1687_v60, %v1324_v15 }
 0x187   : > { %1311 = vst [vmem:[#allocation2 + $0x78] sm:$0xff] %v1295_v56  ;;  %1301 = vst [vmem:[#allocation2 + $0x28] sm:$0xff] %v1285_v37  ;;  %v1340_v61 = vadd.f32 (!%p1686_p11), %v1687_v60, %v1317_v54  ;;  %v1355_v9 = vmax.f32 (!%p1686_p11), %v1339_v38, 0.0  ;;  %v1325_v16 = vld [vmem:[#allocation2 + $0x48] sm:$0xff] (!%p1686_p11)  ;;  %v1349_v29 = vadd.f32 (!%p1686_p11), %v1687_v60, %v1326_v27  ;;  %v1350_v6 = vadd.f32 (!%p1686_p11), %v1687_v60, %v1327_v21 }
 0x188   : > { %1309 = vst [vmem:[#allocation2 + $0x68] sm:$0xff] %v1293_v59  ;;  %v1358_v18 = vmax.f32 (!%p1686_p11), %v1342_v2, 0.0  ;;  %v1348_v14 = vadd.f32 (!%p1686_p11), %v1687_v60, %v1325_v16  ;;  %v1363_v33 = vmax.f32 (!%p1686_p11), %v1347_v28, 0.0 }
 0x189   : > { %v1356_v10 = vmax.f32 %v1340_v61, 0.0  ;;  %v1365_v39 = vmax.f32 %v1349_v29, 0.0  ;;  %v1366_v43 = vmax.f32 %v1350_v6, 0.0 }
 0x18a   : > { %v1733_v26 = vpack.c.bf16 %v1358_v18, %v1357_v17  ;;  %v1364_v36 = vmax.f32 %v1348_v14, 0.0 }
 0x18b   : > { %v1322_v7 = vld [vmem:[#allocation2 + $0x30] sm:$0xff]  ;;  %v1728_v23 = vpack.c.bf16 %v1356_v10, %v1355_v9  ;;  %v1753_v48 = vpack.c.bf16 %v1366_v43, %v1365_v39 }
 0x18c   : > { %v1320_v0 = vld [vmem:[#allocation2 + $0x20] sm:$0xff]  ;;  %v1345_v12 = vadd.f32 %v1687_v60, %v1322_v7  ;;  %v1330_v30 = vld [vmem:[#allocation2 + $0x70] sm:$0xff]  ;;  %1765 = vst [vmem:[%s2481_s3 + $0x8] sm:$0xff] %v1733_v26   ;;  %v1748_v47 = vpack.c.bf16 %v1364_v36, %v1363_v33 }
 0x18d   : > { %v1343_v4 = vadd.f32 %v1687_v60, %v1320_v0  ;;  %v1323_v8 = vld [vmem:[#allocation2 + $0x38] sm:$0xff]  ;;  %v1328_v13 = vld [vmem:[#allocation2 + $0x60] sm:$0xff]  ;;  %1729 = vst [vmem:[%s2481_s3] sm:$0xff] %v1728_v23   ;;  %v1353_v45 = vadd.f32 %v1687_v60, %v1330_v30  ;;  %1769 = vst [vmem:[%s2481_s3 + $0x28] sm:$0xff] %v1753_v48  }
 0x18e   : > { %v1321_v3 = vld [vmem:[#allocation2 + $0x28] sm:$0xff]  ;;  %v1346_v20 = vadd.f32 %v1687_v60, %v1323_v8  ;;  %v1361_v5 = vmax.f32 %v1345_v12, 0.0  ;;  %v1331_v31 = vld [vmem:[#allocation2 + $0x78] sm:$0xff]  ;;  %v1351_v34 = vadd.f32 %v1687_v60, %v1328_v13  ;;  %1768 = vst [vmem:[%s2481_s3 + $0x20] sm:$0xff] %v1748_v47  }
 0x18f   : > { %v1344_v11 = vadd.f32 %v1687_v60, %v1321_v3  ;;  %v1359_v19 = vmax.f32 %v1343_v4, 0.0  ;;  %v1329_v25 = vld [vmem:[#allocation2 + $0x68] sm:$0xff]  ;;  %v1354_v46 = vadd.f32 %v1687_v60, %v1331_v31  ;;  %v1369_v49 = vmax.f32 %v1353_v45, 0.0 }
 0x190   : > { %v1362_v22 = vmax.f32 %v1346_v20, 0.0  ;;  %v1352_v40 = vadd.f32 %v1687_v60, %v1329_v25  ;;  %v1367_v44 = vmax.f32 %v1351_v34, 0.0 }
 0x191   : > { %v1360_v24 = vmax.f32 %v1344_v11, 0.0  ;;  %v1370_v50 = vmax.f32 %v1354_v46, 0.0 }
 0x192   : > { %v1743_v35 = vpack.c.bf16 %v1362_v22, %v1361_v5  ;;  %v1368_v55 = vmax.f32 %v1352_v40, 0.0 }
 0x193   : > { %v1738_v32 = vpack.c.bf16 %v1360_v24, %v1359_v19  ;;  %v1763_v41 = vpack.c.bf16 %v1370_v50, %v1369_v49 }
 0x194   : > { %1767 = vst [vmem:[%s2481_s3 + $0x18] sm:$0xff] %v1743_v35   ;;  %v1758_v51 = vpack.c.bf16 %v1368_v55, %v1367_v44 }
 0x195   : > { %1766 = vst [vmem:[%s2481_s3 + $0x10] sm:$0xff] %v1738_v32   ;;  %1771 = vst [vmem:[%s2481_s3 + $0x38] sm:$0xff] %v1763_v41  }
 0x196   : > { %1770 = vst [vmem:[%s2481_s3 + $0x30] sm:$0xff] %v1758_v51  }
 0x197 PF: > { %s13_s16 = sadd.s32 1, %s2141_s16   ;;  %s2482_s12 = smov %s2129_s13 }
 0x198   : > { %p10_p12 = scmp.ge.s32.totalorder %s13_s16, 7   ;;  %s2483_s13 = smov %s2199_s20 }
 0x199   : > { %s2484_s14 = smov %s2137_s15  ;;  %s2485_s15 = smov %s2487_s17 }
 0x19a   :  { %12 = sbr.rel (!%p10_p12) target bundleno = 3 (0x3), region = 113 }

// kernel: fpm_forward.14
= control target key start
LH: loop header
LB: loop body
LE: loop exit
PB: predicated region body
PF: predicated region fallthrough
CT: control target
= control target key end

     0   :  { %s2148_s12 = smov 0   ;;  %s2150_s13 = smov 0   ;;  %s2462_s0 = inlined_call_operand.vmem [shape: bf16[128,3200], index: 0, kind: input, shape index: {}]   ;;  %s2463_s1 = inlined_call_operand.vmem [shape: bf16[3200,128], index: 1, kind: input, shape index: {}]   ;;  %s2464_s2 = inlined_call_operand.vmem [shape: f32[1,128], index: 2, kind: input, shape index: {}]   ;;  %s2465_s3 = inlined_call_operand.vmem [shape: bf16[128,128], index: 3, kind: output, shape index: {}]  }
   0x1   :  { %s2152_s14 = smov 0   ;;  %s2154_s15 = smov 0  }
   0x2   :  { %s2156_s16 = smov 0  }
   0x3 LB: > { %s25_s17 = sadd.s32 1, %s2121_s15  ;;  %p48_p1 = scmp.ne.s32.totalorder %s2113_s13, %s2109_s12  ;;  %s2125_s16 = sphi %s2156_s16, %s13_s16   ;;  %s2121_s15 = sphi %s2154_s15, %s2469_s15   ;;  %s2117_s14 = sphi %s2152_s14, %s2468_s14   ;;  %s2113_s13 = sphi %s2150_s13, %s2467_s13   ;;  %s2109_s12 = sphi %s2148_s12, %s2466_s12  }
   0x4   : > { %p26_p0 = scmp.ge.s32.totalorder %s25_s17, 5  ;;  %p49_p2 = scmp.eq.s32.totalorder %s2125_s16, 0 }
   0x5   : > { %s41_s19 = sadd.s32 1, %s2113_s13  ;;  %p1553_p5 = scmp.ge.s32.totalorder %s2125_s16, 5 }
   0x6   : > { %s2471_s17 = smov (%p26_p0, %s25_s17), 0  ;;  %p50_p3 = por %p49_p2, %p48_p1 }
   0x7   : > { %s37_s18 = ssub.s32 %s2121_s15, %s2471_s17  ;;  %162 = sbr.rel (%p1553_p5) target bundleno = 45 (0x2d), region = 20 }
   0x8   : > { %p39_p4 = scmp.eq.s32.totalorder %s37_s18, 0 }
   0xa   : > { %s2183_s20 = scalar_select %p39_p4, %s2113_s13, %s41_s19  }
   0xe   : > { %165 = sbr.rel (!%p50_p3) target bundleno = 45 (0x2d), region = 24  ;;  %s167_s21 = sand.u32 (%p50_p3), 1, %s2113_s13  }
   0xf   : > { %s1692_s22 = smul.u32 (%p50_p3), 20, %s2121_s15 }
  0x10   : > { %s1948_s23 = smul.u32 (%p50_p3), 320, %s167_s21 }
  0x11   : > { %s2191_s26 = scalar_lea.vmem (%p50_p3), %s2462_s0, %s1692_s22 }
  0x12   : > { %v190_v0 = vld [vmem:[%s2191_s26] sm:$0xff] (%p50_p3)  ;;  %v192_v1 = vld [vmem:[%s2191_s26 + $0x8] sm:$0xff] (%p50_p3)  ;;  %s2196_s27 = scalar_lea.vmem (%p50_p3), [#allocation3], %s1948_s23  ;;  %v200_v5 = vld [vmem:[%s2191_s26 + $0xd0] sm:$0xff] (%p50_p3) }
  0x13   : > { %v194_v2 = vld [vmem:[%s2191_s26 + $0x64] sm:$0xff] (%p50_p3)  ;;  %191 = vst [vmem:[%s2196_s27] sm:$0xff] (%p50_p3), %v190_v0  ;;  %193 = vst [vmem:[%s2196_s27 + $0x8] sm:$0xff] (%p50_p3), %v192_v1  ;;  %v196_v3 = vld [vmem:[%s2191_s26 + $0x6c] sm:$0xff] (%p50_p3) }
  0x14   : > { %195 = vst [vmem:[%s2196_s27 + $0x14] sm:$0xff] (%p50_p3), %v194_v2  ;;  %v198_v4 = vld [vmem:[%s2191_s26 + $0xc8] sm:$0xff] (%p50_p3)  ;;  %197 = vst [vmem:[%s2196_s27 + $0x1c] sm:$0xff] (%p50_p3), %v196_v3  ;;  %v204_v7 = vld [vmem:[%s2191_s26 + $0x134] sm:$0xff] (%p50_p3) }
  0x15   : > { %199 = vst [vmem:[%s2196_s27 + $0x28] sm:$0xff] %v198_v4  ;;  %201 = vst [vmem:[%s2196_s27 + $0x30] sm:$0xff] %v200_v5  ;;  %v202_v6 = vld [vmem:[%s2191_s26 + $0x12c] sm:$0xff]  ;;  %v208_v9 = vld [vmem:[%s2191_s26 + $0x198] sm:$0xff] }
  0x16   : > { %v206_v8 = vld [vmem:[%s2191_s26 + $0x190] sm:$0xff]  ;;  %203 = vst [vmem:[%s2196_s27 + $0x3c] sm:$0xff] %v202_v6  ;;  %205 = vst [vmem:[%s2196_s27 + $0x44] sm:$0xff] %v204_v7  ;;  %v212_v11 = vld [vmem:[%s2191_s26 + $0x1fc] sm:$0xff] }
  0x17   : > { %207 = vst [vmem:[%s2196_s27 + $0x50] sm:$0xff] %v206_v8  ;;  %v210_v10 = vld [vmem:[%s2191_s26 + $0x1f4] sm:$0xff]  ;;  %209 = vst [vmem:[%s2196_s27 + $0x58] sm:$0xff] %v208_v9  ;;  %v216_v13 = vld [vmem:[%s2191_s26 + $0x260] sm:$0xff] }
  0x18   : > { %211 = vst [vmem:[%s2196_s27 + $0x64] sm:$0xff] %v210_v10  ;;  %213 = vst [vmem:[%s2196_s27 + $0x6c] sm:$0xff] %v212_v11  ;;  %v214_v12 = vld [vmem:[%s2191_s26 + $0x258] sm:$0xff]  ;;  %v220_v15 = vld [vmem:[%s2191_s26 + $0x2c4] sm:$0xff] }
  0x19   : > { %v218_v14 = vld [vmem:[%s2191_s26 + $0x2bc] sm:$0xff]  ;;  %215 = vst [vmem:[%s2196_s27 + $0x78] sm:$0xff] %v214_v12  ;;  %217 = vst [vmem:[%s2196_s27 + $0x80] sm:$0xff] %v216_v13  ;;  %v224_v17 = vld [vmem:[%s2191_s26 + $0x328] sm:$0xff] }
  0x1a   : > { %219 = vst [vmem:[%s2196_s27 + $0x8c] sm:$0xff] %v218_v14  ;;  %v222_v16 = vld [vmem:[%s2191_s26 + $0x320] sm:$0xff]  ;;  %221 = vst [vmem:[%s2196_s27 + $0x94] sm:$0xff] %v220_v15  ;;  %v228_v19 = vld [vmem:[%s2191_s26 + $0x38c] sm:$0xff] }
  0x1b   : > { %223 = vst [vmem:[%s2196_s27 + $0xa0] sm:$0xff] %v222_v16  ;;  %225 = vst [vmem:[%s2196_s27 + $0xa8] sm:$0xff] %v224_v17  ;;  %v226_v18 = vld [vmem:[%s2191_s26 + $0x384] sm:$0xff]  ;;  %v232_v21 = vld [vmem:[%s2191_s26 + $0x3f0] sm:$0xff] }
  0x1c   : > { %v230_v20 = vld [vmem:[%s2191_s26 + $0x3e8] sm:$0xff]  ;;  %227 = vst [vmem:[%s2196_s27 + $0xb4] sm:$0xff] %v226_v18  ;;  %229 = vst [vmem:[%s2196_s27 + $0xbc] sm:$0xff] %v228_v19  ;;  %v236_v23 = vld [vmem:[%s2191_s26 + $0x454] sm:$0xff] }
  0x1d   : > { %231 = vst [vmem:[%s2196_s27 + $0xc8] sm:$0xff] %v230_v20  ;;  %v234_v22 = vld [vmem:[%s2191_s26 + $0x44c] sm:$0xff]  ;;  %233 = vst [vmem:[%s2196_s27 + $0xd0] sm:$0xff] %v232_v21  ;;  %v240_v25 = vld [vmem:[%s2191_s26 + $0x4b8] sm:$0xff] }
  0x1e   : > { %235 = vst [vmem:[%s2196_s27 + $0xdc] sm:$0xff] %v234_v22  ;;  %237 = vst [vmem:[%s2196_s27 + $0xe4] sm:$0xff] %v236_v23  ;;  %v238_v24 = vld [vmem:[%s2191_s26 + $0x4b0] sm:$0xff]  ;;  %v244_v27 = vld [vmem:[%s2191_s26 + $0x51c] sm:$0xff] }
  0x1f   : > { %v242_v26 = vld [vmem:[%s2191_s26 + $0x514] sm:$0xff]  ;;  %239 = vst [vmem:[%s2196_s27 + $0xf0] sm:$0xff] %v238_v24  ;;  %241 = vst [vmem:[%s2196_s27 + $0xf8] sm:$0xff] %v240_v25  ;;  %v248_v29 = vld [vmem:[%s2191_s26 + $0x580] sm:$0xff] }
  0x20   : > { %243 = vst [vmem:[%s2196_s27 + $0x104] sm:$0xff] %v242_v26  ;;  %v246_v28 = vld [vmem:[%s2191_s26 + $0x578] sm:$0xff]  ;;  %245 = vst [vmem:[%s2196_s27 + $0x10c] sm:$0xff] %v244_v27  ;;  %v252_v31 = vld [vmem:[%s2191_s26 + $0x5e4] sm:$0xff] }
  0x21   : > { %247 = vst [vmem:[%s2196_s27 + $0x118] sm:$0xff] %v246_v28  ;;  %249 = vst [vmem:[%s2196_s27 + $0x120] sm:$0xff] %v248_v29  ;;  %v250_v30 = vld [vmem:[%s2191_s26 + $0x5dc] sm:$0xff]  ;;  %v1555_v32 = vld [vmem:[%s2191_s26 + $0x10] sm:$0xf] }
  0x22   : > { %251 = vst [vmem:[%s2196_s27 + $0x12c] sm:$0xff] %v250_v30  ;;  %253 = vst [vmem:[%s2196_s27 + $0x134] sm:$0xff] %v252_v31  ;;  %v1557_v33 = vld [vmem:[%s2191_s26 + $0x74] sm:$0xf]  ;;  %v1559_v34 = vld [vmem:[%s2191_s26 + $0xd8] sm:$0xf] }
  0x23   : > { %1556 = vst [vmem:[%s2196_s27 + $0x10] sm:$0xf] %v1555_v32  ;;  %v1561_v35 = vld [vmem:[%s2191_s26 + $0x13c] sm:$0xf]  ;;  %1558 = vst [vmem:[%s2196_s27 + $0x24] sm:$0xf] %v1557_v33 }
  0x24   : > { %1560 = vst [vmem:[%s2196_s27 + $0x38] sm:$0xf] %v1559_v34  ;;  %1562 = vst [vmem:[%s2196_s27 + $0x4c] sm:$0xf] %v1561_v35  ;;  %v1563_v36 = vld [vmem:[%s2191_s26 + $0x1a0] sm:$0xf] }
  0x25   : > { %v1565_v37 = vld [vmem:[%s2191_s26 + $0x204] sm:$0xf]  ;;  %v1567_v38 = vld [vmem:[%s2191_s26 + $0x268] sm:$0xf]  ;;  %1564 = vst [vmem:[%s2196_s27 + $0x60] sm:$0xf] %v1563_v36 }
  0x26   : > { %1566 = vst [vmem:[%s2196_s27 + $0x74] sm:$0xf] %v1565_v37  ;;  %1568 = vst [vmem:[%s2196_s27 + $0x88] sm:$0xf] %v1567_v38  ;;  %v1569_v39 = vld [vmem:[%s2191_s26 + $0x2cc] sm:$0xf] }
  0x27   : > { %v1571_v40 = vld [vmem:[%s2191_s26 + $0x330] sm:$0xf]  ;;  %v1573_v41 = vld [vmem:[%s2191_s26 + $0x394] sm:$0xf]  ;;  %1570 = vst [vmem:[%s2196_s27 + $0x9c] sm:$0xf] %v1569_v39 }
  0x28   : > { %1572 = vst [vmem:[%s2196_s27 + $0xb0] sm:$0xf] %v1571_v40  ;;  %1574 = vst [vmem:[%s2196_s27 + $0xc4] sm:$0xf] %v1573_v41  ;;  %v1575_v42 = vld [vmem:[%s2191_s26 + $0x3f8] sm:$0xf] }
  0x29   : > { %v1577_v43 = vld [vmem:[%s2191_s26 + $0x45c] sm:$0xf]  ;;  %v1579_v44 = vld [vmem:[%s2191_s26 + $0x4c0] sm:$0xf]  ;;  %1576 = vst [vmem:[%s2196_s27 + $0xd8] sm:$0xf] %v1575_v42 }
  0x2a   : > { %1578 = vst [vmem:[%s2196_s27 + $0xec] sm:$0xf] %v1577_v43  ;;  %1580 = vst [vmem:[%s2196_s27 + $0x100] sm:$0xf] %v1579_v44  ;;  %v1581_v45 = vld [vmem:[%s2191_s26 + $0x524] sm:$0xf] }
  0x2b   : > { %v1583_v46 = vld [vmem:[%s2191_s26 + $0x588] sm:$0xf]  ;;  %v1585_v47 = vld [vmem:[%s2191_s26 + $0x5ec] sm:$0xf]  ;;  %1582 = vst [vmem:[%s2196_s27 + $0x114] sm:$0xf] %v1581_v45 }
  0x2c   : > { %1584 = vst [vmem:[%s2196_s27 + $0x128] sm:$0xf] %v1583_v46  ;;  %1586 = vst [vmem:[%s2196_s27 + $0x13c] sm:$0xf] %v1585_v47 }
  0x2d PF: > { %p1587_p6 = scmp.ge.s32.totalorder %s2125_s16, 1  ;;  %p309_p7 = scmp.lt.s32.totalorder %s2125_s16, 6 }
  0x2f   : > { %p310_p8 = pnand %p1587_p6, %p309_p7 }
  0x30   : > { %s316_s28 = sand.u32 (!%p310_p8), 1, %s2109_s12   ;;  %s355_s29 = smul.u32 (!%p310_p8), 80, %s2117_s14 }
  0x31   : > { %313 = sbr.rel (%p310_p8) target bundleno = 405 (0x195), region = 54  ;;  %p1589_p10 = scmp.ne.s32.totalorder (!%p310_p8), %s2117_s14, 0 }
  0x32   : > { %s1949_s30 = smul.u32 (!%p310_p8), 320, %s316_s28  ;;  %p356_p9 = scmp.lt.s32.totalorder (!%p310_p8), %s355_s29, 399 }
  0x34   : > { %s2300_s8 = scalar_lea.vmem (!%p310_p8), [#allocation3], %s1949_s30 }
  0x38   : > { %s2473_s29 = smov (!%p356_p9, %s355_s29), 399  ;;  %380 = sbr.rel (%p1589_p10) target bundleno = 66 (0x42), region = 62 }
  0x39   : > { %s1588_s4 = sshll.u32 %s2473_s29, 2  ;;  %v2127_v48 = vmov (!%p1589_p10), 0.0  }
  0x3a   : > { %s2298_s7 = scalar_lea.vmem %s2463_s1, %s1588_s4  ;;  %381 = vst [vmem:[#allocation2] sm:$0xff] (!%p1589_p10), %v2127_v48  ;;  %382 = vst [vmem:[#allocation2 + $0x8] sm:$0xff] (!%p1589_p10), %v2127_v48 }
  0x3b   : > { %383 = vst [vmem:[#allocation2 + $0x10] sm:$0xff] (!%p1589_p10), %v2127_v48  ;;  %384 = vst [vmem:[#allocation2 + $0x18] sm:$0xff] (!%p1589_p10), %v2127_v48 }
  0x3c   : > { %385 = vst [vmem:[#allocation2 + $0x20] sm:$0xff] (!%p1589_p10), %v2127_v48  ;;  %386 = vst [vmem:[#allocation2 + $0x28] sm:$0xff] (!%p1589_p10), %v2127_v48 }
  0x3d   : > { %387 = vst [vmem:[#allocation2 + $0x30] sm:$0xff] (!%p1589_p10), %v2127_v48  ;;  %388 = vst [vmem:[#allocation2 + $0x38] sm:$0xff] (!%p1589_p10), %v2127_v48 }
  0x3e   : > { %389 = vst [vmem:[#allocation2 + $0x40] sm:$0xff] (!%p1589_p10), %v2127_v48  ;;  %390 = vst [vmem:[#allocation2 + $0x48] sm:$0xff] (!%p1589_p10), %v2127_v48 }
  0x3f   : > { %391 = vst [vmem:[#allocation2 + $0x50] sm:$0xff] %v2127_v48  ;;  %392 = vst [vmem:[#allocation2 + $0x58] sm:$0xff] %v2127_v48 }
  0x40   : > { %393 = vst [vmem:[#allocation2 + $0x60] sm:$0xff] %v2127_v48  ;;  %394 = vst [vmem:[#allocation2 + $0x68] sm:$0xff] %v2127_v48 }
  0x41   : > { %395 = vst [vmem:[#allocation2 + $0x70] sm:$0xff] %v2127_v48  ;;  %396 = vst [vmem:[#allocation2 + $0x78] sm:$0xff] %v2127_v48 }
  0x42 PF: > { %v1991_v49 = vld [vmem:[%s2298_s7 + $0x40] sm:$0xff]   ;;  %v1995_v53 = vld [vmem:[%s2298_s7 + $0x48] sm:$0xff]   ;;  %v1999_v57 = vld [vmem:[%s2298_s7 + $0x50] sm:$0xff]   ;;  %p1670_p11 = scmp.ne.s32.totalorder %s2117_s14, 4 }
  0x43   : > { %v1992_v50 = vld [vmem:[%s2298_s7 + $0xc0] sm:$0xff]   ;;  %1756 = vmatprep.subr.bf16.mxu0 %v1991_v49  ;;  %v1996_v54 = vld [vmem:[%s2298_s7 + $0xc8] sm:$0xff]   ;;  %v2000_v58 = vld [vmem:[%s2298_s7 + $0xd0] sm:$0xff]  }
  0x44   : > { %v1993_v51 = vld [vmem:[%s2298_s7] sm:$0xff]   ;;  %1820 = vmatprep.subr.bf16.mxu1 %v1992_v50  ;;  %v1997_v55 = vld [vmem:[%s2298_s7 + $0x8] sm:$0xff]   ;;  %v2001_v59 = vld [vmem:[%s2298_s7 + $0x10] sm:$0xff]  }
  0x45   : > { %v1994_v52 = vld [vmem:[%s2298_s7 + $0x80] sm:$0xff]   ;;  %1757 = vmatpush3.bf16.msra.mxu0 %v1993_v51  ;;  %v1998_v56 = vld [vmem:[%s2298_s7 + $0x88] sm:$0xff]   ;;  %v2002_v60 = vld [vmem:[%s2298_s7 + $0x90] sm:$0xff]  }
  0x46   : > { %1821 = vmatpush3.bf16.msra.mxu1 %v1994_v52  ;;  %1758 = vmatprep.subr.bf16.mxu0 %v1995_v53  ;;  %v2003_v61 = vld [vmem:[%s2298_s7 + $0x58] sm:$0xff]   ;;  %v2007_v1 = vld [vmem:[%s2298_s7 + $0x60] sm:$0xff]   ;;  %v2011_v5 = vld [vmem:[%s2298_s7 + $0x68] sm:$0xff]  }
  0x47   : > { %1822 = vmatprep.subr.bf16.mxu1 %v1996_v54  ;;  %v2004_v62 = vld [vmem:[%s2298_s7 + $0xd8] sm:$0xff]   ;;  %v2008_v2 = vld [vmem:[%s2298_s7 + $0xe0] sm:$0xff]   ;;  %v2012_v6 = vld [vmem:[%s2298_s7 + $0xe8] sm:$0xff]  }
  0x48   : > { %v2005_v63 = vld [vmem:[%s2298_s7 + $0x18] sm:$0xff]   ;;  %v2009_v3 = vld [vmem:[%s2298_s7 + $0x20] sm:$0xff]   ;;  %v2013_v7 = vld [vmem:[%s2298_s7 + $0x28] sm:$0xff]  }
  0x49   : > { %1759 = vmatpush3.bf16.msra.mxu0 %v1997_v55  ;;  %v2006_v0 = vld [vmem:[%s2298_s7 + $0x98] sm:$0xff]   ;;  %v2010_v4 = vld [vmem:[%s2298_s7 + $0xa0] sm:$0xff]   ;;  %v2014_v8 = vld [vmem:[%s2298_s7 + $0xa8] sm:$0xff]  }
  0x4a   : > { %1823 = vmatpush3.bf16.msra.mxu1 %v1998_v56  ;;  %1760 = vmatprep.subr.bf16.mxu0 %v1999_v57  ;;  %v2015_v9 = vld [vmem:[%s2298_s7 + $0x70] sm:$0xff]   ;;  %v2019_v13 = vld [vmem:[%s2298_s7 + $0x78] sm:$0xff]   ;;  %v2028_v20 = vld [vmem:[%s2300_s8 + $0xc] ss:$20 sps:$4 sm:$0xff]  }
  0x4b   : > { %1824 = vmatprep.subr.bf16.mxu1 %v2000_v58  ;;  %v2016_v10 = vld [vmem:[%s2298_s7 + $0xf0] sm:$0xff]   ;;  %v2020_v14 = vld [vmem:[%s2298_s7 + $0xf8] sm:$0xff]   ;;  %v2029_v21 = vld [vmem:[%s2298_s7 + $0x100] sm:$0xff]   ;;  %1118 = vmatprep.mubr.bf16.mxu1 %v2028_v20 }
  0x4c   : > { %v2017_v11 = vld [vmem:[%s2298_s7 + $0x30] sm:$0xff]   ;;  %v2021_v15 = vld [vmem:[%s2298_s7 + $0x38] sm:$0xff]   ;;  %v2030_v22 = vld [vmem:[%s2300_s8 + $0x2c] ss:$20 sps:$4 sm:$0xff]  }
  0x4d   : > { %1761 = vmatpush3.bf16.msra.mxu0 %v2001_v59  ;;  %v2018_v12 = vld [vmem:[%s2298_s7 + $0xb0] sm:$0xff]   ;;  %v2022_v16 = vld [vmem:[%s2298_s7 + $0xb8] sm:$0xff]   ;;  %v2036_v24 = vld [vmem:[%s2298_s7 + $0x108] sm:$0xff]  }
  0x4e   : > { %1825 = vmatpush3.bf16.msra.mxu1 %v2002_v60  ;;  %1762 = vmatprep.subr.bf16.mxu0 %v2003_v61  ;;  %v2023_v17 = vld [vmem:[%s2300_s8] ss:$20 sps:$4 sm:$0xff]   ;;  %v2025_v18 = vld [vmem:[%s2300_s8 + $0x4] ss:$20 sps:$4 sm:$0xff]   ;;  %v2026_v19 = vld [vmem:[%s2300_s8 + $0x8] ss:$20 sps:$4 sm:$0xff]  }
  0x4f   : > { %1826 = vmatprep.subr.bf16.mxu1 %v2004_v62  ;;  %1021 = vmatprep.mubr.bf16.mxu0 %v2025_v18  ;;  %v2032_v23 = vld [vmem:[%s2300_s8 + $0x34] ss:$20 sps:$4 sm:$0xff]   ;;  %v2035_v26 = vld [vmem:[%s2300_s8 + $0x30] ss:$20 sps:$4 sm:$0xff]   ;;  %v2050_v30 = vld [vmem:[%s2298_s7 + $0x118] sm:$0xff]  }
  0x50   : > { %v2034_v25 = vld [vmem:[%s2300_s8 + $0x28] ss:$20 sps:$4 sm:$0xff]   ;;  %v2043_v29 = vld [vmem:[%s2298_s7 + $0x110] sm:$0xff]   ;;  %v2042_v32 = vld [vmem:[%s2300_s8 + $0x58] ss:$20 sps:$4 sm:$0xff]  }
  0x51   : > { %1763 = vmatpush3.bf16.msra.mxu0 %v2005_v63  ;;  %v2037_v27 = vld [vmem:[%s2300_s8 + $0x54] ss:$20 sps:$4 sm:$0xff]   ;;  %v2039_v28 = vld [vmem:[%s2300_s8 + $0x5c] ss:$20 sps:$4 sm:$0xff]   ;;  %v2046_v34 = vld [vmem:[%s2300_s8 + $0x84] ss:$20 sps:$4 sm:$0xff]  }
  0x52   : > { %1827 = vmatpush3.bf16.msra.mxu1 %v2006_v0  ;;  %1764 = vmatprep.subr.bf16.mxu0 %v2007_v1  ;;  %v2041_v31 = vld [vmem:[%s2300_s8 + $0x50] ss:$20 sps:$4 sm:$0xff]   ;;  %v2064_v36 = vld [vmem:[%s2298_s7 + $0x128] sm:$0xff]   ;;  %v2049_v38 = vld [vmem:[%s2300_s8 + $0x80] ss:$20 sps:$4 sm:$0xff]  }
  0x53   : > { %1828 = vmatprep.subr.bf16.mxu1 %v2008_v2  ;;  %v2044_v33 = vld [vmem:[%s2300_s8 + $0x7c] ss:$20 sps:$4 sm:$0xff]   ;;  %v2057_v35 = vld [vmem:[%s2298_s7 + $0x120] sm:$0xff]   ;;  %v2048_v37 = vld [vmem:[%s2300_s8 + $0x78] ss:$20 sps:$4 sm:$0xff]  }
  0x54   : > { %v2051_v39 = vld [vmem:[%s2300_s8 + $0xa4] ss:$20 sps:$4 sm:$0xff]   ;;  %v2071_v40 = vld [vmem:[%s2298_s7 + $0x130] sm:$0xff]   ;;  %v2053_v41 = vld [vmem:[%s2300_s8 + $0xac] ss:$20 sps:$4 sm:$0xff]  }
  0x55   : > { %1765 = vmatpush3.bf16.msra.mxu0 %v2009_v3  ;;  %v2078_v42 = vld [vmem:[%s2298_s7 + $0x138] sm:$0xff]   ;;  %v2055_v43 = vld [vmem:[%s2300_s8 + $0xa0] ss:$20 sps:$4 sm:$0xff]   ;;  %v2063_v48 = vld [vmem:[%s2300_s8 + $0xd0] ss:$20 sps:$4 sm:$0xff]  }
  0x56   : > { %1829 = vmatpush3.bf16.msra.mxu1 %v2010_v4  ;;  %1766 = vmatprep.subr.bf16.mxu0 %v2011_v5  ;;  %v2056_v44 = vld [vmem:[%s2300_s8 + $0xa8] ss:$20 sps:$4 sm:$0xff]   ;;  %v2058_v45 = vld [vmem:[%s2300_s8 + $0xcc] ss:$20 sps:$4 sm:$0xff]   ;;  %v2069_v51 = vld [vmem:[%s2300_s8 + $0xf0] ss:$20 sps:$4 sm:$0xff]  }
  0x57   : > { %1830 = vmatprep.subr.bf16.mxu1 %v2012_v6  ;;  %v2060_v46 = vld [vmem:[%s2300_s8 + $0xd4] ss:$20 sps:$4 sm:$0xff]   ;;  %v2067_v50 = vld [vmem:[%s2300_s8 + $0xfc] ss:$20 sps:$4 sm:$0xff]   ;;  %v2070_v52 = vld [vmem:[%s2300_s8 + $0xf8] ss:$20 sps:$4 sm:$0xff]  }
  0x58   : > { %v2062_v47 = vld [vmem:[%s2300_s8 + $0xc8] ss:$20 sps:$4 sm:$0xff]   ;;  %v2074_v54 = vld [vmem:[%s2300_s8 + $0x124] ss:$20 sps:$4 sm:$0xff]   ;;  %v2077_v56 = vld [vmem:[%s2300_s8 + $0x120] ss:$20 sps:$4 sm:$0xff]  }
  0x59   : > { %1767 = vmatpush3.bf16.msra.mxu0 %v2013_v7  ;;  %v2065_v49 = vld [vmem:[%s2300_s8 + $0xf4] ss:$20 sps:$4 sm:$0xff]   ;;  %v2072_v53 = vld [vmem:[%s2300_s8 + $0x11c] ss:$20 sps:$4 sm:$0xff]   ;;  %v2076_v55 = vld [vmem:[%s2300_s8 + $0x118] ss:$20 sps:$4 sm:$0xff]  }
  0x5a   : > { %1831 = vmatpush3.bf16.msra.mxu1 %v2014_v8  ;;  %1768 = vmatprep.subr.bf16.mxu0 %v2015_v9  ;;  %v2079_v57 = vld [vmem:[%s2300_s8 + $0x10] ss:$20 sps:$4 sm:$0xff]   ;;  %v2081_v59 = vld [vmem:[%s2300_s8 + $0x38] ss:$20 sps:$4 sm:$0xff]   ;;  %v2083_v61 = vld [vmem:[%s2300_s8 + $0x60] ss:$20 sps:$4 sm:$0xff]  }
  0x5b   : > { %1832 = vmatprep.subr.bf16.mxu1 %v2016_v10  ;;  %v2080_v58 = vld [vmem:[%s2300_s8 + $0xb0] ss:$20 sps:$4 sm:$0xff]   ;;  %v2082_v60 = vld [vmem:[%s2300_s8 + $0xd8] ss:$20 sps:$4 sm:$0xff]   ;;  %v2084_v62 = vld [vmem:[%s2300_s8 + $0x100] ss:$20 sps:$4 sm:$0xff]  }
  0x5c   : > { %v2085_v63 = vld [vmem:[%s2300_s8 + $0x88] ss:$20 sps:$4 sm:$0xff]  }
  0x5d   : > { %1769 = vmatpush3.bf16.msra.mxu0 %v2017_v11  ;;  %v2086_v0 = vld [vmem:[%s2300_s8 + $0x128] ss:$20 sps:$4 sm:$0xff]  }
  0x5e   : > { %1833 = vmatpush3.bf16.msra.mxu1 %v2018_v12  ;;  %1770 = vmatprep.subr.bf16.mxu0 %v2019_v13 }
  0x5f   : > { %1834 = vmatprep.subr.bf16.mxu1 %v2020_v14 }
  0x61   : > { %1771 = vmatpush3.bf16.msra.mxu0 %v2021_v15 }
  0x62   : > { %1835 = vmatpush3.bf16.msra.mxu1 %v2022_v16  ;;  %1900 = vmatprep.subr.bf16.mxu0 %v2029_v21 }
  0x63   : > { %1932 = vmatprep.subr.bf16.mxu1 %v2029_v21 }
  0x64   : > { %1022 = vmatmul.mubr.bf16.vlgmr.msra.gmra.mrb[0].mxu0 %v2023_v17 }
  0x65   : > { %1119 = vmatmul.mubr.bf16.vlgmr.msra.gmra.mrb[0].mxu1 %v2026_v19  ;;  %1901 = vmatpush3.bf16.msra.mxu0 %v2029_v21 }
  0x66   : > { %1940 = vmatpush3.bf16.msra.mxu1 %v2029_v21  ;;  %1029 = vmatprep.mubr.bf16.mxu0 %v2030_v22 }
  0x67   : > { %1126 = vmatprep.mubr.bf16.mxu1 %v2032_v23  ;;  %1902 = vmatprep.subr.bf16.mxu0 %v2036_v24 }
  0x68   : > { %1933 = vmatprep.subr.bf16.mxu1 %v2036_v24 }
  0x69   : > { %1903 = vmatpush3.bf16.msra.mxu0 %v2036_v24 }
  0x6a   : > { %1941 = vmatpush3.bf16.msra.mxu1 %v2036_v24  ;;  %1904 = vmatprep.subr.bf16.mxu0 %v2043_v29 }
  0x6b   : > { %1934 = vmatprep.subr.bf16.mxu1 %v2043_v29 }
  0x6c   : > { %1030 = vmatmul.mubr.bf16.gmra.mrb[4].mxu0 %v2034_v25 }
  0x6d   : > { %1127 = vmatmul.mubr.bf16.gmra.mrb[4].mxu1 %v2035_v26  ;;  %1037 = vmatprep.mubr.bf16.mxu0 %v2037_v27 }
  0x6e   : > { %1134 = vmatprep.mubr.bf16.mxu1 %v2039_v28  ;;  %1905 = vmatpush3.bf16.msra.mxu0 %v2043_v29 }
  0x6f   : > { %1942 = vmatpush3.bf16.msra.mxu1 %v2043_v29  ;;  %1906 = vmatprep.subr.bf16.mxu0 %v2050_v30 }
  0x70   : > { %1935 = vmatprep.subr.bf16.mxu1 %v2050_v30 }
  0x72   : > { %1907 = vmatpush3.bf16.msra.mxu0 %v2050_v30 }
  0x73   : > { %1943 = vmatpush3.bf16.msra.mxu1 %v2050_v30  ;;  %1908 = vmatprep.subr.bf16.mxu0 %v2057_v35 }
  0x74   : > { %1038 = vmatmul.mubr.bf16.gmra.mrb[8].mxu0 %v2041_v31  ;;  %1936 = vmatprep.subr.bf16.mxu1 %v2057_v35 }
  0x75   : > { %1135 = vmatmul.mubr.bf16.gmra.mrb[8].mxu1 %v2042_v32  ;;  %1045 = vmatprep.mubr.bf16.mxu0 %v2044_v33 }
  0x76   : > { %1142 = vmatprep.mubr.bf16.mxu1 %v2046_v34  ;;  %1909 = vmatpush3.bf16.msra.mxu0 %v2057_v35 }
  0x77   : > { %1944 = vmatpush3.bf16.msra.mxu1 %v2057_v35  ;;  %1910 = vmatprep.subr.bf16.mxu0 %v2064_v36 }
  0x78   : > { %1937 = vmatprep.subr.bf16.mxu1 %v2064_v36 }
  0x7a   : > { %1911 = vmatpush3.bf16.msra.mxu0 %v2064_v36 }
  0x7b   : > { %1945 = vmatpush3.bf16.msra.mxu1 %v2064_v36  ;;  %1912 = vmatprep.subr.bf16.mxu0 %v2071_v40 }
  0x7c   : > { %1046 = vmatmul.mubr.bf16.gmra.mrb[12].mxu0 %v2048_v37  ;;  %1938 = vmatprep.subr.bf16.mxu1 %v2071_v40 }
  0x7d   : > { %1143 = vmatmul.mubr.bf16.gmra.mrb[12].mxu1 %v2049_v38  ;;  %1053 = vmatprep.mubr.bf16.mxu0 %v2051_v39 }
  0x7e   : > { %1150 = vmatprep.mubr.bf16.mxu1 %v2053_v41  ;;  %1913 = vmatpush3.bf16.msra.mxu0 %v2071_v40 }
  0x7f   : > { %1946 = vmatpush3.bf16.msra.mxu1 %v2071_v40  ;;  %1914 = vmatprep.subr.bf16.mxu0 %v2078_v42 }
  0x80   : > { %1939 = vmatprep.subr.bf16.mxu1 %v2078_v42 }
  0x82   : > { %1915 = vmatpush3.bf16.msra.mxu0 %v2078_v42 }
  0x83   : > { %1947 = vmatpush3.bf16.msra.mxu1 %v2078_v42 }
  0x84   : > { %1054 = vmatmul.mubr.bf16.gmra.mrb[16].mxu0 %v2055_v43 }
  0x85   : > { %1151 = vmatmul.mubr.bf16.gmra.mrb[16].mxu1 %v2056_v44  ;;  %1061 = vmatprep.mubr.bf16.mxu0 %v2058_v45 }
  0x86   : > { %1158 = vmatprep.mubr.bf16.mxu1 %v2060_v46 }
  0x8c   : > { %1062 = vmatmul.mubr.bf16.gmra.mrb[20].mxu0 %v2062_v47 }
  0x8d   : > { %1159 = vmatmul.mubr.bf16.gmra.mrb[20].mxu1 %v2063_v48  ;;  %1069 = vmatprep.mubr.bf16.mxu0 %v2065_v49 }
  0x8e   : > { %1166 = vmatprep.mubr.bf16.mxu1 %v2067_v50 }
  0x94   : > { %1070 = vmatmul.mubr.bf16.gmra.mrb[24].mxu0 %v2069_v51 }
  0x95   : > { %1167 = vmatmul.mubr.bf16.gmra.mrb[24].mxu1 %v2070_v52  ;;  %1077 = vmatprep.mubr.bf16.mxu0 %v2072_v53 }
  0x96   : > { %1174 = vmatprep.mubr.bf16.mxu1 %v2074_v54 }
  0x9c   : > { %1078 = vmatmul.mubr.bf16.gmra.mrb[28].mxu0 %v2076_v55 }
  0x9d   : > { %1175 = vmatmul.mubr.bf16.gmra.mrb[28].mxu1 %v2077_v56  ;;  %1916 = vmatprep.mubr.bf16.mxu0 %v2079_v57 }
  0x9e   : > { %1924 = vmatprep.mubr.bf16.mxu1 %v2080_v58 }
  0xa4   : > { %1917 = vmatmul.mubr.bf16.vlgmr.msra.gmra.mrb[32].mxu0 %v2081_v59 }
  0xa5   : > { %1925 = vmatmul.mubr.bf16.vlgmr.msra.gmra.mrb[32].mxu1 %v2082_v60  ;;  %1920 = vmatprep.mubr.bf16.mxu0 %v2083_v61 }
  0xa6   : > { %1928 = vmatprep.mubr.bf16.mxu1 %v2084_v62 }
  0xac   : > { %1921 = vmatmul.mubr.bf16.gmra.mrb[36].mxu0 %v2085_v63 }
  0xad   : > { %1929 = vmatmul.mubr.bf16.gmra.mrb[36].mxu1 %v2086_v0 }
 0x137   : > { %v1772_v1 = vpop.f32.mrb[0].mxu0 }
 0x138   : > { %v1836_v2 = vpop.f32.mrb[0].mxu1  ;;  %v1773_v3 = vpop.f32.mrb[1].mxu0 }
 0x139   : > { %v1774_v4 = vadd.f32 %v1773_v3, %v1772_v1  ;;  %v1837_v5 = vpop.f32.mrb[1].mxu1  ;;  %v1775_v6 = vpop.f32.mrb[2].mxu0 }
 0x13a   : > { %v1838_v7 = vadd.f32 %v1837_v5, %v1836_v2  ;;  %v1839_v8 = vpop.f32.mrb[2].mxu1  ;;  %v1776_v9 = vpop.f32.mrb[3].mxu0 }
 0x13b   : > { %v1777_v10 = vadd.f32 %v1776_v9, %v1775_v6  ;;  %v1840_v11 = vpop.f32.mrb[3].mxu1 }
 0x13c   : > { %v1841_v12 = vadd.f32 %v1840_v11, %v1839_v8  ;;  %v2383_v13 = vadd.f32 %v1838_v7, %v1774_v4 }
 0x13e   : > { %v2385_v14 = vadd.f32 %v1841_v12, %v1777_v10 }
 0x13f   : > { %v1778_v15 = vpop.f32.mrb[4].mxu0 }
 0x140   : > { %v1842_v16 = vpop.f32.mrb[4].mxu1  ;;  %v1779_v17 = vpop.f32.mrb[5].mxu0 }
 0x141   : > { %v1780_v18 = vadd.f32 %v1779_v17, %v1778_v15  ;;  %v1843_v19 = vpop.f32.mrb[5].mxu1  ;;  %v1781_v20 = vpop.f32.mrb[6].mxu0 }
 0x142   : > { %v1844_v21 = vadd.f32 %v1843_v19, %v1842_v16  ;;  %v1845_v22 = vpop.f32.mrb[6].mxu1  ;;  %v1782_v23 = vpop.f32.mrb[7].mxu0 }
 0x143   : > { %v1783_v24 = vadd.f32 %v1782_v23, %v1781_v20  ;;  %v1846_v25 = vpop.f32.mrb[7].mxu1 }
 0x144   : > { %v1847_v26 = vadd.f32 %v1846_v25, %v1845_v22  ;;  %v2387_v27 = vadd.f32 %v1844_v21, %v1780_v18 }
 0x146   : > { %v2389_v28 = vadd.f32 %v1847_v26, %v1783_v24 }
 0x147   : > { %v1784_v29 = vpop.f32.mrb[8].mxu0 }
 0x148   : > { %v1848_v30 = vpop.f32.mrb[8].mxu1  ;;  %v1785_v31 = vpop.f32.mrb[9].mxu0 }
 0x149   : > { %v1786_v32 = vadd.f32 %v1785_v31, %v1784_v29  ;;  %v1849_v33 = vpop.f32.mrb[9].mxu1  ;;  %v1787_v34 = vpop.f32.mrb[10].mxu0 }
 0x14a   : > { %v1850_v35 = vadd.f32 %v1849_v33, %v1848_v30  ;;  %v1851_v36 = vpop.f32.mrb[10].mxu1  ;;  %v1788_v37 = vpop.f32.mrb[11].mxu0 }
 0x14b   : > { %v1789_v38 = vadd.f32 %v1788_v37, %v1787_v34  ;;  %v1852_v39 = vpop.f32.mrb[11].mxu1 }
 0x14c   : > { %v1853_v40 = vadd.f32 %v1852_v39, %v1851_v36  ;;  %v2391_v41 = vadd.f32 %v1850_v35, %v1786_v32 }
 0x14e   : > { %v2393_v42 = vadd.f32 %v1853_v40, %v1789_v38 }
 0x14f   : > { %v1790_v43 = vpop.f32.mrb[12].mxu0 }
 0x150   : > { %v1854_v44 = vpop.f32.mrb[12].mxu1  ;;  %v1791_v45 = vpop.f32.mrb[13].mxu0 }
 0x151   : > { %v1792_v46 = vadd.f32 %v1791_v45, %v1790_v43  ;;  %v1855_v47 = vpop.f32.mrb[13].mxu1  ;;  %v1793_v48 = vpop.f32.mrb[14].mxu0 }
 0x152   : > { %v1856_v49 = vadd.f32 %v1855_v47, %v1854_v44  ;;  %v1857_v50 = vpop.f32.mrb[14].mxu1  ;;  %v1794_v51 = vpop.f32.mrb[15].mxu0 }
 0x153   : > { %v1795_v52 = vadd.f32 %v1794_v51, %v1793_v48  ;;  %v1858_v53 = vpop.f32.mrb[15].mxu1 }
 0x154   : > { %v1859_v54 = vadd.f32 %v1858_v53, %v1857_v50  ;;  %v2395_v55 = vadd.f32 %v1856_v49, %v1792_v46 }
 0x156   : > { %v2397_v56 = vadd.f32 %v1859_v54, %v1795_v52 }
 0x157   : > { %v1796_v57 = vpop.f32.mrb[16].mxu0 }
 0x158   : > { %v1860_v58 = vpop.f32.mrb[16].mxu1  ;;  %v1797_v59 = vpop.f32.mrb[17].mxu0 }
 0x159   : > { %v1798_v60 = vadd.f32 %v1797_v59, %v1796_v57  ;;  %v1861_v61 = vpop.f32.mrb[17].mxu1  ;;  %v1799_v62 = vpop.f32.mrb[18].mxu0  ;;  %v399_v57 = vld [vmem:[#allocation2 + $0x10] sm:$0xff] }
 0x15a   : > { %v1862_v63 = vadd.f32 %v1861_v61, %v1860_v58  ;;  %v1863_v0 = vpop.f32.mrb[18].mxu1  ;;  %v1800_v1 = vpop.f32.mrb[19].mxu0 }
 0x15b   : > { %v1801_v2 = vadd.f32 %v1800_v1, %v1799_v62  ;;  %v1864_v3 = vpop.f32.mrb[19].mxu1  ;;  %v397_v62 = vld [vmem:[#allocation2] sm:$0xff] }
 0x15c   : > { %v1865_v4 = vadd.f32 %v1864_v3, %v1863_v0  ;;  %v1153_v5 = vadd.f32 %v1862_v63, %v1798_v60  ;;  %v407_v60 = vld [vmem:[#allocation2 + $0x50] sm:$0xff] }
 0x15e   : > { %v2399_v6 = vadd.f32 %v1865_v4, %v1801_v2  ;;  %v405_v2 = vld [vmem:[#allocation2 + $0x40] sm:$0xff]  ;;  %v400_v4 = vld [vmem:[#allocation2 + $0x18] sm:$0xff] }
 0x15f   : > { %v1802_v7 = vpop.f32.mrb[20].mxu0 }
 0x160   : > { %v1866_v8 = vpop.f32.mrb[20].mxu1  ;;  %v1803_v9 = vpop.f32.mrb[21].mxu0 }
 0x161   : > { %v1804_v10 = vadd.f32 %v1803_v9, %v1802_v7  ;;  %v1867_v11 = vpop.f32.mrb[21].mxu1  ;;  %v1805_v12 = vpop.f32.mrb[22].mxu0 }
 0x162   : > { %v1868_v15 = vadd.f32 %v1867_v11, %v1866_v8  ;;  %v1869_v16 = vpop.f32.mrb[22].mxu1  ;;  %v1806_v17 = vpop.f32.mrb[23].mxu0  ;;  %v408_v11 = vld [vmem:[#allocation2 + $0x58] sm:$0xff] }
 0x163   : > { %v1807_v18 = vadd.f32 %v1806_v17, %v1805_v12  ;;  %v1870_v19 = vpop.f32.mrb[23].mxu1 }
 0x164   : > { %v1871_v20 = vadd.f32 %v1870_v19, %v1869_v16  ;;  %v1161_v21 = vadd.f32 %v1868_v15, %v1804_v10  ;;  %v398_v15 = vld [vmem:[#allocation2 + $0x8] sm:$0xff] }
 0x166   : > { %v1164_v22 = vadd.f32 %v1871_v20, %v1807_v18  ;;  %v406_v20 = vld [vmem:[#allocation2 + $0x48] sm:$0xff] }
 0x167   : > { %v1808_v23 = vpop.f32.mrb[24].mxu0 }
 0x168   : > { %v1872_v24 = vpop.f32.mrb[24].mxu1  ;;  %v1809_v25 = vpop.f32.mrb[25].mxu0 }
 0x169   : > { %v1810_v26 = vadd.f32 %v1809_v25, %v1808_v23  ;;  %v1873_v29 = vpop.f32.mrb[25].mxu1  ;;  %v1811_v30 = vpop.f32.mrb[26].mxu0 }
 0x16a   : > { %v1874_v31 = vadd.f32 %v1873_v29, %v1872_v24  ;;  %v1875_v32 = vpop.f32.mrb[26].mxu1  ;;  %v1812_v33 = vpop.f32.mrb[27].mxu0  ;;  %v411_v29 = vld [vmem:[#allocation2 + $0x70] sm:$0xff] }
 0x16b   : > { %v1813_v34 = vadd.f32 %v1812_v33, %v1811_v30  ;;  %v1876_v35 = vpop.f32.mrb[27].mxu1 }
 0x16c   : > { %v1877_v36 = vadd.f32 %v1876_v35, %v1875_v32  ;;  %v2401_v37 = vadd.f32 %v1874_v31, %v1810_v26  ;;  %v403_v26 = vld [vmem:[#allocation2 + $0x30] sm:$0xff]  ;;  %v401_v31 = vld [vmem:[#allocation2 + $0x20] sm:$0xff] }
 0x16e   : > { %v2403_v38 = vadd.f32 %v1877_v36, %v1813_v34  ;;  %v409_v34 = vld [vmem:[#allocation2 + $0x60] sm:$0xff]  ;;  %v404_v36 = vld [vmem:[#allocation2 + $0x38] sm:$0xff] }
 0x16f   : > { %v1814_v39 = vpop.f32.mrb[28].mxu0 }
 0x170   : > { %v1878_v40 = vpop.f32.mrb[28].mxu1  ;;  %v1815_v43 = vpop.f32.mrb[29].mxu0 }
 0x171   : > { %v1816_v44 = vadd.f32 %v1815_v43, %v1814_v39  ;;  %v1879_v45 = vpop.f32.mrb[29].mxu1  ;;  %v1817_v46 = vpop.f32.mrb[30].mxu0 }
 0x172   : > { %v1880_v47 = vadd.f32 %v1879_v45, %v1878_v40  ;;  %v1881_v48 = vpop.f32.mrb[30].mxu1  ;;  %v1818_v49 = vpop.f32.mrb[31].mxu0  ;;  %v412_v45 = vld [vmem:[#allocation2 + $0x78] sm:$0xff] }
 0x173   : > { %v1819_v50 = vadd.f32 %v1818_v49, %v1817_v46  ;;  %v1882_v51 = vpop.f32.mrb[31].mxu1 }
 0x174   : > { %v1883_v52 = vadd.f32 %v1882_v51, %v1881_v48  ;;  %v1177_v53 = vadd.f32 %v1880_v47, %v1816_v44  ;;  %v402_v47 = vld [vmem:[#allocation2 + $0x28] sm:$0xff] }
 0x176   : > { %v2405_v54 = vadd.f32 %v1883_v52, %v1819_v50 }
 0x177   : > { %v1918_v58 = vpop.f32.mrb[32].mxu0 }
 0x178   : > { %v1226_v59 = vadd.f32 %v1918_v58, %v2387_v27  ;;  %v1926_v61 = vpop.f32.mrb[32].mxu1  ;;  %v1217_v63 = vpop.f32.mrb[33].mxu0 }
 0x179   : > { %v1258_v0 = vadd.f32 %v1926_v61, %v1161_v21  ;;  %v1218_v1 = vadd.f32 %v1217_v63, %v2383_v13  ;;  %v1249_v3 = vpop.f32.mrb[33].mxu1  ;;  %v1919_v7 = vpop.f32.mrb[34].mxu0 }
 0x17a   : > { %v1282_v8 = vadd.f32 %v1226_v59, %v399_v57  ;;  %v1250_v9 = vadd.f32 %v1249_v3, %v1153_v5  ;;  %v1229_v10 = vadd.f32 %v1919_v7, %v2389_v28  ;;  %v1927_v12 = vpop.f32.mrb[34].mxu1  ;;  %v1220_v16 = vpop.f32.mrb[35].mxu0 }
 0x17b   : > { %v1290_v27 = vadd.f32 %v1258_v0, %v407_v60  ;;  %v1280_v17 = vadd.f32 %v1218_v1, %v397_v62  ;;  %v1261_v18 = vadd.f32 %v1927_v12, %v1164_v22  ;;  %v1221_v19 = vadd.f32 %v1220_v16, %v2385_v14  ;;  %v1252_v21 = vpop.f32.mrb[35].mxu1  ;;  %v1671_v60 = vld [vmem:[%s2464_s2] ss:$0 sm:$0xff] (!%p1670_p11) }
 0x17c   : > { %1298 = vst [vmem:[#allocation2 + $0x10] sm:$0xff] %v1282_v8  ;;  %v1288_v13 = vadd.f32 %v1250_v9, %v405_v2  ;;  %v1283_v23 = vadd.f32 %v1229_v10, %v400_v4  ;;  %v1253_v24 = vadd.f32 %v1252_v21, %v2399_v6 }
 0x17d   : > { %1306 = vst [vmem:[#allocation2 + $0x50] sm:$0xff] %v1290_v27  ;;  %1296 = vst [vmem:[#allocation2] sm:$0xff] %v1280_v17  ;;  %v1291_v5 = vadd.f32 %v1261_v18, %v408_v11  ;;  %v1281_v28 = vadd.f32 %v1221_v19, %v398_v15 }
 0x17e   : > { %1304 = vst [vmem:[#allocation2 + $0x40] sm:$0xff] %v1288_v13  ;;  %1299 = vst [vmem:[#allocation2 + $0x18] sm:$0xff] %v1283_v23  ;;  %v1289_v25 = vadd.f32 %v1253_v24, %v406_v20 }
 0x17f   : > { %1307 = vst [vmem:[#allocation2 + $0x58] sm:$0xff] %v1291_v5  ;;  %1297 = vst [vmem:[#allocation2 + $0x8] sm:$0xff] %v1281_v28  ;;  %v1922_v22 = vpop.f32.mrb[36].mxu0 }
 0x180   : > { %1305 = vst [vmem:[#allocation2 + $0x48] sm:$0xff] %v1289_v25  ;;  %v1242_v14 = vadd.f32 %v1922_v22, %v2395_v55  ;;  %v1930_v30 = vpop.f32.mrb[36].mxu1  ;;  %v1233_v32 = vpop.f32.mrb[37].mxu0 }
 0x181   : > { %v1274_v33 = vadd.f32 %v1930_v30, %v1177_v53  ;;  %v1234_v6 = vadd.f32 %v1233_v32, %v2391_v41  ;;  %v1265_v35 = vpop.f32.mrb[37].mxu1  ;;  %v1923_v39 = vpop.f32.mrb[38].mxu0  ;;  %v410_v41 = vld [vmem:[#allocation2 + $0x68] sm:$0xff] }
 0x182   : > { %v1286_v40 = vadd.f32 %v1242_v14, %v403_v26  ;;  %v1266_v43 = vadd.f32 %v1265_v35, %v2401_v37  ;;  %v1245_v44 = vadd.f32 %v1923_v39, %v2397_v56  ;;  %v1931_v46 = vpop.f32.mrb[38].mxu1  ;;  %v1236_v55 = vpop.f32.mrb[39].mxu0  ;;  %1315 = sbr.rel (%p1670_p11) target bundleno = 405 (0x195), region = 66 }
 0x183   : > { %v1294_v48 = vadd.f32 %v1274_v33, %v411_v29  ;;  %v1284_v49 = vadd.f32 %v1234_v6, %v401_v31  ;;  %v1277_v50 = vadd.f32 %v1931_v46, %v2405_v54  ;;  %v1237_v51 = vadd.f32 %v1236_v55, %v2393_v42  ;;  %v1268_v52 = vpop.f32.mrb[39].mxu1  ;;  %v1318_v62 = vld [vmem:[#allocation2 + $0x10] sm:$0xff] (!%p1670_p11) }
 0x184   : > { %1302 = vst [vmem:[#allocation2 + $0x30] sm:$0xff] %v1286_v40  ;;  %v1292_v53 = vadd.f32 %v1266_v43, %v409_v34  ;;  %v1287_v57 = vadd.f32 %v1245_v44, %v404_v36  ;;  %v1269_v58 = vadd.f32 %v1268_v52, %v2403_v38  ;;  %v1316_v42 = vld [vmem:[#allocation2] sm:$0xff] (!%p1670_p11)  ;;  %v1341_v1 = vadd.f32 (!%p1670_p11), %v1671_v60, %v1318_v62  ;;  %v1326_v27 = vld [vmem:[#allocation2 + $0x50] sm:$0xff] (!%p1670_p11) }
 0x185   : > { %1310 = vst [vmem:[#allocation2 + $0x70] sm:$0xff] %v1294_v48  ;;  %1300 = vst [vmem:[#allocation2 + $0x20] sm:$0xff] %v1284_v49  ;;  %v1295_v56 = vadd.f32 %v1277_v50, %v412_v45  ;;  %v1285_v37 = vadd.f32 %v1237_v51, %v402_v47  ;;  %v1339_v38 = vadd.f32 (!%p1670_p11), %v1671_v60, %v1316_v42  ;;  %v1319_v63 = vld [vmem:[#allocation2 + $0x18] sm:$0xff] (!%p1670_p11)  ;;  %v1324_v15 = vld [vmem:[#allocation2 + $0x40] sm:$0xff] (!%p1670_p11) }
 0x186   : > { %1308 = vst [vmem:[#allocation2 + $0x60] sm:$0xff] %v1292_v53  ;;  %1303 = vst [vmem:[#allocation2 + $0x38] sm:$0xff] %v1287_v57  ;;  %v1293_v59 = vadd.f32 %v1269_v58, %v410_v41  ;;  %v1317_v54 = vld [vmem:[#allocation2 + $0x8] sm:$0xff] (!%p1670_p11)  ;;  %v1342_v2 = vadd.f32 (!%p1670_p11), %v1671_v60, %v1319_v63  ;;  %v1347_v18 = vadd.f32 (!%p1670_p11), %v1671_v60, %v1324_v15  ;;  %v1327_v20 = vld [vmem:[#allocation2 + $0x58] sm:$0xff] (!%p1670_p11) }
 0x187   : > { %1311 = vst [vmem:[#allocation2 + $0x78] sm:$0xff] %v1295_v56  ;;  %1301 = vst [vmem:[#allocation2 + $0x28] sm:$0xff] %v1285_v37  ;;  %v1340_v61 = vadd.f32 (!%p1670_p11), %v1671_v60, %v1317_v54  ;;  %v1325_v16 = vld [vmem:[#allocation2 + $0x48] sm:$0xff] (!%p1670_p11)  ;;  %v1349_v21 = vadd.f32 (!%p1670_p11), %v1671_v60, %v1326_v27  ;;  %v1350_v28 = vadd.f32 (!%p1670_p11), %v1671_v60, %v1327_v20 }
 0x188   : > { %1309 = vst [vmem:[#allocation2 + $0x68] sm:$0xff] %v1293_v59  ;;  %v1717_v17 = vpack.c.bf16 (!%p1670_p11), %v1342_v2, %v1341_v1  ;;  %v1348_v19 = vadd.f32 (!%p1670_p11), %v1671_v60, %v1325_v16 }
 0x189   : > { %v1712_v9 = vpack.c.bf16 %v1340_v61, %v1339_v38  ;;  %v1737_v32 = vpack.c.bf16 %v1350_v28, %v1349_v21 }
 0x18a   : > { %1749 = vst [vmem:[%s2465_s3 + $0x8] sm:$0xff] %v1717_v17   ;;  %v1732_v14 = vpack.c.bf16 %v1348_v19, %v1347_v18 }
 0x18b   : > { %v1322_v7 = vld [vmem:[#allocation2 + $0x30] sm:$0xff]  ;;  %1713 = vst [vmem:[%s2465_s3] sm:$0xff] %v1712_v9   ;;  %1753 = vst [vmem:[%s2465_s3 + $0x28] sm:$0xff] %v1737_v32  }
 0x18c   : > { %v1320_v0 = vld [vmem:[#allocation2 + $0x20] sm:$0xff]  ;;  %v1345_v11 = vadd.f32 %v1671_v60, %v1322_v7  ;;  %v1330_v26 = vld [vmem:[#allocation2 + $0x70] sm:$0xff]  ;;  %1752 = vst [vmem:[%s2465_s3 + $0x20] sm:$0xff] %v1732_v14  }
 0x18d   : > { %v1343_v4 = vadd.f32 %v1671_v60, %v1320_v0  ;;  %v1323_v8 = vld [vmem:[#allocation2 + $0x38] sm:$0xff]  ;;  %v1328_v13 = vld [vmem:[#allocation2 + $0x60] sm:$0xff]  ;;  %v1353_v30 = vadd.f32 %v1671_v60, %v1330_v26 }
 0x18e   : > { %v1321_v3 = vld [vmem:[#allocation2 + $0x28] sm:$0xff]  ;;  %v1346_v12 = vadd.f32 %v1671_v60, %v1323_v8  ;;  %v1351_v25 = vadd.f32 %v1671_v60, %v1328_v13  ;;  %v1331_v22 = vld [vmem:[#allocation2 + $0x78] sm:$0xff] }
 0x18f   : > { %v1344_v10 = vadd.f32 %v1671_v60, %v1321_v3  ;;  %v1329_v23 = vld [vmem:[#allocation2 + $0x68] sm:$0xff]  ;;  %v1354_v31 = vadd.f32 %v1671_v60, %v1331_v22 }
 0x190   : > { %v1727_v5 = vpack.c.bf16 %v1346_v12, %v1345_v11  ;;  %v1352_v29 = vadd.f32 %v1671_v60, %v1329_v23 }
 0x191   : > { %v1722_v24 = vpack.c.bf16 %v1344_v10, %v1343_v4  ;;  %v1747_v6 = vpack.c.bf16 %v1354_v31, %v1353_v30 }
 0x192   : > { %1751 = vst [vmem:[%s2465_s3 + $0x18] sm:$0xff] %v1727_v5   ;;  %v1742_v33 = vpack.c.bf16 %v1352_v29, %v1351_v25 }
 0x193   : > { %1750 = vst [vmem:[%s2465_s3 + $0x10] sm:$0xff] %v1722_v24   ;;  %1755 = vst [vmem:[%s2465_s3 + $0x38] sm:$0xff] %v1747_v6  }
 0x194   : > { %1754 = vst [vmem:[%s2465_s3 + $0x30] sm:$0xff] %v1742_v33  }
 0x195 PF: > { %s13_s16 = sadd.s32 1, %s2125_s16   ;;  %s2466_s12 = smov %s2113_s13 }
 0x196   : > { %p10_p12 = scmp.ge.s32.totalorder %s13_s16, 7   ;;  %s2467_s13 = smov %s2183_s20 }
 0x197   : > { %s2468_s14 = smov %s2121_s15  ;;  %s2469_s15 = smov %s2471_s17 }
 0x198   :  { %12 = sbr.rel (!%p10_p12) target bundleno = 3 (0x3), region = 113 }

// kernel: fpm_forward.15
= control target key start
LH: loop header
LB: loop body
LE: loop exit
PB: predicated region body
PF: predicated region fallthrough
CT: control target
= control target key end

     0   :  { %s3032_s1 = inlined_call_operand.vmem [shape: bf16[1152,128], index: 1, kind: input, shape index: {}]   ;;  %s3033_s0 = inlined_call_operand.vmem [shape: bf16[128,1152], index: 0, kind: input, shape index: {}]   ;;  %s3034_s2 = inlined_call_operand.vmem [shape: f32[1,128], index: 2, kind: input, shape index: {}]   ;;  %s3035_s3 = inlined_call_operand.vmem [shape: bf16[128,128], index: 3, kind: output, shape index: {}]  }
   0x1   :  { %v2278_v0 = vld [vmem:[%s3032_s1 + $0x40] sm:$0xff]   ;;  %v2282_v4 = vld [vmem:[%s3032_s1 + $0x48] sm:$0xff]   ;;  %v2286_v8 = vld [vmem:[%s3032_s1 + $0x50] sm:$0xff]  }
   0x2   :  { %v2279_v1 = vld [vmem:[%s3032_s1 + $0xc0] sm:$0xff]   ;;  %1958 = vmatprep.subr.bf16.mxu0 %v2278_v0  ;;  %v2283_v5 = vld [vmem:[%s3032_s1 + $0xc8] sm:$0xff]   ;;  %v2287_v9 = vld [vmem:[%s3032_s1 + $0xd0] sm:$0xff]  }
   0x3   :  { %v2280_v2 = vld [vmem:[%s3032_s1] sm:$0xff]   ;;  %2022 = vmatprep.subr.bf16.mxu1 %v2279_v1  ;;  %v2284_v6 = vld [vmem:[%s3032_s1 + $0x8] sm:$0xff]   ;;  %v2288_v10 = vld [vmem:[%s3032_s1 + $0x10] sm:$0xff]  }
   0x4   :  { %v2281_v3 = vld [vmem:[%s3032_s1 + $0x80] sm:$0xff]   ;;  %1959 = vmatpush3.bf16.msra.mxu0 %v2280_v2  ;;  %v2285_v7 = vld [vmem:[%s3032_s1 + $0x88] sm:$0xff]   ;;  %v2289_v11 = vld [vmem:[%s3032_s1 + $0x90] sm:$0xff]  }
   0x5   :  { %2023 = vmatpush3.bf16.msra.mxu1 %v2281_v3  ;;  %1960 = vmatprep.subr.bf16.mxu0 %v2282_v4  ;;  %v2290_v12 = vld [vmem:[%s3032_s1 + $0x58] sm:$0xff]   ;;  %v2294_v16 = vld [vmem:[%s3032_s1 + $0x60] sm:$0xff]   ;;  %v2298_v20 = vld [vmem:[%s3032_s1 + $0x68] sm:$0xff]  }
   0x6   :  { %2024 = vmatprep.subr.bf16.mxu1 %v2283_v5  ;;  %v2291_v13 = vld [vmem:[%s3032_s1 + $0xd8] sm:$0xff]   ;;  %v2295_v17 = vld [vmem:[%s3032_s1 + $0xe0] sm:$0xff]   ;;  %v2299_v21 = vld [vmem:[%s3032_s1 + $0xe8] sm:$0xff]  }
   0x7   :  { %v2292_v14 = vld [vmem:[%s3032_s1 + $0x18] sm:$0xff]   ;;  %v2296_v18 = vld [vmem:[%s3032_s1 + $0x20] sm:$0xff]   ;;  %v2300_v22 = vld [vmem:[%s3032_s1 + $0x28] sm:$0xff]  }
   0x8   :  { %1961 = vmatpush3.bf16.msra.mxu0 %v2284_v6  ;;  %v2293_v15 = vld [vmem:[%s3032_s1 + $0x98] sm:$0xff]   ;;  %v2297_v19 = vld [vmem:[%s3032_s1 + $0xa0] sm:$0xff]   ;;  %v2301_v23 = vld [vmem:[%s3032_s1 + $0xa8] sm:$0xff]  }
   0x9   :  { %2025 = vmatpush3.bf16.msra.mxu1 %v2285_v7  ;;  %1962 = vmatprep.subr.bf16.mxu0 %v2286_v8  ;;  %v2302_v24 = vld [vmem:[%s3032_s1 + $0x70] sm:$0xff]   ;;  %v2306_v28 = vld [vmem:[%s3032_s1 + $0x78] sm:$0xff]   ;;  %v2310_v32 = vld [vmem:[%s3033_s0] ss:$36 sps:$4 sm:$0xff]  }
   0xa   :  { %2026 = vmatprep.subr.bf16.mxu1 %v2287_v9  ;;  %v2303_v25 = vld [vmem:[%s3032_s1 + $0xf0] sm:$0xff]   ;;  %v2307_v29 = vld [vmem:[%s3032_s1 + $0xf8] sm:$0xff]   ;;  %v2312_v33 = vld [vmem:[%s3033_s0 + $0x4] ss:$36 sps:$4 sm:$0xff]  }
   0xb   :  { %v2304_v26 = vld [vmem:[%s3032_s1 + $0x30] sm:$0xff]   ;;  %v2308_v30 = vld [vmem:[%s3032_s1 + $0x38] sm:$0xff]   ;;  %v2313_v34 = vld [vmem:[%s3033_s0 + $0x8] ss:$36 sps:$4 sm:$0xff]   ;;  %1107 = vmatprep.mubr.bf16.mxu0 %v2312_v33 }
   0xc   :  { %1963 = vmatpush3.bf16.msra.mxu0 %v2288_v10  ;;  %v2305_v27 = vld [vmem:[%s3032_s1 + $0xb0] sm:$0xff]   ;;  %v2309_v31 = vld [vmem:[%s3032_s1 + $0xb8] sm:$0xff]   ;;  %v2316_v36 = vld [vmem:[%s3032_s1 + $0x140] sm:$0xff]  }
   0xd   :  { %2027 = vmatpush3.bf16.msra.mxu1 %v2289_v11  ;;  %1964 = vmatprep.subr.bf16.mxu0 %v2290_v12  ;;  %v2315_v35 = vld [vmem:[%s3033_s0 + $0xc] ss:$36 sps:$4 sm:$0xff]   ;;  %v2317_v37 = vld [vmem:[%s3032_s1 + $0x1c0] sm:$0xff]   ;;  %v2322_v41 = vld [vmem:[%s3033_s0 + $0x54] ss:$36 sps:$4 sm:$0xff]  }
   0xe   :  { %2028 = vmatprep.subr.bf16.mxu1 %v2291_v13  ;;  %1204 = vmatprep.mubr.bf16.mxu1 %v2315_v35  ;;  %v2318_v38 = vld [vmem:[%s3032_s1 + $0x100] sm:$0xff]   ;;  %v2320_v40 = vld [vmem:[%s3033_s0 + $0x4c] ss:$36 sps:$4 sm:$0xff]   ;;  %v2330_v48 = vld [vmem:[%s3033_s0 + $0x94] ss:$36 sps:$4 sm:$0xff]  }
   0xf   :  { %v2319_v39 = vld [vmem:[%s3032_s1 + $0x180] sm:$0xff]   ;;  %v2324_v42 = vld [vmem:[%s3033_s0 + $0x48] ss:$36 sps:$4 sm:$0xff]   ;;  %v2325_v43 = vld [vmem:[%s3033_s0 + $0x50] ss:$36 sps:$4 sm:$0xff]  }
  0x10   :  { %1965 = vmatpush3.bf16.msra.mxu0 %v2292_v14  ;;  %v2326_v44 = vld [vmem:[%s3032_s1 + $0x148] sm:$0xff]   ;;  %v2332_v49 = vld [vmem:[%s3033_s0 + $0x9c] ss:$36 sps:$4 sm:$0xff]   ;;  %v2334_v50 = vld [vmem:[%s3033_s0 + $0x90] ss:$36 sps:$4 sm:$0xff]  }
  0x11   :  { %2029 = vmatpush3.bf16.msra.mxu1 %v2293_v15  ;;  %1966 = vmatprep.subr.bf16.mxu0 %v2294_v16  ;;  %v2327_v45 = vld [vmem:[%s3032_s1 + $0x1c8] sm:$0xff]   ;;  %v2335_v51 = vld [vmem:[%s3033_s0 + $0x98] ss:$36 sps:$4 sm:$0xff]   ;;  %v2336_v52 = vld [vmem:[%s3032_s1 + $0x150] sm:$0xff]  }
  0x12   :  { %2030 = vmatprep.subr.bf16.mxu1 %v2295_v17  ;;  %v2328_v46 = vld [vmem:[%s3032_s1 + $0x108] sm:$0xff]   ;;  %v2337_v53 = vld [vmem:[%s3032_s1 + $0x1d0] sm:$0xff]   ;;  %v2340_v56 = vld [vmem:[%s3033_s0 + $0xdc] ss:$36 sps:$4 sm:$0xff]  }
  0x13   :  { %v2329_v47 = vld [vmem:[%s3032_s1 + $0x188] sm:$0xff]   ;;  %v2338_v54 = vld [vmem:[%s3032_s1 + $0x110] sm:$0xff]   ;;  %v2344_v58 = vld [vmem:[%s3033_s0 + $0xd8] ss:$36 sps:$4 sm:$0xff]  }
  0x14   :  { %1967 = vmatpush3.bf16.msra.mxu0 %v2296_v18  ;;  %v2339_v55 = vld [vmem:[%s3032_s1 + $0x190] sm:$0xff]   ;;  %v2342_v57 = vld [vmem:[%s3033_s0 + $0xe4] ss:$36 sps:$4 sm:$0xff]   ;;  %v2346_v60 = vld [vmem:[%s3032_s1 + $0x158] sm:$0xff]  }
  0x15   :  { %2031 = vmatpush3.bf16.msra.mxu1 %v2297_v19  ;;  %1968 = vmatprep.subr.bf16.mxu0 %v2298_v20  ;;  %v2345_v59 = vld [vmem:[%s3033_s0 + $0xe0] ss:$36 sps:$4 sm:$0xff]   ;;  %v2347_v61 = vld [vmem:[%s3032_s1 + $0x1d8] sm:$0xff]   ;;  %v2352_v1 = vld [vmem:[%s3033_s0 + $0x12c] ss:$36 sps:$4 sm:$0xff]  }
  0x16   :  { %2032 = vmatprep.subr.bf16.mxu1 %v2299_v21  ;;  %v2348_v62 = vld [vmem:[%s3032_s1 + $0x118] sm:$0xff]   ;;  %v2350_v0 = vld [vmem:[%s3033_s0 + $0x124] ss:$36 sps:$4 sm:$0xff]   ;;  %v2360_v8 = vld [vmem:[%s3033_s0 + $0x16c] ss:$36 sps:$4 sm:$0xff]  }
  0x17   :  { %v2349_v63 = vld [vmem:[%s3032_s1 + $0x198] sm:$0xff]   ;;  %v2354_v2 = vld [vmem:[%s3033_s0 + $0x120] ss:$36 sps:$4 sm:$0xff]   ;;  %v2355_v4 = vld [vmem:[%s3033_s0 + $0x128] ss:$36 sps:$4 sm:$0xff]  }
  0x18   :  { %1969 = vmatpush3.bf16.msra.mxu0 %v2300_v22  ;;  %v2356_v3 = vld [vmem:[%s3032_s1 + $0x160] sm:$0xff]   ;;  %v2362_v9 = vld [vmem:[%s3033_s0 + $0x174] ss:$36 sps:$4 sm:$0xff]   ;;  %v2366_v10 = vld [vmem:[%s3032_s1 + $0x168] sm:$0xff]  }
  0x19   :  { %2033 = vmatpush3.bf16.msra.mxu1 %v2301_v23  ;;  %1970 = vmatprep.subr.bf16.mxu0 %v2302_v24  ;;  %v2357_v5 = vld [vmem:[%s3032_s1 + $0x1e0] sm:$0xff]   ;;  %v2367_v11 = vld [vmem:[%s3032_s1 + $0x1e8] sm:$0xff]   ;;  %v2365_v15 = vld [vmem:[%s3033_s0 + $0x170] ss:$36 sps:$4 sm:$0xff]  }
  0x1a   :  { %2034 = vmatprep.subr.bf16.mxu1 %v2303_v25  ;;  %v2358_v6 = vld [vmem:[%s3032_s1 + $0x120] sm:$0xff]   ;;  %v2364_v12 = vld [vmem:[%s3033_s0 + $0x168] ss:$36 sps:$4 sm:$0xff]   ;;  %v2370_v16 = vld [vmem:[%s3033_s0 + $0x1b4] ss:$36 sps:$4 sm:$0xff]  }
  0x1b   :  { %v2359_v7 = vld [vmem:[%s3032_s1 + $0x1a0] sm:$0xff]   ;;  %v2368_v13 = vld [vmem:[%s3032_s1 + $0x128] sm:$0xff]   ;;  %v2376_v18 = vld [vmem:[%s3032_s1 + $0x170] sm:$0xff]  }
  0x1c   :  { %1971 = vmatpush3.bf16.msra.mxu0 %v2304_v26  ;;  %v2369_v14 = vld [vmem:[%s3032_s1 + $0x1a8] sm:$0xff]   ;;  %v2372_v17 = vld [vmem:[%s3033_s0 + $0x1bc] ss:$36 sps:$4 sm:$0xff]   ;;  %v2377_v19 = vld [vmem:[%s3032_s1 + $0x1f0] sm:$0xff]  }
  0x1d   :  { %2035 = vmatpush3.bf16.msra.mxu1 %v2305_v27  ;;  %1972 = vmatprep.subr.bf16.mxu0 %v2306_v28  ;;  %v2378_v20 = vld [vmem:[%s3032_s1 + $0x130] sm:$0xff]   ;;  %v2375_v23 = vld [vmem:[%s3033_s0 + $0x1b8] ss:$36 sps:$4 sm:$0xff]   ;;  %v2382_v25 = vld [vmem:[%s3033_s0 + $0x204] ss:$36 sps:$4 sm:$0xff]  }
  0x1e   :  { %2036 = vmatprep.subr.bf16.mxu1 %v2307_v29  ;;  %v2379_v21 = vld [vmem:[%s3032_s1 + $0x1b0] sm:$0xff]   ;;  %v2380_v24 = vld [vmem:[%s3033_s0 + $0x1fc] ss:$36 sps:$4 sm:$0xff]  }
  0x1f   :  { %v2374_v22 = vld [vmem:[%s3033_s0 + $0x1b0] ss:$36 sps:$4 sm:$0xff]   ;;  %v2386_v26 = vld [vmem:[%s3032_s1 + $0x178] sm:$0xff]  }
  0x20   :  { %1973 = vmatpush3.bf16.msra.mxu0 %v2308_v30  ;;  %v2387_v27 = vld [vmem:[%s3032_s1 + $0x1f8] sm:$0xff]   ;;  %v2390_v35 = vld [vmem:[%s3033_s0 + $0x10] ss:$36 sps:$4 sm:$0xff]  }
  0x21   :  { %2037 = vmatpush3.bf16.msra.mxu1 %v2309_v31  ;;  %2086 = vmatprep.subr.bf16.mxu0 %v2316_v36  ;;  %v2388_v28 = vld [vmem:[%s3032_s1 + $0x138] sm:$0xff]   ;;  %v2385_v31 = vld [vmem:[%s3033_s0 + $0x200] ss:$36 sps:$4 sm:$0xff]  }
  0x22   :  { %2150 = vmatprep.subr.bf16.mxu1 %v2317_v37  ;;  %v2389_v29 = vld [vmem:[%s3032_s1 + $0x1b8] sm:$0xff]  }
  0x23   :  { %1108 = vmatmul.mubr.bf16.vlgmr.msra.gmra.mrb[0].mxu0 %v2310_v32  ;;  %v2384_v30 = vld [vmem:[%s3033_s0 + $0x1f8] ss:$36 sps:$4 sm:$0xff]   ;;  %v2396_v32 = vld [vmem:[%s3032_s1 + $0x200] sm:$0xff]  }
  0x24   :  { %1205 = vmatmul.mubr.bf16.vlgmr.msra.gmra.mrb[0].mxu1 %v2313_v34  ;;  %2087 = vmatpush3.bf16.msra.mxu0 %v2318_v38  ;;  %v2392_v33 = vld [vmem:[%s3033_s0 + $0x14] ss:$36 sps:$4 sm:$0xff]   ;;  %v2395_v34 = vld [vmem:[%s3033_s0 + $0x1c] ss:$36 sps:$4 sm:$0xff]   ;;  %v2399_v38 = vld [vmem:[%s3033_s0 + $0x64] ss:$36 sps:$4 sm:$0xff]  }
  0x25   :  { %2151 = vmatpush3.bf16.msra.mxu1 %v2319_v39  ;;  %1115 = vmatprep.mubr.bf16.mxu0 %v2320_v40  ;;  %v2393_v36 = vld [vmem:[%s3033_s0 + $0x18] ss:$36 sps:$4 sm:$0xff]   ;;  %v2403_v39 = vld [vmem:[%s3032_s1 + $0x208] sm:$0xff]   ;;  %v2410_v40 = vld [vmem:[%s3032_s1 + $0x210] sm:$0xff]  }
  0x26   :  { %1212 = vmatprep.mubr.bf16.mxu1 %v2322_v41  ;;  %2088 = vmatprep.subr.bf16.mxu0 %v2326_v44  ;;  %v2397_v37 = vld [vmem:[%s3033_s0 + $0x5c] ss:$36 sps:$4 sm:$0xff]   ;;  %v2406_v44 = vld [vmem:[%s3033_s0 + $0xac] ss:$36 sps:$4 sm:$0xff]  }
  0x27   :  { %2152 = vmatprep.subr.bf16.mxu1 %v2327_v45  ;;  %v2401_v41 = vld [vmem:[%s3033_s0 + $0x58] ss:$36 sps:$4 sm:$0xff]  }
  0x28   :  { %2089 = vmatpush3.bf16.msra.mxu0 %v2328_v46  ;;  %v2417_v45 = vld [vmem:[%s3032_s1 + $0x218] sm:$0xff]   ;;  %v2424_v46 = vld [vmem:[%s3032_s1 + $0x220] sm:$0xff]  }
  0x29   :  { %2153 = vmatpush3.bf16.msra.mxu1 %v2329_v47  ;;  %2090 = vmatprep.subr.bf16.mxu0 %v2336_v52  ;;  %v2408_v47 = vld [vmem:[%s3033_s0 + $0xa0] ss:$36 sps:$4 sm:$0xff]   ;;  %v2415_v52 = vld [vmem:[%s3033_s0 + $0xe8] ss:$36 sps:$4 sm:$0xff]  }
  0x2a   :  { %2154 = vmatprep.subr.bf16.mxu1 %v2337_v53  ;;  %v2438_v53 = vld [vmem:[%s3032_s1 + $0x230] sm:$0xff]  }
  0x2b   :  { %1116 = vmatmul.mubr.bf16.gmra.mrb[4].mxu0 %v2324_v42  ;;  %v2402_v42 = vld [vmem:[%s3033_s0 + $0x60] ss:$36 sps:$4 sm:$0xff]  }
  0x2c   :  { %1213 = vmatmul.mubr.bf16.gmra.mrb[4].mxu1 %v2325_v43  ;;  %1123 = vmatprep.mubr.bf16.mxu0 %v2330_v48  ;;  %v2404_v43 = vld [vmem:[%s3033_s0 + $0xa4] ss:$36 sps:$4 sm:$0xff]  }
  0x2d   :  { %1220 = vmatprep.mubr.bf16.mxu1 %v2332_v49  ;;  %2091 = vmatpush3.bf16.msra.mxu0 %v2338_v54  ;;  %v2409_v48 = vld [vmem:[%s3033_s0 + $0xa8] ss:$36 sps:$4 sm:$0xff]   ;;  %v2416_v54 = vld [vmem:[%s3033_s0 + $0xf0] ss:$36 sps:$4 sm:$0xff]  }
  0x2e   :  { %2155 = vmatpush3.bf16.msra.mxu1 %v2339_v55  ;;  %2092 = vmatprep.subr.bf16.mxu0 %v2346_v60  ;;  %v2411_v49 = vld [vmem:[%s3033_s0 + $0xec] ss:$36 sps:$4 sm:$0xff]   ;;  %v2418_v55 = vld [vmem:[%s3033_s0 + $0x134] ss:$36 sps:$4 sm:$0xff]   ;;  %v2425_v60 = vld [vmem:[%s3033_s0 + $0x17c] ss:$36 sps:$4 sm:$0xff]  }
  0x2f   :  { %2156 = vmatprep.subr.bf16.mxu1 %v2347_v61  ;;  %v2427_v61 = vld [vmem:[%s3033_s0 + $0x184] ss:$36 sps:$4 sm:$0xff]  }
  0x31   :  { %2093 = vmatpush3.bf16.msra.mxu0 %v2348_v62  ;;  %v2429_v62 = vld [vmem:[%s3033_s0 + $0x178] ss:$36 sps:$4 sm:$0xff]  }
  0x32   :  { %2157 = vmatpush3.bf16.msra.mxu1 %v2349_v63  ;;  %2094 = vmatprep.subr.bf16.mxu0 %v2356_v3  ;;  %v2430_v63 = vld [vmem:[%s3033_s0 + $0x180] ss:$36 sps:$4 sm:$0xff]   ;;  %v2437_v3 = vld [vmem:[%s3033_s0 + $0x1c8] ss:$36 sps:$4 sm:$0xff]  }
  0x33   :  { %1124 = vmatmul.mubr.bf16.gmra.mrb[8].mxu0 %v2334_v50  ;;  %2158 = vmatprep.subr.bf16.mxu1 %v2357_v5  ;;  %v2413_v50 = vld [vmem:[%s3033_s0 + $0xf4] ss:$36 sps:$4 sm:$0xff]  }
  0x34   :  { %1221 = vmatmul.mubr.bf16.gmra.mrb[8].mxu1 %v2335_v51  ;;  %1131 = vmatprep.mubr.bf16.mxu0 %v2340_v56  ;;  %v2431_v51 = vld [vmem:[%s3032_s1 + $0x228] sm:$0xff]   ;;  %v2420_v56 = vld [vmem:[%s3033_s0 + $0x13c] ss:$36 sps:$4 sm:$0xff]   ;;  %v2441_v5 = vld [vmem:[%s3033_s0 + $0x214] ss:$36 sps:$4 sm:$0xff]  }
  0x35   :  { %1228 = vmatprep.mubr.bf16.mxu1 %v2342_v57  ;;  %2095 = vmatpush3.bf16.msra.mxu0 %v2358_v6  ;;  %v2445_v57 = vld [vmem:[%s3032_s1 + $0x238] sm:$0xff]   ;;  %v2443_v6 = vld [vmem:[%s3033_s0 + $0x208] ss:$36 sps:$4 sm:$0xff]  }
  0x36   :  { %2159 = vmatpush3.bf16.msra.mxu1 %v2359_v7  ;;  %2096 = vmatprep.subr.bf16.mxu0 %v2366_v10  ;;  %v2444_v7 = vld [vmem:[%s3033_s0 + $0x210] ss:$36 sps:$4 sm:$0xff]   ;;  %v2448_v10 = vld [vmem:[%s3033_s0 + $0x68] ss:$36 sps:$4 sm:$0xff]  }
  0x37   :  { %2160 = vmatprep.subr.bf16.mxu1 %v2367_v11  ;;  %v2449_v11 = vld [vmem:[%s3033_s0 + $0x188] ss:$36 sps:$4 sm:$0xff]  }
  0x39   :  { %2097 = vmatpush3.bf16.msra.mxu0 %v2368_v13  ;;  %v2451_v13 = vld [vmem:[%s3033_s0 + $0x1d0] ss:$36 sps:$4 sm:$0xff]  }
  0x3a   :  { %2161 = vmatpush3.bf16.msra.mxu1 %v2369_v14  ;;  %2098 = vmatprep.subr.bf16.mxu0 %v2376_v18  ;;  %v2452_v14 = vld [vmem:[%s3033_s0 + $0xf8] ss:$36 sps:$4 sm:$0xff]  }
  0x3b   :  { %1132 = vmatmul.mubr.bf16.gmra.mrb[12].mxu0 %v2344_v58  ;;  %2162 = vmatprep.subr.bf16.mxu1 %v2377_v19  ;;  %v2422_v58 = vld [vmem:[%s3033_s0 + $0x130] ss:$36 sps:$4 sm:$0xff]  }
  0x3c   :  { %1229 = vmatmul.mubr.bf16.gmra.mrb[12].mxu1 %v2345_v59  ;;  %1139 = vmatprep.mubr.bf16.mxu0 %v2350_v0  ;;  %v2423_v59 = vld [vmem:[%s3033_s0 + $0x138] ss:$36 sps:$4 sm:$0xff]   ;;  %v2432_v0 = vld [vmem:[%s3033_s0 + $0x1c4] ss:$36 sps:$4 sm:$0xff]  }
  0x3d   :  { %1236 = vmatprep.mubr.bf16.mxu1 %v2352_v1  ;;  %2099 = vmatpush3.bf16.msra.mxu0 %v2378_v20  ;;  %v2434_v1 = vld [vmem:[%s3033_s0 + $0x1cc] ss:$36 sps:$4 sm:$0xff]  }
  0x3e   :  { %2163 = vmatpush3.bf16.msra.mxu1 %v2379_v21  ;;  %2100 = vmatprep.subr.bf16.mxu0 %v2386_v26 }
  0x3f   :  { %2164 = vmatprep.subr.bf16.mxu1 %v2387_v27 }
  0x41   :  { %2101 = vmatpush3.bf16.msra.mxu0 %v2388_v28 }
  0x42   :  { %2165 = vmatpush3.bf16.msra.mxu1 %v2389_v29  ;;  %2230 = vmatprep.subr.bf16.mxu0 %v2396_v32 }
  0x43   :  { %1140 = vmatmul.mubr.bf16.gmra.mrb[16].mxu0 %v2354_v2  ;;  %2262 = vmatprep.subr.bf16.mxu1 %v2396_v32  ;;  %v2436_v2 = vld [vmem:[%s3033_s0 + $0x1c0] ss:$36 sps:$4 sm:$0xff]  }
  0x44   :  { %1237 = vmatmul.mubr.bf16.gmra.mrb[16].mxu1 %v2355_v4  ;;  %1147 = vmatprep.mubr.bf16.mxu0 %v2360_v8  ;;  %v2439_v4 = vld [vmem:[%s3033_s0 + $0x20c] ss:$36 sps:$4 sm:$0xff]   ;;  %v2446_v8 = vld [vmem:[%s3033_s0 + $0x20] ss:$36 sps:$4 sm:$0xff]  }
  0x45   :  { %1244 = vmatprep.mubr.bf16.mxu1 %v2362_v9  ;;  %v2447_v9 = vld [vmem:[%s3033_s0 + $0x140] ss:$36 sps:$4 sm:$0xff]  }
  0x4b   :  { %1148 = vmatmul.mubr.bf16.gmra.mrb[20].mxu0 %v2364_v12  ;;  %v2450_v12 = vld [vmem:[%s3033_s0 + $0xb0] ss:$36 sps:$4 sm:$0xff]  }
  0x4c   :  { %1245 = vmatmul.mubr.bf16.gmra.mrb[20].mxu1 %v2365_v15  ;;  %1155 = vmatprep.mubr.bf16.mxu0 %v2370_v16  ;;  %v2453_v15 = vld [vmem:[%s3033_s0 + $0x218] ss:$36 sps:$4 sm:$0xff]  }
  0x4d   :  { %1252 = vmatprep.mubr.bf16.mxu1 %v2372_v17 }
  0x53   :  { %1156 = vmatmul.mubr.bf16.gmra.mrb[24].mxu0 %v2374_v22 }
  0x54   :  { %1253 = vmatmul.mubr.bf16.gmra.mrb[24].mxu1 %v2375_v23  ;;  %1163 = vmatprep.mubr.bf16.mxu0 %v2380_v24 }
  0x55   :  { %1260 = vmatprep.mubr.bf16.mxu1 %v2382_v25 }
  0x5b   :  { %1164 = vmatmul.mubr.bf16.gmra.mrb[28].mxu0 %v2384_v30 }
  0x5c   :  { %1261 = vmatmul.mubr.bf16.gmra.mrb[28].mxu1 %v2385_v31  ;;  %1301 = vmatprep.mubr.bf16.mxu0 %v2392_v33 }
  0x5d   :  { %1398 = vmatprep.mubr.bf16.mxu1 %v2395_v34 }
  0x63   :  { %1302 = vmatmul.mubr.bf16.vlgmr.msra.gmra.mrb[32].mxu0 %v2390_v35 }
  0x64   :  { %1399 = vmatmul.mubr.bf16.vlgmr.msra.gmra.mrb[32].mxu1 %v2393_v36  ;;  %2231 = vmatpush3.bf16.msra.mxu0 %v2396_v32 }
  0x65   :  { %2270 = vmatpush3.bf16.msra.mxu1 %v2396_v32  ;;  %1309 = vmatprep.mubr.bf16.mxu0 %v2397_v37 }
  0x66   :  { %1406 = vmatprep.mubr.bf16.mxu1 %v2399_v38  ;;  %2232 = vmatprep.subr.bf16.mxu0 %v2403_v39 }
  0x67   :  { %2263 = vmatprep.subr.bf16.mxu1 %v2403_v39 }
  0x68   :  { %2233 = vmatpush3.bf16.msra.mxu0 %v2403_v39 }
  0x69   :  { %2271 = vmatpush3.bf16.msra.mxu1 %v2403_v39  ;;  %2234 = vmatprep.subr.bf16.mxu0 %v2410_v40 }
  0x6a   :  { %2264 = vmatprep.subr.bf16.mxu1 %v2410_v40 }
  0x6b   :  { %1310 = vmatmul.mubr.bf16.gmra.mrb[36].mxu0 %v2401_v41 }
  0x6c   :  { %1407 = vmatmul.mubr.bf16.gmra.mrb[36].mxu1 %v2402_v42  ;;  %1317 = vmatprep.mubr.bf16.mxu0 %v2404_v43 }
  0x6d   :  { %1414 = vmatprep.mubr.bf16.mxu1 %v2406_v44  ;;  %2235 = vmatpush3.bf16.msra.mxu0 %v2410_v40 }
  0x6e   :  { %2272 = vmatpush3.bf16.msra.mxu1 %v2410_v40  ;;  %2236 = vmatprep.subr.bf16.mxu0 %v2417_v45 }
  0x6f   :  { %2265 = vmatprep.subr.bf16.mxu1 %v2417_v45 }
  0x71   :  { %2237 = vmatpush3.bf16.msra.mxu0 %v2417_v45 }
  0x72   :  { %2273 = vmatpush3.bf16.msra.mxu1 %v2417_v45  ;;  %2238 = vmatprep.subr.bf16.mxu0 %v2424_v46 }
  0x73   :  { %1318 = vmatmul.mubr.bf16.gmra.mrb[40].mxu0 %v2408_v47  ;;  %2266 = vmatprep.subr.bf16.mxu1 %v2424_v46 }
  0x74   :  { %1415 = vmatmul.mubr.bf16.gmra.mrb[40].mxu1 %v2409_v48  ;;  %1325 = vmatprep.mubr.bf16.mxu0 %v2411_v49 }
  0x75   :  { %1422 = vmatprep.mubr.bf16.mxu1 %v2413_v50  ;;  %2239 = vmatpush3.bf16.msra.mxu0 %v2424_v46 }
  0x76   :  { %2274 = vmatpush3.bf16.msra.mxu1 %v2424_v46  ;;  %2240 = vmatprep.subr.bf16.mxu0 %v2431_v51 }
  0x77   :  { %2267 = vmatprep.subr.bf16.mxu1 %v2431_v51 }
  0x79   :  { %2241 = vmatpush3.bf16.msra.mxu0 %v2431_v51 }
  0x7a   :  { %2275 = vmatpush3.bf16.msra.mxu1 %v2431_v51  ;;  %2242 = vmatprep.subr.bf16.mxu0 %v2438_v53 }
  0x7b   :  { %1326 = vmatmul.mubr.bf16.gmra.mrb[44].mxu0 %v2415_v52  ;;  %2268 = vmatprep.subr.bf16.mxu1 %v2438_v53 }
  0x7c   :  { %1423 = vmatmul.mubr.bf16.gmra.mrb[44].mxu1 %v2416_v54  ;;  %1333 = vmatprep.mubr.bf16.mxu0 %v2418_v55 }
  0x7d   :  { %1430 = vmatprep.mubr.bf16.mxu1 %v2420_v56  ;;  %2243 = vmatpush3.bf16.msra.mxu0 %v2438_v53 }
  0x7e   :  { %2276 = vmatpush3.bf16.msra.mxu1 %v2438_v53  ;;  %2244 = vmatprep.subr.bf16.mxu0 %v2445_v57 }
  0x7f   :  { %2269 = vmatprep.subr.bf16.mxu1 %v2445_v57 }
  0x81   :  { %2245 = vmatpush3.bf16.msra.mxu0 %v2445_v57 }
  0x82   :  { %2277 = vmatpush3.bf16.msra.mxu1 %v2445_v57 }
  0x83   :  { %1334 = vmatmul.mubr.bf16.gmra.mrb[48].mxu0 %v2422_v58 }
  0x84   :  { %1431 = vmatmul.mubr.bf16.gmra.mrb[48].mxu1 %v2423_v59  ;;  %1341 = vmatprep.mubr.bf16.mxu0 %v2425_v60 }
  0x85   :  { %1438 = vmatprep.mubr.bf16.mxu1 %v2427_v61 }
  0x8b   :  { %1342 = vmatmul.mubr.bf16.gmra.mrb[52].mxu0 %v2429_v62 }
  0x8c   :  { %1439 = vmatmul.mubr.bf16.gmra.mrb[52].mxu1 %v2430_v63  ;;  %1349 = vmatprep.mubr.bf16.mxu0 %v2432_v0 }
  0x8d   :  { %1446 = vmatprep.mubr.bf16.mxu1 %v2434_v1 }
  0x93   :  { %1350 = vmatmul.mubr.bf16.gmra.mrb[56].mxu0 %v2436_v2 }
  0x94   :  { %1447 = vmatmul.mubr.bf16.gmra.mrb[56].mxu1 %v2437_v3  ;;  %1357 = vmatprep.mubr.bf16.mxu0 %v2439_v4 }
  0x95   :  { %1454 = vmatprep.mubr.bf16.mxu1 %v2441_v5 }
  0x9b   :  { %1358 = vmatmul.mubr.bf16.gmra.mrb[60].mxu0 %v2443_v6 }
  0x9c   :  { %1455 = vmatmul.mubr.bf16.gmra.mrb[60].mxu1 %v2444_v7  ;;  %2246 = vmatprep.mubr.bf16.mxu0 %v2446_v8 }
  0x9d   :  { %2254 = vmatprep.mubr.bf16.mxu1 %v2447_v9 }
  0xa3   :  { %2247 = vmatmul.mubr.bf16.vlgmr.msra.gmra.mrb[64].mxu0 %v2448_v10 }
  0xa4   :  { %2255 = vmatmul.mubr.bf16.vlgmr.msra.gmra.mrb[64].mxu1 %v2449_v11  ;;  %2250 = vmatprep.mubr.bf16.mxu0 %v2450_v12 }
  0xa5   :  { %2258 = vmatprep.mubr.bf16.mxu1 %v2451_v13 }
  0xab   :  { %2251 = vmatmul.mubr.bf16.gmra.mrb[68].mxu0 %v2452_v14 }
  0xac   :  { %2259 = vmatmul.mubr.bf16.gmra.mrb[68].mxu1 %v2453_v15 }
  0xf6   :  { %v1974_v16 = vpop.f32.mrb[0].mxu0 }
  0xf7   :  { %v2038_v17 = vpop.f32.mrb[0].mxu1  ;;  %v1975_v18 = vpop.f32.mrb[1].mxu0 }
  0xf8   :  { %v1976_v19 = vadd.f32 %v1975_v18, %v1974_v16  ;;  %v2039_v20 = vpop.f32.mrb[1].mxu1  ;;  %v1977_v21 = vpop.f32.mrb[2].mxu0 }
  0xf9   :  { %v2040_v22 = vadd.f32 %v2039_v20, %v2038_v17  ;;  %v2041_v23 = vpop.f32.mrb[2].mxu1  ;;  %v1978_v24 = vpop.f32.mrb[3].mxu0 }
  0xfa   :  { %v1979_v25 = vadd.f32 %v1978_v24, %v1977_v21  ;;  %v2042_v26 = vpop.f32.mrb[3].mxu1 }
  0xfb   :  { %v2906_v27 = vadd.f32 %v2040_v22, %v1976_v19  ;;  %v2043_v28 = vadd.f32 %v2042_v26, %v2041_v23 }
  0xfd   :  { %v2908_v29 = vadd.f32 %v2043_v28, %v1979_v25 }
  0xfe   :  { %v1980_v30 = vpop.f32.mrb[4].mxu0 }
  0xff   :  { %v2044_v31 = vpop.f32.mrb[4].mxu1  ;;  %v1981_v32 = vpop.f32.mrb[5].mxu0 }
 0x100   :  { %v1982_v33 = vadd.f32 %v1981_v32, %v1980_v30  ;;  %v2045_v34 = vpop.f32.mrb[5].mxu1  ;;  %v1983_v35 = vpop.f32.mrb[6].mxu0 }
 0x101   :  { %v2046_v36 = vadd.f32 %v2045_v34, %v2044_v31  ;;  %v2047_v37 = vpop.f32.mrb[6].mxu1  ;;  %v1984_v38 = vpop.f32.mrb[7].mxu0 }
 0x102   :  { %v1985_v39 = vadd.f32 %v1984_v38, %v1983_v35  ;;  %v2048_v40 = vpop.f32.mrb[7].mxu1 }
 0x103   :  { %v2910_v41 = vadd.f32 %v2046_v36, %v1982_v33  ;;  %v2049_v42 = vadd.f32 %v2048_v40, %v2047_v37 }
 0x105   :  { %v2912_v43 = vadd.f32 %v2049_v42, %v1985_v39 }
 0x106   :  { %v1986_v44 = vpop.f32.mrb[8].mxu0 }
 0x107   :  { %v2050_v45 = vpop.f32.mrb[8].mxu1  ;;  %v1987_v46 = vpop.f32.mrb[9].mxu0 }
 0x108   :  { %v1988_v47 = vadd.f32 %v1987_v46, %v1986_v44  ;;  %v2051_v48 = vpop.f32.mrb[9].mxu1  ;;  %v1989_v49 = vpop.f32.mrb[10].mxu0 }
 0x109   :  { %v2052_v50 = vadd.f32 %v2051_v48, %v2050_v45  ;;  %v2053_v51 = vpop.f32.mrb[10].mxu1  ;;  %v1990_v52 = vpop.f32.mrb[11].mxu0 }
 0x10a   :  { %v1991_v53 = vadd.f32 %v1990_v52, %v1989_v49  ;;  %v2054_v54 = vpop.f32.mrb[11].mxu1 }
 0x10b   :  { %v2914_v55 = vadd.f32 %v2052_v50, %v1988_v47  ;;  %v2055_v56 = vadd.f32 %v2054_v54, %v2053_v51 }
 0x10d   :  { %v2916_v57 = vadd.f32 %v2055_v56, %v1991_v53 }
 0x10e   :  { %v1992_v58 = vpop.f32.mrb[12].mxu0 }
 0x10f   :  { %v2056_v59 = vpop.f32.mrb[12].mxu1  ;;  %v1993_v60 = vpop.f32.mrb[13].mxu0 }
 0x110   :  { %v1994_v61 = vadd.f32 %v1993_v60, %v1992_v58  ;;  %v2057_v62 = vpop.f32.mrb[13].mxu1  ;;  %v1995_v63 = vpop.f32.mrb[14].mxu0 }
 0x111   :  { %v2058_v0 = vadd.f32 %v2057_v62, %v2056_v59  ;;  %v2059_v1 = vpop.f32.mrb[14].mxu1  ;;  %v1996_v2 = vpop.f32.mrb[15].mxu0 }
 0x112   :  { %v1997_v3 = vadd.f32 %v1996_v2, %v1995_v63  ;;  %v2060_v4 = vpop.f32.mrb[15].mxu1 }
 0x113   :  { %v2918_v5 = vadd.f32 %v2058_v0, %v1994_v61  ;;  %v2061_v6 = vadd.f32 %v2060_v4, %v2059_v1 }
 0x115   :  { %v2920_v7 = vadd.f32 %v2061_v6, %v1997_v3 }
 0x116   :  { %v1998_v8 = vpop.f32.mrb[16].mxu0 }
 0x117   :  { %v2062_v9 = vpop.f32.mrb[16].mxu1  ;;  %v1999_v10 = vpop.f32.mrb[17].mxu0 }
 0x118   :  { %v2000_v11 = vadd.f32 %v1999_v10, %v1998_v8  ;;  %v2063_v12 = vpop.f32.mrb[17].mxu1  ;;  %v2001_v13 = vpop.f32.mrb[18].mxu0 }
 0x119   :  { %v2064_v14 = vadd.f32 %v2063_v12, %v2062_v9  ;;  %v2065_v15 = vpop.f32.mrb[18].mxu1  ;;  %v2002_v16 = vpop.f32.mrb[19].mxu0 }
 0x11a   :  { %v2003_v17 = vadd.f32 %v2002_v16, %v2001_v13  ;;  %v2066_v18 = vpop.f32.mrb[19].mxu1 }
 0x11b   :  { %v2922_v19 = vadd.f32 %v2064_v14, %v2000_v11  ;;  %v2067_v20 = vadd.f32 %v2066_v18, %v2065_v15 }
 0x11d   :  { %v2924_v21 = vadd.f32 %v2067_v20, %v2003_v17 }
 0x11e   :  { %v2004_v22 = vpop.f32.mrb[20].mxu0 }
 0x11f   :  { %v2068_v23 = vpop.f32.mrb[20].mxu1  ;;  %v2005_v24 = vpop.f32.mrb[21].mxu0 }
 0x120   :  { %v2006_v25 = vadd.f32 %v2005_v24, %v2004_v22  ;;  %v2069_v26 = vpop.f32.mrb[21].mxu1  ;;  %v2007_v28 = vpop.f32.mrb[22].mxu0 }
 0x121   :  { %v2070_v30 = vadd.f32 %v2069_v26, %v2068_v23  ;;  %v2071_v31 = vpop.f32.mrb[22].mxu1  ;;  %v2008_v32 = vpop.f32.mrb[23].mxu0 }
 0x122   :  { %v2009_v33 = vadd.f32 %v2008_v32, %v2007_v28  ;;  %v2072_v34 = vpop.f32.mrb[23].mxu1 }
 0x123   :  { %v2926_v35 = vadd.f32 %v2070_v30, %v2006_v25  ;;  %v2073_v36 = vadd.f32 %v2072_v34, %v2071_v31 }
 0x125   :  { %v2928_v37 = vadd.f32 %v2073_v36, %v2009_v33 }
 0x126   :  { %v2010_v38 = vpop.f32.mrb[24].mxu0 }
 0x127   :  { %v2074_v39 = vpop.f32.mrb[24].mxu1  ;;  %v2011_v40 = vpop.f32.mrb[25].mxu0 }
 0x128   :  { %v2012_v42 = vadd.f32 %v2011_v40, %v2010_v38  ;;  %v2075_v44 = vpop.f32.mrb[25].mxu1  ;;  %v2013_v45 = vpop.f32.mrb[26].mxu0 }
 0x129   :  { %v2076_v46 = vadd.f32 %v2075_v44, %v2074_v39  ;;  %v2077_v47 = vpop.f32.mrb[26].mxu1  ;;  %v2014_v48 = vpop.f32.mrb[27].mxu0 }
 0x12a   :  { %v2015_v49 = vadd.f32 %v2014_v48, %v2013_v45  ;;  %v2078_v50 = vpop.f32.mrb[27].mxu1 }
 0x12b   :  { %v2930_v51 = vadd.f32 %v2076_v46, %v2012_v42  ;;  %v2079_v52 = vadd.f32 %v2078_v50, %v2077_v47 }
 0x12d   :  { %v2932_v53 = vadd.f32 %v2079_v52, %v2015_v49 }
 0x12e   :  { %v2016_v54 = vpop.f32.mrb[28].mxu0 }
 0x12f   :  { %v2080_v56 = vpop.f32.mrb[28].mxu1  ;;  %v2017_v58 = vpop.f32.mrb[29].mxu0 }
 0x130   :  { %v2018_v59 = vadd.f32 %v2017_v58, %v2016_v54  ;;  %v2081_v60 = vpop.f32.mrb[29].mxu1  ;;  %v2019_v61 = vpop.f32.mrb[30].mxu0 }
 0x131   :  { %v2082_v62 = vadd.f32 %v2081_v60, %v2080_v56  ;;  %v2083_v63 = vpop.f32.mrb[30].mxu1  ;;  %v2020_v0 = vpop.f32.mrb[31].mxu0 }
 0x132   :  { %v2021_v1 = vadd.f32 %v2020_v0, %v2019_v61  ;;  %v2084_v2 = vpop.f32.mrb[31].mxu1 }
 0x133   :  { %v2934_v3 = vadd.f32 %v2082_v62, %v2018_v59  ;;  %v2085_v4 = vadd.f32 %v2084_v2, %v2083_v63 }
 0x135   :  { %v2936_v6 = vadd.f32 %v2085_v4, %v2021_v1 }
 0x136   :  { %v2102_v8 = vpop.f32.mrb[32].mxu0 }
 0x137   :  { %v2166_v9 = vpop.f32.mrb[32].mxu1  ;;  %v2103_v10 = vpop.f32.mrb[33].mxu0 }
 0x138   :  { %v2104_v11 = vadd.f32 %v2103_v10, %v2102_v8  ;;  %v2167_v12 = vpop.f32.mrb[33].mxu1  ;;  %v2105_v13 = vpop.f32.mrb[34].mxu0 }
 0x139   :  { %v2168_v14 = vadd.f32 %v2167_v12, %v2166_v9  ;;  %v2169_v15 = vpop.f32.mrb[34].mxu1  ;;  %v2106_v16 = vpop.f32.mrb[35].mxu0 }
 0x13a   :  { %v1304_v17 = vadd.f32 %v2104_v11, %v2906_v27  ;;  %v2107_v18 = vadd.f32 %v2106_v16, %v2105_v13  ;;  %v2170_v20 = vpop.f32.mrb[35].mxu1 }
 0x13b   :  { %v2171_v22 = vadd.f32 %v2170_v20, %v2169_v15 }
 0x13c   :  { %v1307_v23 = vadd.f32 %v2107_v18, %v2908_v29  ;;  %v2940_v24 = vadd.f32 %v2168_v14, %v1304_v17 }
 0x13e   :  { %v2108_v25 = vpop.f32.mrb[36].mxu0  ;;  %v2942_v26 = vadd.f32 %v2171_v22, %v1307_v23 }
 0x13f   :  { %v2172_v28 = vpop.f32.mrb[36].mxu1  ;;  %v2109_v30 = vpop.f32.mrb[37].mxu0 }
 0x140   :  { %v2110_v31 = vadd.f32 %v2109_v30, %v2108_v25  ;;  %v2173_v32 = vpop.f32.mrb[37].mxu1  ;;  %v2111_v33 = vpop.f32.mrb[38].mxu0 }
 0x141   :  { %v2174_v34 = vadd.f32 %v2173_v32, %v2172_v28  ;;  %v2175_v36 = vpop.f32.mrb[38].mxu1  ;;  %v2112_v38 = vpop.f32.mrb[39].mxu0 }
 0x142   :  { %v1312_v27 = vadd.f32 %v2110_v31, %v2910_v41  ;;  %v2113_v39 = vadd.f32 %v2112_v38, %v2111_v33  ;;  %v2176_v40 = vpop.f32.mrb[39].mxu1 }
 0x143   :  { %v2177_v42 = vadd.f32 %v2176_v40, %v2175_v36 }
 0x144   :  { %v1315_v29 = vadd.f32 %v2113_v39, %v2912_v43  ;;  %v2946_v44 = vadd.f32 %v2174_v34, %v1312_v27 }
 0x146   :  { %v2114_v45 = vpop.f32.mrb[40].mxu0  ;;  %v2948_v46 = vadd.f32 %v2177_v42, %v1315_v29 }
 0x147   :  { %v2178_v47 = vpop.f32.mrb[40].mxu1  ;;  %v2115_v48 = vpop.f32.mrb[41].mxu0 }
 0x148   :  { %v2116_v49 = vadd.f32 %v2115_v48, %v2114_v45  ;;  %v2179_v50 = vpop.f32.mrb[41].mxu1  ;;  %v2117_v52 = vpop.f32.mrb[42].mxu0 }
 0x149   :  { %v2180_v54 = vadd.f32 %v2179_v50, %v2178_v47  ;;  %v2181_v56 = vpop.f32.mrb[42].mxu1  ;;  %v2118_v58 = vpop.f32.mrb[43].mxu0 }
 0x14a   :  { %v1320_v41 = vadd.f32 %v2116_v49, %v2914_v55  ;;  %v2119_v59 = vadd.f32 %v2118_v58, %v2117_v52  ;;  %v2182_v60 = vpop.f32.mrb[43].mxu1 }
 0x14b   :  { %v2183_v61 = vadd.f32 %v2182_v60, %v2181_v56 }
 0x14c   :  { %v1323_v43 = vadd.f32 %v2119_v59, %v2916_v57  ;;  %v2952_v62 = vadd.f32 %v2180_v54, %v1320_v41 }
 0x14e   :  { %v2120_v63 = vpop.f32.mrb[44].mxu0  ;;  %v2954_v0 = vadd.f32 %v2183_v61, %v1323_v43 }
 0x14f   :  { %v2184_v1 = vpop.f32.mrb[44].mxu1  ;;  %v2121_v2 = vpop.f32.mrb[45].mxu0 }
 0x150   :  { %v2122_v4 = vadd.f32 %v2121_v2, %v2120_v63  ;;  %v2185_v8 = vpop.f32.mrb[45].mxu1  ;;  %v2123_v9 = vpop.f32.mrb[46].mxu0 }
 0x151   :  { %v2186_v10 = vadd.f32 %v2185_v8, %v2184_v1  ;;  %v2187_v11 = vpop.f32.mrb[46].mxu1  ;;  %v2124_v12 = vpop.f32.mrb[47].mxu0 }
 0x152   :  { %v1328_v55 = vadd.f32 %v2122_v4, %v2918_v5  ;;  %v2125_v13 = vadd.f32 %v2124_v12, %v2123_v9  ;;  %v2188_v14 = vpop.f32.mrb[47].mxu1 }
 0x153   :  { %v2189_v15 = vadd.f32 %v2188_v14, %v2187_v11 }
 0x154   :  { %v1331_v57 = vadd.f32 %v2125_v13, %v2920_v7  ;;  %v2958_v16 = vadd.f32 %v2186_v10, %v1328_v55 }
 0x156   :  { %v2126_v17 = vpop.f32.mrb[48].mxu0  ;;  %v2960_v18 = vadd.f32 %v2189_v15, %v1331_v57 }
 0x157   :  { %v2190_v20 = vpop.f32.mrb[48].mxu1  ;;  %v2127_v22 = vpop.f32.mrb[49].mxu0 }
 0x158   :  { %v2128_v23 = vadd.f32 %v2127_v22, %v2126_v17  ;;  %v2191_v25 = vpop.f32.mrb[49].mxu1  ;;  %v2129_v28 = vpop.f32.mrb[50].mxu0 }
 0x159   :  { %v2192_v30 = vadd.f32 %v2191_v25, %v2190_v20  ;;  %v2193_v31 = vpop.f32.mrb[50].mxu1  ;;  %v2130_v32 = vpop.f32.mrb[51].mxu0 }
 0x15a   :  { %v1336_v5 = vadd.f32 %v2128_v23, %v2922_v19  ;;  %v2131_v33 = vadd.f32 %v2130_v32, %v2129_v28  ;;  %v2194_v34 = vpop.f32.mrb[51].mxu1 }
 0x15b   :  { %v2195_v36 = vadd.f32 %v2194_v34, %v2193_v31 }
 0x15c   :  { %v1339_v7 = vadd.f32 %v2131_v33, %v2924_v21  ;;  %v1433_v38 = vadd.f32 %v2192_v30, %v1336_v5  ;;  %v2979_v33 = vld [vmem:[%s3034_s2] ss:$0 sm:$0xff] }
 0x15e   :  { %v2132_v27 = vpop.f32.mrb[52].mxu0  ;;  %v2964_v39 = vadd.f32 %v2195_v36, %v1339_v7 }
 0x15f   :  { %v2196_v40 = vpop.f32.mrb[52].mxu1  ;;  %v2133_v42 = vpop.f32.mrb[53].mxu0 }
 0x160   :  { %v2134_v29 = vadd.f32 %v2133_v42, %v2132_v27  ;;  %v2197_v45 = vpop.f32.mrb[53].mxu1  ;;  %v2135_v47 = vpop.f32.mrb[54].mxu0 }
 0x161   :  { %v2198_v48 = vadd.f32 %v2197_v45, %v2196_v40  ;;  %v2199_v49 = vpop.f32.mrb[54].mxu1  ;;  %v2136_v50 = vpop.f32.mrb[55].mxu0 }
 0x162   :  { %v1344_v52 = vadd.f32 %v2134_v29, %v2926_v35  ;;  %v2137_v19 = vadd.f32 %v2136_v50, %v2135_v47  ;;  %v2200_v54 = vpop.f32.mrb[55].mxu1 }
 0x163   :  { %v2201_v56 = vadd.f32 %v2200_v54, %v2199_v49 }
 0x164   :  { %v1347_v58 = vadd.f32 %v2137_v19, %v2928_v37  ;;  %v1441_v21 = vadd.f32 %v2198_v48, %v1344_v52 }
 0x166   :  { %v2138_v41 = vpop.f32.mrb[56].mxu0  ;;  %v1444_v59 = vadd.f32 %v2201_v56, %v1347_v58 }
 0x167   :  { %v2202_v60 = vpop.f32.mrb[56].mxu1  ;;  %v2139_v61 = vpop.f32.mrb[57].mxu0 }
 0x168   :  { %v2140_v43 = vadd.f32 %v2139_v61, %v2138_v41  ;;  %v2203_v63 = vpop.f32.mrb[57].mxu1  ;;  %v2141_v1 = vpop.f32.mrb[58].mxu0 }
 0x169   :  { %v2204_v2 = vadd.f32 %v2203_v63, %v2202_v60  ;;  %v2205_v4 = vpop.f32.mrb[58].mxu1  ;;  %v2142_v8 = vpop.f32.mrb[59].mxu0 }
 0x16a   :  { %v1352_v9 = vadd.f32 %v2140_v43, %v2930_v51  ;;  %v2143_v10 = vadd.f32 %v2142_v8, %v2141_v1  ;;  %v2206_v35 = vpop.f32.mrb[59].mxu1 }
 0x16b   :  { %v2207_v11 = vadd.f32 %v2206_v35, %v2205_v4 }
 0x16c   :  { %v1355_v12 = vadd.f32 %v2143_v10, %v2932_v53  ;;  %v2970_v55 = vadd.f32 %v2204_v2, %v1352_v9 }
 0x16e   :  { %v2144_v37 = vpop.f32.mrb[60].mxu0  ;;  %v2972_v13 = vadd.f32 %v2207_v11, %v1355_v12 }
 0x16f   :  { %v2208_v14 = vpop.f32.mrb[60].mxu1  ;;  %v2145_v15 = vpop.f32.mrb[61].mxu0 }
 0x170   :  { %v2146_v57 = vadd.f32 %v2145_v15, %v2144_v37  ;;  %v2209_v17 = vpop.f32.mrb[61].mxu1  ;;  %v2147_v20 = vpop.f32.mrb[62].mxu0 }
 0x171   :  { %v2210_v22 = vadd.f32 %v2209_v17, %v2208_v14  ;;  %v2211_v23 = vpop.f32.mrb[62].mxu1  ;;  %v2148_v25 = vpop.f32.mrb[63].mxu0 }
 0x172   :  { %v1360_v51 = vadd.f32 %v2146_v57, %v2934_v3  ;;  %v2149_v28 = vadd.f32 %v2148_v25, %v2147_v20  ;;  %v2212_v30 = vpop.f32.mrb[63].mxu1 }
 0x173   :  { %v2213_v31 = vadd.f32 %v2212_v30, %v2211_v23 }
 0x174   :  { %v1363_v53 = vadd.f32 %v2149_v28, %v2936_v6  ;;  %v1457_v32 = vadd.f32 %v2210_v22, %v1360_v51 }
 0x176   :  { %v2248_v5 = vpop.f32.mrb[64].mxu0  ;;  %v1460_v34 = vadd.f32 %v2213_v31, %v1363_v53 }
 0x177   :  { %v1506_v36 = vadd.f32 %v2248_v5, %v2946_v44  ;;  %v2256_v7 = vpop.f32.mrb[64].mxu1  ;;  %v1497_v27 = vpop.f32.mrb[65].mxu0 }
 0x178   :  { %v1538_v40 = vadd.f32 %v2256_v7, %v1441_v21  ;;  %v1498_v3 = vadd.f32 %v1497_v27, %v2940_v24  ;;  %v1529_v42 = vpop.f32.mrb[65].mxu1  ;;  %v2249_v29 = vpop.f32.mrb[66].mxu0 }
 0x179   :  { %v1620_v45 = vadd.f32 %v2979_v33, %v1506_v36  ;;  %v1530_v6 = vadd.f32 %v1529_v42, %v1433_v38  ;;  %v1509_v47 = vadd.f32 %v2249_v29, %v2948_v46  ;;  %v2257_v48 = vpop.f32.mrb[66].mxu1  ;;  %v1500_v49 = vpop.f32.mrb[67].mxu0 }
 0x17a   :  { %v1628_v50 = vadd.f32 %v2979_v33, %v1538_v40  ;;  %v1618_v52 = vadd.f32 %v2979_v33, %v1498_v3  ;;  %v1541_v19 = vadd.f32 %v2257_v48, %v1444_v59  ;;  %v1501_v44 = vadd.f32 %v1500_v49, %v2942_v26  ;;  %v1532_v54 = vpop.f32.mrb[67].mxu1 }
 0x17b   :  { %v1626_v56 = vadd.f32 %v2979_v33, %v1530_v6  ;;  %v1621_v24 = vadd.f32 %v2979_v33, %v1509_v47  ;;  %v1533_v58 = vadd.f32 %v1532_v54, %v2964_v39  ;;  %v1636_v21 = vmax.f32 %v1620_v45, 0.0 }
 0x17c   :  { %v1629_v38 = vadd.f32 %v2979_v33, %v1541_v19  ;;  %v1619_v46 = vadd.f32 %v2979_v33, %v1501_v44  ;;  %v1644_v61 = vmax.f32 %v1628_v50, 0.0  ;;  %v1634_v43 = vmax.f32 %v1618_v52, 0.0 }
 0x17d   :  { %v1637_v41 = vmax.f32 %v1621_v24, 0.0  ;;  %v1627_v60 = vadd.f32 %v2979_v33, %v1533_v58  ;;  %v1642_v1 = vmax.f32 %v1626_v56, 0.0 }
 0x17e   :  { %v1645_v59 = vmax.f32 %v1629_v38, 0.0  ;;  %v1635_v63 = vmax.f32 %v1619_v46, 0.0  ;;  %v2252_v26 = vpop.f32.mrb[68].mxu0 }
 0x17f   :  { %v1919_v2 = vpack.c.bf16 %v1637_v41, %v1636_v21  ;;  %v1643_v4 = vmax.f32 %v1627_v60, 0.0  ;;  %v1522_v8 = vadd.f32 %v2252_v26, %v2958_v16  ;;  %v2260_v9 = vpop.f32.mrb[68].mxu1  ;;  %v1513_v39 = vpop.f32.mrb[69].mxu0 }
 0x180   :  { %v1939_v10 = vpack.c.bf16 %v1645_v59, %v1644_v61  ;;  %v1914_v35 = vpack.c.bf16 %v1635_v63, %v1634_v43  ;;  %v1554_v11 = vadd.f32 %v2260_v9, %v1457_v32  ;;  %v1514_v12 = vadd.f32 %v1513_v39, %v2952_v62  ;;  %v1545_v37 = vpop.f32.mrb[69].mxu1  ;;  %v2253_v14 = vpop.f32.mrb[70].mxu0 }
 0x181   :  { %1951 = vst [vmem:[%s3035_s3 + $0x8] sm:$0xff] %v1919_v2   ;;  %v1934_v15 = vpack.c.bf16 %v1643_v4, %v1642_v1  ;;  %v1624_v57 = vadd.f32 %v2979_v33, %v1522_v8  ;;  %v1546_v17 = vadd.f32 %v1545_v37, %v2970_v55  ;;  %v1525_v16 = vadd.f32 %v2253_v14, %v2960_v18  ;;  %v2261_v20 = vpop.f32.mrb[70].mxu1  ;;  %v1516_v22 = vpop.f32.mrb[71].mxu0 }
 0x182   :  { %1955 = vst [vmem:[%s3035_s3 + $0x28] sm:$0xff] %v1939_v10   ;;  %1915 = vst [vmem:[%s3035_s3] sm:$0xff] %v1914_v35   ;;  %v1632_v62 = vadd.f32 %v2979_v33, %v1554_v11  ;;  %v1622_v23 = vadd.f32 %v2979_v33, %v1514_v12  ;;  %v1557_v25 = vadd.f32 %v2261_v20, %v1460_v34  ;;  %v1548_v55 = vpop.f32.mrb[71].mxu1 }
 0x183   :  { %v1517_v51 = vadd.f32 %v1516_v22, %v2954_v0  ;;  %1954 = vst [vmem:[%s3035_s3 + $0x20] sm:$0xff] %v1934_v15   ;;  %v1630_v18 = vadd.f32 %v2979_v33, %v1546_v17  ;;  %v1625_v28 = vadd.f32 %v2979_v33, %v1525_v16  ;;  %v1549_v30 = vadd.f32 %v1548_v55, %v2972_v13 }
 0x184   :  { %v1633_v31 = vadd.f32 %v2979_v33, %v1557_v25  ;;  %v1640_v32 = vmax.f32 %v1624_v57, 0.0  ;;  %v1648_v0 = vmax.f32 %v1632_v62, 0.0  ;;  %v1638_v36 = vmax.f32 %v1622_v23, 0.0 }
 0x185   :  { %v1623_v53 = vadd.f32 %v2979_v33, %v1517_v51  ;;  %v1641_v5 = vmax.f32 %v1625_v28, 0.0  ;;  %v1631_v34 = vadd.f32 %v2979_v33, %v1549_v30  ;;  %v1646_v40 = vmax.f32 %v1630_v18, 0.0 }
 0x186   :  { %v1649_v7 = vmax.f32 %v1633_v31, 0.0 }
 0x187   :  { %v1639_v27 = vmax.f32 %v1623_v53, 0.0  ;;  %v1929_v3 = vpack.c.bf16 %v1641_v5, %v1640_v32  ;;  %v1647_v42 = vmax.f32 %v1631_v34, 0.0 }
 0x188   :  { %v1949_v29 = vpack.c.bf16 %v1649_v7, %v1648_v0 }
 0x189   :  { %v1924_v45 = vpack.c.bf16 %v1639_v27, %v1638_v36  ;;  %1953 = vst [vmem:[%s3035_s3 + $0x18] sm:$0xff] %v1929_v3   ;;  %v1944_v13 = vpack.c.bf16 %v1647_v42, %v1646_v40 }
 0x18a   :  { %1957 = vst [vmem:[%s3035_s3 + $0x38] sm:$0xff] %v1949_v29  }
 0x18b   :  { %1952 = vst [vmem:[%s3035_s3 + $0x10] sm:$0xff] %v1924_v45   ;;  %1956 = vst [vmem:[%s3035_s3 + $0x30] sm:$0xff] %v1944_v13  }

// kernel: fpm_forward.16
= control target key start
LH: loop header
LB: loop body
LE: loop exit
PB: predicated region body
PF: predicated region fallthrough
CT: control target
= control target key end

     0   :  { %s2995_s1 = inlined_call_operand.vmem [shape: bf16[1152,128], index: 1, kind: input, shape index: {}]   ;;  %s2996_s0 = inlined_call_operand.vmem [shape: bf16[128,1152], index: 0, kind: input, shape index: {}]   ;;  %s2997_s2 = inlined_call_operand.vmem [shape: f32[1,128], index: 2, kind: input, shape index: {}]   ;;  %s2998_s3 = inlined_call_operand.vmem [shape: bf16[128,128], index: 3, kind: output, shape index: {}]  }
   0x1   :  { %v2262_v0 = vld [vmem:[%s2995_s1 + $0x40] sm:$0xff]   ;;  %v2266_v4 = vld [vmem:[%s2995_s1 + $0x48] sm:$0xff]   ;;  %v2270_v8 = vld [vmem:[%s2995_s1 + $0x50] sm:$0xff]  }
   0x2   :  { %v2263_v1 = vld [vmem:[%s2995_s1 + $0xc0] sm:$0xff]   ;;  %1942 = vmatprep.subr.bf16.mxu0 %v2262_v0  ;;  %v2267_v5 = vld [vmem:[%s2995_s1 + $0xc8] sm:$0xff]   ;;  %v2271_v9 = vld [vmem:[%s2995_s1 + $0xd0] sm:$0xff]  }
   0x3   :  { %v2264_v2 = vld [vmem:[%s2995_s1] sm:$0xff]   ;;  %2006 = vmatprep.subr.bf16.mxu1 %v2263_v1  ;;  %v2268_v6 = vld [vmem:[%s2995_s1 + $0x8] sm:$0xff]   ;;  %v2272_v10 = vld [vmem:[%s2995_s1 + $0x10] sm:$0xff]  }
   0x4   :  { %v2265_v3 = vld [vmem:[%s2995_s1 + $0x80] sm:$0xff]   ;;  %1943 = vmatpush3.bf16.msra.mxu0 %v2264_v2  ;;  %v2269_v7 = vld [vmem:[%s2995_s1 + $0x88] sm:$0xff]   ;;  %v2273_v11 = vld [vmem:[%s2995_s1 + $0x90] sm:$0xff]  }
   0x5   :  { %2007 = vmatpush3.bf16.msra.mxu1 %v2265_v3  ;;  %1944 = vmatprep.subr.bf16.mxu0 %v2266_v4  ;;  %v2274_v12 = vld [vmem:[%s2995_s1 + $0x58] sm:$0xff]   ;;  %v2278_v16 = vld [vmem:[%s2995_s1 + $0x60] sm:$0xff]   ;;  %v2282_v20 = vld [vmem:[%s2995_s1 + $0x68] sm:$0xff]  }
   0x6   :  { %2008 = vmatprep.subr.bf16.mxu1 %v2267_v5  ;;  %v2275_v13 = vld [vmem:[%s2995_s1 + $0xd8] sm:$0xff]   ;;  %v2279_v17 = vld [vmem:[%s2995_s1 + $0xe0] sm:$0xff]   ;;  %v2283_v21 = vld [vmem:[%s2995_s1 + $0xe8] sm:$0xff]  }
   0x7   :  { %v2276_v14 = vld [vmem:[%s2995_s1 + $0x18] sm:$0xff]   ;;  %v2280_v18 = vld [vmem:[%s2995_s1 + $0x20] sm:$0xff]   ;;  %v2284_v22 = vld [vmem:[%s2995_s1 + $0x28] sm:$0xff]  }
   0x8   :  { %1945 = vmatpush3.bf16.msra.mxu0 %v2268_v6  ;;  %v2277_v15 = vld [vmem:[%s2995_s1 + $0x98] sm:$0xff]   ;;  %v2281_v19 = vld [vmem:[%s2995_s1 + $0xa0] sm:$0xff]   ;;  %v2285_v23 = vld [vmem:[%s2995_s1 + $0xa8] sm:$0xff]  }
   0x9   :  { %2009 = vmatpush3.bf16.msra.mxu1 %v2269_v7  ;;  %1946 = vmatprep.subr.bf16.mxu0 %v2270_v8  ;;  %v2286_v24 = vld [vmem:[%s2995_s1 + $0x70] sm:$0xff]   ;;  %v2290_v28 = vld [vmem:[%s2995_s1 + $0x78] sm:$0xff]   ;;  %v2294_v32 = vld [vmem:[%s2996_s0] ss:$36 sps:$4 sm:$0xff]  }
   0xa   :  { %2010 = vmatprep.subr.bf16.mxu1 %v2271_v9  ;;  %v2287_v25 = vld [vmem:[%s2995_s1 + $0xf0] sm:$0xff]   ;;  %v2291_v29 = vld [vmem:[%s2995_s1 + $0xf8] sm:$0xff]   ;;  %v2296_v33 = vld [vmem:[%s2996_s0 + $0x4] ss:$36 sps:$4 sm:$0xff]  }
   0xb   :  { %v2288_v26 = vld [vmem:[%s2995_s1 + $0x30] sm:$0xff]   ;;  %v2292_v30 = vld [vmem:[%s2995_s1 + $0x38] sm:$0xff]   ;;  %v2297_v34 = vld [vmem:[%s2996_s0 + $0x8] ss:$36 sps:$4 sm:$0xff]   ;;  %1107 = vmatprep.mubr.bf16.mxu0 %v2296_v33 }
   0xc   :  { %1947 = vmatpush3.bf16.msra.mxu0 %v2272_v10  ;;  %v2289_v27 = vld [vmem:[%s2995_s1 + $0xb0] sm:$0xff]   ;;  %v2293_v31 = vld [vmem:[%s2995_s1 + $0xb8] sm:$0xff]   ;;  %v2300_v36 = vld [vmem:[%s2995_s1 + $0x140] sm:$0xff]  }
   0xd   :  { %2011 = vmatpush3.bf16.msra.mxu1 %v2273_v11  ;;  %1948 = vmatprep.subr.bf16.mxu0 %v2274_v12  ;;  %v2299_v35 = vld [vmem:[%s2996_s0 + $0xc] ss:$36 sps:$4 sm:$0xff]   ;;  %v2301_v37 = vld [vmem:[%s2995_s1 + $0x1c0] sm:$0xff]   ;;  %v2306_v41 = vld [vmem:[%s2996_s0 + $0x54] ss:$36 sps:$4 sm:$0xff]  }
   0xe   :  { %2012 = vmatprep.subr.bf16.mxu1 %v2275_v13  ;;  %1204 = vmatprep.mubr.bf16.mxu1 %v2299_v35  ;;  %v2302_v38 = vld [vmem:[%s2995_s1 + $0x100] sm:$0xff]   ;;  %v2304_v40 = vld [vmem:[%s2996_s0 + $0x4c] ss:$36 sps:$4 sm:$0xff]   ;;  %v2314_v48 = vld [vmem:[%s2996_s0 + $0x94] ss:$36 sps:$4 sm:$0xff]  }
   0xf   :  { %v2303_v39 = vld [vmem:[%s2995_s1 + $0x180] sm:$0xff]   ;;  %v2308_v42 = vld [vmem:[%s2996_s0 + $0x48] ss:$36 sps:$4 sm:$0xff]   ;;  %v2309_v43 = vld [vmem:[%s2996_s0 + $0x50] ss:$36 sps:$4 sm:$0xff]  }
  0x10   :  { %1949 = vmatpush3.bf16.msra.mxu0 %v2276_v14  ;;  %v2310_v44 = vld [vmem:[%s2995_s1 + $0x148] sm:$0xff]   ;;  %v2316_v49 = vld [vmem:[%s2996_s0 + $0x9c] ss:$36 sps:$4 sm:$0xff]   ;;  %v2318_v50 = vld [vmem:[%s2996_s0 + $0x90] ss:$36 sps:$4 sm:$0xff]  }
  0x11   :  { %2013 = vmatpush3.bf16.msra.mxu1 %v2277_v15  ;;  %1950 = vmatprep.subr.bf16.mxu0 %v2278_v16  ;;  %v2311_v45 = vld [vmem:[%s2995_s1 + $0x1c8] sm:$0xff]   ;;  %v2319_v51 = vld [vmem:[%s2996_s0 + $0x98] ss:$36 sps:$4 sm:$0xff]   ;;  %v2320_v52 = vld [vmem:[%s2995_s1 + $0x150] sm:$0xff]  }
  0x12   :  { %2014 = vmatprep.subr.bf16.mxu1 %v2279_v17  ;;  %v2312_v46 = vld [vmem:[%s2995_s1 + $0x108] sm:$0xff]   ;;  %v2321_v53 = vld [vmem:[%s2995_s1 + $0x1d0] sm:$0xff]   ;;  %v2324_v56 = vld [vmem:[%s2996_s0 + $0xdc] ss:$36 sps:$4 sm:$0xff]  }
  0x13   :  { %v2313_v47 = vld [vmem:[%s2995_s1 + $0x188] sm:$0xff]   ;;  %v2322_v54 = vld [vmem:[%s2995_s1 + $0x110] sm:$0xff]   ;;  %v2328_v58 = vld [vmem:[%s2996_s0 + $0xd8] ss:$36 sps:$4 sm:$0xff]  }
  0x14   :  { %1951 = vmatpush3.bf16.msra.mxu0 %v2280_v18  ;;  %v2323_v55 = vld [vmem:[%s2995_s1 + $0x190] sm:$0xff]   ;;  %v2326_v57 = vld [vmem:[%s2996_s0 + $0xe4] ss:$36 sps:$4 sm:$0xff]   ;;  %v2330_v60 = vld [vmem:[%s2995_s1 + $0x158] sm:$0xff]  }
  0x15   :  { %2015 = vmatpush3.bf16.msra.mxu1 %v2281_v19  ;;  %1952 = vmatprep.subr.bf16.mxu0 %v2282_v20  ;;  %v2329_v59 = vld [vmem:[%s2996_s0 + $0xe0] ss:$36 sps:$4 sm:$0xff]   ;;  %v2331_v61 = vld [vmem:[%s2995_s1 + $0x1d8] sm:$0xff]   ;;  %v2336_v1 = vld [vmem:[%s2996_s0 + $0x12c] ss:$36 sps:$4 sm:$0xff]  }
  0x16   :  { %2016 = vmatprep.subr.bf16.mxu1 %v2283_v21  ;;  %v2332_v62 = vld [vmem:[%s2995_s1 + $0x118] sm:$0xff]   ;;  %v2334_v0 = vld [vmem:[%s2996_s0 + $0x124] ss:$36 sps:$4 sm:$0xff]   ;;  %v2344_v8 = vld [vmem:[%s2996_s0 + $0x16c] ss:$36 sps:$4 sm:$0xff]  }
  0x17   :  { %v2333_v63 = vld [vmem:[%s2995_s1 + $0x198] sm:$0xff]   ;;  %v2338_v2 = vld [vmem:[%s2996_s0 + $0x120] ss:$36 sps:$4 sm:$0xff]   ;;  %v2339_v4 = vld [vmem:[%s2996_s0 + $0x128] ss:$36 sps:$4 sm:$0xff]  }
  0x18   :  { %1953 = vmatpush3.bf16.msra.mxu0 %v2284_v22  ;;  %v2340_v3 = vld [vmem:[%s2995_s1 + $0x160] sm:$0xff]   ;;  %v2346_v9 = vld [vmem:[%s2996_s0 + $0x174] ss:$36 sps:$4 sm:$0xff]   ;;  %v2350_v10 = vld [vmem:[%s2995_s1 + $0x168] sm:$0xff]  }
  0x19   :  { %2017 = vmatpush3.bf16.msra.mxu1 %v2285_v23  ;;  %1954 = vmatprep.subr.bf16.mxu0 %v2286_v24  ;;  %v2341_v5 = vld [vmem:[%s2995_s1 + $0x1e0] sm:$0xff]   ;;  %v2351_v11 = vld [vmem:[%s2995_s1 + $0x1e8] sm:$0xff]   ;;  %v2349_v15 = vld [vmem:[%s2996_s0 + $0x170] ss:$36 sps:$4 sm:$0xff]  }
  0x1a   :  { %2018 = vmatprep.subr.bf16.mxu1 %v2287_v25  ;;  %v2342_v6 = vld [vmem:[%s2995_s1 + $0x120] sm:$0xff]   ;;  %v2348_v12 = vld [vmem:[%s2996_s0 + $0x168] ss:$36 sps:$4 sm:$0xff]   ;;  %v2354_v16 = vld [vmem:[%s2996_s0 + $0x1b4] ss:$36 sps:$4 sm:$0xff]  }
  0x1b   :  { %v2343_v7 = vld [vmem:[%s2995_s1 + $0x1a0] sm:$0xff]   ;;  %v2352_v13 = vld [vmem:[%s2995_s1 + $0x128] sm:$0xff]   ;;  %v2360_v18 = vld [vmem:[%s2995_s1 + $0x170] sm:$0xff]  }
  0x1c   :  { %1955 = vmatpush3.bf16.msra.mxu0 %v2288_v26  ;;  %v2353_v14 = vld [vmem:[%s2995_s1 + $0x1a8] sm:$0xff]   ;;  %v2356_v17 = vld [vmem:[%s2996_s0 + $0x1bc] ss:$36 sps:$4 sm:$0xff]   ;;  %v2361_v19 = vld [vmem:[%s2995_s1 + $0x1f0] sm:$0xff]  }
  0x1d   :  { %2019 = vmatpush3.bf16.msra.mxu1 %v2289_v27  ;;  %1956 = vmatprep.subr.bf16.mxu0 %v2290_v28  ;;  %v2362_v20 = vld [vmem:[%s2995_s1 + $0x130] sm:$0xff]   ;;  %v2359_v23 = vld [vmem:[%s2996_s0 + $0x1b8] ss:$36 sps:$4 sm:$0xff]   ;;  %v2366_v25 = vld [vmem:[%s2996_s0 + $0x204] ss:$36 sps:$4 sm:$0xff]  }
  0x1e   :  { %2020 = vmatprep.subr.bf16.mxu1 %v2291_v29  ;;  %v2363_v21 = vld [vmem:[%s2995_s1 + $0x1b0] sm:$0xff]   ;;  %v2364_v24 = vld [vmem:[%s2996_s0 + $0x1fc] ss:$36 sps:$4 sm:$0xff]  }
  0x1f   :  { %v2358_v22 = vld [vmem:[%s2996_s0 + $0x1b0] ss:$36 sps:$4 sm:$0xff]   ;;  %v2370_v26 = vld [vmem:[%s2995_s1 + $0x178] sm:$0xff]  }
  0x20   :  { %1957 = vmatpush3.bf16.msra.mxu0 %v2292_v30  ;;  %v2371_v27 = vld [vmem:[%s2995_s1 + $0x1f8] sm:$0xff]   ;;  %v2374_v35 = vld [vmem:[%s2996_s0 + $0x10] ss:$36 sps:$4 sm:$0xff]  }
  0x21   :  { %2021 = vmatpush3.bf16.msra.mxu1 %v2293_v31  ;;  %2070 = vmatprep.subr.bf16.mxu0 %v2300_v36  ;;  %v2372_v28 = vld [vmem:[%s2995_s1 + $0x138] sm:$0xff]   ;;  %v2369_v31 = vld [vmem:[%s2996_s0 + $0x200] ss:$36 sps:$4 sm:$0xff]  }
  0x22   :  { %2134 = vmatprep.subr.bf16.mxu1 %v2301_v37  ;;  %v2373_v29 = vld [vmem:[%s2995_s1 + $0x1b8] sm:$0xff]  }
  0x23   :  { %1108 = vmatmul.mubr.bf16.vlgmr.msra.gmra.mrb[0].mxu0 %v2294_v32  ;;  %v2368_v30 = vld [vmem:[%s2996_s0 + $0x1f8] ss:$36 sps:$4 sm:$0xff]   ;;  %v2380_v32 = vld [vmem:[%s2995_s1 + $0x200] sm:$0xff]  }
  0x24   :  { %1205 = vmatmul.mubr.bf16.vlgmr.msra.gmra.mrb[0].mxu1 %v2297_v34  ;;  %2071 = vmatpush3.bf16.msra.mxu0 %v2302_v38  ;;  %v2376_v33 = vld [vmem:[%s2996_s0 + $0x14] ss:$36 sps:$4 sm:$0xff]   ;;  %v2379_v34 = vld [vmem:[%s2996_s0 + $0x1c] ss:$36 sps:$4 sm:$0xff]   ;;  %v2383_v38 = vld [vmem:[%s2996_s0 + $0x64] ss:$36 sps:$4 sm:$0xff]  }
  0x25   :  { %2135 = vmatpush3.bf16.msra.mxu1 %v2303_v39  ;;  %1115 = vmatprep.mubr.bf16.mxu0 %v2304_v40  ;;  %v2377_v36 = vld [vmem:[%s2996_s0 + $0x18] ss:$36 sps:$4 sm:$0xff]   ;;  %v2387_v39 = vld [vmem:[%s2995_s1 + $0x208] sm:$0xff]   ;;  %v2394_v40 = vld [vmem:[%s2995_s1 + $0x210] sm:$0xff]  }
  0x26   :  { %1212 = vmatprep.mubr.bf16.mxu1 %v2306_v41  ;;  %2072 = vmatprep.subr.bf16.mxu0 %v2310_v44  ;;  %v2381_v37 = vld [vmem:[%s2996_s0 + $0x5c] ss:$36 sps:$4 sm:$0xff]   ;;  %v2390_v44 = vld [vmem:[%s2996_s0 + $0xac] ss:$36 sps:$4 sm:$0xff]  }
  0x27   :  { %2136 = vmatprep.subr.bf16.mxu1 %v2311_v45  ;;  %v2385_v41 = vld [vmem:[%s2996_s0 + $0x58] ss:$36 sps:$4 sm:$0xff]  }
  0x28   :  { %2073 = vmatpush3.bf16.msra.mxu0 %v2312_v46  ;;  %v2401_v45 = vld [vmem:[%s2995_s1 + $0x218] sm:$0xff]   ;;  %v2408_v46 = vld [vmem:[%s2995_s1 + $0x220] sm:$0xff]  }
  0x29   :  { %2137 = vmatpush3.bf16.msra.mxu1 %v2313_v47  ;;  %2074 = vmatprep.subr.bf16.mxu0 %v2320_v52  ;;  %v2392_v47 = vld [vmem:[%s2996_s0 + $0xa0] ss:$36 sps:$4 sm:$0xff]   ;;  %v2399_v52 = vld [vmem:[%s2996_s0 + $0xe8] ss:$36 sps:$4 sm:$0xff]  }
  0x2a   :  { %2138 = vmatprep.subr.bf16.mxu1 %v2321_v53  ;;  %v2422_v53 = vld [vmem:[%s2995_s1 + $0x230] sm:$0xff]  }
  0x2b   :  { %1116 = vmatmul.mubr.bf16.gmra.mrb[4].mxu0 %v2308_v42  ;;  %v2386_v42 = vld [vmem:[%s2996_s0 + $0x60] ss:$36 sps:$4 sm:$0xff]  }
  0x2c   :  { %1213 = vmatmul.mubr.bf16.gmra.mrb[4].mxu1 %v2309_v43  ;;  %1123 = vmatprep.mubr.bf16.mxu0 %v2314_v48  ;;  %v2388_v43 = vld [vmem:[%s2996_s0 + $0xa4] ss:$36 sps:$4 sm:$0xff]  }
  0x2d   :  { %1220 = vmatprep.mubr.bf16.mxu1 %v2316_v49  ;;  %2075 = vmatpush3.bf16.msra.mxu0 %v2322_v54  ;;  %v2393_v48 = vld [vmem:[%s2996_s0 + $0xa8] ss:$36 sps:$4 sm:$0xff]   ;;  %v2400_v54 = vld [vmem:[%s2996_s0 + $0xf0] ss:$36 sps:$4 sm:$0xff]  }
  0x2e   :  { %2139 = vmatpush3.bf16.msra.mxu1 %v2323_v55  ;;  %2076 = vmatprep.subr.bf16.mxu0 %v2330_v60  ;;  %v2395_v49 = vld [vmem:[%s2996_s0 + $0xec] ss:$36 sps:$4 sm:$0xff]   ;;  %v2402_v55 = vld [vmem:[%s2996_s0 + $0x134] ss:$36 sps:$4 sm:$0xff]   ;;  %v2409_v60 = vld [vmem:[%s2996_s0 + $0x17c] ss:$36 sps:$4 sm:$0xff]  }
  0x2f   :  { %2140 = vmatprep.subr.bf16.mxu1 %v2331_v61  ;;  %v2411_v61 = vld [vmem:[%s2996_s0 + $0x184] ss:$36 sps:$4 sm:$0xff]  }
  0x31   :  { %2077 = vmatpush3.bf16.msra.mxu0 %v2332_v62  ;;  %v2413_v62 = vld [vmem:[%s2996_s0 + $0x178] ss:$36 sps:$4 sm:$0xff]  }
  0x32   :  { %2141 = vmatpush3.bf16.msra.mxu1 %v2333_v63  ;;  %2078 = vmatprep.subr.bf16.mxu0 %v2340_v3  ;;  %v2414_v63 = vld [vmem:[%s2996_s0 + $0x180] ss:$36 sps:$4 sm:$0xff]   ;;  %v2421_v3 = vld [vmem:[%s2996_s0 + $0x1c8] ss:$36 sps:$4 sm:$0xff]  }
  0x33   :  { %1124 = vmatmul.mubr.bf16.gmra.mrb[8].mxu0 %v2318_v50  ;;  %2142 = vmatprep.subr.bf16.mxu1 %v2341_v5  ;;  %v2397_v50 = vld [vmem:[%s2996_s0 + $0xf4] ss:$36 sps:$4 sm:$0xff]  }
  0x34   :  { %1221 = vmatmul.mubr.bf16.gmra.mrb[8].mxu1 %v2319_v51  ;;  %1131 = vmatprep.mubr.bf16.mxu0 %v2324_v56  ;;  %v2415_v51 = vld [vmem:[%s2995_s1 + $0x228] sm:$0xff]   ;;  %v2404_v56 = vld [vmem:[%s2996_s0 + $0x13c] ss:$36 sps:$4 sm:$0xff]   ;;  %v2425_v5 = vld [vmem:[%s2996_s0 + $0x214] ss:$36 sps:$4 sm:$0xff]  }
  0x35   :  { %1228 = vmatprep.mubr.bf16.mxu1 %v2326_v57  ;;  %2079 = vmatpush3.bf16.msra.mxu0 %v2342_v6  ;;  %v2429_v57 = vld [vmem:[%s2995_s1 + $0x238] sm:$0xff]   ;;  %v2427_v6 = vld [vmem:[%s2996_s0 + $0x208] ss:$36 sps:$4 sm:$0xff]  }
  0x36   :  { %2143 = vmatpush3.bf16.msra.mxu1 %v2343_v7  ;;  %2080 = vmatprep.subr.bf16.mxu0 %v2350_v10  ;;  %v2428_v7 = vld [vmem:[%s2996_s0 + $0x210] ss:$36 sps:$4 sm:$0xff]   ;;  %v2432_v10 = vld [vmem:[%s2996_s0 + $0x68] ss:$36 sps:$4 sm:$0xff]  }
  0x37   :  { %2144 = vmatprep.subr.bf16.mxu1 %v2351_v11  ;;  %v2433_v11 = vld [vmem:[%s2996_s0 + $0x188] ss:$36 sps:$4 sm:$0xff]  }
  0x39   :  { %2081 = vmatpush3.bf16.msra.mxu0 %v2352_v13  ;;  %v2435_v13 = vld [vmem:[%s2996_s0 + $0x1d0] ss:$36 sps:$4 sm:$0xff]  }
  0x3a   :  { %2145 = vmatpush3.bf16.msra.mxu1 %v2353_v14  ;;  %2082 = vmatprep.subr.bf16.mxu0 %v2360_v18  ;;  %v2436_v14 = vld [vmem:[%s2996_s0 + $0xf8] ss:$36 sps:$4 sm:$0xff]  }
  0x3b   :  { %1132 = vmatmul.mubr.bf16.gmra.mrb[12].mxu0 %v2328_v58  ;;  %2146 = vmatprep.subr.bf16.mxu1 %v2361_v19  ;;  %v2406_v58 = vld [vmem:[%s2996_s0 + $0x130] ss:$36 sps:$4 sm:$0xff]  }
  0x3c   :  { %1229 = vmatmul.mubr.bf16.gmra.mrb[12].mxu1 %v2329_v59  ;;  %1139 = vmatprep.mubr.bf16.mxu0 %v2334_v0  ;;  %v2407_v59 = vld [vmem:[%s2996_s0 + $0x138] ss:$36 sps:$4 sm:$0xff]   ;;  %v2416_v0 = vld [vmem:[%s2996_s0 + $0x1c4] ss:$36 sps:$4 sm:$0xff]  }
  0x3d   :  { %1236 = vmatprep.mubr.bf16.mxu1 %v2336_v1  ;;  %2083 = vmatpush3.bf16.msra.mxu0 %v2362_v20  ;;  %v2418_v1 = vld [vmem:[%s2996_s0 + $0x1cc] ss:$36 sps:$4 sm:$0xff]  }
  0x3e   :  { %2147 = vmatpush3.bf16.msra.mxu1 %v2363_v21  ;;  %2084 = vmatprep.subr.bf16.mxu0 %v2370_v26 }
  0x3f   :  { %2148 = vmatprep.subr.bf16.mxu1 %v2371_v27 }
  0x41   :  { %2085 = vmatpush3.bf16.msra.mxu0 %v2372_v28 }
  0x42   :  { %2149 = vmatpush3.bf16.msra.mxu1 %v2373_v29  ;;  %2214 = vmatprep.subr.bf16.mxu0 %v2380_v32 }
  0x43   :  { %1140 = vmatmul.mubr.bf16.gmra.mrb[16].mxu0 %v2338_v2  ;;  %2246 = vmatprep.subr.bf16.mxu1 %v2380_v32  ;;  %v2420_v2 = vld [vmem:[%s2996_s0 + $0x1c0] ss:$36 sps:$4 sm:$0xff]  }
  0x44   :  { %1237 = vmatmul.mubr.bf16.gmra.mrb[16].mxu1 %v2339_v4  ;;  %1147 = vmatprep.mubr.bf16.mxu0 %v2344_v8  ;;  %v2423_v4 = vld [vmem:[%s2996_s0 + $0x20c] ss:$36 sps:$4 sm:$0xff]   ;;  %v2430_v8 = vld [vmem:[%s2996_s0 + $0x20] ss:$36 sps:$4 sm:$0xff]  }
  0x45   :  { %1244 = vmatprep.mubr.bf16.mxu1 %v2346_v9  ;;  %v2431_v9 = vld [vmem:[%s2996_s0 + $0x140] ss:$36 sps:$4 sm:$0xff]  }
  0x4b   :  { %1148 = vmatmul.mubr.bf16.gmra.mrb[20].mxu0 %v2348_v12  ;;  %v2434_v12 = vld [vmem:[%s2996_s0 + $0xb0] ss:$36 sps:$4 sm:$0xff]  }
  0x4c   :  { %1245 = vmatmul.mubr.bf16.gmra.mrb[20].mxu1 %v2349_v15  ;;  %1155 = vmatprep.mubr.bf16.mxu0 %v2354_v16  ;;  %v2437_v15 = vld [vmem:[%s2996_s0 + $0x218] ss:$36 sps:$4 sm:$0xff]  }
  0x4d   :  { %1252 = vmatprep.mubr.bf16.mxu1 %v2356_v17 }
  0x53   :  { %1156 = vmatmul.mubr.bf16.gmra.mrb[24].mxu0 %v2358_v22 }
  0x54   :  { %1253 = vmatmul.mubr.bf16.gmra.mrb[24].mxu1 %v2359_v23  ;;  %1163 = vmatprep.mubr.bf16.mxu0 %v2364_v24 }
  0x55   :  { %1260 = vmatprep.mubr.bf16.mxu1 %v2366_v25 }
  0x5b   :  { %1164 = vmatmul.mubr.bf16.gmra.mrb[28].mxu0 %v2368_v30 }
  0x5c   :  { %1261 = vmatmul.mubr.bf16.gmra.mrb[28].mxu1 %v2369_v31  ;;  %1301 = vmatprep.mubr.bf16.mxu0 %v2376_v33 }
  0x5d   :  { %1398 = vmatprep.mubr.bf16.mxu1 %v2379_v34 }
  0x63   :  { %1302 = vmatmul.mubr.bf16.vlgmr.msra.gmra.mrb[32].mxu0 %v2374_v35 }
  0x64   :  { %1399 = vmatmul.mubr.bf16.vlgmr.msra.gmra.mrb[32].mxu1 %v2377_v36  ;;  %2215 = vmatpush3.bf16.msra.mxu0 %v2380_v32 }
  0x65   :  { %2254 = vmatpush3.bf16.msra.mxu1 %v2380_v32  ;;  %1309 = vmatprep.mubr.bf16.mxu0 %v2381_v37 }
  0x66   :  { %1406 = vmatprep.mubr.bf16.mxu1 %v2383_v38  ;;  %2216 = vmatprep.subr.bf16.mxu0 %v2387_v39 }
  0x67   :  { %2247 = vmatprep.subr.bf16.mxu1 %v2387_v39 }
  0x68   :  { %2217 = vmatpush3.bf16.msra.mxu0 %v2387_v39 }
  0x69   :  { %2255 = vmatpush3.bf16.msra.mxu1 %v2387_v39  ;;  %2218 = vmatprep.subr.bf16.mxu0 %v2394_v40 }
  0x6a   :  { %2248 = vmatprep.subr.bf16.mxu1 %v2394_v40 }
  0x6b   :  { %1310 = vmatmul.mubr.bf16.gmra.mrb[36].mxu0 %v2385_v41 }
  0x6c   :  { %1407 = vmatmul.mubr.bf16.gmra.mrb[36].mxu1 %v2386_v42  ;;  %1317 = vmatprep.mubr.bf16.mxu0 %v2388_v43 }
  0x6d   :  { %1414 = vmatprep.mubr.bf16.mxu1 %v2390_v44  ;;  %2219 = vmatpush3.bf16.msra.mxu0 %v2394_v40 }
  0x6e   :  { %2256 = vmatpush3.bf16.msra.mxu1 %v2394_v40  ;;  %2220 = vmatprep.subr.bf16.mxu0 %v2401_v45 }
  0x6f   :  { %2249 = vmatprep.subr.bf16.mxu1 %v2401_v45 }
  0x71   :  { %2221 = vmatpush3.bf16.msra.mxu0 %v2401_v45 }
  0x72   :  { %2257 = vmatpush3.bf16.msra.mxu1 %v2401_v45  ;;  %2222 = vmatprep.subr.bf16.mxu0 %v2408_v46 }
  0x73   :  { %1318 = vmatmul.mubr.bf16.gmra.mrb[40].mxu0 %v2392_v47  ;;  %2250 = vmatprep.subr.bf16.mxu1 %v2408_v46 }
  0x74   :  { %1415 = vmatmul.mubr.bf16.gmra.mrb[40].mxu1 %v2393_v48  ;;  %1325 = vmatprep.mubr.bf16.mxu0 %v2395_v49 }
  0x75   :  { %1422 = vmatprep.mubr.bf16.mxu1 %v2397_v50  ;;  %2223 = vmatpush3.bf16.msra.mxu0 %v2408_v46 }
  0x76   :  { %2258 = vmatpush3.bf16.msra.mxu1 %v2408_v46  ;;  %2224 = vmatprep.subr.bf16.mxu0 %v2415_v51 }
  0x77   :  { %2251 = vmatprep.subr.bf16.mxu1 %v2415_v51 }
  0x79   :  { %2225 = vmatpush3.bf16.msra.mxu0 %v2415_v51 }
  0x7a   :  { %2259 = vmatpush3.bf16.msra.mxu1 %v2415_v51  ;;  %2226 = vmatprep.subr.bf16.mxu0 %v2422_v53 }
  0x7b   :  { %1326 = vmatmul.mubr.bf16.gmra.mrb[44].mxu0 %v2399_v52  ;;  %2252 = vmatprep.subr.bf16.mxu1 %v2422_v53 }
  0x7c   :  { %1423 = vmatmul.mubr.bf16.gmra.mrb[44].mxu1 %v2400_v54  ;;  %1333 = vmatprep.mubr.bf16.mxu0 %v2402_v55 }
  0x7d   :  { %1430 = vmatprep.mubr.bf16.mxu1 %v2404_v56  ;;  %2227 = vmatpush3.bf16.msra.mxu0 %v2422_v53 }
  0x7e   :  { %2260 = vmatpush3.bf16.msra.mxu1 %v2422_v53  ;;  %2228 = vmatprep.subr.bf16.mxu0 %v2429_v57 }
  0x7f   :  { %2253 = vmatprep.subr.bf16.mxu1 %v2429_v57 }
  0x81   :  { %2229 = vmatpush3.bf16.msra.mxu0 %v2429_v57 }
  0x82   :  { %2261 = vmatpush3.bf16.msra.mxu1 %v2429_v57 }
  0x83   :  { %1334 = vmatmul.mubr.bf16.gmra.mrb[48].mxu0 %v2406_v58 }
  0x84   :  { %1431 = vmatmul.mubr.bf16.gmra.mrb[48].mxu1 %v2407_v59  ;;  %1341 = vmatprep.mubr.bf16.mxu0 %v2409_v60 }
  0x85   :  { %1438 = vmatprep.mubr.bf16.mxu1 %v2411_v61 }
  0x8b   :  { %1342 = vmatmul.mubr.bf16.gmra.mrb[52].mxu0 %v2413_v62 }
  0x8c   :  { %1439 = vmatmul.mubr.bf16.gmra.mrb[52].mxu1 %v2414_v63  ;;  %1349 = vmatprep.mubr.bf16.mxu0 %v2416_v0 }
  0x8d   :  { %1446 = vmatprep.mubr.bf16.mxu1 %v2418_v1 }
  0x93   :  { %1350 = vmatmul.mubr.bf16.gmra.mrb[56].mxu0 %v2420_v2 }
  0x94   :  { %1447 = vmatmul.mubr.bf16.gmra.mrb[56].mxu1 %v2421_v3  ;;  %1357 = vmatprep.mubr.bf16.mxu0 %v2423_v4 }
  0x95   :  { %1454 = vmatprep.mubr.bf16.mxu1 %v2425_v5 }
  0x9b   :  { %1358 = vmatmul.mubr.bf16.gmra.mrb[60].mxu0 %v2427_v6 }
  0x9c   :  { %1455 = vmatmul.mubr.bf16.gmra.mrb[60].mxu1 %v2428_v7  ;;  %2230 = vmatprep.mubr.bf16.mxu0 %v2430_v8 }
  0x9d   :  { %2238 = vmatprep.mubr.bf16.mxu1 %v2431_v9 }
  0xa3   :  { %2231 = vmatmul.mubr.bf16.vlgmr.msra.gmra.mrb[64].mxu0 %v2432_v10 }
  0xa4   :  { %2239 = vmatmul.mubr.bf16.vlgmr.msra.gmra.mrb[64].mxu1 %v2433_v11  ;;  %2234 = vmatprep.mubr.bf16.mxu0 %v2434_v12 }
  0xa5   :  { %2242 = vmatprep.mubr.bf16.mxu1 %v2435_v13 }
  0xab   :  { %2235 = vmatmul.mubr.bf16.gmra.mrb[68].mxu0 %v2436_v14 }
  0xac   :  { %2243 = vmatmul.mubr.bf16.gmra.mrb[68].mxu1 %v2437_v15 }
  0xf6   :  { %v1958_v16 = vpop.f32.mrb[0].mxu0 }
  0xf7   :  { %v2022_v17 = vpop.f32.mrb[0].mxu1  ;;  %v1959_v18 = vpop.f32.mrb[1].mxu0 }
  0xf8   :  { %v1960_v19 = vadd.f32 %v1959_v18, %v1958_v16  ;;  %v2023_v20 = vpop.f32.mrb[1].mxu1  ;;  %v1961_v21 = vpop.f32.mrb[2].mxu0 }
  0xf9   :  { %v2024_v22 = vadd.f32 %v2023_v20, %v2022_v17  ;;  %v2025_v23 = vpop.f32.mrb[2].mxu1  ;;  %v1962_v24 = vpop.f32.mrb[3].mxu0 }
  0xfa   :  { %v1963_v25 = vadd.f32 %v1962_v24, %v1961_v21  ;;  %v2026_v26 = vpop.f32.mrb[3].mxu1 }
  0xfb   :  { %v2890_v27 = vadd.f32 %v2024_v22, %v1960_v19  ;;  %v2027_v28 = vadd.f32 %v2026_v26, %v2025_v23 }
  0xfd   :  { %v2892_v29 = vadd.f32 %v2027_v28, %v1963_v25 }
  0xfe   :  { %v1964_v30 = vpop.f32.mrb[4].mxu0 }
  0xff   :  { %v2028_v31 = vpop.f32.mrb[4].mxu1  ;;  %v1965_v32 = vpop.f32.mrb[5].mxu0 }
 0x100   :  { %v1966_v33 = vadd.f32 %v1965_v32, %v1964_v30  ;;  %v2029_v34 = vpop.f32.mrb[5].mxu1  ;;  %v1967_v35 = vpop.f32.mrb[6].mxu0 }
 0x101   :  { %v2030_v36 = vadd.f32 %v2029_v34, %v2028_v31  ;;  %v2031_v37 = vpop.f32.mrb[6].mxu1  ;;  %v1968_v38 = vpop.f32.mrb[7].mxu0 }
 0x102   :  { %v1969_v39 = vadd.f32 %v1968_v38, %v1967_v35  ;;  %v2032_v40 = vpop.f32.mrb[7].mxu1 }
 0x103   :  { %v2894_v41 = vadd.f32 %v2030_v36, %v1966_v33  ;;  %v2033_v42 = vadd.f32 %v2032_v40, %v2031_v37 }
 0x105   :  { %v2896_v43 = vadd.f32 %v2033_v42, %v1969_v39 }
 0x106   :  { %v1970_v44 = vpop.f32.mrb[8].mxu0 }
 0x107   :  { %v2034_v45 = vpop.f32.mrb[8].mxu1  ;;  %v1971_v46 = vpop.f32.mrb[9].mxu0 }
 0x108   :  { %v1972_v47 = vadd.f32 %v1971_v46, %v1970_v44  ;;  %v2035_v48 = vpop.f32.mrb[9].mxu1  ;;  %v1973_v49 = vpop.f32.mrb[10].mxu0 }
 0x109   :  { %v2036_v50 = vadd.f32 %v2035_v48, %v2034_v45  ;;  %v2037_v51 = vpop.f32.mrb[10].mxu1  ;;  %v1974_v52 = vpop.f32.mrb[11].mxu0 }
 0x10a   :  { %v1975_v53 = vadd.f32 %v1974_v52, %v1973_v49  ;;  %v2038_v54 = vpop.f32.mrb[11].mxu1 }
 0x10b   :  { %v2898_v55 = vadd.f32 %v2036_v50, %v1972_v47  ;;  %v2039_v56 = vadd.f32 %v2038_v54, %v2037_v51 }
 0x10d   :  { %v2900_v57 = vadd.f32 %v2039_v56, %v1975_v53 }
 0x10e   :  { %v1976_v58 = vpop.f32.mrb[12].mxu0 }
 0x10f   :  { %v2040_v59 = vpop.f32.mrb[12].mxu1  ;;  %v1977_v60 = vpop.f32.mrb[13].mxu0 }
 0x110   :  { %v1978_v61 = vadd.f32 %v1977_v60, %v1976_v58  ;;  %v2041_v62 = vpop.f32.mrb[13].mxu1  ;;  %v1979_v63 = vpop.f32.mrb[14].mxu0 }
 0x111   :  { %v2042_v0 = vadd.f32 %v2041_v62, %v2040_v59  ;;  %v2043_v1 = vpop.f32.mrb[14].mxu1  ;;  %v1980_v2 = vpop.f32.mrb[15].mxu0 }
 0x112   :  { %v1981_v3 = vadd.f32 %v1980_v2, %v1979_v63  ;;  %v2044_v4 = vpop.f32.mrb[15].mxu1 }
 0x113   :  { %v2902_v5 = vadd.f32 %v2042_v0, %v1978_v61  ;;  %v2045_v6 = vadd.f32 %v2044_v4, %v2043_v1 }
 0x115   :  { %v2904_v7 = vadd.f32 %v2045_v6, %v1981_v3 }
 0x116   :  { %v1982_v8 = vpop.f32.mrb[16].mxu0 }
 0x117   :  { %v2046_v9 = vpop.f32.mrb[16].mxu1  ;;  %v1983_v10 = vpop.f32.mrb[17].mxu0 }
 0x118   :  { %v1984_v11 = vadd.f32 %v1983_v10, %v1982_v8  ;;  %v2047_v12 = vpop.f32.mrb[17].mxu1  ;;  %v1985_v13 = vpop.f32.mrb[18].mxu0 }
 0x119   :  { %v2048_v14 = vadd.f32 %v2047_v12, %v2046_v9  ;;  %v2049_v15 = vpop.f32.mrb[18].mxu1  ;;  %v1986_v16 = vpop.f32.mrb[19].mxu0 }
 0x11a   :  { %v1987_v17 = vadd.f32 %v1986_v16, %v1985_v13  ;;  %v2050_v18 = vpop.f32.mrb[19].mxu1 }
 0x11b   :  { %v2906_v19 = vadd.f32 %v2048_v14, %v1984_v11  ;;  %v2051_v20 = vadd.f32 %v2050_v18, %v2049_v15 }
 0x11d   :  { %v2908_v21 = vadd.f32 %v2051_v20, %v1987_v17 }
 0x11e   :  { %v1988_v22 = vpop.f32.mrb[20].mxu0 }
 0x11f   :  { %v2052_v23 = vpop.f32.mrb[20].mxu1  ;;  %v1989_v24 = vpop.f32.mrb[21].mxu0 }
 0x120   :  { %v1990_v25 = vadd.f32 %v1989_v24, %v1988_v22  ;;  %v2053_v26 = vpop.f32.mrb[21].mxu1  ;;  %v1991_v28 = vpop.f32.mrb[22].mxu0 }
 0x121   :  { %v2054_v30 = vadd.f32 %v2053_v26, %v2052_v23  ;;  %v2055_v31 = vpop.f32.mrb[22].mxu1  ;;  %v1992_v32 = vpop.f32.mrb[23].mxu0 }
 0x122   :  { %v1993_v33 = vadd.f32 %v1992_v32, %v1991_v28  ;;  %v2056_v34 = vpop.f32.mrb[23].mxu1 }
 0x123   :  { %v2910_v35 = vadd.f32 %v2054_v30, %v1990_v25  ;;  %v2057_v36 = vadd.f32 %v2056_v34, %v2055_v31 }
 0x125   :  { %v2912_v37 = vadd.f32 %v2057_v36, %v1993_v33 }
 0x126   :  { %v1994_v38 = vpop.f32.mrb[24].mxu0 }
 0x127   :  { %v2058_v39 = vpop.f32.mrb[24].mxu1  ;;  %v1995_v40 = vpop.f32.mrb[25].mxu0 }
 0x128   :  { %v1996_v42 = vadd.f32 %v1995_v40, %v1994_v38  ;;  %v2059_v44 = vpop.f32.mrb[25].mxu1  ;;  %v1997_v45 = vpop.f32.mrb[26].mxu0 }
 0x129   :  { %v2060_v46 = vadd.f32 %v2059_v44, %v2058_v39  ;;  %v2061_v47 = vpop.f32.mrb[26].mxu1  ;;  %v1998_v48 = vpop.f32.mrb[27].mxu0 }
 0x12a   :  { %v1999_v49 = vadd.f32 %v1998_v48, %v1997_v45  ;;  %v2062_v50 = vpop.f32.mrb[27].mxu1 }
 0x12b   :  { %v2914_v51 = vadd.f32 %v2060_v46, %v1996_v42  ;;  %v2063_v52 = vadd.f32 %v2062_v50, %v2061_v47 }
 0x12d   :  { %v2916_v53 = vadd.f32 %v2063_v52, %v1999_v49 }
 0x12e   :  { %v2000_v54 = vpop.f32.mrb[28].mxu0 }
 0x12f   :  { %v2064_v56 = vpop.f32.mrb[28].mxu1  ;;  %v2001_v58 = vpop.f32.mrb[29].mxu0 }
 0x130   :  { %v2002_v59 = vadd.f32 %v2001_v58, %v2000_v54  ;;  %v2065_v60 = vpop.f32.mrb[29].mxu1  ;;  %v2003_v61 = vpop.f32.mrb[30].mxu0 }
 0x131   :  { %v2066_v62 = vadd.f32 %v2065_v60, %v2064_v56  ;;  %v2067_v63 = vpop.f32.mrb[30].mxu1  ;;  %v2004_v0 = vpop.f32.mrb[31].mxu0 }
 0x132   :  { %v2005_v1 = vadd.f32 %v2004_v0, %v2003_v61  ;;  %v2068_v2 = vpop.f32.mrb[31].mxu1 }
 0x133   :  { %v2918_v3 = vadd.f32 %v2066_v62, %v2002_v59  ;;  %v2069_v4 = vadd.f32 %v2068_v2, %v2067_v63 }
 0x135   :  { %v2920_v6 = vadd.f32 %v2069_v4, %v2005_v1 }
 0x136   :  { %v2086_v8 = vpop.f32.mrb[32].mxu0 }
 0x137   :  { %v2150_v9 = vpop.f32.mrb[32].mxu1  ;;  %v2087_v10 = vpop.f32.mrb[33].mxu0 }
 0x138   :  { %v2088_v11 = vadd.f32 %v2087_v10, %v2086_v8  ;;  %v2151_v12 = vpop.f32.mrb[33].mxu1  ;;  %v2089_v13 = vpop.f32.mrb[34].mxu0 }
 0x139   :  { %v2152_v14 = vadd.f32 %v2151_v12, %v2150_v9  ;;  %v2153_v15 = vpop.f32.mrb[34].mxu1  ;;  %v2090_v16 = vpop.f32.mrb[35].mxu0 }
 0x13a   :  { %v1304_v17 = vadd.f32 %v2088_v11, %v2890_v27  ;;  %v2091_v18 = vadd.f32 %v2090_v16, %v2089_v13  ;;  %v2154_v20 = vpop.f32.mrb[35].mxu1 }
 0x13b   :  { %v2155_v22 = vadd.f32 %v2154_v20, %v2153_v15 }
 0x13c   :  { %v1307_v23 = vadd.f32 %v2091_v18, %v2892_v29  ;;  %v2924_v24 = vadd.f32 %v2152_v14, %v1304_v17 }
 0x13e   :  { %v2092_v25 = vpop.f32.mrb[36].mxu0  ;;  %v2926_v26 = vadd.f32 %v2155_v22, %v1307_v23 }
 0x13f   :  { %v2156_v28 = vpop.f32.mrb[36].mxu1  ;;  %v2093_v30 = vpop.f32.mrb[37].mxu0 }
 0x140   :  { %v2094_v31 = vadd.f32 %v2093_v30, %v2092_v25  ;;  %v2157_v32 = vpop.f32.mrb[37].mxu1  ;;  %v2095_v33 = vpop.f32.mrb[38].mxu0 }
 0x141   :  { %v2158_v34 = vadd.f32 %v2157_v32, %v2156_v28  ;;  %v2159_v36 = vpop.f32.mrb[38].mxu1  ;;  %v2096_v38 = vpop.f32.mrb[39].mxu0 }
 0x142   :  { %v1312_v27 = vadd.f32 %v2094_v31, %v2894_v41  ;;  %v2097_v39 = vadd.f32 %v2096_v38, %v2095_v33  ;;  %v2160_v40 = vpop.f32.mrb[39].mxu1 }
 0x143   :  { %v2161_v42 = vadd.f32 %v2160_v40, %v2159_v36 }
 0x144   :  { %v1315_v29 = vadd.f32 %v2097_v39, %v2896_v43  ;;  %v2930_v44 = vadd.f32 %v2158_v34, %v1312_v27 }
 0x146   :  { %v2098_v45 = vpop.f32.mrb[40].mxu0  ;;  %v2932_v46 = vadd.f32 %v2161_v42, %v1315_v29 }
 0x147   :  { %v2162_v47 = vpop.f32.mrb[40].mxu1  ;;  %v2099_v48 = vpop.f32.mrb[41].mxu0 }
 0x148   :  { %v2100_v49 = vadd.f32 %v2099_v48, %v2098_v45  ;;  %v2163_v50 = vpop.f32.mrb[41].mxu1  ;;  %v2101_v52 = vpop.f32.mrb[42].mxu0 }
 0x149   :  { %v2164_v54 = vadd.f32 %v2163_v50, %v2162_v47  ;;  %v2165_v56 = vpop.f32.mrb[42].mxu1  ;;  %v2102_v58 = vpop.f32.mrb[43].mxu0 }
 0x14a   :  { %v1320_v41 = vadd.f32 %v2100_v49, %v2898_v55  ;;  %v2103_v59 = vadd.f32 %v2102_v58, %v2101_v52  ;;  %v2166_v60 = vpop.f32.mrb[43].mxu1 }
 0x14b   :  { %v2167_v61 = vadd.f32 %v2166_v60, %v2165_v56 }
 0x14c   :  { %v1323_v43 = vadd.f32 %v2103_v59, %v2900_v57  ;;  %v2936_v62 = vadd.f32 %v2164_v54, %v1320_v41 }
 0x14e   :  { %v2104_v63 = vpop.f32.mrb[44].mxu0  ;;  %v2938_v0 = vadd.f32 %v2167_v61, %v1323_v43 }
 0x14f   :  { %v2168_v1 = vpop.f32.mrb[44].mxu1  ;;  %v2105_v2 = vpop.f32.mrb[45].mxu0 }
 0x150   :  { %v2106_v4 = vadd.f32 %v2105_v2, %v2104_v63  ;;  %v2169_v8 = vpop.f32.mrb[45].mxu1  ;;  %v2107_v9 = vpop.f32.mrb[46].mxu0 }
 0x151   :  { %v2170_v10 = vadd.f32 %v2169_v8, %v2168_v1  ;;  %v2171_v11 = vpop.f32.mrb[46].mxu1  ;;  %v2108_v12 = vpop.f32.mrb[47].mxu0 }
 0x152   :  { %v1328_v55 = vadd.f32 %v2106_v4, %v2902_v5  ;;  %v2109_v13 = vadd.f32 %v2108_v12, %v2107_v9  ;;  %v2172_v14 = vpop.f32.mrb[47].mxu1 }
 0x153   :  { %v2173_v15 = vadd.f32 %v2172_v14, %v2171_v11 }
 0x154   :  { %v1331_v57 = vadd.f32 %v2109_v13, %v2904_v7  ;;  %v2942_v16 = vadd.f32 %v2170_v10, %v1328_v55 }
 0x156   :  { %v2110_v17 = vpop.f32.mrb[48].mxu0  ;;  %v2944_v18 = vadd.f32 %v2173_v15, %v1331_v57 }
 0x157   :  { %v2174_v20 = vpop.f32.mrb[48].mxu1  ;;  %v2111_v22 = vpop.f32.mrb[49].mxu0 }
 0x158   :  { %v2112_v23 = vadd.f32 %v2111_v22, %v2110_v17  ;;  %v2175_v25 = vpop.f32.mrb[49].mxu1  ;;  %v2113_v28 = vpop.f32.mrb[50].mxu0 }
 0x159   :  { %v2176_v30 = vadd.f32 %v2175_v25, %v2174_v20  ;;  %v2177_v31 = vpop.f32.mrb[50].mxu1  ;;  %v2114_v32 = vpop.f32.mrb[51].mxu0 }
 0x15a   :  { %v1336_v5 = vadd.f32 %v2112_v23, %v2906_v19  ;;  %v2115_v33 = vadd.f32 %v2114_v32, %v2113_v28  ;;  %v2178_v34 = vpop.f32.mrb[51].mxu1 }
 0x15b   :  { %v2179_v36 = vadd.f32 %v2178_v34, %v2177_v31 }
 0x15c   :  { %v1339_v7 = vadd.f32 %v2115_v33, %v2908_v21  ;;  %v1433_v38 = vadd.f32 %v2176_v30, %v1336_v5 }
 0x15e   :  { %v2116_v27 = vpop.f32.mrb[52].mxu0  ;;  %v2948_v39 = vadd.f32 %v2179_v36, %v1339_v7 }
 0x15f   :  { %v2180_v40 = vpop.f32.mrb[52].mxu1  ;;  %v2117_v42 = vpop.f32.mrb[53].mxu0 }
 0x160   :  { %v2118_v29 = vadd.f32 %v2117_v42, %v2116_v27  ;;  %v2181_v45 = vpop.f32.mrb[53].mxu1  ;;  %v2119_v47 = vpop.f32.mrb[54].mxu0  ;;  %v1862_v27 = vld [vmem:[%s2997_s2] ss:$0 sm:$0xff] }
 0x161   :  { %v2182_v48 = vadd.f32 %v2181_v45, %v2180_v40  ;;  %v2183_v49 = vpop.f32.mrb[54].mxu1  ;;  %v2120_v50 = vpop.f32.mrb[55].mxu0 }
 0x162   :  { %v1344_v52 = vadd.f32 %v2118_v29, %v2910_v35  ;;  %v2121_v19 = vadd.f32 %v2120_v50, %v2119_v47  ;;  %v2184_v54 = vpop.f32.mrb[55].mxu1 }
 0x163   :  { %v2185_v56 = vadd.f32 %v2184_v54, %v2183_v49 }
 0x164   :  { %v1347_v58 = vadd.f32 %v2121_v19, %v2912_v37  ;;  %v1441_v21 = vadd.f32 %v2182_v48, %v1344_v52 }
 0x166   :  { %v2122_v41 = vpop.f32.mrb[56].mxu0  ;;  %v1444_v59 = vadd.f32 %v2185_v56, %v1347_v58 }
 0x167   :  { %v2186_v60 = vpop.f32.mrb[56].mxu1  ;;  %v2123_v61 = vpop.f32.mrb[57].mxu0 }
 0x168   :  { %v2124_v43 = vadd.f32 %v2123_v61, %v2122_v41  ;;  %v2187_v63 = vpop.f32.mrb[57].mxu1  ;;  %v2125_v1 = vpop.f32.mrb[58].mxu0 }
 0x169   :  { %v2188_v2 = vadd.f32 %v2187_v63, %v2186_v60  ;;  %v2189_v4 = vpop.f32.mrb[58].mxu1  ;;  %v2126_v8 = vpop.f32.mrb[59].mxu0 }
 0x16a   :  { %v1352_v9 = vadd.f32 %v2124_v43, %v2914_v51  ;;  %v2127_v10 = vadd.f32 %v2126_v8, %v2125_v1  ;;  %v2190_v35 = vpop.f32.mrb[59].mxu1 }
 0x16b   :  { %v2191_v11 = vadd.f32 %v2190_v35, %v2189_v4 }
 0x16c   :  { %v1355_v12 = vadd.f32 %v2127_v10, %v2916_v53  ;;  %v1449_v55 = vadd.f32 %v2188_v2, %v1352_v9 }
 0x16e   :  { %v2128_v37 = vpop.f32.mrb[60].mxu0  ;;  %v2954_v13 = vadd.f32 %v2191_v11, %v1355_v12 }
 0x16f   :  { %v2192_v14 = vpop.f32.mrb[60].mxu1  ;;  %v2129_v15 = vpop.f32.mrb[61].mxu0 }
 0x170   :  { %v2130_v57 = vadd.f32 %v2129_v15, %v2128_v37  ;;  %v2193_v17 = vpop.f32.mrb[61].mxu1  ;;  %v2131_v20 = vpop.f32.mrb[62].mxu0 }
 0x171   :  { %v2194_v22 = vadd.f32 %v2193_v17, %v2192_v14  ;;  %v2195_v23 = vpop.f32.mrb[62].mxu1  ;;  %v2132_v25 = vpop.f32.mrb[63].mxu0 }
 0x172   :  { %v1360_v28 = vadd.f32 %v2130_v57, %v2918_v3  ;;  %v2133_v51 = vadd.f32 %v2132_v25, %v2131_v20  ;;  %v2196_v30 = vpop.f32.mrb[63].mxu1 }
 0x173   :  { %v2197_v31 = vadd.f32 %v2196_v30, %v2195_v23 }
 0x174   :  { %v1363_v32 = vadd.f32 %v2133_v51, %v2920_v6  ;;  %v1457_v53 = vadd.f32 %v2194_v22, %v1360_v28 }
 0x176   :  { %v2232_v5 = vpop.f32.mrb[64].mxu0  ;;  %v1460_v33 = vadd.f32 %v2197_v31, %v1363_v32 }
 0x177   :  { %v1506_v34 = vadd.f32 %v2232_v5, %v2930_v44  ;;  %v2240_v36 = vpop.f32.mrb[64].mxu1  ;;  %v1497_v7 = vpop.f32.mrb[65].mxu0 }
 0x178   :  { %v1538_v40 = vadd.f32 %v2240_v36, %v1441_v21  ;;  %v1498_v42 = vadd.f32 %v1497_v7, %v2924_v24  ;;  %v1529_v3 = vpop.f32.mrb[65].mxu1  ;;  %v2233_v29 = vpop.f32.mrb[66].mxu0 }
 0x179   :  { %v1530_v45 = vadd.f32 %v1529_v3, %v1433_v38  ;;  %v1509_v47 = vadd.f32 %v2233_v29, %v2932_v46  ;;  %v2241_v6 = vpop.f32.mrb[66].mxu1  ;;  %v1500_v48 = vpop.f32.mrb[67].mxu0  ;;  %v1620_v52 = vadd.f32 %v1862_v27, %v1506_v34 }
 0x17a   :  { %v1541_v49 = vadd.f32 %v2241_v6, %v1444_v59  ;;  %v1501_v50 = vadd.f32 %v1500_v48, %v2926_v26  ;;  %v1532_v44 = vpop.f32.mrb[67].mxu1  ;;  %v1628_v56 = vadd.f32 %v1862_v27, %v1538_v40  ;;  %v1618_v58 = vadd.f32 %v1862_v27, %v1498_v42 }
 0x17b   :  { %v1621_v19 = vadd.f32 %v1862_v27, %v1509_v47  ;;  %v1533_v54 = vadd.f32 %v1532_v44, %v2948_v39  ;;  %v1626_v24 = vadd.f32 %v1862_v27, %v1530_v45 }
 0x17c   :  { %v1629_v21 = vadd.f32 %v1862_v27, %v1541_v49  ;;  %v1619_v41 = vadd.f32 %v1862_v27, %v1501_v50 }
 0x17d   :  { %v1903_v60 = vpack.c.bf16 %v1621_v19, %v1620_v52  ;;  %v1627_v61 = vadd.f32 %v1862_v27, %v1533_v54 }
 0x17e   :  { %v1923_v38 = vpack.c.bf16 %v1629_v21, %v1628_v56  ;;  %v1898_v43 = vpack.c.bf16 %v1619_v41, %v1618_v58  ;;  %v2236_v46 = vpop.f32.mrb[68].mxu0 }
 0x17f   :  { %1935 = vst [vmem:[%s2998_s3 + $0x8] sm:$0xff] %v1903_v60   ;;  %v1918_v26 = vpack.c.bf16 %v1627_v61, %v1626_v24  ;;  %v1522_v59 = vadd.f32 %v2236_v46, %v2942_v16  ;;  %v2244_v63 = vpop.f32.mrb[68].mxu1  ;;  %v1513_v1 = vpop.f32.mrb[69].mxu0 }
 0x180   :  { %1939 = vst [vmem:[%s2998_s3 + $0x28] sm:$0xff] %v1923_v38   ;;  %1899 = vst [vmem:[%s2998_s3] sm:$0xff] %v1898_v43   ;;  %v1554_v39 = vadd.f32 %v2244_v63, %v1457_v53  ;;  %v1514_v2 = vadd.f32 %v1513_v1, %v2936_v62  ;;  %v1545_v4 = vpop.f32.mrb[69].mxu1  ;;  %v2237_v8 = vpop.f32.mrb[70].mxu0 }
 0x181   :  { %1938 = vst [vmem:[%s2998_s3 + $0x20] sm:$0xff] %v1918_v26   ;;  %v1546_v16 = vadd.f32 %v1545_v4, %v1449_v55  ;;  %v1525_v9 = vadd.f32 %v2237_v8, %v2944_v18  ;;  %v2245_v10 = vpop.f32.mrb[70].mxu1  ;;  %v1516_v35 = vpop.f32.mrb[71].mxu0  ;;  %v1624_v14 = vadd.f32 %v1862_v27, %v1522_v59 }
 0x182   :  { %v1557_v11 = vadd.f32 %v2245_v10, %v1460_v33  ;;  %v1517_v12 = vadd.f32 %v1516_v35, %v2938_v0  ;;  %v1548_v37 = vpop.f32.mrb[71].mxu1  ;;  %v1632_v62 = vadd.f32 %v1862_v27, %v1554_v39  ;;  %v1622_v17 = vadd.f32 %v1862_v27, %v1514_v2 }
 0x183   :  { %v1625_v15 = vadd.f32 %v1862_v27, %v1525_v9  ;;  %v1549_v57 = vadd.f32 %v1548_v37, %v2954_v13  ;;  %v1630_v23 = vadd.f32 %v1862_v27, %v1546_v16 }
 0x184   :  { %v1633_v20 = vadd.f32 %v1862_v27, %v1557_v11  ;;  %v1623_v22 = vadd.f32 %v1862_v27, %v1517_v12 }
 0x185   :  { %v1913_v25 = vpack.c.bf16 %v1625_v15, %v1624_v14  ;;  %v1631_v28 = vadd.f32 %v1862_v27, %v1549_v57 }
 0x186   :  { %v1933_v55 = vpack.c.bf16 %v1633_v20, %v1632_v62  ;;  %v1908_v51 = vpack.c.bf16 %v1623_v22, %v1622_v17 }
 0x187   :  { %1937 = vst [vmem:[%s2998_s3 + $0x18] sm:$0xff] %v1913_v25   ;;  %v1928_v18 = vpack.c.bf16 %v1631_v28, %v1630_v23 }
 0x188   :  { %1941 = vst [vmem:[%s2998_s3 + $0x38] sm:$0xff] %v1933_v55   ;;  %1936 = vst [vmem:[%s2998_s3 + $0x10] sm:$0xff] %v1908_v51  }
 0x189   :  { %1940 = vst [vmem:[%s2998_s3 + $0x30] sm:$0xff] %v1928_v18  }

// kernel: fpm_forward.17
= control target key start
LH: loop header
LB: loop body
LE: loop exit
PB: predicated region body
PF: predicated region fallthrough
CT: control target
= control target key end

     0   :  { %s1946_s15 = smov 0   ;;  %s1948_s16 = smov 0   ;;  %s2106_s0 = inlined_call_operand.vmem [shape: bf16[4,128,512], index: 0, kind: input, shape index: {}]   ;;  %s2107_s1 = inlined_call_operand.vmem [shape: bf16[4,512,128], index: 1, kind: input, shape index: {}]   ;;  %s2108_s2 = inlined_call_operand.vmem [shape: f32[1,128], index: 2, kind: input, shape index: {}]   ;;  %s2109_s3 = inlined_call_operand.vmem [shape: bf16[4,128,128], index: 3, kind: input, shape index: {}]   ;;  %s2110_s4 = inlined_call_operand.vmem [shape: bf16[4,128,128], index: 4, kind: output, shape index: {}]  }
   0x1   :  { %s1950_s17 = smov 0  }
   0x2 LB: > { %s40_s18 = sadd.s32 1, %s1915_s16  ;;  %p1467_p0 = scmp.ge.s32.totalorder %s1919_s17, 1  ;;  %s1919_s17 = sphi %s1950_s17, %s14_s17   ;;  %s1915_s16 = sphi %s1948_s16, %s2112_s16   ;;  %s1911_s15 = sphi %s1946_s15, %s2111_s15  }
   0x3   : > { %p42_p1 = scmp.ge.s32.totalorder %s40_s18, 4  ;;  %p259_p2 = scmp.lt.s32.totalorder %s1919_s17, 5 }
   0x5   : > { %s2114_s18 = smov (%p42_p1, %s40_s18), 0  ;;  %p260_p3 = pnand %p1467_p0, %p259_p2 }
   0x6   : > { %p330_p4 = scmp.lt.s32.totalorder (!%p260_p3), %s1911_s15, 3 }
   0x7   : > { %263 = sbr.rel (%p260_p3) target bundleno = 338 (0x152), region = 36 }
   0xe   : > { %s2116_s15 = smov (!%p330_p4, %s1911_s15), 3 }
   0xf   : > { %s1559_s19 = sshll.u32 %s2116_s15, 8  ;;  %s1561_s26 = sshll.u32 %s2116_s15, 6 }
  0x10   : > { %s1972_s22 = scalar_lea.vmem %s2107_s1, %s1559_s19  ;;  %s2009_s25 = scalar_lea.vmem %s2106_s0, %s1559_s19 }
  0x11   : > { %v1817_v0 = vld [vmem:[%s1972_s22 + $0x40] sm:$0xff]   ;;  %v1821_v4 = vld [vmem:[%s1972_s22 + $0x48] sm:$0xff]   ;;  %v1825_v8 = vld [vmem:[%s1972_s22 + $0x50] sm:$0xff]   ;;  %s2051_s29 = scalar_lea.vmem %s2109_s3, %s1561_s26  ;;  %s2068_s8 = scalar_lea.vmem %s2110_s4, %s1561_s26 }
  0x12   : > { %v1818_v1 = vld [vmem:[%s1972_s22 + $0xc0] sm:$0xff]   ;;  %1665 = vmatprep.subr.bf16.mxu0 %v1817_v0  ;;  %v1822_v5 = vld [vmem:[%s1972_s22 + $0xc8] sm:$0xff]   ;;  %v1826_v9 = vld [vmem:[%s1972_s22 + $0xd0] sm:$0xff]  }
  0x13   : > { %v1819_v2 = vld [vmem:[%s1972_s22] sm:$0xff]   ;;  %1729 = vmatprep.subr.bf16.mxu1 %v1818_v1  ;;  %v1823_v6 = vld [vmem:[%s1972_s22 + $0x8] sm:$0xff]   ;;  %v1827_v10 = vld [vmem:[%s1972_s22 + $0x10] sm:$0xff]  }
  0x14   : > { %v1820_v3 = vld [vmem:[%s1972_s22 + $0x80] sm:$0xff]   ;;  %1666 = vmatpush3.bf16.msra.mxu0 %v1819_v2  ;;  %v1824_v7 = vld [vmem:[%s1972_s22 + $0x88] sm:$0xff]   ;;  %v1828_v11 = vld [vmem:[%s1972_s22 + $0x90] sm:$0xff]  }
  0x15   : > { %1730 = vmatpush3.bf16.msra.mxu1 %v1820_v3  ;;  %1667 = vmatprep.subr.bf16.mxu0 %v1821_v4  ;;  %v1829_v12 = vld [vmem:[%s1972_s22 + $0x58] sm:$0xff]   ;;  %v1833_v16 = vld [vmem:[%s1972_s22 + $0x60] sm:$0xff]   ;;  %v1837_v20 = vld [vmem:[%s1972_s22 + $0x68] sm:$0xff]  }
  0x16   : > { %1731 = vmatprep.subr.bf16.mxu1 %v1822_v5  ;;  %v1830_v13 = vld [vmem:[%s1972_s22 + $0xd8] sm:$0xff]   ;;  %v1834_v17 = vld [vmem:[%s1972_s22 + $0xe0] sm:$0xff]   ;;  %v1838_v21 = vld [vmem:[%s1972_s22 + $0xe8] sm:$0xff]  }
  0x17   : > { %v1831_v14 = vld [vmem:[%s1972_s22 + $0x18] sm:$0xff]   ;;  %v1835_v18 = vld [vmem:[%s1972_s22 + $0x20] sm:$0xff]   ;;  %v1839_v22 = vld [vmem:[%s1972_s22 + $0x28] sm:$0xff]  }
  0x18   : > { %1668 = vmatpush3.bf16.msra.mxu0 %v1823_v6  ;;  %v1832_v15 = vld [vmem:[%s1972_s22 + $0x98] sm:$0xff]   ;;  %v1836_v19 = vld [vmem:[%s1972_s22 + $0xa0] sm:$0xff]   ;;  %v1840_v23 = vld [vmem:[%s1972_s22 + $0xa8] sm:$0xff]  }
  0x19   : > { %1732 = vmatpush3.bf16.msra.mxu1 %v1824_v7  ;;  %1669 = vmatprep.subr.bf16.mxu0 %v1825_v8  ;;  %v1841_v24 = vld [vmem:[%s1972_s22 + $0x70] sm:$0xff]   ;;  %v1845_v28 = vld [vmem:[%s1972_s22 + $0x78] sm:$0xff]  }
  0x1a   : > { %1733 = vmatprep.subr.bf16.mxu1 %v1826_v9  ;;  %v1842_v25 = vld [vmem:[%s1972_s22 + $0xf0] sm:$0xff]   ;;  %v1846_v29 = vld [vmem:[%s1972_s22 + $0xf8] sm:$0xff]   ;;  %v2056_v9 = vld [vmem:[%s2108_s2] ss:$0 sm:$0xff] }
  0x1b   : > { %v1843_v26 = vld [vmem:[%s1972_s22 + $0x30] sm:$0xff]   ;;  %v1847_v30 = vld [vmem:[%s1972_s22 + $0x38] sm:$0xff]  }
  0x1c   : > { %1670 = vmatpush3.bf16.msra.mxu0 %v1827_v10  ;;  %v1844_v27 = vld [vmem:[%s1972_s22 + $0xb0] sm:$0xff]   ;;  %v1848_v31 = vld [vmem:[%s1972_s22 + $0xb8] sm:$0xff]   ;;  %v1580_v10 = vld [vmem:[%s2051_s29] sm:$0xff]  }
  0x1d   : > { %1734 = vmatpush3.bf16.msra.mxu1 %v1828_v11  ;;  %1671 = vmatprep.subr.bf16.mxu0 %v1829_v12  ;;  %v1849_v32 = vld [vmem:[%s2009_s25] ss:$16 sps:$4 sm:$0xff]   ;;  %v1851_v33 = vld [vmem:[%s2009_s25 + $0x4] ss:$16 sps:$4 sm:$0xff]   ;;  %v1852_v34 = vld [vmem:[%s2009_s25 + $0x8] ss:$16 sps:$4 sm:$0xff]  }
  0x1e   : > { %1735 = vmatprep.subr.bf16.mxu1 %v1830_v13  ;;  %v1854_v35 = vld [vmem:[%s2009_s25 + $0xc] ss:$16 sps:$4 sm:$0xff]   ;;  %903 = vmatprep.mubr.bf16.mxu0 %v1851_v33  ;;  %v1855_v36 = vld [vmem:[%s2009_s25 + $0x24] ss:$16 sps:$4 sm:$0xff]   ;;  %v1859_v38 = vld [vmem:[%s2009_s25 + $0x20] ss:$16 sps:$4 sm:$0xff]  }
  0x1f   : > { %1000 = vmatprep.mubr.bf16.mxu1 %v1854_v35  ;;  %v1857_v37 = vld [vmem:[%s2009_s25 + $0x2c] ss:$16 sps:$4 sm:$0xff]   ;;  %v1860_v39 = vld [vmem:[%s2009_s25 + $0x28] ss:$16 sps:$4 sm:$0xff]   ;;  %v1861_v40 = vld [vmem:[%s2009_s25 + $0x44] ss:$16 sps:$4 sm:$0xff]  }
  0x20   : > { %1672 = vmatpush3.bf16.msra.mxu0 %v1831_v14  ;;  %v1863_v41 = vld [vmem:[%s2009_s25 + $0x4c] ss:$16 sps:$4 sm:$0xff]   ;;  %v1865_v42 = vld [vmem:[%s2009_s25 + $0x40] ss:$16 sps:$4 sm:$0xff]   ;;  %v1866_v43 = vld [vmem:[%s2009_s25 + $0x48] ss:$16 sps:$4 sm:$0xff]  }
  0x21   : > { %1736 = vmatpush3.bf16.msra.mxu1 %v1832_v15  ;;  %1673 = vmatprep.subr.bf16.mxu0 %v1833_v16  ;;  %v1867_v44 = vld [vmem:[%s2009_s25 + $0x64] ss:$16 sps:$4 sm:$0xff]   ;;  %v1869_v45 = vld [vmem:[%s2009_s25 + $0x6c] ss:$16 sps:$4 sm:$0xff]   ;;  %v1871_v46 = vld [vmem:[%s2009_s25 + $0x60] ss:$16 sps:$4 sm:$0xff]   ;;  %v1581_v16 = vunpack.c.l.bf16 %v1580_v10 }
  0x22   : > { %1737 = vmatprep.subr.bf16.mxu1 %v1834_v17  ;;  %v1872_v47 = vld [vmem:[%s2009_s25 + $0x68] ss:$16 sps:$4 sm:$0xff]   ;;  %v1873_v48 = vld [vmem:[%s2009_s25 + $0x84] ss:$16 sps:$4 sm:$0xff]   ;;  %v1875_v49 = vld [vmem:[%s2009_s25 + $0x8c] ss:$16 sps:$4 sm:$0xff]  }
  0x23   : > { %v1877_v50 = vld [vmem:[%s2009_s25 + $0x80] ss:$16 sps:$4 sm:$0xff]   ;;  %v1878_v51 = vld [vmem:[%s2009_s25 + $0x88] ss:$16 sps:$4 sm:$0xff]   ;;  %v1879_v52 = vld [vmem:[%s2009_s25 + $0xa4] ss:$16 sps:$4 sm:$0xff]  }
  0x24   : > { %1674 = vmatpush3.bf16.msra.mxu0 %v1835_v18  ;;  %v1881_v53 = vld [vmem:[%s2009_s25 + $0xac] ss:$16 sps:$4 sm:$0xff]   ;;  %v1883_v54 = vld [vmem:[%s2009_s25 + $0xa0] ss:$16 sps:$4 sm:$0xff]   ;;  %v1884_v55 = vld [vmem:[%s2009_s25 + $0xa8] ss:$16 sps:$4 sm:$0xff]  }
  0x25   : > { %1738 = vmatpush3.bf16.msra.mxu1 %v1836_v19  ;;  %1675 = vmatprep.subr.bf16.mxu0 %v1837_v20  ;;  %v1885_v56 = vld [vmem:[%s2009_s25 + $0xc4] ss:$16 sps:$4 sm:$0xff]   ;;  %v1887_v57 = vld [vmem:[%s2009_s25 + $0xcc] ss:$16 sps:$4 sm:$0xff]   ;;  %v1889_v58 = vld [vmem:[%s2009_s25 + $0xc0] ss:$16 sps:$4 sm:$0xff]  }
  0x26   : > { %1739 = vmatprep.subr.bf16.mxu1 %v1838_v21  ;;  %v1890_v59 = vld [vmem:[%s2009_s25 + $0xc8] ss:$16 sps:$4 sm:$0xff]   ;;  %v1891_v60 = vld [vmem:[%s2009_s25 + $0xe4] ss:$16 sps:$4 sm:$0xff]   ;;  %v1893_v61 = vld [vmem:[%s2009_s25 + $0xec] ss:$16 sps:$4 sm:$0xff]   ;;  %v1582_v21 = vunpack.c.h.bf16 %v1580_v10 }
  0x27   : > { %v1895_v62 = vld [vmem:[%s2009_s25 + $0xe0] ss:$16 sps:$4 sm:$0xff]   ;;  %v1896_v63 = vld [vmem:[%s2009_s25 + $0xe8] ss:$16 sps:$4 sm:$0xff]  }
  0x28   : > { %1676 = vmatpush3.bf16.msra.mxu0 %v1839_v22 }
  0x29   : > { %1740 = vmatpush3.bf16.msra.mxu1 %v1840_v23  ;;  %1677 = vmatprep.subr.bf16.mxu0 %v1841_v24 }
  0x2a   : > { %1741 = vmatprep.subr.bf16.mxu1 %v1842_v25 }
  0x2c   : > { %1678 = vmatpush3.bf16.msra.mxu0 %v1843_v26 }
  0x2d   : > { %1742 = vmatpush3.bf16.msra.mxu1 %v1844_v27  ;;  %1679 = vmatprep.subr.bf16.mxu0 %v1845_v28 }
  0x2e   : > { %1743 = vmatprep.subr.bf16.mxu1 %v1846_v29 }
  0x30   : > { %1680 = vmatpush3.bf16.msra.mxu0 %v1847_v30  ;;  %v1651_v30 = vld [vmem:[%s2051_s29 + $0x8] sm:$0xff]  }
  0x31   : > { %1744 = vmatpush3.bf16.msra.mxu1 %v1848_v31 }
  0x33   : > { %904 = vmatmul.mubr.bf16.vlgmr.msra.gmra.mrb[0].mxu0 %v1849_v32 }
  0x34   : > { %1001 = vmatmul.mubr.bf16.vlgmr.msra.gmra.mrb[0].mxu1 %v1852_v34  ;;  %911 = vmatprep.mubr.bf16.mxu0 %v1855_v36 }
  0x35   : > { %1008 = vmatprep.mubr.bf16.mxu1 %v1857_v37 }
  0x3b   : > { %912 = vmatmul.mubr.bf16.gmra.mrb[4].mxu0 %v1859_v38  ;;  %v1585_v38 = vunpack.c.l.bf16 %v1651_v30 }
  0x3c   : > { %1009 = vmatmul.mubr.bf16.gmra.mrb[4].mxu1 %v1860_v39  ;;  %919 = vmatprep.mubr.bf16.mxu0 %v1861_v40 }
  0x3d   : > { %1016 = vmatprep.mubr.bf16.mxu1 %v1863_v41 }
  0x43   : > { %920 = vmatmul.mubr.bf16.gmra.mrb[8].mxu0 %v1865_v42 }
  0x44   : > { %1017 = vmatmul.mubr.bf16.gmra.mrb[8].mxu1 %v1866_v43  ;;  %927 = vmatprep.mubr.bf16.mxu0 %v1867_v44 }
  0x45   : > { %1024 = vmatprep.mubr.bf16.mxu1 %v1869_v45 }
  0x4b   : > { %928 = vmatmul.mubr.bf16.gmra.mrb[12].mxu0 %v1871_v46 }
  0x4c   : > { %1025 = vmatmul.mubr.bf16.gmra.mrb[12].mxu1 %v1872_v47  ;;  %935 = vmatprep.mubr.bf16.mxu0 %v1873_v48  ;;  %v1586_v47 = vunpack.c.h.bf16 %v1651_v30 }
  0x4d   : > { %1032 = vmatprep.mubr.bf16.mxu1 %v1875_v49 }
  0x53   : > { %936 = vmatmul.mubr.bf16.gmra.mrb[16].mxu0 %v1877_v50 }
  0x54   : > { %1033 = vmatmul.mubr.bf16.gmra.mrb[16].mxu1 %v1878_v51  ;;  %943 = vmatprep.mubr.bf16.mxu0 %v1879_v52 }
  0x55   : > { %1040 = vmatprep.mubr.bf16.mxu1 %v1881_v53 }
  0x5b   : > { %944 = vmatmul.mubr.bf16.gmra.mrb[20].mxu0 %v1883_v54 }
  0x5c   : > { %1041 = vmatmul.mubr.bf16.gmra.mrb[20].mxu1 %v1884_v55  ;;  %951 = vmatprep.mubr.bf16.mxu0 %v1885_v56  ;;  %v1652_v56 = vld [vmem:[%s2051_s29 + $0x10] sm:$0xff]  }
  0x5d   : > { %1048 = vmatprep.mubr.bf16.mxu1 %v1887_v57  ;;  %v1590_v10 = vunpack.c.h.bf16 %v1652_v56 }
  0x63   : > { %952 = vmatmul.mubr.bf16.gmra.mrb[24].mxu0 %v1889_v58 }
  0x64   : > { %1049 = vmatmul.mubr.bf16.gmra.mrb[24].mxu1 %v1890_v59  ;;  %959 = vmatprep.mubr.bf16.mxu0 %v1891_v60 }
  0x65   : > { %1056 = vmatprep.mubr.bf16.mxu1 %v1893_v61 }
  0x6b   : > { %960 = vmatmul.mubr.bf16.gmra.mrb[28].mxu0 %v1895_v62 }
  0x6c   : > { %1057 = vmatmul.mubr.bf16.gmra.mrb[28].mxu1 %v1896_v63 }
 0x106   : > { %v1681_v0 = vpop.f32.mrb[0].mxu0 }
 0x107   : > { %v1745_v1 = vpop.f32.mrb[0].mxu1  ;;  %v1682_v2 = vpop.f32.mrb[1].mxu0 }
 0x108   : > { %v1683_v3 = vadd.f32 %v1682_v2, %v1681_v0  ;;  %v1746_v4 = vpop.f32.mrb[1].mxu1  ;;  %v1684_v5 = vpop.f32.mrb[2].mxu0  ;;  %v1589_v0 = vunpack.c.l.bf16 %v1652_v56 }
 0x109   : > { %v1747_v6 = vadd.f32 %v1746_v4, %v1745_v1  ;;  %v1748_v7 = vpop.f32.mrb[2].mxu1  ;;  %v1685_v8 = vpop.f32.mrb[3].mxu0 }
 0x10a   : > { %v1686_v11 = vadd.f32 %v1685_v8, %v1684_v5  ;;  %v1749_v12 = vpop.f32.mrb[3].mxu1 }
 0x10b   : > { %v1003_v13 = vadd.f32 %v1747_v6, %v1683_v3  ;;  %v1750_v14 = vadd.f32 %v1749_v12, %v1748_v7 }
 0x10d   : > { %v1123_v15 = vadd.f32 %v2056_v9, %v1003_v13  ;;  %v1006_v17 = vadd.f32 %v1750_v14, %v1686_v11 }
 0x10e   : > { %v1687_v18 = vpop.f32.mrb[4].mxu0 }
 0x10f   : > { %v1139_v19 = vmax.f32 %v1123_v15, 0.0  ;;  %v1124_v20 = vadd.f32 %v2056_v9, %v1006_v17  ;;  %v1751_v22 = vpop.f32.mrb[4].mxu1  ;;  %v1688_v23 = vpop.f32.mrb[5].mxu0 }
 0x110   : > { %v1689_v24 = vadd.f32 %v1688_v23, %v1687_v18  ;;  %v1752_v25 = vpop.f32.mrb[5].mxu1  ;;  %v1690_v26 = vpop.f32.mrb[6].mxu0 }
 0x111   : > { %v1187_v27 = vadd.f32 %v1581_v16, %v1139_v19  ;;  %v1140_v28 = vmax.f32 %v1124_v20, 0.0  ;;  %v1753_v29 = vadd.f32 %v1752_v25, %v1751_v22  ;;  %v1754_v31 = vpop.f32.mrb[6].mxu1  ;;  %v1691_v32 = vpop.f32.mrb[7].mxu0  ;;  %v1653_v19 = vld [vmem:[%s2051_s29 + $0x18] sm:$0xff]  }
 0x112   : > { %v1692_v33 = vadd.f32 %v1691_v32, %v1690_v26  ;;  %v1755_v34 = vpop.f32.mrb[7].mxu1 }
 0x113   : > { %v1188_v35 = vadd.f32 %v1582_v21, %v1140_v28  ;;  %v1011_v36 = vadd.f32 %v1753_v29, %v1689_v24  ;;  %v1756_v37 = vadd.f32 %v1755_v34, %v1754_v31  ;;  %v1203_v39 = vmax.f32 %v1187_v27, 0.0 }
 0x114   : > { %v1593_v27 = vunpack.c.l.bf16 %v1653_v19 }
 0x115   : > { %v1204_v40 = vmax.f32 %v1188_v35, 0.0  ;;  %v1125_v41 = vadd.f32 %v2056_v9, %v1011_v36  ;;  %v1014_v42 = vadd.f32 %v1756_v37, %v1692_v33  ;;  %v1594_v36 = vunpack.c.h.bf16 %v1653_v19 }
 0x116   : > { %v1693_v43 = vpop.f32.mrb[8].mxu0 }
 0x117   : > { %v1614_v44 = vpack.c.bf16 %v1204_v40, %v1203_v39  ;;  %v1141_v45 = vmax.f32 %v1125_v41, 0.0  ;;  %v1126_v46 = vadd.f32 %v2056_v9, %v1014_v42  ;;  %v1757_v48 = vpop.f32.mrb[8].mxu1  ;;  %v1694_v49 = vpop.f32.mrb[9].mxu0 }
 0x118   : > { %v1695_v50 = vadd.f32 %v1694_v49, %v1693_v43  ;;  %v1758_v51 = vpop.f32.mrb[9].mxu1  ;;  %v1696_v52 = vpop.f32.mrb[10].mxu0 }
 0x119   : > { %1615 = vst [vmem:[%s2068_s8] sm:$0xff] %v1614_v44   ;;  %v1189_v53 = vadd.f32 %v1585_v38, %v1141_v45  ;;  %v1142_v54 = vmax.f32 %v1126_v46, 0.0  ;;  %v1759_v55 = vadd.f32 %v1758_v51, %v1757_v48  ;;  %v1760_v57 = vpop.f32.mrb[10].mxu1  ;;  %v1697_v58 = vpop.f32.mrb[11].mxu0  ;;  %v1654_v45 = vld [vmem:[%s2051_s29 + $0x20] sm:$0xff]  }
 0x11a   : > { %v1698_v59 = vadd.f32 %v1697_v58, %v1696_v52  ;;  %v1761_v60 = vpop.f32.mrb[11].mxu1 }
 0x11b   : > { %v1190_v61 = vadd.f32 %v1586_v47, %v1142_v54  ;;  %v1019_v62 = vadd.f32 %v1759_v55, %v1695_v50  ;;  %v1762_v63 = vadd.f32 %v1761_v60, %v1760_v57  ;;  %v1205_v1 = vmax.f32 %v1189_v53, 0.0 }
 0x11c   : > { %v1597_v53 = vunpack.c.l.bf16 %v1654_v45 }
 0x11d   : > { %v1206_v2 = vmax.f32 %v1190_v61, 0.0  ;;  %v1127_v3 = vadd.f32 %v2056_v9, %v1019_v62  ;;  %v1022_v4 = vadd.f32 %v1762_v63, %v1698_v59  ;;  %v1598_v62 = vunpack.c.h.bf16 %v1654_v45 }
 0x11e   : > { %v1699_v5 = vpop.f32.mrb[12].mxu0 }
 0x11f   : > { %v1619_v6 = vpack.c.bf16 %v1206_v2, %v1205_v1  ;;  %v1143_v7 = vmax.f32 %v1127_v3, 0.0  ;;  %v1128_v8 = vadd.f32 %v2056_v9, %v1022_v4  ;;  %v1763_v11 = vpop.f32.mrb[12].mxu1  ;;  %v1700_v12 = vpop.f32.mrb[13].mxu0 }
 0x120   : > { %v1701_v13 = vadd.f32 %v1700_v12, %v1699_v5  ;;  %v1764_v14 = vpop.f32.mrb[13].mxu1  ;;  %v1702_v15 = vpop.f32.mrb[14].mxu0 }
 0x121   : > { %1658 = vst [vmem:[%s2068_s8 + $0x8] sm:$0xff] %v1619_v6   ;;  %v1191_v16 = vadd.f32 %v1589_v0, %v1143_v7  ;;  %v1144_v17 = vmax.f32 %v1128_v8, 0.0  ;;  %v1765_v18 = vadd.f32 %v1764_v14, %v1763_v11  ;;  %v1766_v20 = vpop.f32.mrb[14].mxu1  ;;  %v1703_v21 = vpop.f32.mrb[15].mxu0  ;;  %v1655_v7 = vld [vmem:[%s2051_s29 + $0x28] sm:$0xff]  }
 0x122   : > { %v1704_v22 = vadd.f32 %v1703_v21, %v1702_v15  ;;  %v1767_v23 = vpop.f32.mrb[15].mxu1 }
 0x123   : > { %v1192_v24 = vadd.f32 %v1590_v10, %v1144_v17  ;;  %v1027_v25 = vadd.f32 %v1765_v18, %v1701_v13  ;;  %v1768_v26 = vadd.f32 %v1767_v23, %v1766_v20  ;;  %v1207_v28 = vmax.f32 %v1191_v16, 0.0 }
 0x124   : > { %v1601_v16 = vunpack.c.l.bf16 %v1655_v7 }
 0x125   : > { %v1208_v29 = vmax.f32 %v1192_v24, 0.0  ;;  %v1129_v30 = vadd.f32 %v2056_v9, %v1027_v25  ;;  %v1030_v31 = vadd.f32 %v1768_v26, %v1704_v22  ;;  %v1602_v25 = vunpack.c.h.bf16 %v1655_v7 }
 0x126   : > { %v1705_v32 = vpop.f32.mrb[16].mxu0 }
 0x127   : > { %v1624_v33 = vpack.c.bf16 %v1208_v29, %v1207_v28  ;;  %v1145_v34 = vmax.f32 %v1129_v30, 0.0  ;;  %v1130_v35 = vadd.f32 %v2056_v9, %v1030_v31  ;;  %v1769_v37 = vpop.f32.mrb[16].mxu1  ;;  %v1706_v38 = vpop.f32.mrb[17].mxu0 }
 0x128   : > { %v1707_v39 = vadd.f32 %v1706_v38, %v1705_v32  ;;  %v1770_v40 = vpop.f32.mrb[17].mxu1  ;;  %v1708_v41 = vpop.f32.mrb[18].mxu0 }
 0x129   : > { %1659 = vst [vmem:[%s2068_s8 + $0x10] sm:$0xff] %v1624_v33   ;;  %v1193_v42 = vadd.f32 %v1593_v27, %v1145_v34  ;;  %v1146_v43 = vmax.f32 %v1130_v35, 0.0  ;;  %v1771_v44 = vadd.f32 %v1770_v40, %v1769_v37  ;;  %v1772_v46 = vpop.f32.mrb[18].mxu1  ;;  %v1709_v47 = vpop.f32.mrb[19].mxu0  ;;  %v1656_v34 = vld [vmem:[%s2051_s29 + $0x30] sm:$0xff]  }
 0x12a   : > { %v1710_v48 = vadd.f32 %v1709_v47, %v1708_v41  ;;  %v1773_v49 = vpop.f32.mrb[19].mxu1 }
 0x12b   : > { %v1194_v50 = vadd.f32 %v1594_v36, %v1146_v43  ;;  %v1035_v51 = vadd.f32 %v1771_v44, %v1707_v39  ;;  %v1774_v52 = vadd.f32 %v1773_v49, %v1772_v46  ;;  %v1209_v54 = vmax.f32 %v1193_v42, 0.0 }
 0x12c   : > { %v1605_v42 = vunpack.c.l.bf16 %v1656_v34 }
 0x12d   : > { %v1210_v55 = vmax.f32 %v1194_v50, 0.0  ;;  %v1131_v56 = vadd.f32 %v2056_v9, %v1035_v51  ;;  %v1038_v57 = vadd.f32 %v1774_v52, %v1710_v48  ;;  %v1606_v51 = vunpack.c.h.bf16 %v1656_v34 }
 0x12e   : > { %v1711_v58 = vpop.f32.mrb[20].mxu0 }
 0x12f   : > { %v1629_v59 = vpack.c.bf16 %v1210_v55, %v1209_v54  ;;  %v1147_v60 = vmax.f32 %v1131_v56, 0.0  ;;  %v1132_v61 = vadd.f32 %v2056_v9, %v1038_v57  ;;  %v1775_v63 = vpop.f32.mrb[20].mxu1  ;;  %v1712_v0 = vpop.f32.mrb[21].mxu0 }
 0x130   : > { %v1713_v1 = vadd.f32 %v1712_v0, %v1711_v58  ;;  %v1776_v2 = vpop.f32.mrb[21].mxu1  ;;  %v1714_v3 = vpop.f32.mrb[22].mxu0 }
 0x131   : > { %1660 = vst [vmem:[%s2068_s8 + $0x18] sm:$0xff] %v1629_v59   ;;  %v1195_v4 = vadd.f32 %v1597_v53, %v1147_v60  ;;  %v1148_v5 = vmax.f32 %v1132_v61, 0.0  ;;  %v1777_v6 = vadd.f32 %v1776_v2, %v1775_v63  ;;  %v1778_v8 = vpop.f32.mrb[22].mxu1  ;;  %v1715_v10 = vpop.f32.mrb[23].mxu0  ;;  %v1657_v60 = vld [vmem:[%s2051_s29 + $0x38] sm:$0xff]  }
 0x132   : > { %v1716_v11 = vadd.f32 %v1715_v10, %v1714_v3  ;;  %v1779_v12 = vpop.f32.mrb[23].mxu1 }
 0x133   : > { %v1196_v13 = vadd.f32 %v1598_v62, %v1148_v5  ;;  %v1043_v14 = vadd.f32 %v1777_v6, %v1713_v1  ;;  %v1780_v15 = vadd.f32 %v1779_v12, %v1778_v8  ;;  %v1211_v17 = vmax.f32 %v1195_v4, 0.0 }
 0x134   : > { %v1609_v4 = vunpack.c.l.bf16 %v1657_v60 }
 0x135   : > { %v1212_v18 = vmax.f32 %v1196_v13, 0.0  ;;  %v1133_v19 = vadd.f32 %v2056_v9, %v1043_v14  ;;  %v1046_v20 = vadd.f32 %v1780_v15, %v1716_v11  ;;  %v1610_v13 = vunpack.c.h.bf16 %v1657_v60 }
 0x136   : > { %v1717_v21 = vpop.f32.mrb[24].mxu0 }
 0x137   : > { %v1634_v22 = vpack.c.bf16 %v1212_v18, %v1211_v17  ;;  %v1149_v23 = vmax.f32 %v1133_v19, 0.0  ;;  %v1134_v24 = vadd.f32 %v2056_v9, %v1046_v20  ;;  %v1781_v26 = vpop.f32.mrb[24].mxu1  ;;  %v1718_v27 = vpop.f32.mrb[25].mxu0 }
 0x138   : > { %v1719_v28 = vadd.f32 %v1718_v27, %v1717_v21  ;;  %v1782_v29 = vpop.f32.mrb[25].mxu1  ;;  %v1720_v30 = vpop.f32.mrb[26].mxu0 }
 0x139   : > { %1661 = vst [vmem:[%s2068_s8 + $0x20] sm:$0xff] %v1634_v22   ;;  %v1197_v31 = vadd.f32 %v1601_v16, %v1149_v23  ;;  %v1150_v32 = vmax.f32 %v1134_v24, 0.0  ;;  %v1783_v33 = vadd.f32 %v1782_v29, %v1781_v26  ;;  %v1784_v35 = vpop.f32.mrb[26].mxu1  ;;  %v1721_v36 = vpop.f32.mrb[27].mxu0 }
 0x13a   : > { %v1722_v37 = vadd.f32 %v1721_v36, %v1720_v30  ;;  %v1785_v38 = vpop.f32.mrb[27].mxu1 }
 0x13b   : > { %v1198_v39 = vadd.f32 %v1602_v25, %v1150_v32  ;;  %v1051_v40 = vadd.f32 %v1783_v33, %v1719_v28  ;;  %v1786_v41 = vadd.f32 %v1785_v38, %v1784_v35  ;;  %v1213_v43 = vmax.f32 %v1197_v31, 0.0 }
 0x13d   : > { %v1214_v44 = vmax.f32 %v1198_v39, 0.0  ;;  %v1135_v45 = vadd.f32 %v2056_v9, %v1051_v40  ;;  %v1054_v46 = vadd.f32 %v1786_v41, %v1722_v37 }
 0x13e   : > { %v1723_v47 = vpop.f32.mrb[28].mxu0 }
 0x13f   : > { %v1639_v48 = vpack.c.bf16 %v1214_v44, %v1213_v43  ;;  %v1151_v49 = vmax.f32 %v1135_v45, 0.0  ;;  %v1136_v50 = vadd.f32 %v2056_v9, %v1054_v46  ;;  %v1787_v52 = vpop.f32.mrb[28].mxu1  ;;  %v1724_v53 = vpop.f32.mrb[29].mxu0 }
 0x140   : > { %v1725_v54 = vadd.f32 %v1724_v53, %v1723_v47  ;;  %v1788_v55 = vpop.f32.mrb[29].mxu1  ;;  %v1726_v56 = vpop.f32.mrb[30].mxu0 }
 0x141   : > { %1662 = vst [vmem:[%s2068_s8 + $0x28] sm:$0xff] %v1639_v48   ;;  %v1199_v57 = vadd.f32 %v1605_v42, %v1151_v49  ;;  %v1152_v58 = vmax.f32 %v1136_v50, 0.0  ;;  %v1789_v59 = vadd.f32 %v1788_v55, %v1787_v52  ;;  %v1790_v61 = vpop.f32.mrb[30].mxu1  ;;  %v1727_v62 = vpop.f32.mrb[31].mxu0 }
 0x142   : > { %v1728_v63 = vadd.f32 %v1727_v62, %v1726_v56  ;;  %v1791_v0 = vpop.f32.mrb[31].mxu1 }
 0x143   : > { %v1200_v1 = vadd.f32 %v1606_v51, %v1152_v58  ;;  %v1059_v2 = vadd.f32 %v1789_v59, %v1725_v54  ;;  %v1792_v3 = vadd.f32 %v1791_v0, %v1790_v61  ;;  %v1215_v5 = vmax.f32 %v1199_v57, 0.0 }
 0x145   : > { %v1216_v6 = vmax.f32 %v1200_v1, 0.0  ;;  %v1137_v7 = vadd.f32 %v2056_v9, %v1059_v2  ;;  %v1062_v8 = vadd.f32 %v1792_v3, %v1728_v63 }
 0x147   : > { %v1644_v10 = vpack.c.bf16 %v1216_v6, %v1215_v5  ;;  %v1153_v11 = vmax.f32 %v1137_v7, 0.0  ;;  %v1138_v12 = vadd.f32 %v2056_v9, %v1062_v8 }
 0x149   : > { %1663 = vst [vmem:[%s2068_s8 + $0x30] sm:$0xff] %v1644_v10   ;;  %v1201_v14 = vadd.f32 %v1609_v4, %v1153_v11  ;;  %v1154_v15 = vmax.f32 %v1138_v12, 0.0 }
 0x14b   : > { %v1202_v16 = vadd.f32 %v1610_v13, %v1154_v15  ;;  %v1217_v17 = vmax.f32 %v1201_v14, 0.0 }
 0x14d   : > { %v1218_v18 = vmax.f32 %v1202_v16, 0.0 }
 0x14f   : > { %v1649_v19 = vpack.c.bf16 %v1218_v18, %v1217_v17 }
 0x151   : > { %1664 = vst [vmem:[%s2068_s8 + $0x38] sm:$0xff] %v1649_v19  }
 0x152 PF: > { %s14_s17 = sadd.s32 1, %s1919_s17   ;;  %s2111_s15 = smov %s1915_s16 }
 0x153   : > { %p11_p5 = scmp.ge.s32.totalorder %s14_s17, 6   ;;  %s2112_s16 = smov %s2114_s18 }
 0x155   :  { %13 = sbr.rel (!%p11_p5) target bundleno = 2 (0x2), region = 83 }

// kernel: fpm_forward.10
= control target key start
LH: loop header
LB: loop body
LE: loop exit
PB: predicated region body
PF: predicated region fallthrough
CT: control target
= control target key end

     0   :  { %s1467_s12 = smov 0   ;;  %s1469_s13 = smov 0   ;;  %s1604_s0 = inlined_call_operand.vmem [shape: bf16[512,128], index: 0, kind: input, shape index: {}]   ;;  %s1605_s1 = inlined_call_operand.vmem [shape: bf16[128,128], index: 1, kind: input, shape index: {}]   ;;  %s1606_s2 = inlined_call_operand.vmem [shape: f32[1,128], index: 2, kind: input, shape index: {}]   ;;  %s1607_s3 = inlined_call_operand.vmem [shape: bf16[512,128], index: 3, kind: output, shape index: {}]  }
   0x1   :  { %s1471_s14 = smov 0  }
   0x2 LB: > { %s32_s15 = sadd.s32 1, %s1441_s13  ;;  %p1096_p0 = scmp.ge.s32.totalorder %s1445_s14, 1  ;;  %s1445_s14 = sphi %s1471_s14, %s13_s14   ;;  %s1441_s13 = sphi %s1469_s13, %s1609_s13   ;;  %s1437_s12 = sphi %s1467_s12, %s1608_s12  }
   0x3   : > { %p34_p1 = scmp.ge.s32.totalorder %s32_s15, 2  ;;  %p188_p2 = scmp.lt.s32.totalorder %s1445_s14, 3 }
   0x5   : > { %s1611_s15 = smov (%p34_p1, %s32_s15), 0  ;;  %p189_p3 = pnand %p1096_p0, %p188_p2 }
   0x6   : > { %v1399_v0 = vld [vmem:[%s1605_s1] sm:$0xff] (!%p189_p3)   ;;  %s1097_s18 = sshll.u32 (!%p189_p3), %s1437_s12, 5  ;;  %v1400_v1 = vld [vmem:[%s1605_s1 + $0x8] sm:$0xff] (!%p189_p3)   ;;  %v1401_v2 = vld [vmem:[%s1605_s1 + $0x10] sm:$0xff] (!%p189_p3)  }
   0x7   : > { %192 = sbr.rel (%p189_p3) target bundleno = 283 (0x11b), region = 32  ;;  %p230_p4 = scmp.lt.s32.totalorder (!%p189_p3), %s1097_s18, 63  ;;  %1311 = vmatprep.subr.bf16.mxu0 (!%p189_p3), %v1399_v0  ;;  %1359 = vmatprep.subr.bf16.mxu1 (!%p189_p3), %v1399_v0  ;;  %v1402_v3 = vld [vmem:[%s1605_s1 + $0x18] sm:$0xff] (!%p189_p3)   ;;  %v1403_v6 = vld [vmem:[%s1605_s1 + $0x20] sm:$0xff] (!%p189_p3)   ;;  %v1404_v7 = vld [vmem:[%s1605_s1 + $0x28] sm:$0xff] (!%p189_p3)  }
   0x8   : > { %1312 = vmatpush3.bf16.msra.mxu0 (!%p189_p3), %v1399_v0  ;;  %1367 = vmatpush3.bf16.msra.mxu1 (!%p189_p3), %v1399_v0  ;;  %v1405_v8 = vld [vmem:[%s1605_s1 + $0x30] sm:$0xff] (!%p189_p3)   ;;  %v1406_v9 = vld [vmem:[%s1605_s1 + $0x38] sm:$0xff] (!%p189_p3)   ;;  %v1538_v25 = vld [vmem:[%s1606_s2] ss:$0 sm:$0xff] (!%p189_p3) }
   0x9   : > { %1313 = vmatprep.subr.bf16.mxu0 (!%p189_p3), %v1400_v1  ;;  %1360 = vmatprep.subr.bf16.mxu1 (!%p189_p3), %v1400_v1 }
   0xc   : > { %1314 = vmatpush3.bf16.msra.mxu0 (!%p189_p3), %v1400_v1  ;;  %1368 = vmatpush3.bf16.msra.mxu1 (!%p189_p3), %v1400_v1 }
   0xd   : > { %1315 = vmatprep.subr.bf16.mxu0 (!%p189_p3), %v1401_v2  ;;  %1361 = vmatprep.subr.bf16.mxu1 (!%p189_p3), %v1401_v2 }
   0xe   : > { %s1613_s18 = smov (!%p230_p4, %s1097_s18), 63 }
   0xf   : > { %s1098_s23 = sshll.u32 %s1613_s18, 2 }
  0x10   : > { %s1502_s26 = scalar_lea.vmem %s1604_s0, %s1098_s23  ;;  %1316 = vmatpush3.bf16.msra.mxu0 %v1401_v2  ;;  %1369 = vmatpush3.bf16.msra.mxu1 %v1401_v2  ;;  %s1551_s17 = scalar_lea.vmem %s1607_s3, %s1098_s23 }
  0x11   : > { %v1407_v4 = vld [vmem:[%s1502_s26] sm:$0xff]   ;;  %1317 = vmatprep.subr.bf16.mxu0 %v1402_v3  ;;  %1362 = vmatprep.subr.bf16.mxu1 %v1402_v3  ;;  %v1409_v10 = vld [vmem:[%s1502_s26 + $0x8] sm:$0xff]   ;;  %v1411_v12 = vld [vmem:[%s1502_s26 + $0x10] sm:$0xff]  }
  0x12   : > { %v1408_v5 = vld [vmem:[%s1502_s26 + $0x40] sm:$0xff]   ;;  %1327 = vmatprep.mubr.bf16.mxu0 %v1407_v4  ;;  %v1410_v11 = vld [vmem:[%s1502_s26 + $0x48] sm:$0xff]   ;;  %v1412_v13 = vld [vmem:[%s1502_s26 + $0x50] sm:$0xff]  }
  0x13   : > { %1343 = vmatprep.mubr.bf16.mxu1 %v1408_v5  ;;  %v1413_v14 = vld [vmem:[%s1502_s26 + $0x18] sm:$0xff]   ;;  %v1415_v16 = vld [vmem:[%s1502_s26 + $0x20] sm:$0xff]   ;;  %v1417_v18 = vld [vmem:[%s1502_s26 + $0x28] sm:$0xff]  }
  0x14   : > { %1318 = vmatpush3.bf16.msra.mxu0 %v1402_v3  ;;  %1370 = vmatpush3.bf16.msra.mxu1 %v1402_v3  ;;  %v1414_v15 = vld [vmem:[%s1502_s26 + $0x58] sm:$0xff]   ;;  %v1416_v17 = vld [vmem:[%s1502_s26 + $0x60] sm:$0xff]   ;;  %v1418_v19 = vld [vmem:[%s1502_s26 + $0x68] sm:$0xff]  }
  0x15   : > { %1319 = vmatprep.subr.bf16.mxu0 %v1403_v6  ;;  %1363 = vmatprep.subr.bf16.mxu1 %v1403_v6  ;;  %v1419_v20 = vld [vmem:[%s1502_s26 + $0x30] sm:$0xff]   ;;  %v1421_v22 = vld [vmem:[%s1502_s26 + $0x38] sm:$0xff]  }
  0x16   : > { %v1420_v21 = vld [vmem:[%s1502_s26 + $0x70] sm:$0xff]   ;;  %v1422_v23 = vld [vmem:[%s1502_s26 + $0x78] sm:$0xff]  }
  0x18   : > { %1320 = vmatpush3.bf16.msra.mxu0 %v1403_v6  ;;  %1371 = vmatpush3.bf16.msra.mxu1 %v1403_v6 }
  0x19   : > { %1321 = vmatprep.subr.bf16.mxu0 %v1404_v7  ;;  %1364 = vmatprep.subr.bf16.mxu1 %v1404_v7 }
  0x1c   : > { %1322 = vmatpush3.bf16.msra.mxu0 %v1404_v7  ;;  %1372 = vmatpush3.bf16.msra.mxu1 %v1404_v7 }
  0x1d   : > { %1323 = vmatprep.subr.bf16.mxu0 %v1405_v8  ;;  %1365 = vmatprep.subr.bf16.mxu1 %v1405_v8 }
  0x20   : > { %1324 = vmatpush3.bf16.msra.mxu0 %v1405_v8  ;;  %1373 = vmatpush3.bf16.msra.mxu1 %v1405_v8 }
  0x21   : > { %1325 = vmatprep.subr.bf16.mxu0 %v1406_v9  ;;  %1366 = vmatprep.subr.bf16.mxu1 %v1406_v9 }
  0x24   : > { %1326 = vmatpush3.bf16.msra.mxu0 %v1406_v9  ;;  %1374 = vmatpush3.bf16.msra.mxu1 %v1406_v9 }
  0x27   : > { %1328 = vmatmul.mubr.bf16.vlgmr.msra.gmra.mrb[0].mxu0 %v1409_v10  ;;  %1344 = vmatmul.mubr.bf16.vlgmr.msra.gmra.mrb[0].mxu1 %v1410_v11 }
  0x28   : > { %1331 = vmatprep.mubr.bf16.mxu0 %v1411_v12  ;;  %1347 = vmatprep.mubr.bf16.mxu1 %v1412_v13 }
  0x2f   : > { %1332 = vmatmul.mubr.bf16.gmra.mrb[4].mxu0 %v1413_v14  ;;  %1348 = vmatmul.mubr.bf16.gmra.mrb[4].mxu1 %v1414_v15 }
  0x30   : > { %1335 = vmatprep.mubr.bf16.mxu0 %v1415_v16  ;;  %1351 = vmatprep.mubr.bf16.mxu1 %v1416_v17 }
  0x37   : > { %1336 = vmatmul.mubr.bf16.gmra.mrb[8].mxu0 %v1417_v18  ;;  %1352 = vmatmul.mubr.bf16.gmra.mrb[8].mxu1 %v1418_v19 }
  0x38   : > { %1339 = vmatprep.mubr.bf16.mxu0 %v1419_v20  ;;  %1355 = vmatprep.mubr.bf16.mxu1 %v1420_v21 }
  0x3f   : > { %1340 = vmatmul.mubr.bf16.gmra.mrb[12].mxu0 %v1421_v22  ;;  %1356 = vmatmul.mubr.bf16.gmra.mrb[12].mxu1 %v1422_v23 }
  0xfa   : > { %v1329_v24 = vpop.f32.mrb[0].mxu0  ;;  %v1345_v26 = vpop.f32.mrb[0].mxu1 }
  0xfb   : > { %v554_v27 = vpop.f32.mrb[1].mxu0  ;;  %v618_v28 = vpop.f32.mrb[1].mxu1  ;;  %v789_v31 = vadd.f32 %v1329_v24, %v1538_v25  ;;  %v805_v32 = vadd.f32 %v1345_v26, %v1538_v25 }
  0xfc   : > { %v1330_v29 = vpop.f32.mrb[2].mxu0  ;;  %v1346_v30 = vpop.f32.mrb[2].mxu1  ;;  %v787_v37 = vadd.f32 %v1538_v25, %v554_v27  ;;  %v803_v38 = vadd.f32 %v1538_v25, %v618_v28 }
  0xfd   : > { %v790_v33 = vadd.f32 %v1330_v29, %v1538_v25  ;;  %v806_v34 = vadd.f32 %v1346_v30, %v1538_v25  ;;  %v557_v35 = vpop.f32.mrb[3].mxu0  ;;  %v621_v36 = vpop.f32.mrb[3].mxu1 }
  0xfe   : > { %v788_v39 = vadd.f32 %v1538_v25, %v557_v35  ;;  %v804_v40 = vadd.f32 %v1538_v25, %v621_v36 }
  0xff   : > { %v1200_v41 = vpack.c.bf16 %v790_v33, %v789_v31  ;;  %v1240_v42 = vpack.c.bf16 %v806_v34, %v805_v32 }
 0x100   : > { %v1195_v43 = vpack.c.bf16 %v788_v39, %v787_v37  ;;  %v1235_v44 = vpack.c.bf16 %v804_v40, %v803_v38 }
 0x101   : > { %1272 = vst [vmem:[%s1551_s17 + $0x8] sm:$0xff] %v1200_v41   ;;  %1280 = vst [vmem:[%s1551_s17 + $0x48] sm:$0xff] %v1240_v42  }
 0x102   : > { %1196 = vst [vmem:[%s1551_s17] sm:$0xff] %v1195_v43   ;;  %1279 = vst [vmem:[%s1551_s17 + $0x40] sm:$0xff] %v1235_v44   ;;  %v1333_v45 = vpop.f32.mrb[4].mxu0  ;;  %v1349_v46 = vpop.f32.mrb[4].mxu1 }
 0x103   : > { %v570_v47 = vpop.f32.mrb[5].mxu0  ;;  %v634_v48 = vpop.f32.mrb[5].mxu1  ;;  %v793_v51 = vadd.f32 %v1333_v45, %v1538_v25  ;;  %v809_v52 = vadd.f32 %v1349_v46, %v1538_v25 }
 0x104   : > { %v1334_v49 = vpop.f32.mrb[6].mxu0  ;;  %v1350_v50 = vpop.f32.mrb[6].mxu1  ;;  %v791_v57 = vadd.f32 %v1538_v25, %v570_v47  ;;  %v807_v58 = vadd.f32 %v1538_v25, %v634_v48 }
 0x105   : > { %v794_v53 = vadd.f32 %v1334_v49, %v1538_v25  ;;  %v810_v54 = vadd.f32 %v1350_v50, %v1538_v25  ;;  %v573_v55 = vpop.f32.mrb[7].mxu0  ;;  %v637_v56 = vpop.f32.mrb[7].mxu1 }
 0x106   : > { %v792_v59 = vadd.f32 %v1538_v25, %v573_v55  ;;  %v808_v60 = vadd.f32 %v1538_v25, %v637_v56 }
 0x107   : > { %v1210_v61 = vpack.c.bf16 %v794_v53, %v793_v51  ;;  %v1250_v62 = vpack.c.bf16 %v810_v54, %v809_v52 }
 0x108   : > { %v1205_v63 = vpack.c.bf16 %v792_v59, %v791_v57  ;;  %v1245_v0 = vpack.c.bf16 %v808_v60, %v807_v58 }
 0x109   : > { %1274 = vst [vmem:[%s1551_s17 + $0x18] sm:$0xff] %v1210_v61   ;;  %1282 = vst [vmem:[%s1551_s17 + $0x58] sm:$0xff] %v1250_v62  }
 0x10a   : > { %1273 = vst [vmem:[%s1551_s17 + $0x10] sm:$0xff] %v1205_v63   ;;  %1281 = vst [vmem:[%s1551_s17 + $0x50] sm:$0xff] %v1245_v0   ;;  %v1337_v1 = vpop.f32.mrb[8].mxu0  ;;  %v1353_v2 = vpop.f32.mrb[8].mxu1 }
 0x10b   : > { %v586_v3 = vpop.f32.mrb[9].mxu0  ;;  %v650_v4 = vpop.f32.mrb[9].mxu1  ;;  %v797_v7 = vadd.f32 %v1337_v1, %v1538_v25  ;;  %v813_v8 = vadd.f32 %v1353_v2, %v1538_v25 }
 0x10c   : > { %v1338_v5 = vpop.f32.mrb[10].mxu0  ;;  %v1354_v6 = vpop.f32.mrb[10].mxu1  ;;  %v795_v13 = vadd.f32 %v1538_v25, %v586_v3  ;;  %v811_v14 = vadd.f32 %v1538_v25, %v650_v4 }
 0x10d   : > { %v798_v9 = vadd.f32 %v1338_v5, %v1538_v25  ;;  %v814_v10 = vadd.f32 %v1354_v6, %v1538_v25  ;;  %v589_v11 = vpop.f32.mrb[11].mxu0  ;;  %v653_v12 = vpop.f32.mrb[11].mxu1 }
 0x10e   : > { %v796_v15 = vadd.f32 %v1538_v25, %v589_v11  ;;  %v812_v16 = vadd.f32 %v1538_v25, %v653_v12 }
 0x10f   : > { %v1220_v17 = vpack.c.bf16 %v798_v9, %v797_v7  ;;  %v1260_v18 = vpack.c.bf16 %v814_v10, %v813_v8 }
 0x110   : > { %v1215_v19 = vpack.c.bf16 %v796_v15, %v795_v13  ;;  %v1255_v20 = vpack.c.bf16 %v812_v16, %v811_v14 }
 0x111   : > { %1276 = vst [vmem:[%s1551_s17 + $0x28] sm:$0xff] %v1220_v17   ;;  %1284 = vst [vmem:[%s1551_s17 + $0x68] sm:$0xff] %v1260_v18  }
 0x112   : > { %1275 = vst [vmem:[%s1551_s17 + $0x20] sm:$0xff] %v1215_v19   ;;  %1283 = vst [vmem:[%s1551_s17 + $0x60] sm:$0xff] %v1255_v20   ;;  %v1341_v21 = vpop.f32.mrb[12].mxu0  ;;  %v1357_v22 = vpop.f32.mrb[12].mxu1 }
 0x113   : > { %v602_v23 = vpop.f32.mrb[13].mxu0  ;;  %v666_v24 = vpop.f32.mrb[13].mxu1  ;;  %v801_v28 = vadd.f32 %v1341_v21, %v1538_v25  ;;  %v817_v29 = vadd.f32 %v1357_v22, %v1538_v25 }
 0x114   : > { %v1342_v26 = vpop.f32.mrb[14].mxu0  ;;  %v1358_v27 = vpop.f32.mrb[14].mxu1  ;;  %v799_v34 = vadd.f32 %v1538_v25, %v602_v23  ;;  %v815_v35 = vadd.f32 %v1538_v25, %v666_v24 }
 0x115   : > { %v802_v30 = vadd.f32 %v1342_v26, %v1538_v25  ;;  %v818_v31 = vadd.f32 %v1358_v27, %v1538_v25  ;;  %v605_v32 = vpop.f32.mrb[15].mxu0  ;;  %v669_v33 = vpop.f32.mrb[15].mxu1 }
 0x116   : > { %v800_v36 = vadd.f32 %v1538_v25, %v605_v32  ;;  %v816_v37 = vadd.f32 %v1538_v25, %v669_v33 }
 0x117   : > { %v1230_v38 = vpack.c.bf16 %v802_v30, %v801_v28  ;;  %v1270_v39 = vpack.c.bf16 %v818_v31, %v817_v29 }
 0x118   : > { %v1225_v40 = vpack.c.bf16 %v800_v36, %v799_v34  ;;  %v1265_v41 = vpack.c.bf16 %v816_v37, %v815_v35 }
 0x119   : > { %1278 = vst [vmem:[%s1551_s17 + $0x38] sm:$0xff] %v1230_v38   ;;  %1286 = vst [vmem:[%s1551_s17 + $0x78] sm:$0xff] %v1270_v39  }
 0x11a   : > { %1277 = vst [vmem:[%s1551_s17 + $0x30] sm:$0xff] %v1225_v40   ;;  %1285 = vst [vmem:[%s1551_s17 + $0x70] sm:$0xff] %v1265_v41  }
 0x11b PF: > { %s13_s14 = sadd.s32 1, %s1445_s14   ;;  %s1608_s12 = smov %s1441_s13 }
 0x11c   : > { %p10_p5 = scmp.ge.s32.totalorder %s13_s14, 4   ;;  %s1609_s13 = smov %s1611_s15 }
 0x11e   :  { %12 = sbr.rel (!%p10_p5) target bundleno = 2 (0x2), region = 76 }

// kernel: fpm_forward.19
= control target key start
LH: loop header
LB: loop body
LE: loop exit
PB: predicated region body
PF: predicated region fallthrough
CT: control target
= control target key end

     0   :  { %s1803_s15 = smov 0   ;;  %s1805_s16 = smov 0   ;;  %s1968_s0 = inlined_call_operand.vmem [shape: bf16[4,128,512], index: 0, kind: input, shape index: {}]   ;;  %s1969_s1 = inlined_call_operand.vmem [shape: bf16[4,512,128], index: 1, kind: input, shape index: {}]   ;;  %s1970_s2 = inlined_call_operand.vmem [shape: f32[1,128], index: 2, kind: input, shape index: {}]   ;;  %s1971_s3 = inlined_call_operand.vmem [shape: bf16[4,128,128], index: 3, kind: input, shape index: {}]   ;;  %s1972_s4 = inlined_call_operand.vmem [shape: f32[4,128,128], index: 4, kind: output, shape index: {}]  }
   0x1   :  { %s1807_s17 = smov 0  }
   0x2 LB: > { %s40_s18 = sadd.s32 1, %s1772_s16  ;;  %p1403_p0 = scmp.ge.s32.totalorder %s1776_s17, 1  ;;  %s1776_s17 = sphi %s1807_s17, %s14_s17   ;;  %s1772_s16 = sphi %s1805_s16, %s1974_s16   ;;  %s1768_s15 = sphi %s1803_s15, %s1973_s15  }
   0x3   : > { %p42_p1 = scmp.ge.s32.totalorder %s40_s18, 4  ;;  %p259_p2 = scmp.lt.s32.totalorder %s1776_s17, 5 }
   0x5   : > { %s1976_s18 = smov (%p42_p1, %s40_s18), 0  ;;  %p260_p3 = pnand %p1403_p0, %p259_p2 }
   0x6   : > { %p330_p4 = scmp.lt.s32.totalorder (!%p260_p3), %s1768_s15, 3 }
   0x7   : > { %263 = sbr.rel (%p260_p3) target bundleno = 336 (0x150), region = 36 }
   0xe   : > { %s1978_s15 = smov (!%p330_p4, %s1768_s15), 3 }
   0xf   : > { %s1479_s19 = sshll.u32 %s1978_s15, 8  ;;  %s1481_s26 = sshll.u32 %s1978_s15, 6 }
  0x10   : > { %s1829_s22 = scalar_lea.vmem %s1969_s1, %s1479_s19  ;;  %s1866_s25 = scalar_lea.vmem %s1968_s0, %s1479_s19 }
  0x11   : > { %v1674_v0 = vld [vmem:[%s1829_s22 + $0x40] sm:$0xff]   ;;  %v1678_v4 = vld [vmem:[%s1829_s22 + $0x48] sm:$0xff]   ;;  %v1682_v8 = vld [vmem:[%s1829_s22 + $0x50] sm:$0xff]   ;;  %s1906_s29 = scalar_lea.vmem %s1971_s3, %s1481_s26  ;;  %s1482_s6 = sshll.u32 %s1978_s15, 7 }
  0x12   : > { %v1675_v1 = vld [vmem:[%s1829_s22 + $0xc0] sm:$0xff]   ;;  %1522 = vmatprep.subr.bf16.mxu0 %v1674_v0  ;;  %v1679_v5 = vld [vmem:[%s1829_s22 + $0xc8] sm:$0xff]   ;;  %v1683_v9 = vld [vmem:[%s1829_s22 + $0xd0] sm:$0xff]   ;;  %s1920_s9 = scalar_lea.vmem %s1972_s4, %s1482_s6 }
  0x13   : > { %v1676_v2 = vld [vmem:[%s1829_s22] sm:$0xff]   ;;  %1586 = vmatprep.subr.bf16.mxu1 %v1675_v1  ;;  %v1680_v6 = vld [vmem:[%s1829_s22 + $0x8] sm:$0xff]   ;;  %v1684_v10 = vld [vmem:[%s1829_s22 + $0x10] sm:$0xff]  }
  0x14   : > { %v1677_v3 = vld [vmem:[%s1829_s22 + $0x80] sm:$0xff]   ;;  %1523 = vmatpush3.bf16.msra.mxu0 %v1676_v2  ;;  %v1681_v7 = vld [vmem:[%s1829_s22 + $0x88] sm:$0xff]   ;;  %v1685_v11 = vld [vmem:[%s1829_s22 + $0x90] sm:$0xff]  }
  0x15   : > { %1587 = vmatpush3.bf16.msra.mxu1 %v1677_v3  ;;  %1524 = vmatprep.subr.bf16.mxu0 %v1678_v4  ;;  %v1686_v12 = vld [vmem:[%s1829_s22 + $0x58] sm:$0xff]   ;;  %v1690_v16 = vld [vmem:[%s1829_s22 + $0x60] sm:$0xff]   ;;  %v1694_v20 = vld [vmem:[%s1829_s22 + $0x68] sm:$0xff]  }
  0x16   : > { %1588 = vmatprep.subr.bf16.mxu1 %v1679_v5  ;;  %v1687_v13 = vld [vmem:[%s1829_s22 + $0xd8] sm:$0xff]   ;;  %v1691_v17 = vld [vmem:[%s1829_s22 + $0xe0] sm:$0xff]   ;;  %v1695_v21 = vld [vmem:[%s1829_s22 + $0xe8] sm:$0xff]  }
  0x17   : > { %v1688_v14 = vld [vmem:[%s1829_s22 + $0x18] sm:$0xff]   ;;  %v1692_v18 = vld [vmem:[%s1829_s22 + $0x20] sm:$0xff]   ;;  %v1696_v22 = vld [vmem:[%s1829_s22 + $0x28] sm:$0xff]  }
  0x18   : > { %1525 = vmatpush3.bf16.msra.mxu0 %v1680_v6  ;;  %v1689_v15 = vld [vmem:[%s1829_s22 + $0x98] sm:$0xff]   ;;  %v1693_v19 = vld [vmem:[%s1829_s22 + $0xa0] sm:$0xff]   ;;  %v1697_v23 = vld [vmem:[%s1829_s22 + $0xa8] sm:$0xff]  }
  0x19   : > { %1589 = vmatpush3.bf16.msra.mxu1 %v1681_v7  ;;  %1526 = vmatprep.subr.bf16.mxu0 %v1682_v8  ;;  %v1698_v24 = vld [vmem:[%s1829_s22 + $0x70] sm:$0xff]   ;;  %v1702_v28 = vld [vmem:[%s1829_s22 + $0x78] sm:$0xff]  }
  0x1a   : > { %1590 = vmatprep.subr.bf16.mxu1 %v1683_v9  ;;  %v1699_v25 = vld [vmem:[%s1829_s22 + $0xf0] sm:$0xff]   ;;  %v1703_v29 = vld [vmem:[%s1829_s22 + $0xf8] sm:$0xff]   ;;  %v1911_v9 = vld [vmem:[%s1970_s2] ss:$0 sm:$0xff] }
  0x1b   : > { %v1700_v26 = vld [vmem:[%s1829_s22 + $0x30] sm:$0xff]   ;;  %v1704_v30 = vld [vmem:[%s1829_s22 + $0x38] sm:$0xff]  }
  0x1c   : > { %1527 = vmatpush3.bf16.msra.mxu0 %v1684_v10  ;;  %v1701_v27 = vld [vmem:[%s1829_s22 + $0xb0] sm:$0xff]   ;;  %v1705_v31 = vld [vmem:[%s1829_s22 + $0xb8] sm:$0xff]   ;;  %v1484_v10 = vld [vmem:[%s1906_s29] sm:$0xff]  }
  0x1d   : > { %1591 = vmatpush3.bf16.msra.mxu1 %v1685_v11  ;;  %1528 = vmatprep.subr.bf16.mxu0 %v1686_v12  ;;  %v1706_v32 = vld [vmem:[%s1866_s25] ss:$16 sps:$4 sm:$0xff]   ;;  %v1708_v33 = vld [vmem:[%s1866_s25 + $0x4] ss:$16 sps:$4 sm:$0xff]   ;;  %v1709_v34 = vld [vmem:[%s1866_s25 + $0x8] ss:$16 sps:$4 sm:$0xff]  }
  0x1e   : > { %1592 = vmatprep.subr.bf16.mxu1 %v1687_v13  ;;  %v1711_v35 = vld [vmem:[%s1866_s25 + $0xc] ss:$16 sps:$4 sm:$0xff]   ;;  %903 = vmatprep.mubr.bf16.mxu0 %v1708_v33  ;;  %v1712_v36 = vld [vmem:[%s1866_s25 + $0x24] ss:$16 sps:$4 sm:$0xff]   ;;  %v1716_v38 = vld [vmem:[%s1866_s25 + $0x20] ss:$16 sps:$4 sm:$0xff]  }
  0x1f   : > { %1000 = vmatprep.mubr.bf16.mxu1 %v1711_v35  ;;  %v1714_v37 = vld [vmem:[%s1866_s25 + $0x2c] ss:$16 sps:$4 sm:$0xff]   ;;  %v1717_v39 = vld [vmem:[%s1866_s25 + $0x28] ss:$16 sps:$4 sm:$0xff]   ;;  %v1718_v40 = vld [vmem:[%s1866_s25 + $0x44] ss:$16 sps:$4 sm:$0xff]  }
  0x20   : > { %1529 = vmatpush3.bf16.msra.mxu0 %v1688_v14  ;;  %v1720_v41 = vld [vmem:[%s1866_s25 + $0x4c] ss:$16 sps:$4 sm:$0xff]   ;;  %v1722_v42 = vld [vmem:[%s1866_s25 + $0x40] ss:$16 sps:$4 sm:$0xff]   ;;  %v1723_v43 = vld [vmem:[%s1866_s25 + $0x48] ss:$16 sps:$4 sm:$0xff]  }
  0x21   : > { %1593 = vmatpush3.bf16.msra.mxu1 %v1689_v15  ;;  %1530 = vmatprep.subr.bf16.mxu0 %v1690_v16  ;;  %v1724_v44 = vld [vmem:[%s1866_s25 + $0x64] ss:$16 sps:$4 sm:$0xff]   ;;  %v1726_v45 = vld [vmem:[%s1866_s25 + $0x6c] ss:$16 sps:$4 sm:$0xff]   ;;  %v1728_v46 = vld [vmem:[%s1866_s25 + $0x60] ss:$16 sps:$4 sm:$0xff]   ;;  %v1485_v16 = vunpack.c.l.bf16 %v1484_v10 }
  0x22   : > { %1594 = vmatprep.subr.bf16.mxu1 %v1691_v17  ;;  %v1729_v47 = vld [vmem:[%s1866_s25 + $0x68] ss:$16 sps:$4 sm:$0xff]   ;;  %v1730_v48 = vld [vmem:[%s1866_s25 + $0x84] ss:$16 sps:$4 sm:$0xff]   ;;  %v1732_v49 = vld [vmem:[%s1866_s25 + $0x8c] ss:$16 sps:$4 sm:$0xff]  }
  0x23   : > { %v1734_v50 = vld [vmem:[%s1866_s25 + $0x80] ss:$16 sps:$4 sm:$0xff]   ;;  %v1735_v51 = vld [vmem:[%s1866_s25 + $0x88] ss:$16 sps:$4 sm:$0xff]   ;;  %v1736_v52 = vld [vmem:[%s1866_s25 + $0xa4] ss:$16 sps:$4 sm:$0xff]  }
  0x24   : > { %1531 = vmatpush3.bf16.msra.mxu0 %v1692_v18  ;;  %v1738_v53 = vld [vmem:[%s1866_s25 + $0xac] ss:$16 sps:$4 sm:$0xff]   ;;  %v1740_v54 = vld [vmem:[%s1866_s25 + $0xa0] ss:$16 sps:$4 sm:$0xff]   ;;  %v1741_v55 = vld [vmem:[%s1866_s25 + $0xa8] ss:$16 sps:$4 sm:$0xff]  }
  0x25   : > { %1595 = vmatpush3.bf16.msra.mxu1 %v1693_v19  ;;  %1532 = vmatprep.subr.bf16.mxu0 %v1694_v20  ;;  %v1742_v56 = vld [vmem:[%s1866_s25 + $0xc4] ss:$16 sps:$4 sm:$0xff]   ;;  %v1744_v57 = vld [vmem:[%s1866_s25 + $0xcc] ss:$16 sps:$4 sm:$0xff]   ;;  %v1746_v58 = vld [vmem:[%s1866_s25 + $0xc0] ss:$16 sps:$4 sm:$0xff]  }
  0x26   : > { %1596 = vmatprep.subr.bf16.mxu1 %v1695_v21  ;;  %v1747_v59 = vld [vmem:[%s1866_s25 + $0xc8] ss:$16 sps:$4 sm:$0xff]   ;;  %v1748_v60 = vld [vmem:[%s1866_s25 + $0xe4] ss:$16 sps:$4 sm:$0xff]   ;;  %v1750_v61 = vld [vmem:[%s1866_s25 + $0xec] ss:$16 sps:$4 sm:$0xff]   ;;  %v1486_v21 = vunpack.c.h.bf16 %v1484_v10 }
  0x27   : > { %v1752_v62 = vld [vmem:[%s1866_s25 + $0xe0] ss:$16 sps:$4 sm:$0xff]   ;;  %v1753_v63 = vld [vmem:[%s1866_s25 + $0xe8] ss:$16 sps:$4 sm:$0xff]  }
  0x28   : > { %1533 = vmatpush3.bf16.msra.mxu0 %v1696_v22 }
  0x29   : > { %1597 = vmatpush3.bf16.msra.mxu1 %v1697_v23  ;;  %1534 = vmatprep.subr.bf16.mxu0 %v1698_v24 }
  0x2a   : > { %1598 = vmatprep.subr.bf16.mxu1 %v1699_v25 }
  0x2c   : > { %1535 = vmatpush3.bf16.msra.mxu0 %v1700_v26 }
  0x2d   : > { %1599 = vmatpush3.bf16.msra.mxu1 %v1701_v27  ;;  %1536 = vmatprep.subr.bf16.mxu0 %v1702_v28 }
  0x2e   : > { %1600 = vmatprep.subr.bf16.mxu1 %v1703_v29 }
  0x30   : > { %1537 = vmatpush3.bf16.msra.mxu0 %v1704_v30 }
  0x31   : > { %1601 = vmatpush3.bf16.msra.mxu1 %v1705_v31 }
  0x33   : > { %904 = vmatmul.mubr.bf16.vlgmr.msra.gmra.mrb[0].mxu0 %v1706_v32  ;;  %v1515_v32 = vld [vmem:[%s1906_s29 + $0x8] sm:$0xff]  }
  0x34   : > { %1001 = vmatmul.mubr.bf16.vlgmr.msra.gmra.mrb[0].mxu1 %v1709_v34  ;;  %911 = vmatprep.mubr.bf16.mxu0 %v1712_v36 }
  0x35   : > { %1008 = vmatprep.mubr.bf16.mxu1 %v1714_v37 }
  0x3b   : > { %912 = vmatmul.mubr.bf16.gmra.mrb[4].mxu0 %v1716_v38 }
  0x3c   : > { %1009 = vmatmul.mubr.bf16.gmra.mrb[4].mxu1 %v1717_v39  ;;  %919 = vmatprep.mubr.bf16.mxu0 %v1718_v40 }
  0x3d   : > { %1016 = vmatprep.mubr.bf16.mxu1 %v1720_v41  ;;  %v1489_v41 = vunpack.c.l.bf16 %v1515_v32 }
  0x43   : > { %920 = vmatmul.mubr.bf16.gmra.mrb[8].mxu0 %v1722_v42 }
  0x44   : > { %1017 = vmatmul.mubr.bf16.gmra.mrb[8].mxu1 %v1723_v43  ;;  %927 = vmatprep.mubr.bf16.mxu0 %v1724_v44 }
  0x45   : > { %1024 = vmatprep.mubr.bf16.mxu1 %v1726_v45 }
  0x4b   : > { %928 = vmatmul.mubr.bf16.gmra.mrb[12].mxu0 %v1728_v46  ;;  %v1490_v46 = vunpack.c.h.bf16 %v1515_v32 }
  0x4c   : > { %1025 = vmatmul.mubr.bf16.gmra.mrb[12].mxu1 %v1729_v47  ;;  %935 = vmatprep.mubr.bf16.mxu0 %v1730_v48 }
  0x4d   : > { %1032 = vmatprep.mubr.bf16.mxu1 %v1732_v49 }
  0x53   : > { %936 = vmatmul.mubr.bf16.gmra.mrb[16].mxu0 %v1734_v50 }
  0x54   : > { %1033 = vmatmul.mubr.bf16.gmra.mrb[16].mxu1 %v1735_v51  ;;  %943 = vmatprep.mubr.bf16.mxu0 %v1736_v52 }
  0x55   : > { %1040 = vmatprep.mubr.bf16.mxu1 %v1738_v53 }
  0x5b   : > { %944 = vmatmul.mubr.bf16.gmra.mrb[20].mxu0 %v1740_v54 }
  0x5c   : > { %1041 = vmatmul.mubr.bf16.gmra.mrb[20].mxu1 %v1741_v55  ;;  %951 = vmatprep.mubr.bf16.mxu0 %v1742_v56 }
  0x5d   : > { %1048 = vmatprep.mubr.bf16.mxu1 %v1744_v57  ;;  %v1516_v57 = vld [vmem:[%s1906_s29 + $0x10] sm:$0xff]  }
  0x63   : > { %952 = vmatmul.mubr.bf16.gmra.mrb[24].mxu0 %v1746_v58 }
  0x64   : > { %1049 = vmatmul.mubr.bf16.gmra.mrb[24].mxu1 %v1747_v59  ;;  %959 = vmatprep.mubr.bf16.mxu0 %v1748_v60 }
  0x65   : > { %1056 = vmatprep.mubr.bf16.mxu1 %v1750_v61 }
  0x6b   : > { %960 = vmatmul.mubr.bf16.gmra.mrb[28].mxu0 %v1752_v62 }
  0x6c   : > { %1057 = vmatmul.mubr.bf16.gmra.mrb[28].mxu1 %v1753_v63 }
 0x106   : > { %v1538_v0 = vpop.f32.mrb[0].mxu0 }
 0x107   : > { %v1602_v1 = vpop.f32.mrb[0].mxu1  ;;  %v1539_v2 = vpop.f32.mrb[1].mxu0 }
 0x108   : > { %v1540_v3 = vadd.f32 %v1539_v2, %v1538_v0  ;;  %v1603_v4 = vpop.f32.mrb[1].mxu1  ;;  %v1541_v5 = vpop.f32.mrb[2].mxu0  ;;  %v1493_v2 = vunpack.c.l.bf16 %v1516_v57 }
 0x109   : > { %v1604_v6 = vadd.f32 %v1603_v4, %v1602_v1  ;;  %v1605_v7 = vpop.f32.mrb[2].mxu1  ;;  %v1542_v8 = vpop.f32.mrb[3].mxu0 }
 0x10a   : > { %v1543_v11 = vadd.f32 %v1542_v8, %v1541_v5  ;;  %v1606_v12 = vpop.f32.mrb[3].mxu1 }
 0x10b   : > { %v1003_v13 = vadd.f32 %v1604_v6, %v1540_v3  ;;  %v1607_v14 = vadd.f32 %v1606_v12, %v1605_v7  ;;  %v1494_v7 = vunpack.c.h.bf16 %v1516_v57 }
 0x10d   : > { %v1123_v15 = vadd.f32 %v1911_v9, %v1003_v13  ;;  %v1006_v17 = vadd.f32 %v1607_v14, %v1543_v11 }
 0x10e   : > { %v1544_v18 = vpop.f32.mrb[4].mxu0 }
 0x10f   : > { %v1139_v19 = vmax.f32 %v1123_v15, 0.0  ;;  %v1124_v20 = vadd.f32 %v1911_v9, %v1006_v17  ;;  %v1608_v22 = vpop.f32.mrb[4].mxu1  ;;  %v1545_v23 = vpop.f32.mrb[5].mxu0 }
 0x110   : > { %v1546_v24 = vadd.f32 %v1545_v23, %v1544_v18  ;;  %v1609_v25 = vpop.f32.mrb[5].mxu1  ;;  %v1547_v26 = vpop.f32.mrb[6].mxu0 }
 0x111   : > { %v1187_v27 = vmul.f32 %v1485_v16, %v1139_v19  ;;  %v1140_v28 = vmax.f32 %v1124_v20, 0.0  ;;  %v1610_v29 = vadd.f32 %v1609_v25, %v1608_v22  ;;  %v1611_v30 = vpop.f32.mrb[6].mxu1  ;;  %v1548_v31 = vpop.f32.mrb[7].mxu0  ;;  %v1517_v19 = vld [vmem:[%s1906_s29 + $0x18] sm:$0xff]  }
 0x112   : > { %v1549_v33 = vadd.f32 %v1548_v31, %v1547_v26  ;;  %v1612_v34 = vpop.f32.mrb[7].mxu1 }
 0x113   : > { %v1203_v35 = vmax.f32 %v1187_v27, 0.0  ;;  %v1188_v36 = vmul.f32 %v1486_v21, %v1140_v28  ;;  %v1011_v37 = vadd.f32 %v1610_v29, %v1546_v24  ;;  %v1613_v38 = vadd.f32 %v1612_v34, %v1611_v30 }
 0x114   : > { %v1497_v28 = vunpack.c.l.bf16 %v1517_v19 }
 0x115   : > { %1219 = vst [vmem:[%s1920_s9] sm:$0xff] %v1203_v35  ;;  %v1204_v39 = vmax.f32 %v1188_v36, 0.0  ;;  %v1125_v40 = vadd.f32 %v1911_v9, %v1011_v37  ;;  %v1014_v42 = vadd.f32 %v1613_v38, %v1549_v33  ;;  %v1498_v33 = vunpack.c.h.bf16 %v1517_v19 }
 0x116   : > { %v1550_v43 = vpop.f32.mrb[8].mxu0 }
 0x117   : > { %1220 = vst [vmem:[%s1920_s9 + $0x8] sm:$0xff] %v1204_v39  ;;  %v1141_v44 = vmax.f32 %v1125_v40, 0.0  ;;  %v1126_v45 = vadd.f32 %v1911_v9, %v1014_v42  ;;  %v1614_v47 = vpop.f32.mrb[8].mxu1  ;;  %v1551_v48 = vpop.f32.mrb[9].mxu0 }
 0x118   : > { %v1552_v49 = vadd.f32 %v1551_v48, %v1550_v43  ;;  %v1615_v50 = vpop.f32.mrb[9].mxu1  ;;  %v1553_v51 = vpop.f32.mrb[10].mxu0 }
 0x119   : > { %v1189_v52 = vmul.f32 %v1489_v41, %v1141_v44  ;;  %v1142_v53 = vmax.f32 %v1126_v45, 0.0  ;;  %v1616_v54 = vadd.f32 %v1615_v50, %v1614_v47  ;;  %v1617_v55 = vpop.f32.mrb[10].mxu1  ;;  %v1554_v56 = vpop.f32.mrb[11].mxu0  ;;  %v1518_v44 = vld [vmem:[%s1906_s29 + $0x20] sm:$0xff]  }
 0x11a   : > { %v1555_v58 = vadd.f32 %v1554_v56, %v1553_v51  ;;  %v1618_v59 = vpop.f32.mrb[11].mxu1 }
 0x11b   : > { %v1205_v60 = vmax.f32 %v1189_v52, 0.0  ;;  %v1190_v61 = vmul.f32 %v1490_v46, %v1142_v53  ;;  %v1019_v62 = vadd.f32 %v1616_v54, %v1552_v49  ;;  %v1619_v63 = vadd.f32 %v1618_v59, %v1617_v55 }
 0x11c   : > { %v1501_v53 = vunpack.c.l.bf16 %v1518_v44 }
 0x11d   : > { %1221 = vst [vmem:[%s1920_s9 + $0x10] sm:$0xff] %v1205_v60  ;;  %v1206_v0 = vmax.f32 %v1190_v61, 0.0  ;;  %v1127_v1 = vadd.f32 %v1911_v9, %v1019_v62  ;;  %v1022_v3 = vadd.f32 %v1619_v63, %v1555_v58  ;;  %v1502_v58 = vunpack.c.h.bf16 %v1518_v44 }
 0x11e   : > { %v1556_v4 = vpop.f32.mrb[12].mxu0 }
 0x11f   : > { %1222 = vst [vmem:[%s1920_s9 + $0x18] sm:$0xff] %v1206_v0  ;;  %v1143_v5 = vmax.f32 %v1127_v1, 0.0  ;;  %v1128_v6 = vadd.f32 %v1911_v9, %v1022_v3  ;;  %v1620_v8 = vpop.f32.mrb[12].mxu1  ;;  %v1557_v10 = vpop.f32.mrb[13].mxu0 }
 0x120   : > { %v1558_v11 = vadd.f32 %v1557_v10, %v1556_v4  ;;  %v1621_v12 = vpop.f32.mrb[13].mxu1  ;;  %v1559_v13 = vpop.f32.mrb[14].mxu0 }
 0x121   : > { %v1191_v14 = vmul.f32 %v1493_v2, %v1143_v5  ;;  %v1144_v15 = vmax.f32 %v1128_v6, 0.0  ;;  %v1622_v16 = vadd.f32 %v1621_v12, %v1620_v8  ;;  %v1623_v17 = vpop.f32.mrb[14].mxu1  ;;  %v1560_v18 = vpop.f32.mrb[15].mxu0  ;;  %v1519_v5 = vld [vmem:[%s1906_s29 + $0x28] sm:$0xff]  }
 0x122   : > { %v1561_v20 = vadd.f32 %v1560_v18, %v1559_v13  ;;  %v1624_v21 = vpop.f32.mrb[15].mxu1 }
 0x123   : > { %v1207_v22 = vmax.f32 %v1191_v14, 0.0  ;;  %v1192_v23 = vmul.f32 %v1494_v7, %v1144_v15  ;;  %v1027_v24 = vadd.f32 %v1622_v16, %v1558_v11  ;;  %v1625_v25 = vadd.f32 %v1624_v21, %v1623_v17 }
 0x124   : > { %v1505_v15 = vunpack.c.l.bf16 %v1519_v5 }
 0x125   : > { %1223 = vst [vmem:[%s1920_s9 + $0x20] sm:$0xff] %v1207_v22  ;;  %v1208_v26 = vmax.f32 %v1192_v23, 0.0  ;;  %v1129_v27 = vadd.f32 %v1911_v9, %v1027_v24  ;;  %v1030_v29 = vadd.f32 %v1625_v25, %v1561_v20  ;;  %v1506_v20 = vunpack.c.h.bf16 %v1519_v5 }
 0x126   : > { %v1562_v30 = vpop.f32.mrb[16].mxu0 }
 0x127   : > { %1224 = vst [vmem:[%s1920_s9 + $0x28] sm:$0xff] %v1208_v26  ;;  %v1145_v31 = vmax.f32 %v1129_v27, 0.0  ;;  %v1130_v32 = vadd.f32 %v1911_v9, %v1030_v29  ;;  %v1626_v34 = vpop.f32.mrb[16].mxu1  ;;  %v1563_v35 = vpop.f32.mrb[17].mxu0 }
 0x128   : > { %v1564_v36 = vadd.f32 %v1563_v35, %v1562_v30  ;;  %v1627_v37 = vpop.f32.mrb[17].mxu1  ;;  %v1565_v38 = vpop.f32.mrb[18].mxu0 }
 0x129   : > { %v1193_v39 = vmul.f32 %v1497_v28, %v1145_v31  ;;  %v1146_v40 = vmax.f32 %v1130_v32, 0.0  ;;  %v1628_v41 = vadd.f32 %v1627_v37, %v1626_v34  ;;  %v1629_v42 = vpop.f32.mrb[18].mxu1  ;;  %v1566_v43 = vpop.f32.mrb[19].mxu0  ;;  %v1520_v31 = vld [vmem:[%s1906_s29 + $0x30] sm:$0xff]  }
 0x12a   : > { %v1567_v45 = vadd.f32 %v1566_v43, %v1565_v38  ;;  %v1630_v46 = vpop.f32.mrb[19].mxu1 }
 0x12b   : > { %v1209_v47 = vmax.f32 %v1193_v39, 0.0  ;;  %v1194_v48 = vmul.f32 %v1498_v33, %v1146_v40  ;;  %v1035_v49 = vadd.f32 %v1628_v41, %v1564_v36  ;;  %v1631_v50 = vadd.f32 %v1630_v46, %v1629_v42 }
 0x12c   : > { %v1509_v40 = vunpack.c.l.bf16 %v1520_v31 }
 0x12d   : > { %1225 = vst [vmem:[%s1920_s9 + $0x30] sm:$0xff] %v1209_v47  ;;  %v1210_v51 = vmax.f32 %v1194_v48, 0.0  ;;  %v1131_v52 = vadd.f32 %v1911_v9, %v1035_v49  ;;  %v1038_v54 = vadd.f32 %v1631_v50, %v1567_v45  ;;  %v1510_v45 = vunpack.c.h.bf16 %v1520_v31 }
 0x12e   : > { %v1568_v55 = vpop.f32.mrb[20].mxu0 }
 0x12f   : > { %1226 = vst [vmem:[%s1920_s9 + $0x38] sm:$0xff] %v1210_v51  ;;  %v1147_v56 = vmax.f32 %v1131_v52, 0.0  ;;  %v1132_v57 = vadd.f32 %v1911_v9, %v1038_v54  ;;  %v1632_v59 = vpop.f32.mrb[20].mxu1  ;;  %v1569_v60 = vpop.f32.mrb[21].mxu0 }
 0x130   : > { %v1570_v61 = vadd.f32 %v1569_v60, %v1568_v55  ;;  %v1633_v62 = vpop.f32.mrb[21].mxu1  ;;  %v1571_v63 = vpop.f32.mrb[22].mxu0 }
 0x131   : > { %v1195_v0 = vmul.f32 %v1501_v53, %v1147_v56  ;;  %v1148_v1 = vmax.f32 %v1132_v57, 0.0  ;;  %v1634_v2 = vadd.f32 %v1633_v62, %v1632_v59  ;;  %v1635_v3 = vpop.f32.mrb[22].mxu1  ;;  %v1572_v4 = vpop.f32.mrb[23].mxu0  ;;  %v1521_v56 = vld [vmem:[%s1906_s29 + $0x38] sm:$0xff]  }
 0x132   : > { %v1573_v6 = vadd.f32 %v1572_v4, %v1571_v63  ;;  %v1636_v7 = vpop.f32.mrb[23].mxu1  ;;  %v1514_v5 = vunpack.c.h.bf16 %v1521_v56 }
 0x133   : > { %v1211_v8 = vmax.f32 %v1195_v0, 0.0  ;;  %v1196_v10 = vmul.f32 %v1502_v58, %v1148_v1  ;;  %v1043_v11 = vadd.f32 %v1634_v2, %v1570_v61  ;;  %v1637_v12 = vadd.f32 %v1636_v7, %v1635_v3 }
 0x134   : > { %v1513_v1 = vunpack.c.l.bf16 %v1521_v56 }
 0x135   : > { %1227 = vst [vmem:[%s1920_s9 + $0x40] sm:$0xff] %v1211_v8  ;;  %v1212_v13 = vmax.f32 %v1196_v10, 0.0  ;;  %v1133_v14 = vadd.f32 %v1911_v9, %v1043_v11  ;;  %v1046_v16 = vadd.f32 %v1637_v12, %v1573_v6 }
 0x136   : > { %v1574_v17 = vpop.f32.mrb[24].mxu0 }
 0x137   : > { %1228 = vst [vmem:[%s1920_s9 + $0x48] sm:$0xff] %v1212_v13  ;;  %v1149_v18 = vmax.f32 %v1133_v14, 0.0  ;;  %v1134_v19 = vadd.f32 %v1911_v9, %v1046_v16  ;;  %v1638_v21 = vpop.f32.mrb[24].mxu1  ;;  %v1575_v22 = vpop.f32.mrb[25].mxu0 }
 0x138   : > { %v1576_v23 = vadd.f32 %v1575_v22, %v1574_v17  ;;  %v1639_v24 = vpop.f32.mrb[25].mxu1  ;;  %v1577_v25 = vpop.f32.mrb[26].mxu0 }
 0x139   : > { %v1197_v26 = vmul.f32 %v1505_v15, %v1149_v18  ;;  %v1150_v27 = vmax.f32 %v1134_v19, 0.0  ;;  %v1640_v28 = vadd.f32 %v1639_v24, %v1638_v21  ;;  %v1641_v29 = vpop.f32.mrb[26].mxu1  ;;  %v1578_v30 = vpop.f32.mrb[27].mxu0 }
 0x13a   : > { %v1579_v32 = vadd.f32 %v1578_v30, %v1577_v25  ;;  %v1642_v33 = vpop.f32.mrb[27].mxu1 }
 0x13b   : > { %v1213_v34 = vmax.f32 %v1197_v26, 0.0  ;;  %v1198_v35 = vmul.f32 %v1506_v20, %v1150_v27  ;;  %v1051_v36 = vadd.f32 %v1640_v28, %v1576_v23  ;;  %v1643_v37 = vadd.f32 %v1642_v33, %v1641_v29 }
 0x13d   : > { %1229 = vst [vmem:[%s1920_s9 + $0x50] sm:$0xff] %v1213_v34  ;;  %v1214_v38 = vmax.f32 %v1198_v35, 0.0  ;;  %v1135_v39 = vadd.f32 %v1911_v9, %v1051_v36  ;;  %v1054_v41 = vadd.f32 %v1643_v37, %v1579_v32 }
 0x13e   : > { %v1580_v42 = vpop.f32.mrb[28].mxu0 }
 0x13f   : > { %1230 = vst [vmem:[%s1920_s9 + $0x58] sm:$0xff] %v1214_v38  ;;  %v1151_v43 = vmax.f32 %v1135_v39, 0.0  ;;  %v1136_v44 = vadd.f32 %v1911_v9, %v1054_v41  ;;  %v1644_v46 = vpop.f32.mrb[28].mxu1  ;;  %v1581_v47 = vpop.f32.mrb[29].mxu0 }
 0x140   : > { %v1582_v48 = vadd.f32 %v1581_v47, %v1580_v42  ;;  %v1645_v49 = vpop.f32.mrb[29].mxu1  ;;  %v1583_v50 = vpop.f32.mrb[30].mxu0 }
 0x141   : > { %v1199_v51 = vmul.f32 %v1509_v40, %v1151_v43  ;;  %v1152_v52 = vmax.f32 %v1136_v44, 0.0  ;;  %v1646_v53 = vadd.f32 %v1645_v49, %v1644_v46  ;;  %v1647_v54 = vpop.f32.mrb[30].mxu1  ;;  %v1584_v55 = vpop.f32.mrb[31].mxu0 }
 0x142   : > { %v1585_v57 = vadd.f32 %v1584_v55, %v1583_v50  ;;  %v1648_v58 = vpop.f32.mrb[31].mxu1 }
 0x143   : > { %v1215_v59 = vmax.f32 %v1199_v51, 0.0  ;;  %v1200_v60 = vmul.f32 %v1510_v45, %v1152_v52  ;;  %v1059_v61 = vadd.f32 %v1646_v53, %v1582_v48  ;;  %v1649_v62 = vadd.f32 %v1648_v58, %v1647_v54 }
 0x145   : > { %1231 = vst [vmem:[%s1920_s9 + $0x60] sm:$0xff] %v1215_v59  ;;  %v1216_v63 = vmax.f32 %v1200_v60, 0.0  ;;  %v1137_v0 = vadd.f32 %v1911_v9, %v1059_v61  ;;  %v1062_v2 = vadd.f32 %v1649_v62, %v1585_v57 }
 0x147   : > { %1232 = vst [vmem:[%s1920_s9 + $0x68] sm:$0xff] %v1216_v63  ;;  %v1153_v3 = vmax.f32 %v1137_v0, 0.0  ;;  %v1138_v4 = vadd.f32 %v1911_v9, %v1062_v2 }
 0x149   : > { %v1201_v6 = vmul.f32 %v1513_v1, %v1153_v3  ;;  %v1154_v7 = vmax.f32 %v1138_v4, 0.0 }
 0x14b   : > { %v1217_v8 = vmax.f32 %v1201_v6, 0.0  ;;  %v1202_v10 = vmul.f32 %v1514_v5, %v1154_v7 }
 0x14d   : > { %1233 = vst [vmem:[%s1920_s9 + $0x70] sm:$0xff] %v1217_v8  ;;  %v1218_v11 = vmax.f32 %v1202_v10, 0.0 }
 0x14f   : > { %1234 = vst [vmem:[%s1920_s9 + $0x78] sm:$0xff] %v1218_v11 }
 0x150 PF: > { %s14_s17 = sadd.s32 1, %s1776_s17   ;;  %s1973_s15 = smov %s1772_s16 }
 0x151   : > { %p11_p5 = scmp.ge.s32.totalorder %s14_s17, 6   ;;  %s1974_s16 = smov %s1976_s18 }
 0x153   :  { %13 = sbr.rel (!%p11_p5) target bundleno = 2 (0x2), region = 83 }

</bundles_post_ra>
